<compile_context>
chip_gen: v5e
topology: v5e:2x2
jax: 0.10.0
libtpu: 0.0.40
codegen_flags: <defaults>
</compile_context>

<pallas_src>
import math

import jax
import jax.numpy as jnp
from jax.experimental import pallas as pl
from jax.experimental.pallas import tpu as pltpu


_VMEM_LIMIT_CACHE = None


def _vmem_limit_bytes():
    """Per-generation VMEM cap: ~3/4 of physical (96 MiB v5e/v6e, 48 MiB v7x)."""
    global _VMEM_LIMIT_CACHE
    if _VMEM_LIMIT_CACHE is None:
        cap = 64 * 1024 * 1024
        try:
            cap = int(pltpu.get_tpu_info().vmem_capacity_bytes)
        except Exception:
            pass
        _VMEM_LIMIT_CACHE = min(100 * 1024 * 1024, (cap * 3) // 4)
    return _VMEM_LIMIT_CACHE


def _compiler_params(semantics):
    return pltpu.CompilerParams(dimension_semantics=semantics,
                                vmem_limit_bytes=_vmem_limit_bytes())


def _pick_tile(n, target):
    """Largest multiple-of-8 divisor of n that is <= target (or n itself)."""
    if n <= target:
        return n
    t = target - (target % 8)
    while t >= 8:
        if n % t == 0:
            return t
        t -= 8
    return n


# ----------------------------- Pallas kernels -----------------------------

def _knn_kernel(x_ref, sq_ref, idx_ref):
    # x_ref:   (1, N, C) bf16 (full per-batch; block index constant over tiles)
    # sq_ref:  (1, 1, N) f32 precomputed ||x_j||^2
    # idx_ref: (1, TQ, K) int32 -- indices of the K nearest neighbours
    t = pl.program_id(1)
    n = x_ref.shape[1]
    tq, k = idx_ref.shape[1], idx_ref.shape[2]
    start = pl.multiple_of(t * tq, 8)
    xq = x_ref[0, pl.ds(start, tq), :]                              # (TQ, C)

    # Ranking score: 2<xi,xj> - ||xj||^2.  The -||xi||^2 term is constant per
    # query row and dropped (does not change the top-k ordering).
    scores = 2.0 * jax.lax.dot_general(
        xq, x_ref[0], (((1,), (1,)), ((), ())),
        preferred_element_type=jnp.float32) - sq_ref[0]             # (TQ, N)

    cols = jax.lax.broadcasted_iota(jnp.int32, (tq, n), 1)
    kpos = jax.lax.broadcasted_iota(jnp.int32, (tq, k), 1)

    # K passes of row-max + masked argmax (mask-and-repeat), entirely in VMEM.
    def select(ki, carry):
        sc, acc = carry
        rowmax = jnp.max(sc, axis=-1, keepdims=True)                 # (TQ, 1)
        amax = jnp.min(jnp.where(sc == rowmax, cols, n),
                       axis=-1, keepdims=True)                       # (TQ, 1)
        acc = jnp.where(kpos == ki, amax, acc)
        sc = jnp.where(cols == amax, -jnp.inf, sc)
        return sc, acc

    _, idx = jax.lax.fori_loop(0, k, select,
                               (scores, jnp.zeros((tq, k), jnp.int32)))
    idx_ref[0] = idx


def _pointwise_mm_kernel(x_ref, w_ref, out_ref):
    # 1x1 "conv": (1, TN, C) @ (C, Cout) -> (1, TN, Cout), bf16 out.
    out_ref[0] = jnp.dot(x_ref[0], w_ref[...],
                         preferred_element_type=jnp.float32).astype(out_ref.dtype)


def _edge_conv_kernel(idx_ref, x_ref, y_ref, w2_ref, shift_ref, out_ref):
    # idx_ref:   (1, TN, K) int32 neighbour ids
    # x_ref:     (1, TN, C) bf16 centre tile
    # y_ref:     (1, N, Cout) bf16 = x @ (W_nbr*scale), full per batch
    # w2_ref:    (C, Cout) bf16 = (W_ctr - W_nbr)*scale
    # shift_ref: (1, Cout) f32 folded BN shift
    # out_ref:   (1, TN, Cout) bf16
    tn, k = idx_ref.shape[1], idx_ref.shape[2]
    n = y_ref.shape[1]

    ctr_term = jnp.dot(x_ref[0], w2_ref[...],
                       preferred_element_type=jnp.float32) + shift_ref[...]

    # Neighbour gather: stack all K one-hot selectors into one (K*TN, N) bf16
    # matrix and issue a SINGLE MXU matmul against y, then max over the K
    # row-groups on the VPU.  No (B, N, K, C) gathered tensor ever touches HBM.
    # TODO(synk): replace the one-hot matmul with a native VMEM row gather once
    # Mosaic supports large dynamic row gathers.
    idx = idx_ref[0]                                                 # (TN, K)
    y = y_ref[0]                                                     # (N, Cout)
    cols = jax.lax.broadcasted_iota(jnp.int32, (tn, n), 1)
    onehot = jnp.concatenate(
        [(idx[:, ki:ki + 1] == cols).astype(jnp.bfloat16) for ki in range(k)],
        axis=0)                                                      # (K*TN, N)
    g = jnp.dot(onehot, y, preferred_element_type=jnp.float32)       # (K*TN, Cout)
    m = g[0:tn]
    for ki in range(1, k):
        m = jnp.maximum(m, g[ki * tn:(ki + 1) * tn])

    # LeakyReLU is monotonic, so the max over K commutes with it: apply the
    # folded centre/BN term and the activation once, after the neighbour max.
    h = m + ctr_term
    out_ref[0] = jnp.where(h > 0, h, 0.2 * h).astype(out_ref.dtype)


def _conv5_pool_kernel(x1_ref, x2_ref, x3_ref, x4_ref,
                       w1_ref, w2_ref, w3_ref, w4_ref, shift_ref,
                       max_ref, sum_ref):
    # Fused concat(x1..x4) -> conv5 (1x1, 512->1024, BN scale folded) -> shift
    # -> LeakyReLU -> running global max / sum over the N tiles.
    # TODO(synk): a pre-concatenated (B, N, 512) buffer (aliased column-offset
    # outputs from the edge convs) would turn this into one 512-deep matmul.
    t = pl.program_id(1)
    h = jnp.dot(x1_ref[0], w1_ref[...], preferred_element_type=jnp.float32)
    h = h + jnp.dot(x2_ref[0], w2_ref[...], preferred_element_type=jnp.float32)
    h = h + jnp.dot(x3_ref[0], w3_ref[...], preferred_element_type=jnp.float32)
    h = h + jnp.dot(x4_ref[0], w4_ref[...], preferred_element_type=jnp.float32)
    h = h + shift_ref[...]
    h = jnp.where(h > 0, h, 0.2 * h)
    tmax = jnp.max(h, axis=0, keepdims=True)                         # (1, 1024)
    tsum = jnp.sum(h, axis=0, keepdims=True)                         # (1, 1024)

    @pl.when(t == 0)
    def _():
        max_ref[0] = tmax
        sum_ref[0] = tsum

    @pl.when(t > 0)
    def _():
        max_ref[0] = jnp.maximum(max_ref[0], tmax)
        sum_ref[0] = sum_ref[0] + tsum


def _head_kernel(g_ref, w_ref, shift_ref, out_ref):
    # linear1 (2048 -> embed_dim, no bias, BN6 scale folded) + BN6 shift.
    out_ref[...] = (jnp.dot(g_ref[...], w_ref[...],
                            preferred_element_type=jnp.float32) + shift_ref[...])


# ------------------------------ wrappers -----------------------------------

def knn_indices(x, k):
    """Fused pairwise-score + top-k: emits only the (B, N, K) int32 indices."""
    b, n, c = x.shape
    sq = jnp.sum(jnp.square(x.astype(jnp.float32)), axis=-1)[:, None, :]  # (B,1,N)
    tq = _pick_tile(n, 512)
    return pl.pallas_call(
        _knn_kernel,
        out_shape=jax.ShapeDtypeStruct((b, n, k), jnp.int32),
        grid=(b, n // tq),
        in_specs=[pl.BlockSpec((1, n, c), lambda i, t: (i, 0, 0)),
                  pl.BlockSpec((1, 1, n), lambda i, t: (i, 0, 0))],
        out_specs=pl.BlockSpec((1, tq, k), lambda i, t: (i, t, 0)),
        compiler_params=_compiler_params(("parallel", "parallel")),
    )(x, sq)


def pointwise_matmul(x, w):
    """y = x @ w per point (1x1 conv, no bias), bf16 output."""
    b, n, c = x.shape
    cout = w.shape[1]
    tn = _pick_tile(n, 512)
    return pl.pallas_call(
        _pointwise_mm_kernel,
        out_shape=jax.ShapeDtypeStruct((b, n, cout), jnp.bfloat16),
        grid=(b, n // tn),
        in_specs=[pl.BlockSpec((1, tn, c), lambda i, t: (i, t, 0)),
                  pl.BlockSpec((c, cout), lambda i, t: (0, 0))],
        out_specs=pl.BlockSpec((1, tn, cout), lambda i, t: (i, t, 0)),
        compiler_params=_compiler_params(("parallel", "parallel")),
    )(x, w)


def edge_conv(x, w_nbr, w_ctr, scale, shift, k):
    """One DGCNN edge-conv block: knn -> in-kernel gather -> conv+BN+LReLU -> max_k."""
    b, n, c = x.shape
    cout = w_nbr.shape[1]
    # Fold the inference-mode BN scale into the two halves of the 1x1 conv:
    #   BN((nbr - ctr) @ W1 + ctr @ W2) = nbr @ (W1*s) + ctr @ ((W2 - W1)*s) + shift
    w1s = (w_nbr * scale).astype(jnp.bfloat16)
    w2s = ((w_ctr - w_nbr) * scale).astype(jnp.bfloat16)

    idx = knn_indices(x, k)                       # (B, N, K) int32, fused top-k
    y = pointwise_matmul(x, w1s)                  # (B, N, Cout) bf16, hoisted

    # Keep the stacked one-hot selector ((K*TN, N) bf16) under ~8 MiB of VMEM.
    tgt = max(8, min(256, (8 * 1024 * 1024) // max(1, 2 * k * n)))
    tn = _pick_tile(n, tgt)
    return pl.pallas_call(
        _edge_conv_kernel,
        out_shape=jax.ShapeDtypeStruct((b, n, cout), jnp.bfloat16),
        grid=(b, n // tn),
        in_specs=[
            pl.BlockSpec((1, tn, k), lambda i, t: (i, t, 0)),    # neighbour ids
            pl.BlockSpec((1, tn, c), lambda i, t: (i, t, 0)),    # centre tile
            pl.BlockSpec((1, n, cout), lambda i, t: (i, 0, 0)),  # full y per batch
            pl.BlockSpec((c, cout), lambda i, t: (0, 0)),
            pl.BlockSpec((1, cout), lambda i, t: (0, 0)),
        ],
        out_specs=pl.BlockSpec((1, tn, cout), lambda i, t: (i, t, 0)),
        compiler_params=_compiler_params(("parallel", "parallel")),
    )(idx, x, y, w2s, shift)


def conv5_pool(x1, x2, x3, x4, w, scale, shift):
    b, n, _ = x1.shape
    cout = w.shape[1]
    cs = [a.shape[2] for a in (x1, x2, x3, x4)]
    offs = [0, cs[0], cs[0] + cs[1], cs[0] + cs[1] + cs[2], sum(cs)]
    wf = (w * scale).astype(jnp.bfloat16)               # fold BN5 scale
    wchunks = [wf[offs[i]:offs[i + 1]] for i in range(4)]
    tn = _pick_tile(n, 512)

    x_specs = [pl.BlockSpec((1, tn, ci), lambda i, t: (i, t, 0)) for ci in cs]
    w_specs = [pl.BlockSpec((ci, cout), lambda i, t: (0, 0)) for ci in cs]

    gmax, gsum = pl.pallas_call(
        _conv5_pool_kernel,
        out_shape=(jax.ShapeDtypeStruct((b, 1, cout), jnp.float32),
                   jax.ShapeDtypeStruct((b, 1, cout), jnp.float32)),
        grid=(b, n // tn),
        in_specs=x_specs + w_specs + [pl.BlockSpec((1, cout), lambda i, t: (0, 0))],
        out_specs=(pl.BlockSpec((1, 1, cout), lambda i, t: (i, 0, 0)),
                   pl.BlockSpec((1, 1, cout), lambda i, t: (i, 0, 0))),
        compiler_params=_compiler_params(("parallel", "arbitrary")),
    )(x1, x2, x3, x4, *wchunks, shift)
    return gmax[:, 0, :], gsum[:, 0, :] / n


def head(g, w, scale, shift):
    b = g.shape[0]
    e = w.shape[1]
    wf = (w * scale).astype(jnp.bfloat16)               # fold BN6 scale into linear1
    return pl.pallas_call(
        _head_kernel,
        out_shape=jax.ShapeDtypeStruct((b, e), jnp.float32),
    )(g.astype(jnp.bfloat16), wf, shift)


def dgcnn_forward(x_bcn, params, k):
    """x_bcn: (B, 3, N) like the PyTorch module input (NCW)."""
    x = jnp.transpose(x_bcn, (0, 2, 1)).astype(jnp.bfloat16)    # (B, N, 3)
    x1 = edge_conv(x, *params["conv1"], k)                      # (B, N, 64)
    x2 = edge_conv(x1, *params["conv2"], k)                     # (B, N, 64)
    x3 = edge_conv(x2, *params["conv3"], k)                     # (B, N, 128)
    x4 = edge_conv(x3, *params["conv4"], k)                     # (B, N, 256)
    gmax, gavg = conv5_pool(x1, x2, x3, x4, *params["conv5"])   # (B, 1024) x 2
    g = jnp.concatenate([gmax, gavg], axis=-1)                  # (B, 2048)
    return head(g, *params["head"])                             # (B, embed_dim)


# --------------------------- parameter setup --------------------------------

def init_params(key, embed_dim=256):
    def conv_w(k_, cin, cout):
        return jax.random.normal(k_, (cin, cout), jnp.float32) / math.sqrt(cin)

    def bn(k_, c):
        k1, k2, k3, k4 = jax.random.split(k_, 4)
        gamma = jax.random.uniform(k1, (c,), jnp.float32, 0.5, 1.5)
        beta = 0.1 * jax.random.normal(k2, (c,), jnp.float32)
        mean = 0.1 * jax.random.normal(k3, (c,), jnp.float32)
        var = jax.random.uniform(k4, (c,), jnp.float32, 0.5, 1.5)
        scale = gamma / jnp.sqrt(var + 1e-5)
        shift = beta - mean * scale
        return scale.reshape(1, c), shift.reshape(1, c)

    ks = jax.random.split(key, 16)
    p = {}
    # each conv_i: (W_nbr, W_ctr, bn_scale, bn_shift) -- the two halves of the
    # PyTorch (Cout, 2*Cin, 1, 1) 1x1 conv weight, already transposed to (Cin, Cout).
    p["conv1"] = (conv_w(ks[0], 3, 64), conv_w(ks[1], 3, 64), *bn(ks[2], 64))
    p["conv2"] = (conv_w(ks[3], 64, 64), conv_w(ks[4], 64, 64), *bn(ks[5], 64))
    p["conv3"] = (conv_w(ks[6], 64, 128), conv_w(ks[7], 64, 128), *bn(ks[8], 128))
    p["conv4"] = (conv_w(ks[9], 128, 256), conv_w(ks[10], 128, 256), *bn(ks[11], 256))
    p["conv5"] = (conv_w(ks[12], 512, 1024), *bn(ks[13], 1024))
    p["head"] = (conv_w(ks[14], 2048, embed_dim), *bn(ks[15], embed_dim))
    return p


# --------------------------------- main --------------------------------------

if __name__ == "__main__":
    key = jax.random.PRNGKey(0)
    kp, kx = jax.random.split(key)

    B, C_IN, N, K = 2, 3, 32, 8          # small shapes; k < num_points
    EMBED_DIM = 256                      # module default

    params = init_params(kp, embed_dim=EMBED_DIM)
    x = jax.random.normal(kx, (B, C_IN, N), jnp.float32)   # PyTorch-style (B, C, N)

    fwd = jax.jit(lambda inp: dgcnn_forward(inp, params, K))
    out = fwd(x)
    jax.block_until_ready(out)
    assert out.shape == (B, EMBED_DIM) and out.dtype == jnp.float32
    print("KERNEL_OK")
</pallas_src>

<mosaic_0001>
module attributes {stable_mosaic.version = 11 : i64} {
  func.func @_pointwise_mm_kernel(%arg0: i32, %arg1: i32, %arg2: memref<1x32x3xbf16, #tpu.memory_space<vmem>>, %arg3: memref<3x64xbf16, #tpu.memory_space<vmem>>, %arg4: memref<1x32x64xbf16, #tpu.memory_space<vmem>>) attributes {dimension_semantics = [#tpu.dimension_semantics<parallel>, #tpu.dimension_semantics<parallel>], iteration_bounds = array<i64: 2, 1>, scalar_prefetch = 0 : i64, scratch_operands = 0 : i64, tpu.core_type = #tpu.core_type<tc>, window_params = [{transform_indices = @transform_0, window_bounds = array<i64: 1, 32, 3>}, {pipeline_mode = #tpu.pipeline_mode<synchronous>, transform_indices = @transform_1, window_bounds = array<i64: 3, 64>}, {transform_indices = @transform_2, window_bounds = array<i64: 1, 32, 64>}]} {
    %c0 = arith.constant 0 : index
    %c0_0 = arith.constant 0 : index
    %c0_1 = arith.constant 0 : index
    %0 = vector.load %arg2[%c0, %c0_0, %c0_1] : memref<1x32x3xbf16, #tpu.memory_space<vmem>>, vector<1x32x3xbf16>
    %1 = vector.shape_cast %0 : vector<1x32x3xbf16> to vector<32x3xbf16>
    %c0_2 = arith.constant 0 : index
    %c0_3 = arith.constant 0 : index
    %2 = vector.load %arg3[%c0_2, %c0_3] : memref<3x64xbf16, #tpu.memory_space<vmem>>, vector<3x64xbf16>
    %cst = arith.constant dense<0.000000e+00> : vector<32x64xf32>
    %3 = tpu.matmul %1, %2, %cst {dimension_numbers = #tpu.dot_dimension_numbers<[1], [0], [0], [1], [0, 0, 1, 1], [], []>} : vector<32x3xbf16>, vector<3x64xbf16>, vector<32x64xf32> -> vector<32x64xf32>
    %4 = arith.truncf %3 : vector<32x64xf32> to vector<32x64xbf16>
    %c0_4 = arith.constant 0 : index
    %c0_5 = arith.constant 0 : index
    %c0_6 = arith.constant 0 : index
    %5 = vector.load %arg4[%c0_4, %c0_5, %c0_6] : memref<1x32x64xbf16, #tpu.memory_space<vmem>>, vector<1x32x64xbf16>
    %6 = vector.shape_cast %5 : vector<1x32x64xbf16> to vector<32x64xbf16>
    %7 = vector.shape_cast %4 : vector<32x64xbf16> to vector<1x32x64xbf16>
    tpu.vector_store %arg4[%c0_4, %c0_5, %c0_6], %7 {strides = array<i32>} : memref<1x32x64xbf16, #tpu.memory_space<vmem>>, vector<1x32x64xbf16>,
    return
  }
  func.func @transform_0(%arg0: i32, %arg1: i32) -> (i32, i32, i32) {
    %c0_i32 = arith.constant 0 : i32
    %c0_i32_0 = arith.constant 0 : i32
    return %arg0, %arg1, %c0_i32 : i32, i32, i32
  }
  func.func @transform_1(%arg0: i32, %arg1: i32) -> (i32, i32) {
    %c0_i32 = arith.constant 0 : i32
    %c0_i32_0 = arith.constant 0 : i32
    %c0_i32_1 = arith.constant 0 : i32
    return %c0_i32, %c0_i32_0 : i32, i32
  }
  func.func @transform_2(%arg0: i32, %arg1: i32) -> (i32, i32, i32) {
    %c0_i32 = arith.constant 0 : i32
    %c0_i32_0 = arith.constant 0 : i32
    return %arg0, %arg1, %c0_i32 : i32, i32, i32
  }
}

module attributes {stable_mosaic.version = 11 : i64} {
  func.func @_edge_conv_kernel(%arg0: i32, %arg1: i32, %arg2: memref<1x32x8xi32, #tpu.memory_space<vmem>>, %arg3: memref<1x32x3xbf16, #tpu.memory_space<vmem>>, %arg4: memref<1x32x64xbf16, #tpu.memory_space<vmem>>, %arg5: memref<3x64xbf16, #tpu.memory_space<vmem>>, %arg6: memref<1x64xf32, #tpu.memory_space<vmem>>, %arg7: memref<1x32x64xbf16, #tpu.memory_space<vmem>>) attributes {dimension_semantics = [#tpu.dimension_semantics<parallel>, #tpu.dimension_semantics<parallel>], iteration_bounds = array<i64: 2, 1>, scalar_prefetch = 0 : i64, scratch_operands = 0 : i64, tpu.core_type = #tpu.core_type<tc>, window_params = [{transform_indices = @transform_0, window_bounds = array<i64: 1, 32, 8>}, {transform_indices = @transform_1, window_bounds = array<i64: 1, 32, 3>}, {transform_indices = @transform_2, window_bounds = array<i64: 1, 32, 64>}, {pipeline_mode = #tpu.pipeline_mode<synchronous>, transform_indices = @transform_3, window_bounds = array<i64: 3, 64>}, {pipeline_mode = #tpu.pipeline_mode<synchronous>, transform_indices = @transform_4, window_bounds = array<i64: 1, 64>}, {transform_indices = @transform_5, window_bounds = array<i64: 1, 32, 64>}]} {
    %c0 = arith.constant 0 : index
    %c0_0 = arith.constant 0 : index
    %c0_1 = arith.constant 0 : index
    %0 = vector.load %arg3[%c0, %c0_0, %c0_1] : memref<1x32x3xbf16, #tpu.memory_space<vmem>>, vector<1x32x3xbf16>
    %1 = vector.shape_cast %0 : vector<1x32x3xbf16> to vector<32x3xbf16>
    %c0_2 = arith.constant 0 : index
    %c0_3 = arith.constant 0 : index
    %2 = vector.load %arg5[%c0_2, %c0_3] : memref<3x64xbf16, #tpu.memory_space<vmem>>, vector<3x64xbf16>
    %cst = arith.constant dense<0.000000e+00> : vector<32x64xf32>
    %3 = tpu.matmul %1, %2, %cst {dimension_numbers = #tpu.dot_dimension_numbers<[1], [0], [0], [1], [0, 0, 1, 1], [], []>} : vector<32x3xbf16>, vector<3x64xbf16>, vector<32x64xf32> -> vector<32x64xf32>
    %c0_4 = arith.constant 0 : index
    %c0_5 = arith.constant 0 : index
    %4 = vector.load %arg6[%c0_4, %c0_5] : memref<1x64xf32, #tpu.memory_space<vmem>>, vector<1x64xf32>
    %5 = vector.broadcast %4 : vector<1x64xf32> to vector<32x64xf32>
    %6 = arith.addf %3, %5 : vector<32x64xf32>
    %c0_6 = arith.constant 0 : index
    %c0_7 = arith.constant 0 : index
    %c0_8 = arith.constant 0 : index
    %7 = vector.load %arg2[%c0_6, %c0_7, %c0_8] : memref<1x32x8xi32, #tpu.memory_space<vmem>>, vector<1x32x8xi32>
    %8 = vector.shape_cast %7 : vector<1x32x8xi32> to vector<32x8xi32>
    %c0_9 = arith.constant 0 : index
    %c0_10 = arith.constant 0 : index
    %c0_11 = arith.constant 0 : index
    %9 = vector.load %arg4[%c0_9, %c0_10, %c0_11] : memref<1x32x64xbf16, #tpu.memory_space<vmem>>, vector<1x32x64xbf16>
    %10 = vector.shape_cast %9 : vector<1x32x64xbf16> to vector<32x64xbf16>
    %11 = tpu.iota {dimensions = array<i32: 1>} : vector<32x32xi32>
    %12 = vector.extract_strided_slice %8 {offsets = [0, 0], sizes = [32, 1], strides = [1, 1]} : vector<32x8xi32> to vector<32x1xi32>
    %13 = vector.broadcast %12 : vector<32x1xi32> to vector<32x32xi32>
    %14 = arith.cmpi eq, %13, %11 : vector<32x32xi32>
    %15 = arith.extui %14 : vector<32x32xi1> to vector<32x32xi32>
    %16 = arith.sitofp %15 : vector<32x32xi32> to vector<32x32xf32>
    %17 = arith.truncf %16 : vector<32x32xf32> to vector<32x32xbf16>
    %18 = vector.extract_strided_slice %8 {offsets = [0, 1], sizes = [32, 1], strides = [1, 1]} : vector<32x8xi32> to vector<32x1xi32>
    %19 = vector.broadcast %18 : vector<32x1xi32> to vector<32x32xi32>
    %20 = arith.cmpi eq, %19, %11 : vector<32x32xi32>
    %21 = arith.extui %20 : vector<32x32xi1> to vector<32x32xi32>
    %22 = arith.sitofp %21 : vector<32x32xi32> to vector<32x32xf32>
    %23 = arith.truncf %22 : vector<32x32xf32> to vector<32x32xbf16>
    %24 = vector.extract_strided_slice %8 {offsets = [0, 2], sizes = [32, 1], strides = [1, 1]} : vector<32x8xi32> to vector<32x1xi32>
    %25 = vector.broadcast %24 : vector<32x1xi32> to vector<32x32xi32>
    %26 = arith.cmpi eq, %25, %11 : vector<32x32xi32>
    %27 = arith.extui %26 : vector<32x32xi1> to vector<32x32xi32>
    %28 = arith.sitofp %27 : vector<32x32xi32> to vector<32x32xf32>
    %29 = arith.truncf %28 : vector<32x32xf32> to vector<32x32xbf16>
    %30 = vector.extract_strided_slice %8 {offsets = [0, 3], sizes = [32, 1], strides = [1, 1]} : vector<32x8xi32> to vector<32x1xi32>
    %31 = vector.broadcast %30 : vector<32x1xi32> to vector<32x32xi32>
    %32 = arith.cmpi eq, %31, %11 : vector<32x32xi32>
    %33 = arith.extui %32 : vector<32x32xi1> to vector<32x32xi32>
    %34 = arith.sitofp %33 : vector<32x32xi32> to vector<32x32xf32>
    %35 = arith.truncf %34 : vector<32x32xf32> to vector<32x32xbf16>
    %36 = vector.extract_strided_slice %8 {offsets = [0, 4], sizes = [32, 1], strides = [1, 1]} : vector<32x8xi32> to vector<32x1xi32>
    %37 = vector.broadcast %36 : vector<32x1xi32> to vector<32x32xi32>
    %38 = arith.cmpi eq, %37, %11 : vector<32x32xi32>
    %39 = arith.extui %38 : vector<32x32xi1> to vector<32x32xi32>
    %40 = arith.sitofp %39 : vector<32x32xi32> to vector<32x32xf32>
    %41 = arith.truncf %40 : vector<32x32xf32> to vector<32x32xbf16>
    %42 = vector.extract_strided_slice %8 {offsets = [0, 5], sizes = [32, 1], strides = [1, 1]} : vector<32x8xi32> to vector<32x1xi32>
    %43 = vector.broadcast %42 : vector<32x1xi32> to vector<32x32xi32>
    %44 = arith.cmpi eq, %43, %11 : vector<32x32xi32>
    %45 = arith.extui %44 : vector<32x32xi1> to vector<32x32xi32>
    %46 = arith.sitofp %45 : vector<32x32xi32> to vector<32x32xf32>
    %47 = arith.truncf %46 : vector<32x32xf32> to vector<32x32xbf16>
    %48 = vector.extract_strided_slice %8 {offsets = [0, 6], sizes = [32, 1], strides = [1, 1]} : vector<32x8xi32> to vector<32x1xi32>
    %49 = vector.broadcast %48 : vector<32x1xi32> to vector<32x32xi32>
    %50 = arith.cmpi eq, %49, %11 : vector<32x32xi32>
    %51 = arith.extui %50 : vector<32x32xi1> to vector<32x32xi32>
    %52 = arith.sitofp %51 : vector<32x32xi32> to vector<32x32xf32>
    %53 = arith.truncf %52 : vector<32x32xf32> to vector<32x32xbf16>
    %54 = vector.extract_strided_slice %8 {offsets = [0, 7], sizes = [32, 1], strides = [1, 1]} : vector<32x8xi32> to vector<32x1xi32>
    %55 = vector.broadcast %54 : vector<32x1xi32> to vector<32x32xi32>
    %56 = arith.cmpi eq, %55, %11 : vector<32x32xi32>
    %57 = arith.extui %56 : vector<32x32xi1> to vector<32x32xi32>
    %58 = arith.sitofp %57 : vector<32x32xi32> to vector<32x32xf32>
    %59 = arith.truncf %58 : vector<32x32xf32> to vector<32x32xbf16>
    %60 = tpu.concatenate %17, %23, %29, %35, %41, %47, %53, %59 in 0 : vector<32x32xbf16>, vector<32x32xbf16>, vector<32x32xbf16>, vector<32x32xbf16>, vector<32x32xbf16>, vector<32x32xbf16>, vector<32x32xbf16>, vector<32x32xbf16> -> vector<256x32xbf16>
    %cst_12 = arith.constant dense<0.000000e+00> : vector<256x64xf32>
    %61 = tpu.matmul %60, %10, %cst_12 {dimension_numbers = #tpu.dot_dimension_numbers<[1], [0], [0], [1], [0, 0, 1, 1], [], []>} : vector<256x32xbf16>, vector<32x64xbf16>, vector<256x64xf32> -> vector<256x64xf32>
    %62 = vector.extract_strided_slice %61 {offsets = [0, 0], sizes = [32, 64], strides = [1, 1]} : vector<256x64xf32> to vector<32x64xf32>
    %63 = vector.extract_strided_slice %61 {offsets = [32, 0], sizes = [32, 64], strides = [1, 1]} : vector<256x64xf32> to vector<32x64xf32>
    %64 = arith.maximumf %62, %63 : vector<32x64xf32>
    %65 = vector.extract_strided_slice %61 {offsets = [64, 0], sizes = [32, 64], strides = [1, 1]} : vector<256x64xf32> to vector<32x64xf32>
    %66 = arith.maximumf %64, %65 : vector<32x64xf32>
    %67 = vector.extract_strided_slice %61 {offsets = [96, 0], sizes = [32, 64], strides = [1, 1]} : vector<256x64xf32> to vector<32x64xf32>
    %68 = arith.maximumf %66, %67 : vector<32x64xf32>
    %69 = vector.extract_strided_slice %61 {offsets = [128, 0], sizes = [32, 64], strides = [1, 1]} : vector<256x64xf32> to vector<32x64xf32>
    %70 = arith.maximumf %68, %69 : vector<32x64xf32>
    %71 = vector.extract_strided_slice %61 {offsets = [160, 0], sizes = [32, 64], strides = [1, 1]} : vector<256x64xf32> to vector<32x64xf32>
    %72 = arith.maximumf %70, %71 : vector<32x64xf32>
    %73 = vector.extract_strided_slice %61 {offsets = [192, 0], sizes = [32, 64], strides = [1, 1]} : vector<256x64xf32> to vector<32x64xf32>
    %74 = arith.maximumf %72, %73 : vector<32x64xf32>
    %75 = vector.extract_strided_slice %61 {offsets = [224, 0], sizes = [32, 64], strides = [1, 1]} : vector<256x64xf32> to vector<32x64xf32>
    %76 = arith.maximumf %74, %75 : vector<32x64xf32>
    %77 = arith.addf %76, %6 : vector<32x64xf32>
    %cst_13 = arith.constant 0.000000e+00 : f32
    %78 = vector.broadcast %cst_13 : f32 to vector<32x64xf32>
    %79 = arith.cmpf ogt, %77, %78 : vector<32x64xf32>
    %cst_14 = arith.constant 2.000000e-01 : f32
    %80 = vector.broadcast %cst_14 : f32 to vector<32x64xf32>
    %81 = arith.mulf %80, %77 : vector<32x64xf32>
    %82 = arith.select %79, %77, %81 : vector<32x64xi1>, vector<32x64xf32>
    %83 = arith.truncf %82 : vector<32x64xf32> to vector<32x64xbf16>
    %c0_15 = arith.constant 0 : index
    %c0_16 = arith.constant 0 : index
    %c0_17 = arith.constant 0 : index
    %84 = vector.load %arg7[%c0_15, %c0_16, %c0_17] : memref<1x32x64xbf16, #tpu.memory_space<vmem>>, vector<1x32x64xbf16>
    %85 = vector.shape_cast %84 : vector<1x32x64xbf16> to vector<32x64xbf16>
    %86 = vector.shape_cast %83 : vector<32x64xbf16> to vector<1x32x64xbf16>
    tpu.vector_store %arg7[%c0_15, %c0_16, %c0_17], %86 {strides = array<i32>} : memref<1x32x64xbf16, #tpu.memory_space<vmem>>, vector<1x32x64xbf16>,
    return
  }
  func.func @transform_0(%arg0: i32, %arg1: i32) -> (i32, i32, i32) {
    %c0_i32 = arith.constant 0 : i32
    %c0_i32_0 = arith.constant 0 : i32
    return %arg0, %arg1, %c0_i32 : i32, i32, i32
  }
  func.func @transform_1(%arg0: i32, %arg1: i32) -> (i32, i32, i32) {
    %c0_i32 = arith.constant 0 : i32
    %c0_i32_0 = arith.constant 0 : i32
    return %arg0, %arg1, %c0_i32 : i32, i32, i32
  }
  func.func @transform_2(%arg0: i32, %arg1: i32) -> (i32, i32, i32) {
    %c0_i32 = arith.constant 0 : i32
    %c0_i32_0 = arith.constant 0 : i32
    %c0_i32_1 = arith.constant 0 : i32
    return %arg0, %c0_i32, %c0_i32_0 : i32, i32, i32
  }
  func.func @transform_3(%arg0: i32, %arg1: i32) -> (i32, i32) {
    %c0_i32 = arith.constant 0 : i32
    %c0_i32_0 = arith.constant 0 : i32
    %c0_i32_1 = arith.constant 0 : i32
    return %c0_i32, %c0_i32_0 : i32, i32
  }
  func.func @transform_4(%arg0: i32, %arg1: i32) -> (i32, i32) {
    %c0_i32 = arith.constant 0 : i32
    %c0_i32_0 = arith.constant 0 : i32
    %c0_i32_1 = arith.constant 0 : i32
    return %c0_i32, %c0_i32_0 : i32, i32
  }
  func.func @transform_5(%arg0: i32, %arg1: i32) -> (i32, i32, i32) {
    %c0_i32 = arith.constant 0 : i32
    %c0_i32_0 = arith.constant 0 : i32
    return %arg0, %arg1, %c0_i32 : i32, i32, i32
  }
}

module attributes {stable_mosaic.version = 11 : i64} {
  func.func @_pointwise_mm_kernel(%arg0: i32, %arg1: i32, %arg2: memref<1x32x64xbf16, #tpu.memory_space<vmem>>, %arg3: memref<64x64xbf16, #tpu.memory_space<vmem>>, %arg4: memref<1x32x64xbf16, #tpu.memory_space<vmem>>) attributes {dimension_semantics = [#tpu.dimension_semantics<parallel>, #tpu.dimension_semantics<parallel>], iteration_bounds = array<i64: 2, 1>, scalar_prefetch = 0 : i64, scratch_operands = 0 : i64, tpu.core_type = #tpu.core_type<tc>, window_params = [{transform_indices = @transform_0, window_bounds = array<i64: 1, 32, 64>}, {pipeline_mode = #tpu.pipeline_mode<synchronous>, transform_indices = @transform_1, window_bounds = array<i64: 64, 64>}, {transform_indices = @transform_2, window_bounds = array<i64: 1, 32, 64>}]} {
    %c0 = arith.constant 0 : index
    %c0_0 = arith.constant 0 : index
    %c0_1 = arith.constant 0 : index
    %0 = vector.load %arg2[%c0, %c0_0, %c0_1] : memref<1x32x64xbf16, #tpu.memory_space<vmem>>, vector<1x32x64xbf16>
    %1 = vector.shape_cast %0 : vector<1x32x64xbf16> to vector<32x64xbf16>
    %c0_2 = arith.constant 0 : index
    %c0_3 = arith.constant 0 : index
    %2 = vector.load %arg3[%c0_2, %c0_3] : memref<64x64xbf16, #tpu.memory_space<vmem>>, vector<64x64xbf16>
    %cst = arith.constant dense<0.000000e+00> : vector<32x64xf32>
    %3 = tpu.matmul %1, %2, %cst {dimension_numbers = #tpu.dot_dimension_numbers<[1], [0], [0], [1], [0, 0, 1, 1], [], []>} : vector<32x64xbf16>, vector<64x64xbf16>, vector<32x64xf32> -> vector<32x64xf32>
    %4 = arith.truncf %3 : vector<32x64xf32> to vector<32x64xbf16>
    %c0_4 = arith.constant 0 : index
    %c0_5 = arith.constant 0 : index
    %c0_6 = arith.constant 0 : index
    %5 = vector.load %arg4[%c0_4, %c0_5, %c0_6] : memref<1x32x64xbf16, #tpu.memory_space<vmem>>, vector<1x32x64xbf16>
    %6 = vector.shape_cast %5 : vector<1x32x64xbf16> to vector<32x64xbf16>
    %7 = vector.shape_cast %4 : vector<32x64xbf16> to vector<1x32x64xbf16>
    tpu.vector_store %arg4[%c0_4, %c0_5, %c0_6], %7 {strides = array<i32>} : memref<1x32x64xbf16, #tpu.memory_space<vmem>>, vector<1x32x64xbf16>,
    return
  }
  func.func @transform_0(%arg0: i32, %arg1: i32) -> (i32, i32, i32) {
    %c0_i32 = arith.constant 0 : i32
    %c0_i32_0 = arith.constant 0 : i32
    return %arg0, %arg1, %c0_i32 : i32, i32, i32
  }
  func.func @transform_1(%arg0: i32, %arg1: i32) -> (i32, i32) {
    %c0_i32 = arith.constant 0 : i32
    %c0_i32_0 = arith.constant 0 : i32
    %c0_i32_1 = arith.constant 0 : i32
    return %c0_i32, %c0_i32_0 : i32, i32
  }
  func.func @transform_2(%arg0: i32, %arg1: i32) -> (i32, i32, i32) {
    %c0_i32 = arith.constant 0 : i32
    %c0_i32_0 = arith.constant 0 : i32
    return %arg0, %arg1, %c0_i32 : i32, i32, i32
  }
}

module attributes {stable_mosaic.version = 11 : i64} {
  func.func @_knn_kernel(%arg0: i32, %arg1: i32, %arg2: memref<1x32x3xbf16, #tpu.memory_space<vmem>>, %arg3: memref<1x1x32xf32, #tpu.memory_space<vmem>>, %arg4: memref<1x32x8xi32, #tpu.memory_space<vmem>>) attributes {dimension_semantics = [#tpu.dimension_semantics<parallel>, #tpu.dimension_semantics<parallel>], iteration_bounds = array<i64: 2, 1>, scalar_prefetch = 0 : i64, scratch_operands = 0 : i64, tpu.core_type = #tpu.core_type<tc>, window_params = [{transform_indices = @transform_0, window_bounds = array<i64: 1, 32, 3>}, {transform_indices = @transform_1, window_bounds = array<i64: 1, 1, 32>}, {transform_indices = @transform_2, window_bounds = array<i64: 1, 32, 8>}]} {
    %c32_i32 = arith.constant 32 : i32
    %0 = arith.muli %arg1, %c32_i32 : i32
    %1 = tpu.assume_multiple %0, 8 : i32
    %c0 = arith.constant 0 : index
    %2 = arith.index_cast %1 : i32 to index
    %c0_0 = arith.constant 0 : index
    %3 = vector.load %arg2[%c0, %2, %c0_0] : memref<1x32x3xbf16, #tpu.memory_space<vmem>>, vector<1x32x3xbf16>
    %4 = vector.shape_cast %3 : vector<1x32x3xbf16> to vector<32x3xbf16>
    %c0_1 = arith.constant 0 : index
    %c0_2 = arith.constant 0 : index
    %c0_3 = arith.constant 0 : index
    %5 = vector.load %arg2[%c0_1, %c0_2, %c0_3] : memref<1x32x3xbf16, #tpu.memory_space<vmem>>, vector<1x32x3xbf16>
    %6 = vector.shape_cast %5 : vector<1x32x3xbf16> to vector<32x3xbf16>
    %cst = arith.constant dense<0.000000e+00> : vector<32x32xf32>
    %7 = tpu.matmul %4, %6, %cst {dimension_numbers = #tpu.dot_dimension_numbers<[1], [1], [0], [0], [0, 0, 1, 0], [], []>} : vector<32x3xbf16>, vector<32x3xbf16>, vector<32x32xf32> -> vector<32x32xf32>
    %cst_4 = arith.constant 2.000000e+00 : f32
    %8 = vector.broadcast %cst_4 : f32 to vector<32x32xf32>
    %9 = arith.mulf %8, %7 : vector<32x32xf32>
    %c0_5 = arith.constant 0 : index
    %c0_6 = arith.constant 0 : index
    %c0_7 = arith.constant 0 : index
    %10 = vector.load %arg3[%c0_5, %c0_6, %c0_7] : memref<1x1x32xf32, #tpu.memory_space<vmem>>, vector<1x1x32xf32>
    %11 = vector.shape_cast %10 : vector<1x1x32xf32> to vector<1x32xf32>
    %12 = vector.broadcast %11 : vector<1x32xf32> to vector<32x32xf32>
    %13 = arith.subf %9, %12 : vector<32x32xf32>
    %14 = tpu.iota {dimensions = array<i32: 1>} : vector<32x32xi32>
    %15 = tpu.iota {dimensions = array<i32: 1>} : vector<32x8xi32>
    %c0_i32 = arith.constant 0 : i32
    %16 = vector.broadcast %c0_i32 : i32 to vector<32x8xi32>
    %c0_i32_8 = arith.constant 0 : i32
    %c8_i32 = arith.constant 8 : i32
    %17 = arith.addi %c0_i32_8, %c8_i32 : i32
    %c1_i32 = arith.constant 1 : i32
    %18:2 = scf.for %arg5 = %c0_i32_8 to %17 step %c1_i32 iter_args(%arg6 = %13, %arg7 = %16) -> (vector<32x32xf32>, vector<32x8xi32>)  : i32 {
      %cst_13 = arith.constant dense<0xFF800000> : vector<32xf32>
      %22 = vector.multi_reduction <maximumf>, %arg6, %cst_13 [1] : vector<32x32xf32> to vector<32xf32>
      %23 = vector.shape_cast %22 : vector<32xf32> to vector<32x1xf32>
      %24 = vector.broadcast %23 : vector<32x1xf32> to vector<32x32xf32>
      %25 = arith.cmpf oeq, %arg6, %24 : vector<32x32xf32>
      %c32_i32_14 = arith.constant 32 : i32
      %26 = vector.broadcast %c32_i32_14 : i32 to vector<32x32xi32>
      %27 = arith.select %25, %14, %26 : vector<32x32xi1>, vector<32x32xi32>
      %cst_15 = arith.constant dense<2147483647> : vector<32xi32>
      %28 = vector.multi_reduction <minsi>, %27, %cst_15 [1] : vector<32x32xi32> to vector<32xi32>
      %29 = vector.shape_cast %28 : vector<32xi32> to vector<32x1xi32>
      %30 = vector.broadcast %arg5 : i32 to vector<32x8xi32>
      %31 = arith.cmpi eq, %15, %30 : vector<32x8xi32>
      %32 = vector.shape_cast %29 : vector<32x1xi32> to vector<32x1xi32>
      %33 = vector.broadcast %32 : vector<32x1xi32> to vector<32x8xi32>
      %34 = arith.select %31, %33, %arg7 : vector<32x8xi1>, vector<32x8xi32>
      %35 = vector.broadcast %29 : vector<32x1xi32> to vector<32x32xi32>
      %36 = arith.cmpi eq, %14, %35 : vector<32x32xi32>
      %cst_16 = arith.constant 0xFF800000 : f32
      %37 = vector.broadcast %cst_16 : f32 to vector<32x32xf32>
      %38 = arith.select %36, %37, %arg6 : vector<32x32xi1>, vector<32x32xf32>
      scf.yield %38, %34 : vector<32x32xf32>, vector<32x8xi32>
    }
    %c8_i32_9 = arith.constant 8 : i32
    %c0_10 = arith.constant 0 : index
    %c0_11 = arith.constant 0 : index
    %c0_12 = arith.constant 0 : index
    %19 = vector.load %arg4[%c0_10, %c0_11, %c0_12] : memref<1x32x8xi32, #tpu.memory_space<vmem>>, vector<1x32x8xi32>
    %20 = vector.shape_cast %19 : vector<1x32x8xi32> to vector<32x8xi32>
    %21 = vector.shape_cast %18#1 : vector<32x8xi32> to vector<1x32x8xi32>
    tpu.vector_store %arg4[%c0_10, %c0_11, %c0_12], %21 {strides = array<i32>} : memref<1x32x8xi32, #tpu.memory_space<vmem>>, vector<1x32x8xi32>,
    return
  }
  func.func @transform_0(%arg0: i32, %arg1: i32) -> (i32, i32, i32) {
    %c0_i32 = arith.constant 0 : i32
    %c0_i32_0 = arith.constant 0 : i32
    %c0_i32_1 = arith.constant 0 : i32
    return %arg0, %c0_i32, %c0_i32_0 : i32, i32, i32
  }
  func.func @transform_1(%arg0: i32, %arg1: i32) -> (i32, i32, i32) {
    %c0_i32 = arith.constant 0 : i32
    %c0_i32_0 = arith.constant 0 : i32
    %c0_i32_1 = arith.constant 0 : i32
    return %arg0, %c0_i32, %c0_i32_0 : i32, i32, i32
  }
  func.func @transform_2(%arg0: i32, %arg1: i32) -> (i32, i32, i32) {
    %c0_i32 = arith.constant 0 : i32
    %c0_i32_0 = arith.constant 0 : i32
    return %arg0, %arg1, %c0_i32 : i32, i32, i32
  }
}

module attributes {stable_mosaic.version = 11 : i64} {
  func.func @_knn_kernel(%arg0: i32, %arg1: i32, %arg2: memref<1x32x64xbf16, #tpu.memory_space<vmem>>, %arg3: memref<1x1x32xf32, #tpu.memory_space<vmem>>, %arg4: memref<1x32x8xi32, #tpu.memory_space<vmem>>) attributes {dimension_semantics = [#tpu.dimension_semantics<parallel>, #tpu.dimension_semantics<parallel>], iteration_bounds = array<i64: 2, 1>, scalar_prefetch = 0 : i64, scratch_operands = 0 : i64, tpu.core_type = #tpu.core_type<tc>, window_params = [{transform_indices = @transform_0, window_bounds = array<i64: 1, 32, 64>}, {transform_indices = @transform_1, window_bounds = array<i64: 1, 1, 32>}, {transform_indices = @transform_2, window_bounds = array<i64: 1, 32, 8>}]} {
    %c32_i32 = arith.constant 32 : i32
    %0 = arith.muli %arg1, %c32_i32 : i32
    %1 = tpu.assume_multiple %0, 8 : i32
    %c0 = arith.constant 0 : index
    %2 = arith.index_cast %1 : i32 to index
    %c0_0 = arith.constant 0 : index
    %3 = vector.load %arg2[%c0, %2, %c0_0] : memref<1x32x64xbf16, #tpu.memory_space<vmem>>, vector<1x32x64xbf16>
    %4 = vector.shape_cast %3 : vector<1x32x64xbf16> to vector<32x64xbf16>
    %c0_1 = arith.constant 0 : index
    %c0_2 = arith.constant 0 : index
    %c0_3 = arith.constant 0 : index
    %5 = vector.load %arg2[%c0_1, %c0_2, %c0_3] : memref<1x32x64xbf16, #tpu.memory_space<vmem>>, vector<1x32x64xbf16>
    %6 = vector.shape_cast %5 : vector<1x32x64xbf16> to vector<32x64xbf16>
    %cst = arith.constant dense<0.000000e+00> : vector<32x32xf32>
    %7 = tpu.matmul %4, %6, %cst {dimension_numbers = #tpu.dot_dimension_numbers<[1], [1], [0], [0], [0, 0, 1, 0], [], []>} : vector<32x64xbf16>, vector<32x64xbf16>, vector<32x32xf32> -> vector<32x32xf32>
    %cst_4 = arith.constant 2.000000e+00 : f32
    %8 = vector.broadcast %cst_4 : f32 to vector<32x32xf32>
    %9 = arith.mulf %8, %7 : vector<32x32xf32>
    %c0_5 = arith.constant 0 : index
    %c0_6 = arith.constant 0 : index
    %c0_7 = arith.constant 0 : index
    %10 = vector.load %arg3[%c0_5, %c0_6, %c0_7] : memref<1x1x32xf32, #tpu.memory_space<vmem>>, vector<1x1x32xf32>
    %11 = vector.shape_cast %10 : vector<1x1x32xf32> to vector<1x32xf32>
    %12 = vector.broadcast %11 : vector<1x32xf32> to vector<32x32xf32>
    %13 = arith.subf %9, %12 : vector<32x32xf32>
    %14 = tpu.iota {dimensions = array<i32: 1>} : vector<32x32xi32>
    %15 = tpu.iota {dimensions = array<i32: 1>} : vector<32x8xi32>
    %c0_i32 = arith.constant 0 : i32
    %16 = vector.broadcast %c0_i32 : i32 to vector<32x8xi32>
    %c0_i32_8 = arith.constant 0 : i32
    %c8_i32 = arith.constant 8 : i32
    %17 = arith.addi %c0_i32_8, %c8_i32 : i32
    %c1_i32 = arith.constant 1 : i32
    %18:2 = scf.for %arg5 = %c0_i32_8 to %17 step %c1_i32 iter_args(%arg6 = %13, %arg7 = %16) -> (vector<32x32xf32>, vector<32x8xi32>)  : i32 {
      %cst_13 = arith.constant dense<0xFF800000> : vector<32xf32>
      %22 = vector.multi_reduction <maximumf>, %arg6, %cst_13 [1] : vector<32x32xf32> to vector<32xf32>
      %23 = vector.shape_cast %22 : vector<32xf32> to vector<32x1xf32>
      %24 = vector.broadcast %23 : vector<32x1xf32> to vector<32x32xf32>
      %25 = arith.cmpf oeq, %arg6, %24 : vector<32x32xf32>
      %c32_i32_14 = arith.constant 32 : i32
      %26 = vector.broadcast %c32_i32_14 : i32 to vector<32x32xi32>
      %27 = arith.select %25, %14, %26 : vector<32x32xi1>, vector<32x32xi32>
      %cst_15 = arith.constant dense<2147483647> : vector<32xi32>
      %28 = vector.multi_reduction <minsi>, %27, %cst_15 [1] : vector<32x32xi32> to vector<32xi32>
      %29 = vector.shape_cast %28 : vector<32xi32> to vector<32x1xi32>
      %30 = vector.broadcast %arg5 : i32 to vector<32x8xi32>
      %31 = arith.cmpi eq, %15, %30 : vector<32x8xi32>
      %32 = vector.shape_cast %29 : vector<32x1xi32> to vector<32x1xi32>
      %33 = vector.broadcast %32 : vector<32x1xi32> to vector<32x8xi32>
      %34 = arith.select %31, %33, %arg7 : vector<32x8xi1>, vector<32x8xi32>
      %35 = vector.broadcast %29 : vector<32x1xi32> to vector<32x32xi32>
      %36 = arith.cmpi eq, %14, %35 : vector<32x32xi32>
      %cst_16 = arith.constant 0xFF800000 : f32
      %37 = vector.broadcast %cst_16 : f32 to vector<32x32xf32>
      %38 = arith.select %36, %37, %arg6 : vector<32x32xi1>, vector<32x32xf32>
      scf.yield %38, %34 : vector<32x32xf32>, vector<32x8xi32>
    }
    %c8_i32_9 = arith.constant 8 : i32
    %c0_10 = arith.constant 0 : index
    %c0_11 = arith.constant 0 : index
    %c0_12 = arith.constant 0 : index
    %19 = vector.load %arg4[%c0_10, %c0_11, %c0_12] : memref<1x32x8xi32, #tpu.memory_space<vmem>>, vector<1x32x8xi32>
    %20 = vector.shape_cast %19 : vector<1x32x8xi32> to vector<32x8xi32>
    %21 = vector.shape_cast %18#1 : vector<32x8xi32> to vector<1x32x8xi32>
    tpu.vector_store %arg4[%c0_10, %c0_11, %c0_12], %21 {strides = array<i32>} : memref<1x32x8xi32, #tpu.memory_space<vmem>>, vector<1x32x8xi32>,
    return
  }
  func.func @transform_0(%arg0: i32, %arg1: i32) -> (i32, i32, i32) {
    %c0_i32 = arith.constant 0 : i32
    %c0_i32_0 = arith.constant 0 : i32
    %c0_i32_1 = arith.constant 0 : i32
    return %arg0, %c0_i32, %c0_i32_0 : i32, i32, i32
  }
  func.func @transform_1(%arg0: i32, %arg1: i32) -> (i32, i32, i32) {
    %c0_i32 = arith.constant 0 : i32
    %c0_i32_0 = arith.constant 0 : i32
    %c0_i32_1 = arith.constant 0 : i32
    return %arg0, %c0_i32, %c0_i32_0 : i32, i32, i32
  }
  func.func @transform_2(%arg0: i32, %arg1: i32) -> (i32, i32, i32) {
    %c0_i32 = arith.constant 0 : i32
    %c0_i32_0 = arith.constant 0 : i32
    return %arg0, %arg1, %c0_i32 : i32, i32, i32
  }
}

module attributes {stable_mosaic.version = 11 : i64} {
  func.func @_edge_conv_kernel(%arg0: i32, %arg1: i32, %arg2: memref<1x32x8xi32, #tpu.memory_space<vmem>>, %arg3: memref<1x32x64xbf16, #tpu.memory_space<vmem>>, %arg4: memref<1x32x64xbf16, #tpu.memory_space<vmem>>, %arg5: memref<64x64xbf16, #tpu.memory_space<vmem>>, %arg6: memref<1x64xf32, #tpu.memory_space<vmem>>, %arg7: memref<1x32x64xbf16, #tpu.memory_space<vmem>>) attributes {dimension_semantics = [#tpu.dimension_semantics<parallel>, #tpu.dimension_semantics<parallel>], iteration_bounds = array<i64: 2, 1>, scalar_prefetch = 0 : i64, scratch_operands = 0 : i64, tpu.core_type = #tpu.core_type<tc>, window_params = [{transform_indices = @transform_0, window_bounds = array<i64: 1, 32, 8>}, {transform_indices = @transform_1, window_bounds = array<i64: 1, 32, 64>}, {transform_indices = @transform_2, window_bounds = array<i64: 1, 32, 64>}, {pipeline_mode = #tpu.pipeline_mode<synchronous>, transform_indices = @transform_3, window_bounds = array<i64: 64, 64>}, {pipeline_mode = #tpu.pipeline_mode<synchronous>, transform_indices = @transform_4, window_bounds = array<i64: 1, 64>}, {transform_indices = @transform_5, window_bounds = array<i64: 1, 32, 64>}]} {
    %c0 = arith.constant 0 : index
    %c0_0 = arith.constant 0 : index
    %c0_1 = arith.constant 0 : index
    %0 = vector.load %arg3[%c0, %c0_0, %c0_1] : memref<1x32x64xbf16, #tpu.memory_space<vmem>>, vector<1x32x64xbf16>
    %1 = vector.shape_cast %0 : vector<1x32x64xbf16> to vector<32x64xbf16>
    %c0_2 = arith.constant 0 : index
    %c0_3 = arith.constant 0 : index
    %2 = vector.load %arg5[%c0_2, %c0_3] : memref<64x64xbf16, #tpu.memory_space<vmem>>, vector<64x64xbf16>
    %cst = arith.constant dense<0.000000e+00> : vector<32x64xf32>
    %3 = tpu.matmul %1, %2, %cst {dimension_numbers = #tpu.dot_dimension_numbers<[1], [0], [0], [1], [0, 0, 1, 1], [], []>} : vector<32x64xbf16>, vector<64x64xbf16>, vector<32x64xf32> -> vector<32x64xf32>
    %c0_4 = arith.constant 0 : index
    %c0_5 = arith.constant 0 : index
    %4 = vector.load %arg6[%c0_4, %c0_5] : memref<1x64xf32, #tpu.memory_space<vmem>>, vector<1x64xf32>
    %5 = vector.broadcast %4 : vector<1x64xf32> to vector<32x64xf32>
    %6 = arith.addf %3, %5 : vector<32x64xf32>
    %c0_6 = arith.constant 0 : index
    %c0_7 = arith.constant 0 : index
    %c0_8 = arith.constant 0 : index
    %7 = vector.load %arg2[%c0_6, %c0_7, %c0_8] : memref<1x32x8xi32, #tpu.memory_space<vmem>>, vector<1x32x8xi32>
    %8 = vector.shape_cast %7 : vector<1x32x8xi32> to vector<32x8xi32>
    %c0_9 = arith.constant 0 : index
    %c0_10 = arith.constant 0 : index
    %c0_11 = arith.constant 0 : index
    %9 = vector.load %arg4[%c0_9, %c0_10, %c0_11] : memref<1x32x64xbf16, #tpu.memory_space<vmem>>, vector<1x32x64xbf16>
    %10 = vector.shape_cast %9 : vector<1x32x64xbf16> to vector<32x64xbf16>
    %11 = tpu.iota {dimensions = array<i32: 1>} : vector<32x32xi32>
    %12 = vector.extract_strided_slice %8 {offsets = [0, 0], sizes = [32, 1], strides = [1, 1]} : vector<32x8xi32> to vector<32x1xi32>
    %13 = vector.broadcast %12 : vector<32x1xi32> to vector<32x32xi32>
    %14 = arith.cmpi eq, %13, %11 : vector<32x32xi32>
    %15 = arith.extui %14 : vector<32x32xi1> to vector<32x32xi32>
    %16 = arith.sitofp %15 : vector<32x32xi32> to vector<32x32xf32>
    %17 = arith.truncf %16 : vector<32x32xf32> to vector<32x32xbf16>
    %18 = vector.extract_strided_slice %8 {offsets = [0, 1], sizes = [32, 1], strides = [1, 1]} : vector<32x8xi32> to vector<32x1xi32>
    %19 = vector.broadcast %18 : vector<32x1xi32> to vector<32x32xi32>
    %20 = arith.cmpi eq, %19, %11 : vector<32x32xi32>
    %21 = arith.extui %20 : vector<32x32xi1> to vector<32x32xi32>
    %22 = arith.sitofp %21 : vector<32x32xi32> to vector<32x32xf32>
    %23 = arith.truncf %22 : vector<32x32xf32> to vector<32x32xbf16>
    %24 = vector.extract_strided_slice %8 {offsets = [0, 2], sizes = [32, 1], strides = [1, 1]} : vector<32x8xi32> to vector<32x1xi32>
    %25 = vector.broadcast %24 : vector<32x1xi32> to vector<32x32xi32>
    %26 = arith.cmpi eq, %25, %11 : vector<32x32xi32>
    %27 = arith.extui %26 : vector<32x32xi1> to vector<32x32xi32>
    %28 = arith.sitofp %27 : vector<32x32xi32> to vector<32x32xf32>
    %29 = arith.truncf %28 : vector<32x32xf32> to vector<32x32xbf16>
    %30 = vector.extract_strided_slice %8 {offsets = [0, 3], sizes = [32, 1], strides = [1, 1]} : vector<32x8xi32> to vector<32x1xi32>
    %31 = vector.broadcast %30 : vector<32x1xi32> to vector<32x32xi32>
    %32 = arith.cmpi eq, %31, %11 : vector<32x32xi32>
    %33 = arith.extui %32 : vector<32x32xi1> to vector<32x32xi32>
    %34 = arith.sitofp %33 : vector<32x32xi32> to vector<32x32xf32>
    %35 = arith.truncf %34 : vector<32x32xf32> to vector<32x32xbf16>
    %36 = vector.extract_strided_slice %8 {offsets = [0, 4], sizes = [32, 1], strides = [1, 1]} : vector<32x8xi32> to vector<32x1xi32>
    %37 = vector.broadcast %36 : vector<32x1xi32> to vector<32x32xi32>
    %38 = arith.cmpi eq, %37, %11 : vector<32x32xi32>
    %39 = arith.extui %38 : vector<32x32xi1> to vector<32x32xi32>
    %40 = arith.sitofp %39 : vector<32x32xi32> to vector<32x32xf32>
    %41 = arith.truncf %40 : vector<32x32xf32> to vector<32x32xbf16>
    %42 = vector.extract_strided_slice %8 {offsets = [0, 5], sizes = [32, 1], strides = [1, 1]} : vector<32x8xi32> to vector<32x1xi32>
    %43 = vector.broadcast %42 : vector<32x1xi32> to vector<32x32xi32>
    %44 = arith.cmpi eq, %43, %11 : vector<32x32xi32>
    %45 = arith.extui %44 : vector<32x32xi1> to vector<32x32xi32>
    %46 = arith.sitofp %45 : vector<32x32xi32> to vector<32x32xf32>
    %47 = arith.truncf %46 : vector<32x32xf32> to vector<32x32xbf16>
    %48 = vector.extract_strided_slice %8 {offsets = [0, 6], sizes = [32, 1], strides = [1, 1]} : vector<32x8xi32> to vector<32x1xi32>
    %49 = vector.broadcast %48 : vector<32x1xi32> to vector<32x32xi32>
    %50 = arith.cmpi eq, %49, %11 : vector<32x32xi32>
    %51 = arith.extui %50 : vector<32x32xi1> to vector<32x32xi32>
    %52 = arith.sitofp %51 : vector<32x32xi32> to vector<32x32xf32>
    %53 = arith.truncf %52 : vector<32x32xf32> to vector<32x32xbf16>
    %54 = vector.extract_strided_slice %8 {offsets = [0, 7], sizes = [32, 1], strides = [1, 1]} : vector<32x8xi32> to vector<32x1xi32>
    %55 = vector.broadcast %54 : vector<32x1xi32> to vector<32x32xi32>
    %56 = arith.cmpi eq, %55, %11 : vector<32x32xi32>
    %57 = arith.extui %56 : vector<32x32xi1> to vector<32x32xi32>
    %58 = arith.sitofp %57 : vector<32x32xi32> to vector<32x32xf32>
    %59 = arith.truncf %58 : vector<32x32xf32> to vector<32x32xbf16>
    %60 = tpu.concatenate %17, %23, %29, %35, %41, %47, %53, %59 in 0 : vector<32x32xbf16>, vector<32x32xbf16>, vector<32x32xbf16>, vector<32x32xbf16>, vector<32x32xbf16>, vector<32x32xbf16>, vector<32x32xbf16>, vector<32x32xbf16> -> vector<256x32xbf16>
    %cst_12 = arith.constant dense<0.000000e+00> : vector<256x64xf32>
    %61 = tpu.matmul %60, %10, %cst_12 {dimension_numbers = #tpu.dot_dimension_numbers<[1], [0], [0], [1], [0, 0, 1, 1], [], []>} : vector<256x32xbf16>, vector<32x64xbf16>, vector<256x64xf32> -> vector<256x64xf32>
    %62 = vector.extract_strided_slice %61 {offsets = [0, 0], sizes = [32, 64], strides = [1, 1]} : vector<256x64xf32> to vector<32x64xf32>
    %63 = vector.extract_strided_slice %61 {offsets = [32, 0], sizes = [32, 64], strides = [1, 1]} : vector<256x64xf32> to vector<32x64xf32>
    %64 = arith.maximumf %62, %63 : vector<32x64xf32>
    %65 = vector.extract_strided_slice %61 {offsets = [64, 0], sizes = [32, 64], strides = [1, 1]} : vector<256x64xf32> to vector<32x64xf32>
    %66 = arith.maximumf %64, %65 : vector<32x64xf32>
    %67 = vector.extract_strided_slice %61 {offsets = [96, 0], sizes = [32, 64], strides = [1, 1]} : vector<256x64xf32> to vector<32x64xf32>
    %68 = arith.maximumf %66, %67 : vector<32x64xf32>
    %69 = vector.extract_strided_slice %61 {offsets = [128, 0], sizes = [32, 64], strides = [1, 1]} : vector<256x64xf32> to vector<32x64xf32>
    %70 = arith.maximumf %68, %69 : vector<32x64xf32>
    %71 = vector.extract_strided_slice %61 {offsets = [160, 0], sizes = [32, 64], strides = [1, 1]} : vector<256x64xf32> to vector<32x64xf32>
    %72 = arith.maximumf %70, %71 : vector<32x64xf32>
    %73 = vector.extract_strided_slice %61 {offsets = [192, 0], sizes = [32, 64], strides = [1, 1]} : vector<256x64xf32> to vector<32x64xf32>
    %74 = arith.maximumf %72, %73 : vector<32x64xf32>
    %75 = vector.extract_strided_slice %61 {offsets = [224, 0], sizes = [32, 64], strides = [1, 1]} : vector<256x64xf32> to vector<32x64xf32>
    %76 = arith.maximumf %74, %75 : vector<32x64xf32>
    %77 = arith.addf %76, %6 : vector<32x64xf32>
    %cst_13 = arith.constant 0.000000e+00 : f32
    %78 = vector.broadcast %cst_13 : f32 to vector<32x64xf32>
    %79 = arith.cmpf ogt, %77, %78 : vector<32x64xf32>
    %cst_14 = arith.constant 2.000000e-01 : f32
    %80 = vector.broadcast %cst_14 : f32 to vector<32x64xf32>
    %81 = arith.mulf %80, %77 : vector<32x64xf32>
    %82 = arith.select %79, %77, %81 : vector<32x64xi1>, vector<32x64xf32>
    %83 = arith.truncf %82 : vector<32x64xf32> to vector<32x64xbf16>
    %c0_15 = arith.constant 0 : index
    %c0_16 = arith.constant 0 : index
    %c0_17 = arith.constant 0 : index
    %84 = vector.load %arg7[%c0_15, %c0_16, %c0_17] : memref<1x32x64xbf16, #tpu.memory_space<vmem>>, vector<1x32x64xbf16>
    %85 = vector.shape_cast %84 : vector<1x32x64xbf16> to vector<32x64xbf16>
    %86 = vector.shape_cast %83 : vector<32x64xbf16> to vector<1x32x64xbf16>
    tpu.vector_store %arg7[%c0_15, %c0_16, %c0_17], %86 {strides = array<i32>} : memref<1x32x64xbf16, #tpu.memory_space<vmem>>, vector<1x32x64xbf16>,
    return
  }
  func.func @transform_0(%arg0: i32, %arg1: i32) -> (i32, i32, i32) {
    %c0_i32 = arith.constant 0 : i32
    %c0_i32_0 = arith.constant 0 : i32
    return %arg0, %arg1, %c0_i32 : i32, i32, i32
  }
  func.func @transform_1(%arg0: i32, %arg1: i32) -> (i32, i32, i32) {
    %c0_i32 = arith.constant 0 : i32
    %c0_i32_0 = arith.constant 0 : i32
    return %arg0, %arg1, %c0_i32 : i32, i32, i32
  }
  func.func @transform_2(%arg0: i32, %arg1: i32) -> (i32, i32, i32) {
    %c0_i32 = arith.constant 0 : i32
    %c0_i32_0 = arith.constant 0 : i32
    %c0_i32_1 = arith.constant 0 : i32
    return %arg0, %c0_i32, %c0_i32_0 : i32, i32, i32
  }
  func.func @transform_3(%arg0: i32, %arg1: i32) -> (i32, i32) {
    %c0_i32 = arith.constant 0 : i32
    %c0_i32_0 = arith.constant 0 : i32
    %c0_i32_1 = arith.constant 0 : i32
    return %c0_i32, %c0_i32_0 : i32, i32
  }
  func.func @transform_4(%arg0: i32, %arg1: i32) -> (i32, i32) {
    %c0_i32 = arith.constant 0 : i32
    %c0_i32_0 = arith.constant 0 : i32
    %c0_i32_1 = arith.constant 0 : i32
    return %c0_i32, %c0_i32_0 : i32, i32
  }
  func.func @transform_5(%arg0: i32, %arg1: i32) -> (i32, i32, i32) {
    %c0_i32 = arith.constant 0 : i32
    %c0_i32_0 = arith.constant 0 : i32
    return %arg0, %arg1, %c0_i32 : i32, i32, i32
  }
}

module attributes {stable_mosaic.version = 11 : i64} {
  func.func @_pointwise_mm_kernel(%arg0: i32, %arg1: i32, %arg2: memref<1x32x64xbf16, #tpu.memory_space<vmem>>, %arg3: memref<64x128xbf16, #tpu.memory_space<vmem>>, %arg4: memref<1x32x128xbf16, #tpu.memory_space<vmem>>) attributes {dimension_semantics = [#tpu.dimension_semantics<parallel>, #tpu.dimension_semantics<parallel>], iteration_bounds = array<i64: 2, 1>, scalar_prefetch = 0 : i64, scratch_operands = 0 : i64, tpu.core_type = #tpu.core_type<tc>, window_params = [{transform_indices = @transform_0, window_bounds = array<i64: 1, 32, 64>}, {pipeline_mode = #tpu.pipeline_mode<synchronous>, transform_indices = @transform_1, window_bounds = array<i64: 64, 128>}, {transform_indices = @transform_2, window_bounds = array<i64: 1, 32, 128>}]} {
    %c0 = arith.constant 0 : index
    %c0_0 = arith.constant 0 : index
    %c0_1 = arith.constant 0 : index
    %0 = vector.load %arg2[%c0, %c0_0, %c0_1] : memref<1x32x64xbf16, #tpu.memory_space<vmem>>, vector<1x32x64xbf16>
    %1 = vector.shape_cast %0 : vector<1x32x64xbf16> to vector<32x64xbf16>
    %c0_2 = arith.constant 0 : index
    %c0_3 = arith.constant 0 : index
    %2 = vector.load %arg3[%c0_2, %c0_3] : memref<64x128xbf16, #tpu.memory_space<vmem>>, vector<64x128xbf16>
    %cst = arith.constant dense<0.000000e+00> : vector<32x128xf32>
    %3 = tpu.matmul %1, %2, %cst {dimension_numbers = #tpu.dot_dimension_numbers<[1], [0], [0], [1], [0, 0, 1, 1], [], []>} : vector<32x64xbf16>, vector<64x128xbf16>, vector<32x128xf32> -> vector<32x128xf32>
    %4 = arith.truncf %3 : vector<32x128xf32> to vector<32x128xbf16>
    %c0_4 = arith.constant 0 : index
    %c0_5 = arith.constant 0 : index
    %c0_6 = arith.constant 0 : index
    %5 = vector.load %arg4[%c0_4, %c0_5, %c0_6] : memref<1x32x128xbf16, #tpu.memory_space<vmem>>, vector<1x32x128xbf16>
    %6 = vector.shape_cast %5 : vector<1x32x128xbf16> to vector<32x128xbf16>
    %7 = vector.shape_cast %4 : vector<32x128xbf16> to vector<1x32x128xbf16>
    tpu.vector_store %arg4[%c0_4, %c0_5, %c0_6], %7 {strides = array<i32>} : memref<1x32x128xbf16, #tpu.memory_space<vmem>>, vector<1x32x128xbf16>,
    return
  }
  func.func @transform_0(%arg0: i32, %arg1: i32) -> (i32, i32, i32) {
    %c0_i32 = arith.constant 0 : i32
    %c0_i32_0 = arith.constant 0 : i32
    return %arg0, %arg1, %c0_i32 : i32, i32, i32
  }
  func.func @transform_1(%arg0: i32, %arg1: i32) -> (i32, i32) {
    %c0_i32 = arith.constant 0 : i32
    %c0_i32_0 = arith.constant 0 : i32
    %c0_i32_1 = arith.constant 0 : i32
    return %c0_i32, %c0_i32_0 : i32, i32
  }
  func.func @transform_2(%arg0: i32, %arg1: i32) -> (i32, i32, i32) {
    %c0_i32 = arith.constant 0 : i32
    %c0_i32_0 = arith.constant 0 : i32
    return %arg0, %arg1, %c0_i32 : i32, i32, i32
  }
}

module attributes {stable_mosaic.version = 11 : i64} {
  func.func @_edge_conv_kernel(%arg0: i32, %arg1: i32, %arg2: memref<1x32x8xi32, #tpu.memory_space<vmem>>, %arg3: memref<1x32x64xbf16, #tpu.memory_space<vmem>>, %arg4: memref<1x32x128xbf16, #tpu.memory_space<vmem>>, %arg5: memref<64x128xbf16, #tpu.memory_space<vmem>>, %arg6: memref<1x128xf32, #tpu.memory_space<vmem>>, %arg7: memref<1x32x128xbf16, #tpu.memory_space<vmem>>) attributes {dimension_semantics = [#tpu.dimension_semantics<parallel>, #tpu.dimension_semantics<parallel>], iteration_bounds = array<i64: 2, 1>, scalar_prefetch = 0 : i64, scratch_operands = 0 : i64, tpu.core_type = #tpu.core_type<tc>, window_params = [{transform_indices = @transform_0, window_bounds = array<i64: 1, 32, 8>}, {transform_indices = @transform_1, window_bounds = array<i64: 1, 32, 64>}, {transform_indices = @transform_2, window_bounds = array<i64: 1, 32, 128>}, {pipeline_mode = #tpu.pipeline_mode<synchronous>, transform_indices = @transform_3, window_bounds = array<i64: 64, 128>}, {pipeline_mode = #tpu.pipeline_mode<synchronous>, transform_indices = @transform_4, window_bounds = array<i64: 1, 128>}, {transform_indices = @transform_5, window_bounds = array<i64: 1, 32, 128>}]} {
    %c0 = arith.constant 0 : index
    %c0_0 = arith.constant 0 : index
    %c0_1 = arith.constant 0 : index
    %0 = vector.load %arg3[%c0, %c0_0, %c0_1] : memref<1x32x64xbf16, #tpu.memory_space<vmem>>, vector<1x32x64xbf16>
    %1 = vector.shape_cast %0 : vector<1x32x64xbf16> to vector<32x64xbf16>
    %c0_2 = arith.constant 0 : index
    %c0_3 = arith.constant 0 : index
    %2 = vector.load %arg5[%c0_2, %c0_3] : memref<64x128xbf16, #tpu.memory_space<vmem>>, vector<64x128xbf16>
    %cst = arith.constant dense<0.000000e+00> : vector<32x128xf32>
    %3 = tpu.matmul %1, %2, %cst {dimension_numbers = #tpu.dot_dimension_numbers<[1], [0], [0], [1], [0, 0, 1, 1], [], []>} : vector<32x64xbf16>, vector<64x128xbf16>, vector<32x128xf32> -> vector<32x128xf32>
    %c0_4 = arith.constant 0 : index
    %c0_5 = arith.constant 0 : index
    %4 = vector.load %arg6[%c0_4, %c0_5] : memref<1x128xf32, #tpu.memory_space<vmem>>, vector<1x128xf32>
    %5 = vector.broadcast %4 : vector<1x128xf32> to vector<32x128xf32>
    %6 = arith.addf %3, %5 : vector<32x128xf32>
    %c0_6 = arith.constant 0 : index
    %c0_7 = arith.constant 0 : index
    %c0_8 = arith.constant 0 : index
    %7 = vector.load %arg2[%c0_6, %c0_7, %c0_8] : memref<1x32x8xi32, #tpu.memory_space<vmem>>, vector<1x32x8xi32>
    %8 = vector.shape_cast %7 : vector<1x32x8xi32> to vector<32x8xi32>
    %c0_9 = arith.constant 0 : index
    %c0_10 = arith.constant 0 : index
    %c0_11 = arith.constant 0 : index
    %9 = vector.load %arg4[%c0_9, %c0_10, %c0_11] : memref<1x32x128xbf16, #tpu.memory_space<vmem>>, vector<1x32x128xbf16>
    %10 = vector.shape_cast %9 : vector<1x32x128xbf16> to vector<32x128xbf16>
    %11 = tpu.iota {dimensions = array<i32: 1>} : vector<32x32xi32>
    %12 = vector.extract_strided_slice %8 {offsets = [0, 0], sizes = [32, 1], strides = [1, 1]} : vector<32x8xi32> to vector<32x1xi32>
    %13 = vector.broadcast %12 : vector<32x1xi32> to vector<32x32xi32>
    %14 = arith.cmpi eq, %13, %11 : vector<32x32xi32>
    %15 = arith.extui %14 : vector<32x32xi1> to vector<32x32xi32>
    %16 = arith.sitofp %15 : vector<32x32xi32> to vector<32x32xf32>
    %17 = arith.truncf %16 : vector<32x32xf32> to vector<32x32xbf16>
    %18 = vector.extract_strided_slice %8 {offsets = [0, 1], sizes = [32, 1], strides = [1, 1]} : vector<32x8xi32> to vector<32x1xi32>
    %19 = vector.broadcast %18 : vector<32x1xi32> to vector<32x32xi32>
    %20 = arith.cmpi eq, %19, %11 : vector<32x32xi32>
    %21 = arith.extui %20 : vector<32x32xi1> to vector<32x32xi32>
    %22 = arith.sitofp %21 : vector<32x32xi32> to vector<32x32xf32>
    %23 = arith.truncf %22 : vector<32x32xf32> to vector<32x32xbf16>
    %24 = vector.extract_strided_slice %8 {offsets = [0, 2], sizes = [32, 1], strides = [1, 1]} : vector<32x8xi32> to vector<32x1xi32>
    %25 = vector.broadcast %24 : vector<32x1xi32> to vector<32x32xi32>
    %26 = arith.cmpi eq, %25, %11 : vector<32x32xi32>
    %27 = arith.extui %26 : vector<32x32xi1> to vector<32x32xi32>
    %28 = arith.sitofp %27 : vector<32x32xi32> to vector<32x32xf32>
    %29 = arith.truncf %28 : vector<32x32xf32> to vector<32x32xbf16>
    %30 = vector.extract_strided_slice %8 {offsets = [0, 3], sizes = [32, 1], strides = [1, 1]} : vector<32x8xi32> to vector<32x1xi32>
    %31 = vector.broadcast %30 : vector<32x1xi32> to vector<32x32xi32>
    %32 = arith.cmpi eq, %31, %11 : vector<32x32xi32>
    %33 = arith.extui %32 : vector<32x32xi1> to vector<32x32xi32>
    %34 = arith.sitofp %33 : vector<32x32xi32> to vector<32x32xf32>
    %35 = arith.truncf %34 : vector<32x32xf32> to vector<32x32xbf16>
    %36 = vector.extract_strided_slice %8 {offsets = [0, 4], sizes = [32, 1], strides = [1, 1]} : vector<32x8xi32> to vector<32x1xi32>
    %37 = vector.broadcast %36 : vector<32x1xi32> to vector<32x32xi32>
    %38 = arith.cmpi eq, %37, %11 : vector<32x32xi32>
    %39 = arith.extui %38 : vector<32x32xi1> to vector<32x32xi32>
    %40 = arith.sitofp %39 : vector<32x32xi32> to vector<32x32xf32>
    %41 = arith.truncf %40 : vector<32x32xf32> to vector<32x32xbf16>
    %42 = vector.extract_strided_slice %8 {offsets = [0, 5], sizes = [32, 1], strides = [1, 1]} : vector<32x8xi32> to vector<32x1xi32>
    %43 = vector.broadcast %42 : vector<32x1xi32> to vector<32x32xi32>
    %44 = arith.cmpi eq, %43, %11 : vector<32x32xi32>
    %45 = arith.extui %44 : vector<32x32xi1> to vector<32x32xi32>
    %46 = arith.sitofp %45 : vector<32x32xi32> to vector<32x32xf32>
    %47 = arith.truncf %46 : vector<32x32xf32> to vector<32x32xbf16>
    %48 = vector.extract_strided_slice %8 {offsets = [0, 6], sizes = [32, 1], strides = [1, 1]} : vector<32x8xi32> to vector<32x1xi32>
    %49 = vector.broadcast %48 : vector<32x1xi32> to vector<32x32xi32>
    %50 = arith.cmpi eq, %49, %11 : vector<32x32xi32>
    %51 = arith.extui %50 : vector<32x32xi1> to vector<32x32xi32>
    %52 = arith.sitofp %51 : vector<32x32xi32> to vector<32x32xf32>
    %53 = arith.truncf %52 : vector<32x32xf32> to vector<32x32xbf16>
    %54 = vector.extract_strided_slice %8 {offsets = [0, 7], sizes = [32, 1], strides = [1, 1]} : vector<32x8xi32> to vector<32x1xi32>
    %55 = vector.broadcast %54 : vector<32x1xi32> to vector<32x32xi32>
    %56 = arith.cmpi eq, %55, %11 : vector<32x32xi32>
    %57 = arith.extui %56 : vector<32x32xi1> to vector<32x32xi32>
    %58 = arith.sitofp %57 : vector<32x32xi32> to vector<32x32xf32>
    %59 = arith.truncf %58 : vector<32x32xf32> to vector<32x32xbf16>
    %60 = tpu.concatenate %17, %23, %29, %35, %41, %47, %53, %59 in 0 : vector<32x32xbf16>, vector<32x32xbf16>, vector<32x32xbf16>, vector<32x32xbf16>, vector<32x32xbf16>, vector<32x32xbf16>, vector<32x32xbf16>, vector<32x32xbf16> -> vector<256x32xbf16>
    %cst_12 = arith.constant dense<0.000000e+00> : vector<256x128xf32>
    %61 = tpu.matmul %60, %10, %cst_12 {dimension_numbers = #tpu.dot_dimension_numbers<[1], [0], [0], [1], [0, 0, 1, 1], [], []>} : vector<256x32xbf16>, vector<32x128xbf16>, vector<256x128xf32> -> vector<256x128xf32>
    %62 = vector.extract_strided_slice %61 {offsets = [0, 0], sizes = [32, 128], strides = [1, 1]} : vector<256x128xf32> to vector<32x128xf32>
    %63 = vector.extract_strided_slice %61 {offsets = [32, 0], sizes = [32, 128], strides = [1, 1]} : vector<256x128xf32> to vector<32x128xf32>
    %64 = arith.maximumf %62, %63 : vector<32x128xf32>
    %65 = vector.extract_strided_slice %61 {offsets = [64, 0], sizes = [32, 128], strides = [1, 1]} : vector<256x128xf32> to vector<32x128xf32>
    %66 = arith.maximumf %64, %65 : vector<32x128xf32>
    %67 = vector.extract_strided_slice %61 {offsets = [96, 0], sizes = [32, 128], strides = [1, 1]} : vector<256x128xf32> to vector<32x128xf32>
    %68 = arith.maximumf %66, %67 : vector<32x128xf32>
    %69 = vector.extract_strided_slice %61 {offsets = [128, 0], sizes = [32, 128], strides = [1, 1]} : vector<256x128xf32> to vector<32x128xf32>
    %70 = arith.maximumf %68, %69 : vector<32x128xf32>
    %71 = vector.extract_strided_slice %61 {offsets = [160, 0], sizes = [32, 128], strides = [1, 1]} : vector<256x128xf32> to vector<32x128xf32>
    %72 = arith.maximumf %70, %71 : vector<32x128xf32>
    %73 = vector.extract_strided_slice %61 {offsets = [192, 0], sizes = [32, 128], strides = [1, 1]} : vector<256x128xf32> to vector<32x128xf32>
    %74 = arith.maximumf %72, %73 : vector<32x128xf32>
    %75 = vector.extract_strided_slice %61 {offsets = [224, 0], sizes = [32, 128], strides = [1, 1]} : vector<256x128xf32> to vector<32x128xf32>
    %76 = arith.maximumf %74, %75 : vector<32x128xf32>
    %77 = arith.addf %76, %6 : vector<32x128xf32>
    %cst_13 = arith.constant 0.000000e+00 : f32
    %78 = vector.broadcast %cst_13 : f32 to vector<32x128xf32>
    %79 = arith.cmpf ogt, %77, %78 : vector<32x128xf32>
    %cst_14 = arith.constant 2.000000e-01 : f32
    %80 = vector.broadcast %cst_14 : f32 to vector<32x128xf32>
    %81 = arith.mulf %80, %77 : vector<32x128xf32>
    %82 = arith.select %79, %77, %81 : vector<32x128xi1>, vector<32x128xf32>
    %83 = arith.truncf %82 : vector<32x128xf32> to vector<32x128xbf16>
    %c0_15 = arith.constant 0 : index
    %c0_16 = arith.constant 0 : index
    %c0_17 = arith.constant 0 : index
    %84 = vector.load %arg7[%c0_15, %c0_16, %c0_17] : memref<1x32x128xbf16, #tpu.memory_space<vmem>>, vector<1x32x128xbf16>
    %85 = vector.shape_cast %84 : vector<1x32x128xbf16> to vector<32x128xbf16>
    %86 = vector.shape_cast %83 : vector<32x128xbf16> to vector<1x32x128xbf16>
    tpu.vector_store %arg7[%c0_15, %c0_16, %c0_17], %86 {strides = array<i32>} : memref<1x32x128xbf16, #tpu.memory_space<vmem>>, vector<1x32x128xbf16>,
    return
  }
  func.func @transform_0(%arg0: i32, %arg1: i32) -> (i32, i32, i32) {
    %c0_i32 = arith.constant 0 : i32
    %c0_i32_0 = arith.constant 0 : i32
    return %arg0, %arg1, %c0_i32 : i32, i32, i32
  }
  func.func @transform_1(%arg0: i32, %arg1: i32) -> (i32, i32, i32) {
    %c0_i32 = arith.constant 0 : i32
    %c0_i32_0 = arith.constant 0 : i32
    return %arg0, %arg1, %c0_i32 : i32, i32, i32
  }
  func.func @transform_2(%arg0: i32, %arg1: i32) -> (i32, i32, i32) {
    %c0_i32 = arith.constant 0 : i32
    %c0_i32_0 = arith.constant 0 : i32
    %c0_i32_1 = arith.constant 0 : i32
    return %arg0, %c0_i32, %c0_i32_0 : i32, i32, i32
  }
  func.func @transform_3(%arg0: i32, %arg1: i32) -> (i32, i32) {
    %c0_i32 = arith.constant 0 : i32
    %c0_i32_0 = arith.constant 0 : i32
    %c0_i32_1 = arith.constant 0 : i32
    return %c0_i32, %c0_i32_0 : i32, i32
  }
  func.func @transform_4(%arg0: i32, %arg1: i32) -> (i32, i32) {
    %c0_i32 = arith.constant 0 : i32
    %c0_i32_0 = arith.constant 0 : i32
    %c0_i32_1 = arith.constant 0 : i32
    return %c0_i32, %c0_i32_0 : i32, i32
  }
  func.func @transform_5(%arg0: i32, %arg1: i32) -> (i32, i32, i32) {
    %c0_i32 = arith.constant 0 : i32
    %c0_i32_0 = arith.constant 0 : i32
    return %arg0, %arg1, %c0_i32 : i32, i32, i32
  }
}

module attributes {stable_mosaic.version = 11 : i64} {
  func.func @_knn_kernel(%arg0: i32, %arg1: i32, %arg2: memref<1x32x128xbf16, #tpu.memory_space<vmem>>, %arg3: memref<1x1x32xf32, #tpu.memory_space<vmem>>, %arg4: memref<1x32x8xi32, #tpu.memory_space<vmem>>) attributes {dimension_semantics = [#tpu.dimension_semantics<parallel>, #tpu.dimension_semantics<parallel>], iteration_bounds = array<i64: 2, 1>, scalar_prefetch = 0 : i64, scratch_operands = 0 : i64, tpu.core_type = #tpu.core_type<tc>, window_params = [{transform_indices = @transform_0, window_bounds = array<i64: 1, 32, 128>}, {transform_indices = @transform_1, window_bounds = array<i64: 1, 1, 32>}, {transform_indices = @transform_2, window_bounds = array<i64: 1, 32, 8>}]} {
    %c32_i32 = arith.constant 32 : i32
    %0 = arith.muli %arg1, %c32_i32 : i32
    %1 = tpu.assume_multiple %0, 8 : i32
    %c0 = arith.constant 0 : index
    %2 = arith.index_cast %1 : i32 to index
    %c0_0 = arith.constant 0 : index
    %3 = vector.load %arg2[%c0, %2, %c0_0] : memref<1x32x128xbf16, #tpu.memory_space<vmem>>, vector<1x32x128xbf16>
    %4 = vector.shape_cast %3 : vector<1x32x128xbf16> to vector<32x128xbf16>
    %c0_1 = arith.constant 0 : index
    %c0_2 = arith.constant 0 : index
    %c0_3 = arith.constant 0 : index
    %5 = vector.load %arg2[%c0_1, %c0_2, %c0_3] : memref<1x32x128xbf16, #tpu.memory_space<vmem>>, vector<1x32x128xbf16>
    %6 = vector.shape_cast %5 : vector<1x32x128xbf16> to vector<32x128xbf16>
    %cst = arith.constant dense<0.000000e+00> : vector<32x32xf32>
    %7 = tpu.matmul %4, %6, %cst {dimension_numbers = #tpu.dot_dimension_numbers<[1], [1], [0], [0], [0, 0, 1, 0], [], []>} : vector<32x128xbf16>, vector<32x128xbf16>, vector<32x32xf32> -> vector<32x32xf32>
    %cst_4 = arith.constant 2.000000e+00 : f32
    %8 = vector.broadcast %cst_4 : f32 to vector<32x32xf32>
    %9 = arith.mulf %8, %7 : vector<32x32xf32>
    %c0_5 = arith.constant 0 : index
    %c0_6 = arith.constant 0 : index
    %c0_7 = arith.constant 0 : index
    %10 = vector.load %arg3[%c0_5, %c0_6, %c0_7] : memref<1x1x32xf32, #tpu.memory_space<vmem>>, vector<1x1x32xf32>
    %11 = vector.shape_cast %10 : vector<1x1x32xf32> to vector<1x32xf32>
    %12 = vector.broadcast %11 : vector<1x32xf32> to vector<32x32xf32>
    %13 = arith.subf %9, %12 : vector<32x32xf32>
    %14 = tpu.iota {dimensions = array<i32: 1>} : vector<32x32xi32>
    %15 = tpu.iota {dimensions = array<i32: 1>} : vector<32x8xi32>
    %c0_i32 = arith.constant 0 : i32
    %16 = vector.broadcast %c0_i32 : i32 to vector<32x8xi32>
    %c0_i32_8 = arith.constant 0 : i32
    %c8_i32 = arith.constant 8 : i32
    %17 = arith.addi %c0_i32_8, %c8_i32 : i32
    %c1_i32 = arith.constant 1 : i32
    %18:2 = scf.for %arg5 = %c0_i32_8 to %17 step %c1_i32 iter_args(%arg6 = %13, %arg7 = %16) -> (vector<32x32xf32>, vector<32x8xi32>)  : i32 {
      %cst_13 = arith.constant dense<0xFF800000> : vector<32xf32>
      %22 = vector.multi_reduction <maximumf>, %arg6, %cst_13 [1] : vector<32x32xf32> to vector<32xf32>
      %23 = vector.shape_cast %22 : vector<32xf32> to vector<32x1xf32>
      %24 = vector.broadcast %23 : vector<32x1xf32> to vector<32x32xf32>
      %25 = arith.cmpf oeq, %arg6, %24 : vector<32x32xf32>
      %c32_i32_14 = arith.constant 32 : i32
      %26 = vector.broadcast %c32_i32_14 : i32 to vector<32x32xi32>
      %27 = arith.select %25, %14, %26 : vector<32x32xi1>, vector<32x32xi32>
      %cst_15 = arith.constant dense<2147483647> : vector<32xi32>
      %28 = vector.multi_reduction <minsi>, %27, %cst_15 [1] : vector<32x32xi32> to vector<32xi32>
      %29 = vector.shape_cast %28 : vector<32xi32> to vector<32x1xi32>
      %30 = vector.broadcast %arg5 : i32 to vector<32x8xi32>
      %31 = arith.cmpi eq, %15, %30 : vector<32x8xi32>
      %32 = vector.shape_cast %29 : vector<32x1xi32> to vector<32x1xi32>
      %33 = vector.broadcast %32 : vector<32x1xi32> to vector<32x8xi32>
      %34 = arith.select %31, %33, %arg7 : vector<32x8xi1>, vector<32x8xi32>
      %35 = vector.broadcast %29 : vector<32x1xi32> to vector<32x32xi32>
      %36 = arith.cmpi eq, %14, %35 : vector<32x32xi32>
      %cst_16 = arith.constant 0xFF800000 : f32
      %37 = vector.broadcast %cst_16 : f32 to vector<32x32xf32>
      %38 = arith.select %36, %37, %arg6 : vector<32x32xi1>, vector<32x32xf32>
      scf.yield %38, %34 : vector<32x32xf32>, vector<32x8xi32>
    }
    %c8_i32_9 = arith.constant 8 : i32
    %c0_10 = arith.constant 0 : index
    %c0_11 = arith.constant 0 : index
    %c0_12 = arith.constant 0 : index
    %19 = vector.load %arg4[%c0_10, %c0_11, %c0_12] : memref<1x32x8xi32, #tpu.memory_space<vmem>>, vector<1x32x8xi32>
    %20 = vector.shape_cast %19 : vector<1x32x8xi32> to vector<32x8xi32>
    %21 = vector.shape_cast %18#1 : vector<32x8xi32> to vector<1x32x8xi32>
    tpu.vector_store %arg4[%c0_10, %c0_11, %c0_12], %21 {strides = array<i32>} : memref<1x32x8xi32, #tpu.memory_space<vmem>>, vector<1x32x8xi32>,
    return
  }
  func.func @transform_0(%arg0: i32, %arg1: i32) -> (i32, i32, i32) {
    %c0_i32 = arith.constant 0 : i32
    %c0_i32_0 = arith.constant 0 : i32
    %c0_i32_1 = arith.constant 0 : i32
    return %arg0, %c0_i32, %c0_i32_0 : i32, i32, i32
  }
  func.func @transform_1(%arg0: i32, %arg1: i32) -> (i32, i32, i32) {
    %c0_i32 = arith.constant 0 : i32
    %c0_i32_0 = arith.constant 0 : i32
    %c0_i32_1 = arith.constant 0 : i32
    return %arg0, %c0_i32, %c0_i32_0 : i32, i32, i32
  }
  func.func @transform_2(%arg0: i32, %arg1: i32) -> (i32, i32, i32) {
    %c0_i32 = arith.constant 0 : i32
    %c0_i32_0 = arith.constant 0 : i32
    return %arg0, %arg1, %c0_i32 : i32, i32, i32
  }
}

module attributes {stable_mosaic.version = 11 : i64} {
  func.func @_pointwise_mm_kernel(%arg0: i32, %arg1: i32, %arg2: memref<1x32x128xbf16, #tpu.memory_space<vmem>>, %arg3: memref<128x256xbf16, #tpu.memory_space<vmem>>, %arg4: memref<1x32x256xbf16, #tpu.memory_space<vmem>>) attributes {dimension_semantics = [#tpu.dimension_semantics<parallel>, #tpu.dimension_semantics<parallel>], iteration_bounds = array<i64: 2, 1>, scalar_prefetch = 0 : i64, scratch_operands = 0 : i64, tpu.core_type = #tpu.core_type<tc>, window_params = [{transform_indices = @transform_0, window_bounds = array<i64: 1, 32, 128>}, {pipeline_mode = #tpu.pipeline_mode<synchronous>, transform_indices = @transform_1, window_bounds = array<i64: 128, 256>}, {transform_indices = @transform_2, window_bounds = array<i64: 1, 32, 256>}]} {
    %c0 = arith.constant 0 : index
    %c0_0 = arith.constant 0 : index
    %c0_1 = arith.constant 0 : index
    %0 = vector.load %arg2[%c0, %c0_0, %c0_1] : memref<1x32x128xbf16, #tpu.memory_space<vmem>>, vector<1x32x128xbf16>
    %1 = vector.shape_cast %0 : vector<1x32x128xbf16> to vector<32x128xbf16>
    %c0_2 = arith.constant 0 : index
    %c0_3 = arith.constant 0 : index
    %2 = vector.load %arg3[%c0_2, %c0_3] : memref<128x256xbf16, #tpu.memory_space<vmem>>, vector<128x256xbf16>
    %cst = arith.constant dense<0.000000e+00> : vector<32x256xf32>
    %3 = tpu.matmul %1, %2, %cst {dimension_numbers = #tpu.dot_dimension_numbers<[1], [0], [0], [1], [0, 0, 1, 1], [], []>} : vector<32x128xbf16>, vector<128x256xbf16>, vector<32x256xf32> -> vector<32x256xf32>
    %4 = arith.truncf %3 : vector<32x256xf32> to vector<32x256xbf16>
    %c0_4 = arith.constant 0 : index
    %c0_5 = arith.constant 0 : index
    %c0_6 = arith.constant 0 : index
    %5 = vector.load %arg4[%c0_4, %c0_5, %c0_6] : memref<1x32x256xbf16, #tpu.memory_space<vmem>>, vector<1x32x256xbf16>
    %6 = vector.shape_cast %5 : vector<1x32x256xbf16> to vector<32x256xbf16>
    %7 = vector.shape_cast %4 : vector<32x256xbf16> to vector<1x32x256xbf16>
    tpu.vector_store %arg4[%c0_4, %c0_5, %c0_6], %7 {strides = array<i32>} : memref<1x32x256xbf16, #tpu.memory_space<vmem>>, vector<1x32x256xbf16>,
    return
  }
  func.func @transform_0(%arg0: i32, %arg1: i32) -> (i32, i32, i32) {
    %c0_i32 = arith.constant 0 : i32
    %c0_i32_0 = arith.constant 0 : i32
    return %arg0, %arg1, %c0_i32 : i32, i32, i32
  }
  func.func @transform_1(%arg0: i32, %arg1: i32) -> (i32, i32) {
    %c0_i32 = arith.constant 0 : i32
    %c0_i32_0 = arith.constant 0 : i32
    %c0_i32_1 = arith.constant 0 : i32
    return %c0_i32, %c0_i32_0 : i32, i32
  }
  func.func @transform_2(%arg0: i32, %arg1: i32) -> (i32, i32, i32) {
    %c0_i32 = arith.constant 0 : i32
    %c0_i32_0 = arith.constant 0 : i32
    return %arg0, %arg1, %c0_i32 : i32, i32, i32
  }
}

module attributes {stable_mosaic.version = 11 : i64} {
  func.func @_edge_conv_kernel(%arg0: i32, %arg1: i32, %arg2: memref<1x32x8xi32, #tpu.memory_space<vmem>>, %arg3: memref<1x32x128xbf16, #tpu.memory_space<vmem>>, %arg4: memref<1x32x256xbf16, #tpu.memory_space<vmem>>, %arg5: memref<128x256xbf16, #tpu.memory_space<vmem>>, %arg6: memref<1x256xf32, #tpu.memory_space<vmem>>, %arg7: memref<1x32x256xbf16, #tpu.memory_space<vmem>>) attributes {dimension_semantics = [#tpu.dimension_semantics<parallel>, #tpu.dimension_semantics<parallel>], iteration_bounds = array<i64: 2, 1>, scalar_prefetch = 0 : i64, scratch_operands = 0 : i64, tpu.core_type = #tpu.core_type<tc>, window_params = [{transform_indices = @transform_0, window_bounds = array<i64: 1, 32, 8>}, {transform_indices = @transform_1, window_bounds = array<i64: 1, 32, 128>}, {transform_indices = @transform_2, window_bounds = array<i64: 1, 32, 256>}, {pipeline_mode = #tpu.pipeline_mode<synchronous>, transform_indices = @transform_3, window_bounds = array<i64: 128, 256>}, {pipeline_mode = #tpu.pipeline_mode<synchronous>, transform_indices = @transform_4, window_bounds = array<i64: 1, 256>}, {transform_indices = @transform_5, window_bounds = array<i64: 1, 32, 256>}]} {
    %c0 = arith.constant 0 : index
    %c0_0 = arith.constant 0 : index
    %c0_1 = arith.constant 0 : index
    %0 = vector.load %arg3[%c0, %c0_0, %c0_1] : memref<1x32x128xbf16, #tpu.memory_space<vmem>>, vector<1x32x128xbf16>
    %1 = vector.shape_cast %0 : vector<1x32x128xbf16> to vector<32x128xbf16>
    %c0_2 = arith.constant 0 : index
    %c0_3 = arith.constant 0 : index
    %2 = vector.load %arg5[%c0_2, %c0_3] : memref<128x256xbf16, #tpu.memory_space<vmem>>, vector<128x256xbf16>
    %cst = arith.constant dense<0.000000e+00> : vector<32x256xf32>
    %3 = tpu.matmul %1, %2, %cst {dimension_numbers = #tpu.dot_dimension_numbers<[1], [0], [0], [1], [0, 0, 1, 1], [], []>} : vector<32x128xbf16>, vector<128x256xbf16>, vector<32x256xf32> -> vector<32x256xf32>
    %c0_4 = arith.constant 0 : index
    %c0_5 = arith.constant 0 : index
    %4 = vector.load %arg6[%c0_4, %c0_5] : memref<1x256xf32, #tpu.memory_space<vmem>>, vector<1x256xf32>
    %5 = vector.broadcast %4 : vector<1x256xf32> to vector<32x256xf32>
    %6 = arith.addf %3, %5 : vector<32x256xf32>
    %c0_6 = arith.constant 0 : index
    %c0_7 = arith.constant 0 : index
    %c0_8 = arith.constant 0 : index
    %7 = vector.load %arg2[%c0_6, %c0_7, %c0_8] : memref<1x32x8xi32, #tpu.memory_space<vmem>>, vector<1x32x8xi32>
    %8 = vector.shape_cast %7 : vector<1x32x8xi32> to vector<32x8xi32>
    %c0_9 = arith.constant 0 : index
    %c0_10 = arith.constant 0 : index
    %c0_11 = arith.constant 0 : index
    %9 = vector.load %arg4[%c0_9, %c0_10, %c0_11] : memref<1x32x256xbf16, #tpu.memory_space<vmem>>, vector<1x32x256xbf16>
    %10 = vector.shape_cast %9 : vector<1x32x256xbf16> to vector<32x256xbf16>
    %11 = tpu.iota {dimensions = array<i32: 1>} : vector<32x32xi32>
    %12 = vector.extract_strided_slice %8 {offsets = [0, 0], sizes = [32, 1], strides = [1, 1]} : vector<32x8xi32> to vector<32x1xi32>
    %13 = vector.broadcast %12 : vector<32x1xi32> to vector<32x32xi32>
    %14 = arith.cmpi eq, %13, %11 : vector<32x32xi32>
    %15 = arith.extui %14 : vector<32x32xi1> to vector<32x32xi32>
    %16 = arith.sitofp %15 : vector<32x32xi32> to vector<32x32xf32>
    %17 = arith.truncf %16 : vector<32x32xf32> to vector<32x32xbf16>
    %18 = vector.extract_strided_slice %8 {offsets = [0, 1], sizes = [32, 1], strides = [1, 1]} : vector<32x8xi32> to vector<32x1xi32>
    %19 = vector.broadcast %18 : vector<32x1xi32> to vector<32x32xi32>
    %20 = arith.cmpi eq, %19, %11 : vector<32x32xi32>
    %21 = arith.extui %20 : vector<32x32xi1> to vector<32x32xi32>
    %22 = arith.sitofp %21 : vector<32x32xi32> to vector<32x32xf32>
    %23 = arith.truncf %22 : vector<32x32xf32> to vector<32x32xbf16>
    %24 = vector.extract_strided_slice %8 {offsets = [0, 2], sizes = [32, 1], strides = [1, 1]} : vector<32x8xi32> to vector<32x1xi32>
    %25 = vector.broadcast %24 : vector<32x1xi32> to vector<32x32xi32>
    %26 = arith.cmpi eq, %25, %11 : vector<32x32xi32>
    %27 = arith.extui %26 : vector<32x32xi1> to vector<32x32xi32>
    %28 = arith.sitofp %27 : vector<32x32xi32> to vector<32x32xf32>
    %29 = arith.truncf %28 : vector<32x32xf32> to vector<32x32xbf16>
    %30 = vector.extract_strided_slice %8 {offsets = [0, 3], sizes = [32, 1], strides = [1, 1]} : vector<32x8xi32> to vector<32x1xi32>
    %31 = vector.broadcast %30 : vector<32x1xi32> to vector<32x32xi32>
    %32 = arith.cmpi eq, %31, %11 : vector<32x32xi32>
    %33 = arith.extui %32 : vector<32x32xi1> to vector<32x32xi32>
    %34 = arith.sitofp %33 : vector<32x32xi32> to vector<32x32xf32>
    %35 = arith.truncf %34 : vector<32x32xf32> to vector<32x32xbf16>
    %36 = vector.extract_strided_slice %8 {offsets = [0, 4], sizes = [32, 1], strides = [1, 1]} : vector<32x8xi32> to vector<32x1xi32>
    %37 = vector.broadcast %36 : vector<32x1xi32> to vector<32x32xi32>
    %38 = arith.cmpi eq, %37, %11 : vector<32x32xi32>
    %39 = arith.extui %38 : vector<32x32xi1> to vector<32x32xi32>
    %40 = arith.sitofp %39 : vector<32x32xi32> to vector<32x32xf32>
    %41 = arith.truncf %40 : vector<32x32xf32> to vector<32x32xbf16>
    %42 = vector.extract_strided_slice %8 {offsets = [0, 5], sizes = [32, 1], strides = [1, 1]} : vector<32x8xi32> to vector<32x1xi32>
    %43 = vector.broadcast %42 : vector<32x1xi32> to vector<32x32xi32>
    %44 = arith.cmpi eq, %43, %11 : vector<32x32xi32>
    %45 = arith.extui %44 : vector<32x32xi1> to vector<32x32xi32>
    %46 = arith.sitofp %45 : vector<32x32xi32> to vector<32x32xf32>
    %47 = arith.truncf %46 : vector<32x32xf32> to vector<32x32xbf16>
    %48 = vector.extract_strided_slice %8 {offsets = [0, 6], sizes = [32, 1], strides = [1, 1]} : vector<32x8xi32> to vector<32x1xi32>
    %49 = vector.broadcast %48 : vector<32x1xi32> to vector<32x32xi32>
    %50 = arith.cmpi eq, %49, %11 : vector<32x32xi32>
    %51 = arith.extui %50 : vector<32x32xi1> to vector<32x32xi32>
    %52 = arith.sitofp %51 : vector<32x32xi32> to vector<32x32xf32>
    %53 = arith.truncf %52 : vector<32x32xf32> to vector<32x32xbf16>
    %54 = vector.extract_strided_slice %8 {offsets = [0, 7], sizes = [32, 1], strides = [1, 1]} : vector<32x8xi32> to vector<32x1xi32>
    %55 = vector.broadcast %54 : vector<32x1xi32> to vector<32x32xi32>
    %56 = arith.cmpi eq, %55, %11 : vector<32x32xi32>
    %57 = arith.extui %56 : vector<32x32xi1> to vector<32x32xi32>
    %58 = arith.sitofp %57 : vector<32x32xi32> to vector<32x32xf32>
    %59 = arith.truncf %58 : vector<32x32xf32> to vector<32x32xbf16>
    %60 = tpu.concatenate %17, %23, %29, %35, %41, %47, %53, %59 in 0 : vector<32x32xbf16>, vector<32x32xbf16>, vector<32x32xbf16>, vector<32x32xbf16>, vector<32x32xbf16>, vector<32x32xbf16>, vector<32x32xbf16>, vector<32x32xbf16> -> vector<256x32xbf16>
    %cst_12 = arith.constant dense<0.000000e+00> : vector<256x256xf32>
    %61 = tpu.matmul %60, %10, %cst_12 {dimension_numbers = #tpu.dot_dimension_numbers<[1], [0], [0], [1], [0, 0, 1, 1], [], []>} : vector<256x32xbf16>, vector<32x256xbf16>, vector<256x256xf32> -> vector<256x256xf32>
    %62 = vector.extract_strided_slice %61 {offsets = [0, 0], sizes = [32, 256], strides = [1, 1]} : vector<256x256xf32> to vector<32x256xf32>
    %63 = vector.extract_strided_slice %61 {offsets = [32, 0], sizes = [32, 256], strides = [1, 1]} : vector<256x256xf32> to vector<32x256xf32>
    %64 = arith.maximumf %62, %63 : vector<32x256xf32>
    %65 = vector.extract_strided_slice %61 {offsets = [64, 0], sizes = [32, 256], strides = [1, 1]} : vector<256x256xf32> to vector<32x256xf32>
    %66 = arith.maximumf %64, %65 : vector<32x256xf32>
    %67 = vector.extract_strided_slice %61 {offsets = [96, 0], sizes = [32, 256], strides = [1, 1]} : vector<256x256xf32> to vector<32x256xf32>
    %68 = arith.maximumf %66, %67 : vector<32x256xf32>
    %69 = vector.extract_strided_slice %61 {offsets = [128, 0], sizes = [32, 256], strides = [1, 1]} : vector<256x256xf32> to vector<32x256xf32>
    %70 = arith.maximumf %68, %69 : vector<32x256xf32>
    %71 = vector.extract_strided_slice %61 {offsets = [160, 0], sizes = [32, 256], strides = [1, 1]} : vector<256x256xf32> to vector<32x256xf32>
    %72 = arith.maximumf %70, %71 : vector<32x256xf32>
    %73 = vector.extract_strided_slice %61 {offsets = [192, 0], sizes = [32, 256], strides = [1, 1]} : vector<256x256xf32> to vector<32x256xf32>
    %74 = arith.maximumf %72, %73 : vector<32x256xf32>
    %75 = vector.extract_strided_slice %61 {offsets = [224, 0], sizes = [32, 256], strides = [1, 1]} : vector<256x256xf32> to vector<32x256xf32>
    %76 = arith.maximumf %74, %75 : vector<32x256xf32>
    %77 = arith.addf %76, %6 : vector<32x256xf32>
    %cst_13 = arith.constant 0.000000e+00 : f32
    %78 = vector.broadcast %cst_13 : f32 to vector<32x256xf32>
    %79 = arith.cmpf ogt, %77, %78 : vector<32x256xf32>
    %cst_14 = arith.constant 2.000000e-01 : f32
    %80 = vector.broadcast %cst_14 : f32 to vector<32x256xf32>
    %81 = arith.mulf %80, %77 : vector<32x256xf32>
    %82 = arith.select %79, %77, %81 : vector<32x256xi1>, vector<32x256xf32>
    %83 = arith.truncf %82 : vector<32x256xf32> to vector<32x256xbf16>
    %c0_15 = arith.constant 0 : index
    %c0_16 = arith.constant 0 : index
    %c0_17 = arith.constant 0 : index
    %84 = vector.load %arg7[%c0_15, %c0_16, %c0_17] : memref<1x32x256xbf16, #tpu.memory_space<vmem>>, vector<1x32x256xbf16>
    %85 = vector.shape_cast %84 : vector<1x32x256xbf16> to vector<32x256xbf16>
    %86 = vector.shape_cast %83 : vector<32x256xbf16> to vector<1x32x256xbf16>
    tpu.vector_store %arg7[%c0_15, %c0_16, %c0_17], %86 {strides = array<i32>} : memref<1x32x256xbf16, #tpu.memory_space<vmem>>, vector<1x32x256xbf16>,
    return
  }
  func.func @transform_0(%arg0: i32, %arg1: i32) -> (i32, i32, i32) {
    %c0_i32 = arith.constant 0 : i32
    %c0_i32_0 = arith.constant 0 : i32
    return %arg0, %arg1, %c0_i32 : i32, i32, i32
  }
  func.func @transform_1(%arg0: i32, %arg1: i32) -> (i32, i32, i32) {
    %c0_i32 = arith.constant 0 : i32
    %c0_i32_0 = arith.constant 0 : i32
    return %arg0, %arg1, %c0_i32 : i32, i32, i32
  }
  func.func @transform_2(%arg0: i32, %arg1: i32) -> (i32, i32, i32) {
    %c0_i32 = arith.constant 0 : i32
    %c0_i32_0 = arith.constant 0 : i32
    %c0_i32_1 = arith.constant 0 : i32
    return %arg0, %c0_i32, %c0_i32_0 : i32, i32, i32
  }
  func.func @transform_3(%arg0: i32, %arg1: i32) -> (i32, i32) {
    %c0_i32 = arith.constant 0 : i32
    %c0_i32_0 = arith.constant 0 : i32
    %c0_i32_1 = arith.constant 0 : i32
    return %c0_i32, %c0_i32_0 : i32, i32
  }
  func.func @transform_4(%arg0: i32, %arg1: i32) -> (i32, i32) {
    %c0_i32 = arith.constant 0 : i32
    %c0_i32_0 = arith.constant 0 : i32
    %c0_i32_1 = arith.constant 0 : i32
    return %c0_i32, %c0_i32_0 : i32, i32
  }
  func.func @transform_5(%arg0: i32, %arg1: i32) -> (i32, i32, i32) {
    %c0_i32 = arith.constant 0 : i32
    %c0_i32_0 = arith.constant 0 : i32
    return %arg0, %arg1, %c0_i32 : i32, i32, i32
  }
}

module attributes {stable_mosaic.version = 11 : i64} {
  func.func @_conv5_pool_kernel(%arg0: i32, %arg1: i32, %arg2: memref<1x32x64xbf16, #tpu.memory_space<vmem>>, %arg3: memref<1x32x64xbf16, #tpu.memory_space<vmem>>, %arg4: memref<1x32x128xbf16, #tpu.memory_space<vmem>>, %arg5: memref<1x32x256xbf16, #tpu.memory_space<vmem>>, %arg6: memref<64x1024xbf16, #tpu.memory_space<vmem>>, %arg7: memref<64x1024xbf16, #tpu.memory_space<vmem>>, %arg8: memref<128x1024xbf16, #tpu.memory_space<vmem>>, %arg9: memref<256x1024xbf16, #tpu.memory_space<vmem>>, %arg10: memref<1x1024xf32, #tpu.memory_space<vmem>>, %arg11: memref<1x1x1024xf32, #tpu.memory_space<vmem>>, %arg12: memref<1x1x1024xf32, #tpu.memory_space<vmem>>) attributes {dimension_semantics = [#tpu.dimension_semantics<parallel>, #tpu.dimension_semantics<arbitrary>], iteration_bounds = array<i64: 2, 1>, scalar_prefetch = 0 : i64, scratch_operands = 0 : i64, tpu.core_type = #tpu.core_type<tc>, window_params = [{transform_indices = @transform_0, window_bounds = array<i64: 1, 32, 64>}, {transform_indices = @transform_1, window_bounds = array<i64: 1, 32, 64>}, {transform_indices = @transform_2, window_bounds = array<i64: 1, 32, 128>}, {transform_indices = @transform_3, window_bounds = array<i64: 1, 32, 256>}, {pipeline_mode = #tpu.pipeline_mode<synchronous>, transform_indices = @transform_4, window_bounds = array<i64: 64, 1024>}, {pipeline_mode = #tpu.pipeline_mode<synchronous>, transform_indices = @transform_5, window_bounds = array<i64: 64, 1024>}, {pipeline_mode = #tpu.pipeline_mode<synchronous>, transform_indices = @transform_6, window_bounds = array<i64: 128, 1024>}, {pipeline_mode = #tpu.pipeline_mode<synchronous>, transform_indices = @transform_7, window_bounds = array<i64: 256, 1024>}, {pipeline_mode = #tpu.pipeline_mode<synchronous>, transform_indices = @transform_8, window_bounds = array<i64: 1, 1024>}, {transform_indices = @transform_9, window_bounds = array<i64: 1, 1, 1024>}, {transform_indices = @transform_10, window_bounds = array<i64: 1, 1, 1024>}]} {
    %c0 = arith.constant 0 : index
    %c0_0 = arith.constant 0 : index
    %c0_1 = arith.constant 0 : index
    %0 = vector.load %arg2[%c0, %c0_0, %c0_1] : memref<1x32x64xbf16, #tpu.memory_space<vmem>>, vector<1x32x64xbf16>
    %1 = vector.shape_cast %0 : vector<1x32x64xbf16> to vector<32x64xbf16>
    %c0_2 = arith.constant 0 : index
    %c0_3 = arith.constant 0 : index
    %2 = vector.load %arg6[%c0_2, %c0_3] : memref<64x1024xbf16, #tpu.memory_space<vmem>>, vector<64x1024xbf16>
    %cst = arith.constant dense<0.000000e+00> : vector<32x1024xf32>
    %3 = tpu.matmul %1, %2, %cst {dimension_numbers = #tpu.dot_dimension_numbers<[1], [0], [0], [1], [0, 0, 1, 1], [], []>} : vector<32x64xbf16>, vector<64x1024xbf16>, vector<32x1024xf32> -> vector<32x1024xf32>
    %c0_4 = arith.constant 0 : index
    %c0_5 = arith.constant 0 : index
    %c0_6 = arith.constant 0 : index
    %4 = vector.load %arg3[%c0_4, %c0_5, %c0_6] : memref<1x32x64xbf16, #tpu.memory_space<vmem>>, vector<1x32x64xbf16>
    %5 = vector.shape_cast %4 : vector<1x32x64xbf16> to vector<32x64xbf16>
    %c0_7 = arith.constant 0 : index
    %c0_8 = arith.constant 0 : index
    %6 = vector.load %arg7[%c0_7, %c0_8] : memref<64x1024xbf16, #tpu.memory_space<vmem>>, vector<64x1024xbf16>
    %cst_9 = arith.constant dense<0.000000e+00> : vector<32x1024xf32>
    %7 = tpu.matmul %5, %6, %cst_9 {dimension_numbers = #tpu.dot_dimension_numbers<[1], [0], [0], [1], [0, 0, 1, 1], [], []>} : vector<32x64xbf16>, vector<64x1024xbf16>, vector<32x1024xf32> -> vector<32x1024xf32>
    %8 = arith.addf %3, %7 : vector<32x1024xf32>
    %c0_10 = arith.constant 0 : index
    %c0_11 = arith.constant 0 : index
    %c0_12 = arith.constant 0 : index
    %9 = vector.load %arg4[%c0_10, %c0_11, %c0_12] : memref<1x32x128xbf16, #tpu.memory_space<vmem>>, vector<1x32x128xbf16>
    %10 = vector.shape_cast %9 : vector<1x32x128xbf16> to vector<32x128xbf16>
    %c0_13 = arith.constant 0 : index
    %c0_14 = arith.constant 0 : index
    %11 = vector.load %arg8[%c0_13, %c0_14] : memref<128x1024xbf16, #tpu.memory_space<vmem>>, vector<128x1024xbf16>
    %cst_15 = arith.constant dense<0.000000e+00> : vector<32x1024xf32>
    %12 = tpu.matmul %10, %11, %cst_15 {dimension_numbers = #tpu.dot_dimension_numbers<[1], [0], [0], [1], [0, 0, 1, 1], [], []>} : vector<32x128xbf16>, vector<128x1024xbf16>, vector<32x1024xf32> -> vector<32x1024xf32>
    %13 = arith.addf %8, %12 : vector<32x1024xf32>
    %c0_16 = arith.constant 0 : index
    %c0_17 = arith.constant 0 : index
    %c0_18 = arith.constant 0 : index
    %14 = vector.load %arg5[%c0_16, %c0_17, %c0_18] : memref<1x32x256xbf16, #tpu.memory_space<vmem>>, vector<1x32x256xbf16>
    %15 = vector.shape_cast %14 : vector<1x32x256xbf16> to vector<32x256xbf16>
    %c0_19 = arith.constant 0 : index
    %c0_20 = arith.constant 0 : index
    %16 = vector.load %arg9[%c0_19, %c0_20] : memref<256x1024xbf16, #tpu.memory_space<vmem>>, vector<256x1024xbf16>
    %cst_21 = arith.constant dense<0.000000e+00> : vector<32x1024xf32>
    %17 = tpu.matmul %15, %16, %cst_21 {dimension_numbers = #tpu.dot_dimension_numbers<[1], [0], [0], [1], [0, 0, 1, 1], [], []>} : vector<32x256xbf16>, vector<256x1024xbf16>, vector<32x1024xf32> -> vector<32x1024xf32>
    %18 = arith.addf %13, %17 : vector<32x1024xf32>
    %c0_22 = arith.constant 0 : index
    %c0_23 = arith.constant 0 : index
    %19 = vector.load %arg10[%c0_22, %c0_23] : memref<1x1024xf32, #tpu.memory_space<vmem>>, vector<1x1024xf32>
    %20 = vector.broadcast %19 : vector<1x1024xf32> to vector<32x1024xf32>
    %21 = arith.addf %18, %20 : vector<32x1024xf32>
    %cst_24 = arith.constant 0.000000e+00 : f32
    %22 = vector.broadcast %cst_24 : f32 to vector<32x1024xf32>
    %23 = arith.cmpf ogt, %21, %22 : vector<32x1024xf32>
    %cst_25 = arith.constant 2.000000e-01 : f32
    %24 = vector.broadcast %cst_25 : f32 to vector<32x1024xf32>
    %25 = arith.mulf %24, %21 : vector<32x1024xf32>
    %26 = arith.select %23, %21, %25 : vector<32x1024xi1>, vector<32x1024xf32>
    %cst_26 = arith.constant dense<0xFF800000> : vector<1024xf32>
    %27 = vector.multi_reduction <maximumf>, %26, %cst_26 [0] : vector<32x1024xf32> to vector<1024xf32>
    %28 = vector.shape_cast %27 : vector<1024xf32> to vector<1x1024xf32>
    %cst_27 = arith.constant dense<0.000000e+00> : vector<1024xf32>
    %29 = vector.multi_reduction <add>, %26, %cst_27 [0] : vector<32x1024xf32> to vector<1024xf32>
    %30 = vector.shape_cast %29 : vector<1024xf32> to vector<1x1024xf32>
    %c0_i32 = arith.constant 0 : i32
    %31 = arith.cmpi eq, %arg1, %c0_i32 : i32
    %32 = arith.extui %31 : i1 to i32
    %c0_i32_28 = arith.constant 0 : i32
    %33 = arith.cmpi ne, %32, %c0_i32_28 : i32
    scf.if %33 {
      %c0_31 = arith.constant 0 : index
      %c0_32 = arith.constant 0 : index
      %c0_33 = arith.constant 0 : index
      %37 = vector.load %arg11[%c0_31, %c0_32, %c0_33] : memref<1x1x1024xf32, #tpu.memory_space<vmem>>, vector<1x1x1024xf32>
      %38 = vector.shape_cast %37 : vector<1x1x1024xf32> to vector<1x1024xf32>
      %39 = vector.shape_cast %28 : vector<1x1024xf32> to vector<1x1x1024xf32>
      tpu.vector_store %arg11[%c0_31, %c0_32, %c0_33], %39 {strides = array<i32>} : memref<1x1x1024xf32, #tpu.memory_space<vmem>>, vector<1x1x1024xf32>,
      %c0_34 = arith.constant 0 : index
      %c0_35 = arith.constant 0 : index
      %c0_36 = arith.constant 0 : index
      %40 = vector.load %arg12[%c0_34, %c0_35, %c0_36] : memref<1x1x1024xf32, #tpu.memory_space<vmem>>, vector<1x1x1024xf32>
      %41 = vector.shape_cast %40 : vector<1x1x1024xf32> to vector<1x1024xf32>
      %42 = vector.shape_cast %30 : vector<1x1024xf32> to vector<1x1x1024xf32>
      tpu.vector_store %arg12[%c0_34, %c0_35, %c0_36], %42 {strides = array<i32>} : memref<1x1x1024xf32, #tpu.memory_space<vmem>>, vector<1x1x1024xf32>,
    } else {
    }
    %c0_i32_29 = arith.constant 0 : i32
    %34 = arith.cmpi sgt, %arg1, %c0_i32_29 : i32
    %35 = arith.extui %34 : i1 to i32
    %c0_i32_30 = arith.constant 0 : i32
    %36 = arith.cmpi ne, %35, %c0_i32_30 : i32
    scf.if %36 {
      %c0_31 = arith.constant 0 : index
      %c0_32 = arith.constant 0 : index
      %c0_33 = arith.constant 0 : index
      %37 = vector.load %arg11[%c0_31, %c0_32, %c0_33] : memref<1x1x1024xf32, #tpu.memory_space<vmem>>, vector<1x1x1024xf32>
      %38 = vector.shape_cast %37 : vector<1x1x1024xf32> to vector<1x1024xf32>
      %39 = arith.maximumf %38, %28 : vector<1x1024xf32>
      %c0_34 = arith.constant 0 : index
      %c0_35 = arith.constant 0 : index
      %c0_36 = arith.constant 0 : index
      %40 = vector.load %arg11[%c0_34, %c0_35, %c0_36] : memref<1x1x1024xf32, #tpu.memory_space<vmem>>, vector<1x1x1024xf32>
      %41 = vector.shape_cast %40 : vector<1x1x1024xf32> to vector<1x1024xf32>
      %42 = vector.shape_cast %39 : vector<1x1024xf32> to vector<1x1x1024xf32>
      tpu.vector_store %arg11[%c0_34, %c0_35, %c0_36], %42 {strides = array<i32>} : memref<1x1x1024xf32, #tpu.memory_space<vmem>>, vector<1x1x1024xf32>,
      %c0_37 = arith.constant 0 : index
      %c0_38 = arith.constant 0 : index
      %c0_39 = arith.constant 0 : index
      %43 = vector.load %arg12[%c0_37, %c0_38, %c0_39] : memref<1x1x1024xf32, #tpu.memory_space<vmem>>, vector<1x1x1024xf32>
      %44 = vector.shape_cast %43 : vector<1x1x1024xf32> to vector<1x1024xf32>
      %45 = arith.addf %44, %30 : vector<1x1024xf32>
      %c0_40 = arith.constant 0 : index
      %c0_41 = arith.constant 0 : index
      %c0_42 = arith.constant 0 : index
      %46 = vector.load %arg12[%c0_40, %c0_41, %c0_42] : memref<1x1x1024xf32, #tpu.memory_space<vmem>>, vector<1x1x1024xf32>
      %47 = vector.shape_cast %46 : vector<1x1x1024xf32> to vector<1x1024xf32>
      %48 = vector.shape_cast %45 : vector<1x1024xf32> to vector<1x1x1024xf32>
      tpu.vector_store %arg12[%c0_40, %c0_41, %c0_42], %48 {strides = array<i32>} : memref<1x1x1024xf32, #tpu.memory_space<vmem>>, vector<1x1x1024xf32>,
    } else {
    }
    return
  }
  func.func @transform_0(%arg0: i32, %arg1: i32) -> (i32, i32, i32) {
    %c0_i32 = arith.constant 0 : i32
    %c0_i32_0 = arith.constant 0 : i32
    return %arg0, %arg1, %c0_i32 : i32, i32, i32
  }
  func.func @transform_1(%arg0: i32, %arg1: i32) -> (i32, i32, i32) {
    %c0_i32 = arith.constant 0 : i32
    %c0_i32_0 = arith.constant 0 : i32
    return %arg0, %arg1, %c0_i32 : i32, i32, i32
  }
  func.func @transform_2(%arg0: i32, %arg1: i32) -> (i32, i32, i32) {
    %c0_i32 = arith.constant 0 : i32
    %c0_i32_0 = arith.constant 0 : i32
    return %arg0, %arg1, %c0_i32 : i32, i32, i32
  }
  func.func @transform_3(%arg0: i32, %arg1: i32) -> (i32, i32, i32) {
    %c0_i32 = arith.constant 0 : i32
    %c0_i32_0 = arith.constant 0 : i32
    return %arg0, %arg1, %c0_i32 : i32, i32, i32
  }
  func.func @transform_4(%arg0: i32, %arg1: i32) -> (i32, i32) {
    %c0_i32 = arith.constant 0 : i32
    %c0_i32_0 = arith.constant 0 : i32
    %c0_i32_1 = arith.constant 0 : i32
    return %c0_i32, %c0_i32_0 : i32, i32
  }
  func.func @transform_5(%arg0: i32, %arg1: i32) -> (i32, i32) {
    %c0_i32 = arith.constant 0 : i32
    %c0_i32_0 = arith.constant 0 : i32
    %c0_i32_1 = arith.constant 0 : i32
    return %c0_i32, %c0_i32_0 : i32, i32
  }
  func.func @transform_6(%arg0: i32, %arg1: i32) -> (i32, i32) {
    %c0_i32 = arith.constant 0 : i32
    %c0_i32_0 = arith.constant 0 : i32
    %c0_i32_1 = arith.constant 0 : i32
    return %c0_i32, %c0_i32_0 : i32, i32
  }
  func.func @transform_7(%arg0: i32, %arg1: i32) -> (i32, i32) {
    %c0_i32 = arith.constant 0 : i32
    %c0_i32_0 = arith.constant 0 : i32
    %c0_i32_1 = arith.constant 0 : i32
    return %c0_i32, %c0_i32_0 : i32, i32
  }
  func.func @transform_8(%arg0: i32, %arg1: i32) -> (i32, i32) {
    %c0_i32 = arith.constant 0 : i32
    %c0_i32_0 = arith.constant 0 : i32
    %c0_i32_1 = arith.constant 0 : i32
    return %c0_i32, %c0_i32_0 : i32, i32
  }
  func.func @transform_9(%arg0: i32, %arg1: i32) -> (i32, i32, i32) {
    %c0_i32 = arith.constant 0 : i32
    %c0_i32_0 = arith.constant 0 : i32
    %c0_i32_1 = arith.constant 0 : i32
    return %arg0, %c0_i32, %c0_i32_0 : i32, i32, i32
  }
  func.func @transform_10(%arg0: i32, %arg1: i32) -> (i32, i32, i32) {
    %c0_i32 = arith.constant 0 : i32
    %c0_i32_0 = arith.constant 0 : i32
    %c0_i32_1 = arith.constant 0 : i32
    return %arg0, %c0_i32, %c0_i32_0 : i32, i32, i32
  }
}

module attributes {stable_mosaic.version = 11 : i64} {
  func.func @_head_kernel(%arg0: memref<2x2048xbf16, #tpu.memory_space<vmem>>, %arg1: memref<2048x256xbf16, #tpu.memory_space<vmem>>, %arg2: memref<1x256xf32, #tpu.memory_space<vmem>>, %arg3: memref<2x256xf32, #tpu.memory_space<vmem>>) attributes {dimension_semantics = [], scalar_prefetch = 0 : i64, scratch_operands = 0 : i64, tpu.core_type = #tpu.core_type<tc>} {
    %c0 = arith.constant 0 : index
    %c0_0 = arith.constant 0 : index
    %0 = vector.load %arg0[%c0, %c0_0] : memref<2x2048xbf16, #tpu.memory_space<vmem>>, vector<2x2048xbf16>
    %c0_1 = arith.constant 0 : index
    %c0_2 = arith.constant 0 : index
    %1 = vector.load %arg1[%c0_1, %c0_2] : memref<2048x256xbf16, #tpu.memory_space<vmem>>, vector<2048x256xbf16>
    %cst = arith.constant dense<0.000000e+00> : vector<2x256xf32>
    %2 = tpu.matmul %0, %1, %cst {dimension_numbers = #tpu.dot_dimension_numbers<[1], [0], [0], [1], [0, 0, 1, 1], [], []>} : vector<2x2048xbf16>, vector<2048x256xbf16>, vector<2x256xf32> -> vector<2x256xf32>
    %c0_3 = arith.constant 0 : index
    %c0_4 = arith.constant 0 : index
    %3 = vector.load %arg2[%c0_3, %c0_4] : memref<1x256xf32, #tpu.memory_space<vmem>>, vector<1x256xf32>
    %4 = vector.broadcast %3 : vector<1x256xf32> to vector<2x256xf32>
    %5 = arith.addf %2, %4 : vector<2x256xf32>
    %c0_5 = arith.constant 0 : index
    %c0_6 = arith.constant 0 : index
    %6 = vector.load %arg3[%c0_5, %c0_6] : memref<2x256xf32, #tpu.memory_space<vmem>>, vector<2x256xf32>
    tpu.vector_store %arg3[%c0_5, %c0_6], %5 {strides = array<i32>} : memref<2x256xf32, #tpu.memory_space<vmem>>, vector<2x256xf32>,
    return
  }
}

</mosaic_0001>

<bundles_post_ra>
// kernel: _lambda_.15
= control target key start
LH: loop header
LB: loop body
LE: loop exit
PB: predicated region body
PF: predicated region fallthrough
CT: control target
= control target key end

     0   :  { %s419_s9 = smov 0   ;;  %s421_s10 = smov 0   ;;  %s455_s0 = inlined_call_operand.vmem [shape: bf16[2,32,3], index: 0, kind: input, shape index: {}]   ;;  %s456_s1 = inlined_call_operand.vmem [shape: bf16[3,64], index: 1, kind: input, shape index: {}]   ;;  %s457_s2 = inlined_call_operand.vmem [shape: bf16[2,32,64], index: 2, kind: output, shape index: {}]  }
   0x1   :  { %s423_s11 = smov 0  }
   0x2 LB: > { %s24_s12 = sadd.s32 1, %s397_s10  ;;  %p332_p0 = scmp.ge.s32.totalorder %s401_s11, 1  ;;  %s401_s11 = sphi %s423_s11, %s12_s11   ;;  %s397_s10 = sphi %s421_s10, %s459_s10   ;;  %s393_s9 = sphi %s419_s9, %s458_s9  }
   0x3   : > { %p26_p1 = scmp.ge.s32.totalorder %s24_s12, 2  ;;  %p133_p2 = scmp.lt.s32.totalorder %s401_s11, 3 }
   0x5   : > { %s461_s12 = smov (%p26_p1, %s24_s12), 0  ;;  %p134_p3 = pnand %p332_p0, %p133_p2 }
   0x6   : > { %p164_p4 = scmp.lt.s32.totalorder (!%p134_p3), %s393_s9, 1 }
   0x7   : > { %137 = sbr.rel (%p134_p3) target bundleno = 158 (0x9e), region = 28 }
   0xc   : > { %v188_v0 = vld [vmem:[%s456_s1] sm:$0x3]  ;;  %vm206_vm0 = vcmask 1040384   ;;  %vm207_vm1 = vcmask 1041408   ;;  %v403_v1 = vmov 65535   ;;  %s463_s9 = smov (!%p164_p4, %s393_s9), 1 }
   0xd   : > { %v208_v2 = vsel %vm206_vm0, 4294967295, %v403_v1  ;;  %s349_s15 = sshll.u32 %s463_s9, 4  ;;  %vm199_vm2 = vcmask 23552   ;;  %vm236_vm3 = vcmask 519168  }
   0xe   : > { %v209_v3 = vsel %vm207_vm1, %v208_v2, 0  ;;  %s171_s18 = scalar_lea.vmem %s455_s0, %s349_s15  ;;  %s181_s21 = scalar_lea.vmem %s457_s2, %s349_s15 }
   0xf   : > { %v211_v4 = vand.u32 %v209_v3, %v188_v0  ;;  %v351_v5 = vld [vmem:[%s171_s18] sm:$0xff]  ;;  %v352_v6 = vld [vmem:[%s171_s18 + $0x8] sm:$0xff] }
  0x11   : > { %220 = vmatpush.bf16.msra.mxu0 %v211_v4  ;;  %353 = vmatpush.bf16.msra.mxu1 %v211_v4 }
  0x14   : > { %345 = vmatmul.msk.bf16.vlgmr.msra.gmra.mxu0 %vm199_vm2, %v351_v5  ;;  %346 = vmatmul.msk.bf16.vlgmr.msra.gmra.mxu1 %vm199_vm2, %v352_v6 }
  0x91   : > { %v222_v7 = vpop.f32.mrf.mxu0  ;;  %v227_v8 = vpop.f32.mrf.mxu1 }
  0x92   : > { %v232_v9 = vpack.c.bf16 %v222_v7, %v222_v7  ;;  %v234_v10 = vpack.c.bf16 %v227_v8, %v227_v8 }
  0x94   : > { %237 = vst.msk [vmem:[%s181_s21] sm:$0xf] %vm236_vm3, %v232_v9 }
  0x95   : > { %239 = vst.msk [vmem:[%s181_s21 + $0x8] sm:$0xf] %vm236_vm3, %v234_v10 }
  0x99   : > { %v224_v11 = vpop.f32.mrf.mxu0  ;;  %v229_v12 = vpop.f32.mrf.mxu1 }
  0x9a   : > { %v233_v13 = vpack.c.bf16 %v224_v11, %v224_v11  ;;  %v235_v14 = vpack.c.bf16 %v229_v12, %v229_v12 }
  0x9c   : > { %238 = vst.msk [vmem:[%s181_s21 + $0x4] sm:$0xf] %vm236_vm3, %v233_v13 }
  0x9d   : > { %240 = vst.msk [vmem:[%s181_s21 + $0xc] sm:$0xf] %vm236_vm3, %v235_v14 }
  0x9e PF: > { %s12_s11 = sadd.s32 1, %s401_s11   ;;  %s458_s9 = smov %s397_s10 }
  0x9f   : > { %p9_p5 = scmp.ge.s32.totalorder %s12_s11, 4   ;;  %s459_s10 = smov %s461_s12 }
  0xa1   :  { %11 = sbr.rel (!%p9_p5) target bundleno = 2 (0x2), region = 58 }

// kernel: _lambda_.18
= control target key start
LH: loop header
LB: loop body
LE: loop exit
PB: predicated region body
PF: predicated region fallthrough
CT: control target
= control target key end

     0   :  { %7 = vsyncpa [#allocation3], 0  ;;  %s545_s9 = smov 0   ;;  %s547_s10 = smov 0   ;;  %s582_s0 = inlined_call_operand.vmem [shape: bf16[2,32,64], index: 0, kind: input, shape index: {}]   ;;  %s583_s1 = inlined_call_operand.hbm [shape: bf16[64,64], index: 1, kind: input, shape index: {}]   ;;  %s584_s2 = inlined_call_operand.vmem [shape: bf16[2,32,64], index: 2, kind: output, shape index: {}]  }
   0x1   :  { %s549_s11 = smov 0  }
   0x2 LB: > { %s381_s12 = sadd.s32 4294967295, %s525_s11   ;;  %s25_s13 = sadd.s32 1, %s521_s10  ;;  %s525_s11 = sphi %s549_s11, %s13_s11   ;;  %s521_s10 = sphi %s547_s10, %s586_s10   ;;  %s517_s9 = sphi %s545_s9, %s585_s9  }
   0x3   : > { %p27_p0 = scmp.ge.s32.totalorder %s25_s13, 2  ;;  %p383_p1 = scmp.ge.s32.totalorder %s525_s11, 1 }
   0x4   : > { %p107_p2 = scmp.lt.s32.totalorder %s525_s11, 3  ;;  %p440_p4 = scmp.eq.s32.totalorder %s381_s12, 0 }
   0x5   : > { %s588_s13 = smov (%p27_p0, %s25_s13), 0  ;;  %s118_s16 = sshll.u32 %s583_s1, 4  ;;  %s119_s16 = int_to_ptr.hbm [resolvable:$true] %s118_s16 }
   0x6   : > { %p108_p3 = pnand %p383_p1, %p107_p2  ;;  %s527_s17 = smov [#allocation2]  }
   0x7   : > { %s120_s18 = sshll.u32 %s527_s17, 4  ;;  %s528_s19 = smov 64   ;;  %s121_s18 = int_to_ptr.vmem [resolvable:$true] %s120_s18 }
   0x8   : > { %p436_p5 = pneg %p108_p3  ;;  %s529_s20 = smov 4  }
   0x9   : > { %149 = sbr.rel (%p108_p3) target bundleno = 169 (0xa9), region = 28 }
   0xa   : > { %p437_p6 = pnand %p440_p4, %p436_p5 }
   0xc   : > { %439 = dma.hbm_to_vmem [thread:$0]  (!%p437_p6), %s119_s16, 512, %s121_s18, [#allocation3], %s528_s19, %s528_s19, %s529_s20  }
   0xe   : > { %512 = dma.done.wait (%p440_p4), [#allocation3], 512  }
   0xf   : > { %514 = vsyncadd (%p440_p4), [#allocation3], 4294966784  ;;  %p181_p7 = scmp.lt.s32.totalorder %s517_s9, 1  ;;  %v427_v0 = vld [vmem:[#allocation2 + $0x18] sm:$0xff]  ;;  %v426_v1 = vld [vmem:[#allocation2 + $0x10] sm:$0xff]  ;;  %vm247_vm0 = vcmask 523264  }
  0x10   : > { %258 = vmatpush.bf16.msra.mxu0 %v427_v0  ;;  %428 = vmatpush.bf16.msra.mxu1 %v427_v0  ;;  %v425_v2 = vld [vmem:[#allocation2 + $0x8] sm:$0xff]  ;;  %v424_v3 = vld [vmem:[#allocation2] sm:$0xff]  ;;  %vm277_vm1 = vcmask 519168  }
  0x11   : > { %s590_s9 = smov (!%p181_p7, %s517_s9), 1 }
  0x12   : > { %s420_s21 = sshll.u32 %s590_s9, 4 }
  0x13   : > { %s188_s24 = scalar_lea.vmem %s582_s0, %s420_s21  ;;  %s198_s27 = scalar_lea.vmem %s584_s2, %s420_s21 }
  0x14   : > { %259 = vmatpush.bf16.msra.mxu0 %v426_v1  ;;  %429 = vmatpush.bf16.msra.mxu1 %v426_v1  ;;  %v422_v4 = vld [vmem:[%s188_s24] sm:$0xff]  ;;  %v423_v5 = vld [vmem:[%s188_s24 + $0x8] sm:$0xff] }
  0x18   : > { %260 = vmatpush.bf16.msra.mxu0 %v425_v2  ;;  %430 = vmatpush.bf16.msra.mxu1 %v425_v2 }
  0x1c   : > { %261 = vmatpush.bf16.msra.mxu0 %v424_v3  ;;  %431 = vmatpush.bf16.msra.mxu1 %v424_v3 }
  0x1f   : > { %416 = vmatmul.msk.bf16.vlgmr.msra.gmra.mxu0 %vm247_vm0, %v422_v4  ;;  %417 = vmatmul.msk.bf16.vlgmr.msra.gmra.mxu1 %vm247_vm0, %v423_v5 }
  0x9c   : > { %v263_v6 = vpop.f32.mrf.mxu0  ;;  %v268_v7 = vpop.f32.mrf.mxu1 }
  0x9d   : > { %v273_v8 = vpack.c.bf16 %v263_v6, %v263_v6  ;;  %v275_v9 = vpack.c.bf16 %v268_v7, %v268_v7 }
  0x9f   : > { %278 = vst.msk [vmem:[%s198_s27] sm:$0xf] %vm277_vm1, %v273_v8 }
  0xa0   : > { %280 = vst.msk [vmem:[%s198_s27 + $0x8] sm:$0xf] %vm277_vm1, %v275_v9 }
  0xa4   : > { %v265_v10 = vpop.f32.mrf.mxu0  ;;  %v270_v11 = vpop.f32.mrf.mxu1 }
  0xa5   : > { %v274_v12 = vpack.c.bf16 %v265_v10, %v265_v10  ;;  %v276_v13 = vpack.c.bf16 %v270_v11, %v270_v11 }
  0xa7   : > { %279 = vst.msk [vmem:[%s198_s27 + $0x4] sm:$0xf] %vm277_vm1, %v274_v12 }
  0xa8   : > { %281 = vst.msk [vmem:[%s198_s27 + $0xc] sm:$0xf] %vm277_vm1, %v276_v13 }
  0xa9 PF: > { %s13_s11 = sadd.s32 1, %s525_s11   ;;  %s585_s9 = smov %s521_s10 }
  0xaa   : > { %p10_p8 = scmp.ge.s32.totalorder %s13_s11, 4   ;;  %s586_s10 = smov %s588_s13 }
  0xac   :  { %12 = sbr.rel (!%p10_p8) target bundleno = 2 (0x2), region = 63 }
  0xb1   :  { %312 = vsyncpa [#allocation3], 1 }
  0xb2   :  { %314 = vsyncpa [#allocation3 + $0x1], 1 }

// kernel: _lambda_.14
= control target key start
LH: loop header
LB: loop body
LE: loop exit
PB: predicated region body
PF: predicated region fallthrough
CT: control target
= control target key end

     0   :  { %s741_s9 = smov 0   ;;  %s743_s10 = smov 0   ;;  %s895_s0 = inlined_call_operand.vmem [shape: bf16[2,32,3], index: 0, kind: input, shape index: {}]   ;;  %s896_s1 = inlined_call_operand.vmem [shape: f32[2,1,32], index: 1, kind: input, shape index: {}]   ;;  %s897_s2 = inlined_call_operand.vmem [shape: s32[2,32,8], index: 2, kind: output, shape index: {}]  }
   0x1   :  { %s745_s11 = smov 0  }
   0x2 LB: > { %s24_s12 = sadd.s32 1, %s684_s10  ;;  %p500_p0 = scmp.ge.s32.totalorder %s688_s11, 1  ;;  %s688_s11 = sphi %s745_s11, %s12_s11   ;;  %s684_s10 = sphi %s743_s10, %s905_s10   ;;  %s680_s9 = sphi %s741_s9, %s904_s9  }
   0x3   : > { %p26_p1 = scmp.ge.s32.totalorder %s24_s12, 2  ;;  %p134_p2 = scmp.lt.s32.totalorder %s688_s11, 3 }
   0x5   : > { %s907_s12 = smov (%p26_p1, %s24_s12), 0  ;;  %p135_p3 = pnand %p500_p0, %p134_p2 }
   0x6   : > { %p163_p4 = scmp.lt.s32.totalorder (!%p135_p3), %s680_s9, 1  ;;  %s788_s24 = smov (!%p135_p3), 0  }
   0x7   : > { %138 = sbr.rel (%p135_p3) target bundleno = 543 (0x21f), region = 28 }
   0xc   : > { %s909_s9 = smov (!%p163_p4, %s680_s9), 1  ;;  %vm215_vm0 = vcmask 23552   ;;  %v259_v6 = vlaneseq  ;;  %v772_v21 = vmov 0   ;;  %v774_v22 = vmov 0  }
   0xd   : > { %s525_s13 = sshll.u32 %s909_s9, 4  ;;  %s526_s14 = sshll.u32 %s909_s9, 5  ;;  %v776_v23 = vmov 0   ;;  %v778_v24 = vmov 0  }
   0xe   : > { %s167_s17 = scalar_lea.vmem %s895_s0, %s525_s13  ;;  %s765_s20 = scalar_lea.vmem %s897_s2, %s526_s14  ;;  %v770_v7 = vand.u32 127, %v259_v6 }
   0xf   : > { %v530_v0 = vld [vmem:[%s167_s17 + $0x8] sm:$0xff]  ;;  %s170_s23 = scalar_lea.vmem %s896_s1, %s909_s9  ;;  %v529_v2 = vld [vmem:[%s167_s17] sm:$0xff] }
  0x10   : > { %v226_v1 = vsel %vm215_vm0, %v530_v0, 0  ;;  %v223_v3 = vsel %vm215_vm0, %v529_v2, 0  ;;  %v527_v4 = vld [vmem:[%s167_s17] sm:$0xff]  ;;  %v528_v5 = vld [vmem:[%s167_s17 + $0x8] sm:$0xff] }
  0x11   : > { %234 = vmatpush.bf16.xpose.msra.mxu0 %v226_v1  ;;  %531 = vmatpush.bf16.xpose.msra.mxu1 %v226_v1  ;;  %v629_v8 = vld [vmem:[%s170_s23] ss:$0 sm:$0xff] }
  0x19   : > { %235 = vmatpush.bf16.xpose.msra.mxu0 %v223_v3  ;;  %532 = vmatpush.bf16.xpose.msra.mxu1 %v223_v3 }
  0x20   : > { %521 = vmatmul.msk.bf16.vlgmr.msra.gmra.mxu0 %vm215_vm0, %v527_v4  ;;  %522 = vmatmul.msk.bf16.vlgmr.msra.gmra.mxu1 %vm215_vm0, %v528_v5 }
  0x9d   : > { %v237_v9 = vpop.f32.mrf.mxu0  ;;  %v242_v10 = vpop.f32.mrf.mxu1 }
  0x9e   : > { %v247_v11 = vmul.f32 2.0, %v237_v9  ;;  %v249_v12 = vmul.f32 2.0, %v242_v10 }
  0xa0   : > { %v255_v13 = vsub.f32 %v247_v11, %v629_v8   ;;  %v257_v14 = vsub.f32 %v249_v12, %v629_v8  }
  0xa5   : > { %v239_v15 = vpop.f32.mrf.mxu0  ;;  %v244_v16 = vpop.f32.mrf.mxu1 }
  0xa6   : > { %v248_v17 = vmul.f32 2.0, %v239_v15  ;;  %v250_v18 = vmul.f32 2.0, %v244_v16 }
  0xa8   : > { %v256_v19 = vsub.f32 %v248_v17, %v629_v8   ;;  %v258_v20 = vsub.f32 %v250_v18, %v629_v8  }
  0xa9 LB: >> { %vm275_vm1 = vcmask 261120   ;;  %v356_v3 = vstv %s724_s24  ;;  %s266_s24 = sadd.s32 1, %s724_s24   ;;  %s724_s24 = sphi %s788_s24, %s266_s24   ;;  %v720_v13 = vphi %v255_v13, %v366_v13   ;;  %v716_v19 = vphi %v256_v19, %v367_v19   ;;  %v712_v14 = vphi %v257_v14, %v368_v14   ;;  %v708_v20 = vphi %v258_v20, %v369_v20   ;;  %v704_v24 = vphi %v778_v24, %v903_v24   ;;  %v700_v23 = vphi %v776_v23, %v902_v23   ;;  %v696_v22 = vphi %v774_v22, %v901_v22   ;;  %v692_v21 = vphi %v772_v21, %v900_v21  }
  0xaa   : >> { %v276_v25 = vsel %vm275_vm1, %v720_v13, -inf  ;;  %v282_v26 = vsel %vm275_vm1, %v712_v14, -inf  ;;  %v279_v27 = vsel %vm275_vm1, %v716_v19, -inf  ;;  %v285_v28 = vsel %vm275_vm1, %v708_v20, -inf  ;;  %p263_p5 = scmp.ge.s32.totalorder %s266_s24, 8  }
  0xab   : >> { %277 = vmax.xlane.f32.xlu0 %v276_v25  ;;  %283 = vmax.xlane.f32.xlu1 %v282_v26  ;;  %vm839_vm10 = vcmp.eq.s32.totalorder %v770_v7, %v356_v3  ;;  %vm370_vm15 = vcmask (%p263_p5), 64512  }
  0xb3   : >> { %280 = vmax.xlane.f32.xlu0 %v279_v27  ;;  %286 = vmax.xlane.f32.xlu1 %v285_v28 }
 0x11e   : >> { %v278_v29 = vpop.xlane.xlu0 %277  ;;  %v284_v30 = vpop.xlane.xlu1 %283 }
 0x11f   : >> { %vm288_vm2 = vcmp.eq.f32.partialorder %v720_v13, %v278_v29  ;;  %vm290_vm3 = vcmp.eq.f32.partialorder %v712_v14, %v284_v30 }
 0x120   : >> { %v292_v31 = vsel %vm288_vm2, %v770_v7, 32  ;;  %v294_v32 = vsel %vm290_vm3, %v770_v7, 32 }
 0x121   : >> { %v296_v33 = vsel %vm275_vm1, %v292_v31, 2147483647  ;;  %v326_v34 = vsel %vm275_vm1, %v294_v32, 2147483647 }
 0x122   : >> { %v298_v35 = vshra.s32 %v296_v33, 16  ;;  %v328_v36 = vshra.s32 %v326_v34, 16  ;;  %v297_v49 = vand.u32 65535, %v296_v33  ;;  %v327_v50 = vand.u32 65535, %v326_v34 }
 0x124   : >> { %v300_v37 = vcvt.s32.f32 %v298_v35  ;;  %v330_v38 = vcvt.s32.f32 %v328_v36  ;;  %v299_v53 = vcvt.s32.f32 %v297_v49  ;;  %v329_v54 = vcvt.s32.f32 %v327_v50 }
 0x126   : >> { %301 = vmin.xlane.f32.xlu2 %v300_v37  ;;  %v281_v39 = vpop.xlane.xlu0 %280  ;;  %331 = vmin.xlane.f32.xlu0 %v330_v38  ;;  %v287_v40 = vpop.xlane.xlu1 %286 }
 0x127   : >> { %vm289_vm4 = vcmp.eq.f32.partialorder %v716_v19, %v281_v39  ;;  %vm291_vm5 = vcmp.eq.f32.partialorder %v708_v20, %v287_v40 }
 0x128   : >> { %v293_v41 = vsel %vm289_vm4, %v770_v7, 32  ;;  %v295_v42 = vsel %vm291_vm5, %v770_v7, 32 }
 0x129   : >> { %v311_v43 = vsel %vm275_vm1, %v293_v41, 2147483647  ;;  %v341_v44 = vsel %vm275_vm1, %v295_v42, 2147483647 }
 0x12a   : >> { %v313_v45 = vshra.s32 %v311_v43, 16  ;;  %v343_v46 = vshra.s32 %v341_v44, 16  ;;  %v312_v57 = vand.u32 65535, %v311_v43  ;;  %v342_v58 = vand.u32 65535, %v341_v44 }
 0x12c   : >> { %v315_v47 = vcvt.s32.f32 %v313_v45  ;;  %v345_v48 = vcvt.s32.f32 %v343_v46  ;;  %v314_v61 = vcvt.s32.f32 %v312_v57  ;;  %v344_v62 = vcvt.s32.f32 %v342_v58 }
 0x12e   : >> { %316 = vmin.xlane.f32.xlu2 %v315_v47  ;;  %346 = vmin.xlane.f32.xlu1 %v345_v48 }
 0x199   : >> { %v302_v51 = vpop.xlane.xlu2 %301  ;;  %v332_v52 = vpop.xlane.xlu0 %331 }
 0x19a   : >> { %vm303_vm6 = vcmp.eq.f32.partialorder %v300_v37, %v302_v51  ;;  %vm333_vm7 = vcmp.eq.f32.partialorder %v330_v38, %v332_v52  ;;  %v308_v1 = vcvt.f32.s32 %v302_v51  ;;  %v338_v2 = vcvt.f32.s32 %v332_v52 }
 0x19b   : >> { %v304_v55 = vsel %vm303_vm6, %v299_v53, inf  ;;  %v334_v56 = vsel %vm333_vm7, %v329_v54, inf }
 0x19c   : >> { %305 = vmin.xlane.f32.xlu2 %v304_v55  ;;  %335 = vmin.xlane.f32.xlu1 %v334_v56  ;;  %v309_v6 = vshll.u32 %v308_v1, 16  ;;  %v339_v8 = vshll.u32 %v338_v2, 16 }
 0x1a1   : >> { %v317_v59 = vpop.xlane.xlu2 %316  ;;  %v347_v60 = vpop.xlane.xlu1 %346 }
 0x1a2   : >> { %vm318_vm8 = vcmp.eq.f32.partialorder %v315_v47, %v317_v59  ;;  %vm348_vm9 = vcmp.eq.f32.partialorder %v345_v48, %v347_v60  ;;  %v323_v16 = vcvt.f32.s32 %v317_v59  ;;  %v353_v17 = vcvt.f32.s32 %v347_v60 }
 0x1a3   : >> { %v319_v63 = vsel %vm318_vm8, %v314_v61, inf  ;;  %v349_v0 = vsel %vm348_vm9, %v344_v62, inf }
 0x1a4   : >> { %320 = vmin.xlane.f32.xlu0 %v319_v63  ;;  %350 = vmin.xlane.f32.xlu2 %v349_v0  ;;  %v324_v28 = vshll.u32 %v323_v16, 16  ;;  %v354_v29 = vshll.u32 %v353_v17, 16 }
 0x20f   : >> { %v306_v4 = vpop.xlane.xlu2 %305  ;;  %v336_v5 = vpop.xlane.xlu1 %335 }
 0x210   : >> { %v307_v9 = vcvt.f32.s32 %v306_v4  ;;  %v337_v10 = vcvt.f32.s32 %v336_v5 }
 0x212   : >> { %v310_v12 = vadd.s32 %v309_v6, %v307_v9  ;;  %v340_v15 = vadd.s32 %v339_v8, %v337_v10 }
 0x214   : >> { %v358_v18 = vsel %vm839_vm10, %v310_v12, %v704_v24   ;;  %vm362_vm11 = vcmp.eq.s32.totalorder %v770_v7, %v310_v12  ;;  %v360_v25 = vsel %vm839_vm10, %v340_v15, %v696_v22   ;;  %vm364_vm12 = vcmp.eq.s32.totalorder %v770_v7, %v340_v15 }
 0x215   : >> { %v366_v13 = vsel %vm362_vm11, -inf, %v720_v13   ;;  %v368_v14 = vsel %vm364_vm12, -inf, %v712_v14   ;;  %v901_v22 = vmov %v360_v25  ;;  %371 = vst.msk [vmem:[%s765_s20] sm:$0xff] (%p263_p5), %vm370_vm15, %v358_v18 }
 0x216   : > { %373 = vst.msk [vmem:[%s765_s20 + $0x10] sm:$0xff] (%p263_p5), %vm370_vm15, %v360_v25 }
 0x217   : >> { %v321_v26 = vpop.xlane.xlu0 %320  ;;  %v351_v27 = vpop.xlane.xlu2 %350 }
 0x218   : >> { %v322_v30 = vcvt.f32.s32 %v321_v26  ;;  %v352_v31 = vcvt.f32.s32 %v351_v27 }
 0x21a   : >> { %v325_v32 = vadd.s32 %v324_v28, %v322_v30  ;;  %v355_v24 = vadd.s32 %v354_v29, %v352_v31  ;;  %265 = sbr.rel (!%p263_p5) target bundleno = 169 (0xa9), region = 69 }
 0x21c   : >> { %v359_v33 = vsel %vm839_vm10, %v325_v32, %v700_v23   ;;  %vm363_vm13 = vcmp.eq.s32.totalorder %v770_v7, %v325_v32  ;;  %v361_v34 = vsel %vm839_vm10, %v355_v24, %v692_v21   ;;  %vm365_vm14 = vcmp.eq.s32.totalorder %v770_v7, %v355_v24 }
 0x21d   : >> { %v367_v19 = vsel %vm363_vm13, -inf, %v716_v19   ;;  %v369_v20 = vsel %vm365_vm14, -inf, %v708_v20   ;;  %v900_v21 = vmov %v361_v34  ;;  %v902_v23 = vmov %v359_v33  ;;  %372 = vst.msk [vmem:[%s765_s20 + $0x8] sm:$0xff] (%p263_p5), %vm370_vm15, %v359_v33 }
 0x21e   : >> { %v903_v24 = vmov %v358_v18  ;;  %374 = vst.msk [vmem:[%s765_s20 + $0x18] sm:$0xff] (%p263_p5), %vm370_vm15, %v361_v34 }
 0x21f PF: > { %s12_s11 = sadd.s32 1, %s688_s11   ;;  %s904_s9 = smov %s684_s10 }
 0x220   : > { %p9_p6 = scmp.ge.s32.totalorder %s12_s11, 4   ;;  %s905_s10 = smov %s907_s12 }
 0x222   :  { %11 = sbr.rel (!%p9_p6) target bundleno = 2 (0x2), region = 80 }

// kernel: _lambda_.16
= control target key start
LH: loop header
LB: loop body
LE: loop exit
PB: predicated region body
PF: predicated region fallthrough
CT: control target
= control target key end

     0   :  { %s1230_s18 = smov 0   ;;  %s1232_s19 = smov 0   ;;  %s1439_s0 = inlined_call_operand.vmem [shape: s32[2,32,8], index: 0, kind: input, shape index: {}]   ;;  %s1440_s1 = inlined_call_operand.vmem [shape: bf16[2,32,3], index: 1, kind: input, shape index: {}]   ;;  %s1441_s2 = inlined_call_operand.vmem [shape: bf16[2,32,64], index: 2, kind: input, shape index: {}]   ;;  %s1442_s3 = inlined_call_operand.vmem [shape: bf16[3,64], index: 3, kind: input, shape index: {}]   ;;  %s1443_s4 = inlined_call_operand.vmem [shape: f32[1,64], index: 4, kind: input, shape index: {}]   ;;  %s1444_s5 = inlined_call_operand.vmem [shape: bf16[2,32,64], index: 5, kind: output, shape index: {}]  }
   0x1   :  { %s1234_s20 = smov 0  }
   0x2 LB: > { %s27_s21 = sadd.s32 1, %s1184_s19  ;;  %p1011_p0 = scmp.ge.s32.totalorder %s1188_s20, 1  ;;  %s1188_s20 = sphi %s1234_s20, %s15_s20   ;;  %s1184_s19 = sphi %s1232_s19, %s1446_s19   ;;  %s1180_s18 = sphi %s1230_s18, %s1445_s18  }
   0x3   : > { %p29_p1 = scmp.ge.s32.totalorder %s27_s21, 2  ;;  %p235_p2 = scmp.lt.s32.totalorder %s1188_s20, 3 }
   0x5   : > { %s1448_s21 = smov (%p29_p1, %s27_s21), 0  ;;  %p236_p3 = pnand %p1011_p0, %p235_p2 }
   0x6   : > { %p286_p4 = scmp.lt.s32.totalorder (!%p236_p3), %s1180_s18, 1 }
   0x7   : > { %239 = sbr.rel (%p236_p3) target bundleno = 387 (0x183), region = 40 }
   0xc   : > { %v1190_v0 = vmov 3   ;;  %v1191_v1 = vmov 0   ;;  %s1450_s18 = smov (!%p286_p4, %s1180_s18), 1  ;;  %v1192_v2 = vmov 5   ;;  %v1193_v7 = vmov 1  }
   0xd   : > { %1137 = vset.pattern.permute.xlu1 %v1190_v0  ;;  %1136 = vset.pattern.permute.xlu0 %v1191_v1  ;;  %s1088_s22 = sshll.u32 %s1450_s18, 5  ;;  %v1194_v8 = vmov 6   ;;  %v1195_v9 = vmov 2   ;;  %v1196_v10 = vmov 4   ;;  %s1283_s26 = sshll.u32 %s1450_s18, 4  ;;  %v1197_v11 = vmov 7  }
   0xe   : > { %1138 = vset.pattern.permute.xlu2 %v1192_v2  ;;  %s293_s25 = scalar_lea.vmem %s1439_s0, %s1088_s22  ;;  %s309_s29 = scalar_lea.vmem %s1441_s2, %s1283_s26  ;;  %v381_v14 = vlaneseq  ;;  %v1198_v17 = vmov 0.0   ;;  %vm699_vm2 = vcmask 261120   ;;  %vm347_vm7 = vcmask 1040384   ;;  %v325_v49 = vld [vmem:[%s1442_s3] sm:$0x3] }
   0xf   : > { %v1256_v3 = vld [vmem:[%s293_s25 + $0x10] sm:$0xff]  ;;  %v1258_v4 = vld [vmem:[%s293_s25] sm:$0xff]  ;;  %v1263_v5 = vld [vmem:[%s293_s25 + $0x18] sm:$0xff]  ;;  %vm348_vm10 = vcmask 1041408   ;;  %v1199_v50 = vmov 65535   ;;  %s1337_s9 = scalar_lea.vmem %s1440_s1, %s1283_s26  ;;  %vm340_vm13 = vcmask 23552   ;;  %s1417_s14 = scalar_lea.vmem %s1444_s5, %s1283_s26 }
  0x10   : > { %390 = vperm.xlu0 %1136, %v1256_v3   ;;  %468 = vperm.xlu1 %1137, %v1258_v4   ;;  %v374_v6 = vld [vmem:[%s293_s25 + $0x8] sm:$0xff]  ;;  %v1293_v13 = vld [vmem:[%s309_s29] sm:$0xff]  ;;  %v1302_v15 = vand.u32 127, %v381_v14  ;;  %v349_v51 = vsel %vm347_vm7, 4294967295, %v1199_v50 }
  0x11   : > { %530 = vperm.xlu2 %1138, %v1256_v3   ;;  %v1290_v12 = vld [vmem:[%s309_s29 + $0x8] sm:$0xff]  ;;  %v350_v54 = vsel %vm348_vm10, %v349_v51, 0  ;;  %v1092_v61 = vld [vmem:[%s1337_s9] sm:$0xff] }
  0x12   : > { %1098 = vmatpush.bf16.msra.mxu3 %v1290_v12  ;;  %1096 = vmatpush.bf16.msra.mxu1 %v1290_v12  ;;  %v352_v55 = vand.u32 %v350_v54, %v325_v49 }
  0x13   : > { %1097 = vmatpush.bf16.msra.mxu2 %v1290_v12 }
  0x14   : > { %361 = vmatpush.bf16.msra.mxu0 %v352_v55 }
  0x16   : > { %1101 = vmatpush.bf16.msra.mxu3 %v1293_v13  ;;  %1099 = vmatpush.bf16.msra.mxu1 %v1293_v13 }
  0x17   : > { %1100 = vmatpush.bf16.msra.mxu2 %v1293_v13  ;;  %1028 = vmatmul.msk.bf16.vlgmr.msra.gmra.mxu0 %vm340_vm13, %v1092_v61 }
  0x18   : > { %393 = vperm.xlu0 %1136, %v1263_v5   ;;  %471 = vperm.xlu1 %1137, %v374_v6  }
  0x19   : > { %533 = vperm.xlu2 %1138, %v1263_v5   ;;  %754 = vmatpush.bf16.msrb.mxu0 %v1290_v12 }
  0x1d   : > { %755 = vmatpush.bf16.msrb.mxu0 %v1293_v13 }
  0x20   : > { %1139 = vset.pattern.permute.xlu0 %v1193_v7  ;;  %1140 = vset.pattern.permute.xlu1 %v1193_v7 }
  0x21   : > { %412 = vperm.xlu0 %1139, %v1258_v4   ;;  %415 = vperm.xlu1 %1140, %v374_v6  }
  0x22   : > { %1141 = vset.pattern.permute.xlu2 %v1190_v0 }
  0x23   : > { %474 = vperm.xlu2 %1141, %v1256_v3  }
  0x29   : > { %1144 = vset.pattern.permute.xlu0 %v1194_v8  ;;  %1142 = vset.pattern.permute.xlu1 %v1190_v0 }
  0x2a   : > { %555 = vperm.xlu0 %1144, %v374_v6   ;;  %477 = vperm.xlu1 %1142, %v1263_v5  }
  0x2b   : > { %1143 = vset.pattern.permute.xlu2 %v1194_v8 }
  0x2c   : > { %552 = vperm.xlu2 %1143, %v1258_v4  }
  0x32   : > { %1145 = vset.pattern.permute.xlu1 %v1193_v7  ;;  %558 = vperm.xlu0 %1144, %v1256_v3  }
  0x33   : > { %418 = vperm.xlu1 %1145, %v1256_v3  }
  0x34   : > { %1146 = vset.pattern.permute.xlu2 %v1193_v7 }
  0x35   : > { %421 = vperm.xlu2 %1146, %v1263_v5  }
  0x3a   : > { %1151 = vset.pattern.permute.xlu0 %v1195_v9 }
  0x3b   : > { %1147 = vset.pattern.permute.xlu1 %v1196_v10  ;;  %443 = vperm.xlu0 %1151, %v374_v6  }
  0x3c   : > { %496 = vperm.xlu1 %1147, %v1258_v4  }
  0x3d   : > { %1148 = vset.pattern.permute.xlu2 %v1196_v10 }
  0x3e   : > { %499 = vperm.xlu2 %1148, %v374_v6  }
  0x43   : > { %1156 = vset.pattern.permute.xlu0 %v1191_v1 }
  0x44   : > { %1149 = vset.pattern.permute.xlu1 %v1194_v8  ;;  %384 = vperm.xlu0 %1156, %v1258_v4  }
  0x45   : > { %561 = vperm.xlu1 %1149, %v1263_v5  }
  0x46   : > { %1150 = vset.pattern.permute.xlu2 %v1195_v9 }
  0x47   : > { %440 = vperm.xlu2 %1150, %v1258_v4  }
  0x4c   : > { %1161 = vset.pattern.permute.xlu0 %v1192_v2 }
  0x4d   : > { %1152 = vset.pattern.permute.xlu1 %v1196_v10  ;;  %527 = vperm.xlu0 %1161, %v374_v6  }
  0x4e   : > { %502 = vperm.xlu1 %1152, %v1256_v3  }
  0x4f   : > { %1153 = vset.pattern.permute.xlu2 %v1196_v10 }
  0x50   : > { %505 = vperm.xlu2 %1153, %v1263_v5  }
  0x55   : > { %1164 = vset.pattern.permute.xlu0 %v1197_v11 }
  0x56   : > { %1154 = vset.pattern.permute.xlu1 %v1197_v11 }
  0x57   : > { %580 = vperm.xlu1 %1154, %v1258_v4  }
  0x58   : > { %1155 = vset.pattern.permute.xlu2 %v1197_v11 }
  0x59   : > { %583 = vperm.xlu2 %1155, %v374_v6  }
  0x5f   : > { %1157 = vset.pattern.permute.xlu1 %v1191_v1 }
  0x60   : > { %387 = vperm.xlu1 %1157, %v374_v6  }
  0x61   : > { %1158 = vset.pattern.permute.xlu2 %v1195_v9 }
  0x62   : > { %446 = vperm.xlu2 %1158, %v1256_v3  }
  0x68   : > { %1159 = vset.pattern.permute.xlu1 %v1195_v9 }
  0x69   : > { %449 = vperm.xlu1 %1159, %v1263_v5  }
  0x6a   : > { %1160 = vset.pattern.permute.xlu2 %v1192_v2 }
  0x6b   : > { %v531_v16 = vpop.permute.xlu2 %530  ;;  %524 = vperm.xlu2 %1160, %v1258_v4  }
  0x6c   : > { %vm537_vm0 = vcmp.eq.s32.totalorder %v531_v16, %v1302_v15 }
  0x6d   : > { %v1052_v18 = vsel %vm537_vm0, 1.0, %v1198_v17 }
  0x6e   : > { %v549_v19 = vpack.c.bf16 %v1052_v18, %v1052_v18 }
  0x70   : > { %v663_v22 = vunpack.c.l.b16 %v549_v19 }
  0x71   : > { %1162 = vset.pattern.permute.xlu1 %v1197_v11 }
  0x72   : > { %586 = vperm.xlu1 %1162, %v1256_v3  }
  0x73   : > { %v534_v20 = vpop.permute.xlu2 %533  ;;  %1163 = vset.pattern.permute.xlu2 %v1197_v11 }
  0x74   : > { %vm538_vm1 = vcmp.eq.s32.totalorder %v534_v20, %v1302_v15  ;;  %589 = vperm.xlu2 %1163, %v1263_v5  }
  0x75   : > { %v1053_v21 = vsel %vm538_vm1, 1.0, %v1198_v17 }
  0x76   : > { %v550_v23 = vpack.c.bf16 %v1053_v21, %v1053_v21 }
  0x78   : > { %v664_v24 = vunpack.c.l.b16 %v550_v23 }
  0x7a   : > { %v666_v25 = vpack.c.b16 %v664_v24, %v663_v22  ;;  %v1093_v24 = vld [vmem:[%s1337_s9 + $0x8] sm:$0xff] }
  0x7b   : > { %1029 = vmatmul.msk.bf16.gmra.mxu0 %vm340_vm13, %v1093_v24 }
  0x7c   : > { %1081 = vmatmul.msk.bf16.vlgmr.msra.gmra.mxu3 %vm699_vm2, %v666_v25 }
  0x7d   : > { %v475_v26 = vpop.permute.xlu2 %474 }
  0x7e   : > { %vm481_vm12 = vcmp.eq.s32.totalorder %v475_v26, %v1302_v15 }
  0x7f   : > { %v1044_v58 = vsel %vm481_vm12, 1.0, %v1198_v17 }
  0x80   : > { %v493_v63 = vpack.c.bf16 %v1044_v58, %v1044_v58 }
  0x82   : > { %v391_v27 = vpop.permute.xlu0 %390  ;;  %v469_v28 = vpop.permute.xlu1 %468  ;;  %v643_v9 = vunpack.c.l.b16 %v493_v63 }
  0x83   : > { %vm397_vm3 = vcmp.eq.s32.totalorder %v391_v27, %v1302_v15  ;;  %vm479_vm4 = vcmp.eq.s32.totalorder %v469_v28, %v1302_v15 }
  0x84   : > { %v1032_v29 = vsel %vm397_vm3, 1.0, %v1198_v17  ;;  %v1042_v31 = vsel %vm479_vm4, 1.0, %v1198_v17 }
  0x85   : > { %v409_v32 = vpack.c.bf16 %v1032_v29, %v1032_v29  ;;  %v491_v35 = vpack.c.bf16 %v1042_v31, %v1042_v31 }
  0x86   : > { %v553_v30 = vpop.permute.xlu2 %552 }
  0x87   : > { %v613_v38 = vunpack.c.l.b16 %v409_v32  ;;  %v641_v41 = vunpack.c.l.b16 %v491_v35  ;;  %vm563_vm11 = vcmp.eq.s32.totalorder %v553_v30, %v1302_v15 }
  0x88   : > { %v1054_v56 = vsel %vm563_vm11, 1.0, %v1198_v17 }
  0x89   : > { %v575_v62 = vpack.c.bf16 %v1054_v56, %v1054_v56 }
  0x8a   : > { %v394_v33 = vpop.permute.xlu0 %393  ;;  %v472_v34 = vpop.permute.xlu1 %471 }
  0x8b   : > { %vm398_vm5 = vcmp.eq.s32.totalorder %v394_v33, %v1302_v15  ;;  %vm480_vm6 = vcmp.eq.s32.totalorder %v472_v34, %v1302_v15  ;;  %v671_v6 = vunpack.c.l.b16 %v575_v62 }
  0x8c   : > { %v1033_v36 = vsel %vm398_vm5, 1.0, %v1198_v17  ;;  %v1043_v37 = vsel %vm480_vm6, 1.0, %v1198_v17 }
  0x8d   : > { %v410_v39 = vpack.c.bf16 %v1033_v36, %v1033_v36  ;;  %v492_v40 = vpack.c.bf16 %v1043_v37, %v1043_v37 }
  0x8f   : > { %v614_v42 = vunpack.c.l.b16 %v410_v39  ;;  %v642_v43 = vunpack.c.l.b16 %v492_v40  ;;  %v422_v44 = vpop.permute.xlu2 %421 }
  0x90   : > { %vm426_vm0 = vcmp.eq.s32.totalorder %v422_v44, %v1302_v15 }
  0x91   : > { %v616_v45 = vpack.c.b16 %v614_v42, %v613_v38  ;;  %v645_v46 = vpack.c.b16 %v642_v43, %v641_v41  ;;  %v1037_v19 = vsel %vm426_vm0, 1.0, %v1198_v17 }
  0x92   : > { %v438_v22 = vpack.c.bf16 %v1037_v19, %v1037_v19 }
  0x93   : > { %1071 = vmatmul.msk.bf16.vlgmr.msra.gmra.mxu1 %vm699_vm2, %v616_v45  ;;  %v413_v47 = vpop.permute.xlu0 %412  ;;  %1076 = vmatmul.msk.bf16.vlgmr.msra.gmra.mxu2 %vm699_vm2, %v645_v46  ;;  %v416_v48 = vpop.permute.xlu1 %415 }
  0x94   : > { %vm423_vm8 = vcmp.eq.s32.totalorder %v413_v47, %v1302_v15  ;;  %vm424_vm9 = vcmp.eq.s32.totalorder %v416_v48, %v1302_v15  ;;  %v624_v27 = vunpack.c.l.b16 %v438_v22 }
  0x95   : > { %v1034_v52 = vsel %vm423_vm8, 1.0, %v1198_v17  ;;  %v1035_v53 = vsel %vm424_vm9, 1.0, %v1198_v17 }
  0x96   : > { %v435_v59 = vpack.c.bf16 %v1034_v52, %v1034_v52  ;;  %v436_v60 = vpack.c.bf16 %v1035_v53, %v1035_v53 }
  0x98   : > { %v500_v57 = vpop.permute.xlu2 %499  ;;  %v621_v2 = vunpack.c.l.b16 %v435_v59  ;;  %v622_v3 = vunpack.c.l.b16 %v436_v60 }
  0x99   : > { %vm508_vm3 = vcmp.eq.s32.totalorder %v500_v57, %v1302_v15 }
  0x9a   : > { %v625_v12 = vpack.c.b16 %v622_v3, %v621_v2  ;;  %v1047_v25 = vsel %vm508_vm3, 1.0, %v1198_v17 }
  0x9b   : > { %v520_v29 = vpack.c.bf16 %v1047_v25, %v1047_v25 }
  0x9c   : > { %v556_v0 = vpop.permute.xlu0 %555  ;;  %v478_v1 = vpop.permute.xlu1 %477 }
  0x9d   : > { %vm564_vm14 = vcmp.eq.s32.totalorder %v556_v0, %v1302_v15  ;;  %vm482_vm15 = vcmp.eq.s32.totalorder %v478_v1, %v1302_v15  ;;  %v652_v33 = vunpack.c.l.b16 %v520_v29 }
  0x9e   : > { %v1055_v4 = vsel %vm564_vm14, 1.0, %v1198_v17  ;;  %v1045_v5 = vsel %vm482_vm15, 1.0, %v1198_v17 }
  0x9f   : > { %v576_v7 = vpack.c.bf16 %v1055_v4, %v1055_v4  ;;  %v494_v8 = vpack.c.bf16 %v1045_v5, %v1045_v5 }
  0xa1   : > { %v672_v10 = vunpack.c.l.b16 %v576_v7  ;;  %v644_v11 = vunpack.c.l.b16 %v494_v8  ;;  %v441_v14 = vpop.permute.xlu2 %440 }
  0xa2   : > { %vm451_vm6 = vcmp.eq.s32.totalorder %v441_v14, %v1302_v15 }
  0xa3   : > { %1072 = vmatmul.msk.bf16.gmra.mxu1 %vm699_vm2, %v625_v12  ;;  %v646_v16 = vpack.c.b16 %v644_v11, %v643_v9  ;;  %v675_v18 = vpack.c.b16 %v672_v10, %v671_v6  ;;  %v1038_v40 = vsel %vm451_vm6, 1.0, %v1198_v17  ;;  %vm885_vm6 = vcmask 519168  }
  0xa4   : > { %v559_v20 = vpop.permute.xlu0 %558  ;;  %v463_v44 = vpack.c.bf16 %v1038_v40, %v1038_v40 }
  0xa5   : > { %1077 = vmatmul.msk.bf16.gmra.mxu2 %vm699_vm2, %v646_v16  ;;  %1082 = vmatmul.msk.bf16.gmra.mxu3 %vm699_vm2, %v675_v18  ;;  %v419_v13 = vpop.permute.xlu1 %418  ;;  %vm565_vm5 = vcmp.eq.s32.totalorder %v559_v20, %v1302_v15 }
  0xa6   : > { %vm425_vm1 = vcmp.eq.s32.totalorder %v419_v13, %v1302_v15  ;;  %v1056_v38 = vsel %vm565_vm5, 1.0, %v1198_v17  ;;  %v631_v53 = vunpack.c.l.b16 %v463_v44 }
  0xa7   : > { %v1036_v21 = vsel %vm425_vm1, 1.0, %v1198_v17  ;;  %v577_v43 = vpack.c.bf16 %v1056_v38, %v1056_v38 }
  0xa8   : > { %v437_v23 = vpack.c.bf16 %v1036_v21, %v1036_v21 }
  0xa9   : > { %v673_v49 = vunpack.c.l.b16 %v577_v43 }
  0xaa   : > { %v506_v26 = vpop.permute.xlu2 %505  ;;  %v623_v28 = vunpack.c.l.b16 %v437_v23 }
  0xab   : > { %vm510_vm9 = vcmp.eq.s32.totalorder %v506_v26, %v1302_v15 }
  0xac   : > { %v626_v35 = vpack.c.b16 %v624_v27, %v623_v28  ;;  %v1049_v51 = vsel %vm510_vm9, 1.0, %v1198_v17 }
  0xad   : > { %v444_v32 = vpop.permute.xlu0 %443  ;;  %v522_v56 = vpack.c.bf16 %v1049_v51, %v1049_v51  ;;  %v363_v51 = vpop.f32.mrf.mxu0 }
  0xae   : > { %v497_v30 = vpop.permute.xlu1 %496  ;;  %vm452_vm7 = vcmp.eq.s32.totalorder %v444_v32, %v1302_v15 }
  0xaf   : > { %vm507_vm4 = vcmp.eq.s32.totalorder %v497_v30, %v1302_v15  ;;  %v1039_v41 = vsel %vm452_vm7, 1.0, %v1198_v17  ;;  %v654_v60 = vunpack.c.l.b16 %v522_v56 }
  0xb0   : > { %v1046_v31 = vsel %vm507_vm4, 1.0, %v1198_v17  ;;  %v464_v45 = vpack.c.bf16 %v1039_v41, %v1039_v41 }
  0xb1   : > { %v519_v34 = vpack.c.bf16 %v1046_v31, %v1046_v31 }
  0xb2   : > { %v632_v54 = vunpack.c.l.b16 %v464_v45 }
  0xb3   : > { %v651_v36 = vunpack.c.l.b16 %v519_v34  ;;  %1073 = vmatmul.msk.bf16.gmra.mxu1 %vm699_vm2, %v626_v35  ;;  %v584_v37 = vpop.permute.xlu2 %583 }
  0xb4   : > { %v635_v58 = vpack.c.b16 %v632_v54, %v631_v53  ;;  %vm592_vm11 = vcmp.eq.s32.totalorder %v584_v37, %v1302_v15 }
  0xb5   : > { %v655_v39 = vpack.c.b16 %v652_v33, %v651_v36  ;;  %v1059_v0 = vsel %vm592_vm11, 1.0, %v1198_v17 }
  0xb6   : > { %v385_v48 = vpop.permute.xlu0 %384  ;;  %v604_v3 = vpack.c.bf16 %v1059_v0, %v1059_v0 }
  0xb7   : > { %1078 = vmatmul.msk.bf16.gmra.mxu2 %vm699_vm2, %v655_v39  ;;  %v562_v42 = vpop.permute.xlu1 %561  ;;  %vm395_vm15 = vcmp.eq.s32.totalorder %v385_v48, %v1302_v15 }
  0xb8   : > { %vm566_vm8 = vcmp.eq.s32.totalorder %v562_v42, %v1302_v15  ;;  %v682_v8 = vunpack.c.l.b16 %v604_v3  ;;  %v1030_v14 = vsel %vm395_vm15, 1.0, %v1198_v17 }
  0xb9   : > { %v1057_v46 = vsel %vm566_vm8, 1.0, %v1198_v17  ;;  %v407_v18 = vpack.c.bf16 %v1030_v14, %v1030_v14  ;;  %v1165_v14 = vld [vmem:[%s1443_s4] ss:$0 sm:$0xff] }
  0xba   : > { %v578_v47 = vpack.c.bf16 %v1057_v46, %v1057_v46 }
  0xbb   : > { %v611_v22 = vunpack.c.l.b16 %v407_v18 }
  0xbc   : > { %v674_v50 = vunpack.c.l.b16 %v578_v47  ;;  %v447_v52 = vpop.permute.xlu2 %446 }
  0xbd   : > { %vm453_vm1 = vcmp.eq.s32.totalorder %v447_v52, %v1302_v15 }
  0xbe   : > { %v676_v55 = vpack.c.b16 %v674_v50, %v673_v49  ;;  %v1040_v26 = vsel %vm453_vm1, 1.0, %v1198_v17 }
  0xbf   : > { %v528_v62 = vpop.permute.xlu0 %527  ;;  %v465_v30 = vpack.c.bf16 %v1040_v26, %v1040_v26 }
  0xc0   : > { %1083 = vmatmul.msk.bf16.gmra.mxu3 %vm699_vm2, %v676_v55  ;;  %v503_v57 = vpop.permute.xlu1 %502  ;;  %vm536_vm13 = vcmp.eq.s32.totalorder %v528_v62, %v1302_v15 }
  0xc1   : > { %vm509_vm10 = vcmp.eq.s32.totalorder %v503_v57, %v1302_v15  ;;  %v1051_v6 = vsel %vm536_vm13, 1.0, %v1198_v17  ;;  %v633_v33 = vunpack.c.l.b16 %v465_v30 }
  0xc2   : > { %v1048_v59 = vsel %vm509_vm10, 1.0, %v1198_v17  ;;  %v548_v11 = vpack.c.bf16 %v1051_v6, %v1051_v6 }
  0xc3   : > { %v521_v61 = vpack.c.bf16 %v1048_v59, %v1048_v59  ;;  %1074 = vmatmul.msk.bf16.gmra.mxu1 %vm699_vm2, %v635_v58 }
  0xc4   : > { %v662_v19 = vunpack.c.l.b16 %v548_v11 }
  0xc5   : > { %v653_v63 = vunpack.c.l.b16 %v521_v61  ;;  %v525_v1 = vpop.permute.xlu2 %524 }
  0xc6   : > { %vm535_vm12 = vcmp.eq.s32.totalorder %v525_v1, %v1302_v15 }
  0xc7   : > { %v656_v2 = vpack.c.b16 %v654_v60, %v653_v63  ;;  %v1050_v5 = vsel %vm535_vm12, 1.0, %v1198_v17 }
  0xc8   : > { %v547_v10 = vpack.c.bf16 %v1050_v5, %v1050_v5 }
  0xc9   : > { %1079 = vmatmul.msk.bf16.gmra.mxu2 %vm699_vm2, %v656_v2  ;;  %v581_v4 = vpop.permute.xlu1 %580 }
  0xca   : > { %vm591_vm14 = vcmp.eq.s32.totalorder %v581_v4, %v1302_v15  ;;  %v661_v13 = vunpack.c.l.b16 %v547_v10 }
  0xcb   : > { %v1058_v7 = vsel %vm591_vm14, 1.0, %v1198_v17 }
  0xcc   : > { %v603_v9 = vpack.c.bf16 %v1058_v7, %v1058_v7  ;;  %v665_v24 = vpack.c.b16 %v662_v19, %v661_v13 }
  0xce   : > { %v681_v12 = vunpack.c.l.b16 %v603_v9  ;;  %v590_v28 = vpop.permute.xlu2 %589 }
  0xcf   : > { %vm594_vm4 = vcmp.eq.s32.totalorder %v590_v28, %v1302_v15 }
  0xd0   : > { %v685_v16 = vpack.c.b16 %v682_v8, %v681_v12  ;;  %v1061_v35 = vsel %vm594_vm4, 1.0, %v1198_v17 }
  0xd1   : > { %v606_v37 = vpack.c.bf16 %v1061_v35, %v1061_v35 }
  0xd2   : > { %1084 = vmatmul.msk.bf16.gmra.mxu3 %vm699_vm2, %v685_v16  ;;  %v388_v20 = vpop.permute.xlu1 %387 }
  0xd3   : > { %vm396_vm0 = vcmp.eq.s32.totalorder %v388_v20, %v1302_v15  ;;  %v684_v40 = vunpack.c.l.b16 %v606_v37 }
  0xd4   : > { %v1031_v21 = vsel %vm396_vm0, 1.0, %v1198_v17 }
  0xd5   : > { %v408_v23 = vpack.c.bf16 %v1031_v21, %v1031_v21 }
  0xd7   : > { %v612_v25 = vunpack.c.l.b16 %v408_v23  ;;  %v364_v23 = vadd.f32 %v1165_v14, %v363_v51 }
  0xd9   : > { %v615_v27 = vpack.c.b16 %v612_v25, %v611_v22  ;;  %1080 = vmatmul.msk.bf16.gmra.mxu2 %vm699_vm2, %v665_v24 }
  0xdb   : > { %1070 = vmatmul.msk.bf16.vlgmr.msrb.gmra.mxu0 %vm699_vm2, %v615_v27  ;;  %v450_v29 = vpop.permute.xlu1 %449 }
  0xdc   : > { %vm454_vm3 = vcmp.eq.s32.totalorder %v450_v29, %v1302_v15 }
  0xdd   : > { %v1041_v31 = vsel %vm454_vm3, 1.0, %v1198_v17 }
  0xde   : > { %v466_v32 = vpack.c.bf16 %v1041_v31, %v1041_v31 }
  0xe0   : > { %v634_v34 = vunpack.c.l.b16 %v466_v32 }
  0xe2   : > { %v636_v36 = vpack.c.b16 %v634_v34, %v633_v33 }
  0xe4   : > { %1075 = vmatmul.msk.bf16.gmra.mxu1 %vm699_vm2, %v636_v36  ;;  %v587_v38 = vpop.permute.xlu1 %586 }
  0xe5   : > { %vm593_vm5 = vcmp.eq.s32.totalorder %v587_v38, %v1302_v15 }
  0xe6   : > { %v1060_v39 = vsel %vm593_vm5, 1.0, %v1198_v17  ;;  %v365_v17 = vpop.f32.mrf.mxu0 }
  0xe7   : > { %v605_v41 = vpack.c.bf16 %v1060_v39, %v1060_v39 }
  0xe9   : > { %v683_v42 = vunpack.c.l.b16 %v605_v41  ;;  %v366_v41 = vadd.f32 %v1165_v14, %v365_v17 }
  0xeb   : > { %v686_v43 = vpack.c.b16 %v684_v40, %v683_v42 }
  0xed   : > { %1085 = vmatmul.msk.bf16.gmra.mxu3 %vm699_vm2, %v686_v43 }
  0xf8   : > { %v368_v57 = vpop.f32.mrf.mxu0 }
  0xff   : > { %v1404_v49 = vpop.f32.mrf.mxu3 }
 0x100   : > { %v1408_v63 = vpop.f32.mrf.mxu0 }
 0x107   : > { %v1406_v53 = vpop.f32.mrf.mxu3 }
 0x110   : > { %v762_v44 = vpop.f32.mrf.mxu1 }
 0x116   : > { %v787_v45 = vpop.f32.mrf.mxu2 }
 0x118   : > { %v764_v46 = vpop.f32.mrf.mxu1 }
 0x11e   : > { %v789_v47 = vpop.f32.mrf.mxu2 }
 0x120   : > { %v767_v48 = vpop.f32.mrf.mxu1 }
 0x128   : > { %v792_v50 = vpop.f32.mrf.mxu2  ;;  %v769_v52 = vpop.f32.mrf.mxu1 }
 0x129   : > { %v817_v54 = vpop.f32.mrf.mxu3 }
 0x130   : > { %v794_v15 = vpop.f32.mrf.mxu2  ;;  %v772_v56 = vpop.f32.mrf.mxu1 }
 0x131   : > { %v819_v58 = vpop.f32.mrf.mxu3  ;;  %v839_v11 = vmax.f32 %v762_v44, %v772_v56 }
 0x138   : > { %v774_v60 = vpop.f32.mrf.mxu1 }
 0x139   : > { %v840_v30 = vmax.f32 %v764_v46, %v774_v60 }
 0x13a   : > { %v797_v55 = vpop.f32.mrf.mxu2 }
 0x140   : > { %v777_v0 = vpop.f32.mrf.mxu1 }
 0x142   : > { %v799_v59 = vpop.f32.mrf.mxu2 }
 0x143   : > { %v822_v61 = vpop.f32.mrf.mxu3 }
 0x148   : > { %v779_v4 = vpop.f32.mrf.mxu1 }
 0x14b   : > { %v824_v2 = vpop.f32.mrf.mxu3 }
 0x14c   : > { %v802_v62 = vpop.f32.mrf.mxu2 }
 0x154   : > { %v804_v1 = vpop.f32.mrf.mxu2 }
 0x155   : > { %v827_v9 = vpop.f32.mrf.mxu3 }
 0x158   : > { %v757_v3 = vpop.f32.mrf.mxu0 }
 0x159   : > { %v837_v5 = vmax.f32 %v757_v3, %v767_v48 }
 0x15b   : > { %v841_v6 = vmax.f32 %v837_v5, %v777_v0 }
 0x15c   : > { %v807_v7 = vpop.f32.mrf.mxu2 }
 0x15d   : > { %v845_v8 = vmax.f32 %v841_v6, %v787_v45  ;;  %v829_v31 = vpop.f32.mrf.mxu3 }
 0x15f   : > { %v849_v10 = vmax.f32 %v845_v8, %v797_v55 }
 0x160   : > { %v759_v12 = vpop.f32.mrf.mxu0 }
 0x161   : > { %v853_v16 = vmax.f32 %v849_v10, %v807_v7  ;;  %v838_v18 = vmax.f32 %v759_v12, %v769_v52  ;;  %v782_v13 = vpop.f32.mrf.mxu1 }
 0x162   : > { %v843_v19 = vmax.f32 %v839_v11, %v782_v13 }
 0x163   : > { %v857_v20 = vmax.f32 %v853_v16, %v817_v54  ;;  %v842_v21 = vmax.f32 %v838_v18, %v779_v4 }
 0x164   : > { %v847_v22 = vmax.f32 %v843_v19, %v792_v50  ;;  %v809_v26 = vpop.f32.mrf.mxu2 }
 0x165   : > { %v861_v24 = vmax.f32 %v857_v20, %v827_v9  ;;  %v846_v25 = vmax.f32 %v842_v21, %v789_v47  ;;  %v369_v47 = vadd.f32 %v1165_v14, %v368_v57  ;;  %v371_v57 = vadd.f32 %v1165_v14, %v1408_v63 }
 0x166   : > { %v851_v28 = vmax.f32 %v847_v22, %v802_v62 }
 0x167   : > { %v865_v27 = vadd.f32 %v861_v24, %v364_v23  ;;  %v850_v29 = vmax.f32 %v846_v25, %v799_v59 }
 0x168   : > { %v855_v38 = vmax.f32 %v851_v28, %v1404_v49 }
 0x169   : > { %vm869_vm2 = vcmp.gt.f32.partialorder %v865_v27, 0.0  ;;  %v873_v32 = vmul.f32 0.2, %v865_v27  ;;  %v854_v33 = vmax.f32 %v850_v29, %v809_v26  ;;  %v784_v34 = vpop.f32.mrf.mxu1 }
 0x16a   : > { %v844_v35 = vmax.f32 %v840_v30, %v784_v34  ;;  %v859_v45 = vmax.f32 %v855_v38, %v822_v61 }
 0x16b   : > { %v877_v36 = vsel %vm869_vm2, %v865_v27, %v873_v32  ;;  %v858_v37 = vmax.f32 %v854_v33, %v819_v58 }
 0x16c   : > { %v881_v39 = vpack.c.bf16 %v877_v36, %v877_v36  ;;  %v848_v40 = vmax.f32 %v844_v35, %v794_v15 }
 0x16d   : > { %v862_v42 = vmax.f32 %v858_v37, %v829_v31 }
 0x16e   : > { %886 = vst.msk [vmem:[%s1417_s14] sm:$0xf] %vm885_vm6, %v881_v39  ;;  %v852_v44 = vmax.f32 %v848_v40, %v804_v1 }
 0x16f   : > { %v866_v43 = vadd.f32 %v862_v42, %v366_v41 }
 0x170   : > { %v832_v46 = vpop.f32.mrf.mxu3  ;;  %v856_v49 = vmax.f32 %v852_v44, %v1406_v53 }
 0x171   : > { %vm870_vm7 = vcmp.gt.f32.partialorder %v866_v43, 0.0  ;;  %v874_v48 = vmul.f32 0.2, %v866_v43  ;;  %v863_v50 = vmax.f32 %v859_v45, %v832_v46 }
 0x172   : > { %v860_v55 = vmax.f32 %v856_v49, %v824_v2 }
 0x173   : > { %v878_v51 = vsel %vm870_vm7, %v866_v43, %v874_v48  ;;  %v867_v52 = vadd.f32 %v863_v50, %v369_v47 }
 0x174   : > { %v882_v54 = vpack.c.bf16 %v878_v51, %v878_v51 }
 0x175   : > { %vm871_vm8 = vcmp.gt.f32.partialorder %v867_v52, 0.0  ;;  %v875_v15 = vmul.f32 0.2, %v867_v52 }
 0x176   : > { %887 = vst.msk [vmem:[%s1417_s14 + $0x4] sm:$0xf] %vm885_vm6, %v882_v54 }
 0x177   : > { %v879_v17 = vsel %vm871_vm8, %v867_v52, %v875_v15 }
 0x178   : > { %v883_v56 = vpack.c.bf16 %v879_v17, %v879_v17  ;;  %v834_v58 = vpop.f32.mrf.mxu3 }
 0x179   : > { %v864_v59 = vmax.f32 %v860_v55, %v834_v58 }
 0x17a   : > { %888 = vst.msk [vmem:[%s1417_s14 + $0x8] sm:$0xf] %vm885_vm6, %v883_v56 }
 0x17b   : > { %v868_v60 = vadd.f32 %v864_v59, %v371_v57 }
 0x17d   : > { %vm872_vm9 = vcmp.gt.f32.partialorder %v868_v60, 0.0  ;;  %v876_v61 = vmul.f32 0.2, %v868_v60 }
 0x17f   : > { %v880_v62 = vsel %vm872_vm9, %v868_v60, %v876_v61 }
 0x180   : > { %v884_v53 = vpack.c.bf16 %v880_v62, %v880_v62 }
 0x182   : > { %889 = vst.msk [vmem:[%s1417_s14 + $0xc] sm:$0xf] %vm885_vm6, %v884_v53 }
 0x183 PF: > { %s15_s20 = sadd.s32 1, %s1188_s20   ;;  %s1445_s18 = smov %s1184_s19 }
 0x184   : > { %p12_p5 = scmp.ge.s32.totalorder %s15_s20, 4   ;;  %s1446_s19 = smov %s1448_s21 }
 0x186   :  { %14 = sbr.rel (!%p12_p5) target bundleno = 2 (0x2), region = 76 }

// kernel: _lambda_.17
= control target key start
LH: loop header
LB: loop body
LE: loop exit
PB: predicated region body
PF: predicated region fallthrough
CT: control target
= control target key end

     0   :  { %s741_s9 = smov 0   ;;  %s743_s10 = smov 0   ;;  %s895_s0 = inlined_call_operand.vmem [shape: bf16[2,32,64], index: 0, kind: input, shape index: {}]   ;;  %s896_s1 = inlined_call_operand.vmem [shape: f32[2,1,32], index: 1, kind: input, shape index: {}]   ;;  %s897_s2 = inlined_call_operand.vmem [shape: s32[2,32,8], index: 2, kind: output, shape index: {}]  }
   0x1   :  { %s745_s11 = smov 0  }
   0x2 LB: > { %s24_s12 = sadd.s32 1, %s684_s10  ;;  %p500_p0 = scmp.ge.s32.totalorder %s688_s11, 1  ;;  %s688_s11 = sphi %s745_s11, %s12_s11   ;;  %s684_s10 = sphi %s743_s10, %s905_s10   ;;  %s680_s9 = sphi %s741_s9, %s904_s9  }
   0x3   : > { %p26_p1 = scmp.ge.s32.totalorder %s24_s12, 2  ;;  %p134_p2 = scmp.lt.s32.totalorder %s688_s11, 3 }
   0x5   : > { %s907_s12 = smov (%p26_p1, %s24_s12), 0  ;;  %p135_p3 = pnand %p500_p0, %p134_p2 }
   0x6   : > { %p163_p4 = scmp.lt.s32.totalorder (!%p135_p3), %s680_s9, 1  ;;  %s788_s24 = smov (!%p135_p3), 0  }
   0x7   : > { %138 = sbr.rel (%p135_p3) target bundleno = 543 (0x21f), region = 28 }
   0xc   : > { %s909_s9 = smov (!%p163_p4, %s680_s9), 1  ;;  %vm215_vm0 = vcmask 523264   ;;  %v259_v6 = vlaneseq  ;;  %v772_v21 = vmov 0   ;;  %v774_v22 = vmov 0  }
   0xd   : > { %s525_s13 = sshll.u32 %s909_s9, 4  ;;  %s526_s14 = sshll.u32 %s909_s9, 5  ;;  %v776_v23 = vmov 0   ;;  %v778_v24 = vmov 0  }
   0xe   : > { %s167_s17 = scalar_lea.vmem %s895_s0, %s525_s13  ;;  %s765_s20 = scalar_lea.vmem %s897_s2, %s526_s14  ;;  %v770_v7 = vand.u32 127, %v259_v6 }
   0xf   : > { %v530_v0 = vld [vmem:[%s167_s17 + $0x8] sm:$0xff]  ;;  %s170_s23 = scalar_lea.vmem %s896_s1, %s909_s9  ;;  %v529_v2 = vld [vmem:[%s167_s17] sm:$0xff] }
  0x10   : > { %v226_v1 = vsel %vm215_vm0, %v530_v0, 0  ;;  %v223_v3 = vsel %vm215_vm0, %v529_v2, 0  ;;  %v527_v4 = vld [vmem:[%s167_s17] sm:$0xff]  ;;  %v528_v5 = vld [vmem:[%s167_s17 + $0x8] sm:$0xff] }
  0x11   : > { %234 = vmatpush.bf16.xpose.msra.mxu0 %v226_v1  ;;  %531 = vmatpush.bf16.xpose.msra.mxu1 %v226_v1  ;;  %v629_v8 = vld [vmem:[%s170_s23] ss:$0 sm:$0xff] }
  0x19   : > { %235 = vmatpush.bf16.xpose.msra.mxu0 %v223_v3  ;;  %532 = vmatpush.bf16.xpose.msra.mxu1 %v223_v3 }
  0x20   : > { %521 = vmatmul.msk.bf16.vlgmr.msra.gmra.mxu0 %vm215_vm0, %v527_v4  ;;  %522 = vmatmul.msk.bf16.vlgmr.msra.gmra.mxu1 %vm215_vm0, %v528_v5 }
  0x9d   : > { %v237_v9 = vpop.f32.mrf.mxu0  ;;  %v242_v10 = vpop.f32.mrf.mxu1 }
  0x9e   : > { %v247_v11 = vmul.f32 2.0, %v237_v9  ;;  %v249_v12 = vmul.f32 2.0, %v242_v10 }
  0xa0   : > { %v255_v13 = vsub.f32 %v247_v11, %v629_v8   ;;  %v257_v14 = vsub.f32 %v249_v12, %v629_v8  }
  0xa5   : > { %v239_v15 = vpop.f32.mrf.mxu0  ;;  %v244_v16 = vpop.f32.mrf.mxu1 }
  0xa6   : > { %v248_v17 = vmul.f32 2.0, %v239_v15  ;;  %v250_v18 = vmul.f32 2.0, %v244_v16 }
  0xa8   : > { %v256_v19 = vsub.f32 %v248_v17, %v629_v8   ;;  %v258_v20 = vsub.f32 %v250_v18, %v629_v8  }
  0xa9 LB: >> { %vm275_vm1 = vcmask 261120   ;;  %v356_v3 = vstv %s724_s24  ;;  %s266_s24 = sadd.s32 1, %s724_s24   ;;  %s724_s24 = sphi %s788_s24, %s266_s24   ;;  %v720_v13 = vphi %v255_v13, %v366_v13   ;;  %v716_v19 = vphi %v256_v19, %v367_v19   ;;  %v712_v14 = vphi %v257_v14, %v368_v14   ;;  %v708_v20 = vphi %v258_v20, %v369_v20   ;;  %v704_v24 = vphi %v778_v24, %v903_v24   ;;  %v700_v23 = vphi %v776_v23, %v902_v23   ;;  %v696_v22 = vphi %v774_v22, %v901_v22   ;;  %v692_v21 = vphi %v772_v21, %v900_v21  }
  0xaa   : >> { %v276_v25 = vsel %vm275_vm1, %v720_v13, -inf  ;;  %v282_v26 = vsel %vm275_vm1, %v712_v14, -inf  ;;  %v279_v27 = vsel %vm275_vm1, %v716_v19, -inf  ;;  %v285_v28 = vsel %vm275_vm1, %v708_v20, -inf  ;;  %p263_p5 = scmp.ge.s32.totalorder %s266_s24, 8  }
  0xab   : >> { %277 = vmax.xlane.f32.xlu0 %v276_v25  ;;  %283 = vmax.xlane.f32.xlu1 %v282_v26  ;;  %vm839_vm10 = vcmp.eq.s32.totalorder %v770_v7, %v356_v3  ;;  %vm370_vm15 = vcmask (%p263_p5), 64512  }
  0xb3   : >> { %280 = vmax.xlane.f32.xlu0 %v279_v27  ;;  %286 = vmax.xlane.f32.xlu1 %v285_v28 }
 0x11e   : >> { %v278_v29 = vpop.xlane.xlu0 %277  ;;  %v284_v30 = vpop.xlane.xlu1 %283 }
 0x11f   : >> { %vm288_vm2 = vcmp.eq.f32.partialorder %v720_v13, %v278_v29  ;;  %vm290_vm3 = vcmp.eq.f32.partialorder %v712_v14, %v284_v30 }
 0x120   : >> { %v292_v31 = vsel %vm288_vm2, %v770_v7, 32  ;;  %v294_v32 = vsel %vm290_vm3, %v770_v7, 32 }
 0x121   : >> { %v296_v33 = vsel %vm275_vm1, %v292_v31, 2147483647  ;;  %v326_v34 = vsel %vm275_vm1, %v294_v32, 2147483647 }
 0x122   : >> { %v298_v35 = vshra.s32 %v296_v33, 16  ;;  %v328_v36 = vshra.s32 %v326_v34, 16  ;;  %v297_v49 = vand.u32 65535, %v296_v33  ;;  %v327_v50 = vand.u32 65535, %v326_v34 }
 0x124   : >> { %v300_v37 = vcvt.s32.f32 %v298_v35  ;;  %v330_v38 = vcvt.s32.f32 %v328_v36  ;;  %v299_v53 = vcvt.s32.f32 %v297_v49  ;;  %v329_v54 = vcvt.s32.f32 %v327_v50 }
 0x126   : >> { %301 = vmin.xlane.f32.xlu2 %v300_v37  ;;  %v281_v39 = vpop.xlane.xlu0 %280  ;;  %331 = vmin.xlane.f32.xlu0 %v330_v38  ;;  %v287_v40 = vpop.xlane.xlu1 %286 }
 0x127   : >> { %vm289_vm4 = vcmp.eq.f32.partialorder %v716_v19, %v281_v39  ;;  %vm291_vm5 = vcmp.eq.f32.partialorder %v708_v20, %v287_v40 }
 0x128   : >> { %v293_v41 = vsel %vm289_vm4, %v770_v7, 32  ;;  %v295_v42 = vsel %vm291_vm5, %v770_v7, 32 }
 0x129   : >> { %v311_v43 = vsel %vm275_vm1, %v293_v41, 2147483647  ;;  %v341_v44 = vsel %vm275_vm1, %v295_v42, 2147483647 }
 0x12a   : >> { %v313_v45 = vshra.s32 %v311_v43, 16  ;;  %v343_v46 = vshra.s32 %v341_v44, 16  ;;  %v312_v57 = vand.u32 65535, %v311_v43  ;;  %v342_v58 = vand.u32 65535, %v341_v44 }
 0x12c   : >> { %v315_v47 = vcvt.s32.f32 %v313_v45  ;;  %v345_v48 = vcvt.s32.f32 %v343_v46  ;;  %v314_v61 = vcvt.s32.f32 %v312_v57  ;;  %v344_v62 = vcvt.s32.f32 %v342_v58 }
 0x12e   : >> { %316 = vmin.xlane.f32.xlu2 %v315_v47  ;;  %346 = vmin.xlane.f32.xlu1 %v345_v48 }
 0x199   : >> { %v302_v51 = vpop.xlane.xlu2 %301  ;;  %v332_v52 = vpop.xlane.xlu0 %331 }
 0x19a   : >> { %vm303_vm6 = vcmp.eq.f32.partialorder %v300_v37, %v302_v51  ;;  %vm333_vm7 = vcmp.eq.f32.partialorder %v330_v38, %v332_v52  ;;  %v308_v1 = vcvt.f32.s32 %v302_v51  ;;  %v338_v2 = vcvt.f32.s32 %v332_v52 }
 0x19b   : >> { %v304_v55 = vsel %vm303_vm6, %v299_v53, inf  ;;  %v334_v56 = vsel %vm333_vm7, %v329_v54, inf }
 0x19c   : >> { %305 = vmin.xlane.f32.xlu2 %v304_v55  ;;  %335 = vmin.xlane.f32.xlu1 %v334_v56  ;;  %v309_v6 = vshll.u32 %v308_v1, 16  ;;  %v339_v8 = vshll.u32 %v338_v2, 16 }
 0x1a1   : >> { %v317_v59 = vpop.xlane.xlu2 %316  ;;  %v347_v60 = vpop.xlane.xlu1 %346 }
 0x1a2   : >> { %vm318_vm8 = vcmp.eq.f32.partialorder %v315_v47, %v317_v59  ;;  %vm348_vm9 = vcmp.eq.f32.partialorder %v345_v48, %v347_v60  ;;  %v323_v16 = vcvt.f32.s32 %v317_v59  ;;  %v353_v17 = vcvt.f32.s32 %v347_v60 }
 0x1a3   : >> { %v319_v63 = vsel %vm318_vm8, %v314_v61, inf  ;;  %v349_v0 = vsel %vm348_vm9, %v344_v62, inf }
 0x1a4   : >> { %320 = vmin.xlane.f32.xlu0 %v319_v63  ;;  %350 = vmin.xlane.f32.xlu2 %v349_v0  ;;  %v324_v28 = vshll.u32 %v323_v16, 16  ;;  %v354_v29 = vshll.u32 %v353_v17, 16 }
 0x20f   : >> { %v306_v4 = vpop.xlane.xlu2 %305  ;;  %v336_v5 = vpop.xlane.xlu1 %335 }
 0x210   : >> { %v307_v9 = vcvt.f32.s32 %v306_v4  ;;  %v337_v10 = vcvt.f32.s32 %v336_v5 }
 0x212   : >> { %v310_v12 = vadd.s32 %v309_v6, %v307_v9  ;;  %v340_v15 = vadd.s32 %v339_v8, %v337_v10 }
 0x214   : >> { %v358_v18 = vsel %vm839_vm10, %v310_v12, %v704_v24   ;;  %vm362_vm11 = vcmp.eq.s32.totalorder %v770_v7, %v310_v12  ;;  %v360_v25 = vsel %vm839_vm10, %v340_v15, %v696_v22   ;;  %vm364_vm12 = vcmp.eq.s32.totalorder %v770_v7, %v340_v15 }
 0x215   : >> { %v366_v13 = vsel %vm362_vm11, -inf, %v720_v13   ;;  %v368_v14 = vsel %vm364_vm12, -inf, %v712_v14   ;;  %v901_v22 = vmov %v360_v25  ;;  %371 = vst.msk [vmem:[%s765_s20] sm:$0xff] (%p263_p5), %vm370_vm15, %v358_v18 }
 0x216   : > { %373 = vst.msk [vmem:[%s765_s20 + $0x10] sm:$0xff] (%p263_p5), %vm370_vm15, %v360_v25 }
 0x217   : >> { %v321_v26 = vpop.xlane.xlu0 %320  ;;  %v351_v27 = vpop.xlane.xlu2 %350 }
 0x218   : >> { %v322_v30 = vcvt.f32.s32 %v321_v26  ;;  %v352_v31 = vcvt.f32.s32 %v351_v27 }
 0x21a   : >> { %v325_v32 = vadd.s32 %v324_v28, %v322_v30  ;;  %v355_v24 = vadd.s32 %v354_v29, %v352_v31  ;;  %265 = sbr.rel (!%p263_p5) target bundleno = 169 (0xa9), region = 69 }
 0x21c   : >> { %v359_v33 = vsel %vm839_vm10, %v325_v32, %v700_v23   ;;  %vm363_vm13 = vcmp.eq.s32.totalorder %v770_v7, %v325_v32  ;;  %v361_v34 = vsel %vm839_vm10, %v355_v24, %v692_v21   ;;  %vm365_vm14 = vcmp.eq.s32.totalorder %v770_v7, %v355_v24 }
 0x21d   : >> { %v367_v19 = vsel %vm363_vm13, -inf, %v716_v19   ;;  %v369_v20 = vsel %vm365_vm14, -inf, %v708_v20   ;;  %v900_v21 = vmov %v361_v34  ;;  %v902_v23 = vmov %v359_v33  ;;  %372 = vst.msk [vmem:[%s765_s20 + $0x8] sm:$0xff] (%p263_p5), %vm370_vm15, %v359_v33 }
 0x21e   : >> { %v903_v24 = vmov %v358_v18  ;;  %374 = vst.msk [vmem:[%s765_s20 + $0x18] sm:$0xff] (%p263_p5), %vm370_vm15, %v361_v34 }
 0x21f PF: > { %s12_s11 = sadd.s32 1, %s688_s11   ;;  %s904_s9 = smov %s684_s10 }
 0x220   : > { %p9_p6 = scmp.ge.s32.totalorder %s12_s11, 4   ;;  %s905_s10 = smov %s907_s12 }
 0x222   :  { %11 = sbr.rel (!%p9_p6) target bundleno = 2 (0x2), region = 80 }

// kernel: _lambda_.21
= control target key start
LH: loop header
LB: loop body
LE: loop exit
PB: predicated region body
PF: predicated region fallthrough
CT: control target
= control target key end

     0   :  { %7 = vsyncpa [#allocation3], 0  ;;  %s555_s9 = smov 0   ;;  %s557_s10 = smov 0   ;;  %s592_s0 = inlined_call_operand.vmem [shape: bf16[2,32,64], index: 0, kind: input, shape index: {}]   ;;  %s593_s1 = inlined_call_operand.hbm [shape: bf16[64,128], index: 1, kind: input, shape index: {}]   ;;  %s594_s2 = inlined_call_operand.vmem [shape: bf16[2,32,128], index: 2, kind: output, shape index: {}]  }
   0x1   :  { %s559_s11 = smov 0  }
   0x2 LB: > { %s380_s12 = sadd.s32 4294967295, %s535_s11   ;;  %s25_s13 = sadd.s32 1, %s531_s10  ;;  %s535_s11 = sphi %s559_s11, %s13_s11   ;;  %s531_s10 = sphi %s557_s10, %s596_s10   ;;  %s527_s9 = sphi %s555_s9, %s595_s9  }
   0x3   : > { %p27_p0 = scmp.ge.s32.totalorder %s25_s13, 2  ;;  %p382_p1 = scmp.ge.s32.totalorder %s535_s11, 1 }
   0x4   : > { %p107_p2 = scmp.lt.s32.totalorder %s535_s11, 3  ;;  %p450_p4 = scmp.eq.s32.totalorder %s380_s12, 0 }
   0x5   : > { %s598_s13 = smov (%p27_p0, %s25_s13), 0  ;;  %s118_s16 = sshll.u32 %s593_s1, 4  ;;  %s119_s16 = int_to_ptr.hbm [resolvable:$true] %s118_s16 }
   0x6   : > { %p108_p3 = pnand %p382_p1, %p107_p2  ;;  %s537_s17 = smov [#allocation2]  }
   0x7   : > { %s120_s18 = sshll.u32 %s537_s17, 4  ;;  %s538_s19 = smov 64   ;;  %s121_s18 = int_to_ptr.vmem [resolvable:$true] %s120_s18 }
   0x8   : > { %p446_p5 = pneg %p108_p3  ;;  %s539_s20 = smov 4  }
   0x9   : > { %149 = sbr.rel (%p108_p3) target bundleno = 169 (0xa9), region = 28 }
   0xa   : > { %p447_p6 = pnand %p450_p4, %p446_p5 }
   0xc   : > { %449 = dma.hbm_to_vmem [thread:$0]  (!%p447_p6), %s119_s16, 512, %s121_s18, [#allocation3], %s538_s19, %s538_s19, %s539_s20  }
   0xe   : > { %522 = dma.done.wait (%p450_p4), [#allocation3], 512  }
   0xf   : > { %524 = vsyncadd (%p450_p4), [#allocation3], 4294966784  ;;  %p181_p7 = scmp.lt.s32.totalorder %s527_s9, 1  ;;  %v426_v0 = vld [vmem:[#allocation2 + $0x18] sm:$0xff]  ;;  %v425_v1 = vld [vmem:[#allocation2 + $0x10] sm:$0xff]  ;;  %vm247_vm0 = vcmask 523264  }
  0x10   : > { %258 = vmatpush.bf16.msra.mxu0 %v426_v0  ;;  %438 = vmatpush.bf16.msra.mxu1 %v426_v0  ;;  %v424_v2 = vld [vmem:[#allocation2 + $0x8] sm:$0xff]  ;;  %v423_v3 = vld [vmem:[#allocation2] sm:$0xff] }
  0x11   : > { %s600_s9 = smov (!%p181_p7, %s527_s9), 1 }
  0x12   : > { %s419_s21 = sshll.u32 %s600_s9, 4 }
  0x13   : > { %s188_s24 = scalar_lea.vmem %s592_s0, %s419_s21  ;;  %s198_s27 = scalar_lea.vmem %s594_s2, %s419_s21 }
  0x14   : > { %259 = vmatpush.bf16.msra.mxu0 %v425_v1  ;;  %439 = vmatpush.bf16.msra.mxu1 %v425_v1  ;;  %v421_v4 = vld [vmem:[%s188_s24] sm:$0xff]  ;;  %v422_v5 = vld [vmem:[%s188_s24 + $0x8] sm:$0xff] }
  0x18   : > { %260 = vmatpush.bf16.msra.mxu0 %v424_v2  ;;  %440 = vmatpush.bf16.msra.mxu1 %v424_v2 }
  0x1c   : > { %261 = vmatpush.bf16.msra.mxu0 %v423_v3  ;;  %441 = vmatpush.bf16.msra.mxu1 %v423_v3 }
  0x1f   : > { %415 = vmatmul.msk.bf16.vlgmr.msra.gmra.mxu0 %vm247_vm0, %v421_v4  ;;  %416 = vmatmul.msk.bf16.vlgmr.msra.gmra.mxu1 %vm247_vm0, %v422_v5 }
  0x9c   : > { %v263_v6 = vpop.f32.mrf.mxu0  ;;  %v268_v7 = vpop.f32.mrf.mxu1 }
  0xa4   : > { %v265_v8 = vpop.f32.mrf.mxu0  ;;  %v270_v9 = vpop.f32.mrf.mxu1 }
  0xa5   : > { %v430_v10 = vpack.c.bf16 %v265_v8, %v263_v6  ;;  %v435_v11 = vpack.c.bf16 %v270_v9, %v268_v7 }
  0xa7   : > { %431 = vst [vmem:[%s198_s27] sm:$0xff] %v430_v10  }
  0xa8   : > { %437 = vst [vmem:[%s198_s27 + $0x8] sm:$0xff] %v435_v11  }
  0xa9 PF: > { %s13_s11 = sadd.s32 1, %s535_s11   ;;  %s595_s9 = smov %s531_s10 }
  0xaa   : > { %p10_p8 = scmp.ge.s32.totalorder %s13_s11, 4   ;;  %s596_s10 = smov %s598_s13 }
  0xac   :  { %12 = sbr.rel (!%p10_p8) target bundleno = 2 (0x2), region = 63 }
  0xb1   :  { %311 = vsyncpa [#allocation3], 1 }
  0xb2   :  { %313 = vsyncpa [#allocation3 + $0x1], 1 }

// kernel: _lambda_.19
= control target key start
LH: loop header
LB: loop body
LE: loop exit
PB: predicated region body
PF: predicated region fallthrough
CT: control target
= control target key end

     0   :  { %10 = vsyncpa [#allocation3], 0  ;;  %s1353_s18 = smov 0   ;;  %s1355_s19 = smov 0   ;;  %s1563_s0 = inlined_call_operand.vmem [shape: s32[2,32,8], index: 0, kind: input, shape index: {}]   ;;  %s1564_s1 = inlined_call_operand.vmem [shape: bf16[2,32,64], index: 1, kind: input, shape index: {}]   ;;  %s1565_s2 = inlined_call_operand.vmem [shape: bf16[2,32,64], index: 2, kind: input, shape index: {}]   ;;  %s1566_s3 = inlined_call_operand.hbm [shape: bf16[64,64], index: 3, kind: input, shape index: {}]   ;;  %s1567_s4 = inlined_call_operand.vmem [shape: f32[1,64], index: 4, kind: input, shape index: {}]   ;;  %s1568_s5 = inlined_call_operand.vmem [shape: bf16[2,32,64], index: 5, kind: output, shape index: {}]  }
   0x1   :  { %s1357_s20 = smov 0  }
   0x2 LB: > { %s1060_s21 = sadd.s32 4294967295, %s1309_s20   ;;  %s28_s22 = sadd.s32 1, %s1305_s19  ;;  %s1309_s20 = sphi %s1357_s20, %s16_s20   ;;  %s1305_s19 = sphi %s1355_s19, %s1570_s19   ;;  %s1301_s18 = sphi %s1353_s18, %s1569_s18  }
   0x3   : > { %p30_p0 = scmp.ge.s32.totalorder %s28_s22, 2  ;;  %p1062_p1 = scmp.ge.s32.totalorder %s1309_s20, 1 }
   0x4   : > { %p185_p2 = scmp.lt.s32.totalorder %s1309_s20, 3  ;;  %p1185_p4 = scmp.eq.s32.totalorder %s1060_s21, 0 }
   0x5   : > { %s1572_s22 = smov (%p30_p0, %s28_s22), 0  ;;  %s196_s25 = sshll.u32 %s1566_s3, 4  ;;  %s197_s25 = int_to_ptr.hbm [resolvable:$true] %s196_s25 }
   0x6   : > { %p186_p3 = pnand %p1062_p1, %p185_p2  ;;  %s1311_s26 = smov [#allocation2]  }
   0x7   : > { %s198_s27 = sshll.u32 %s1311_s26, 4  ;;  %s1312_s28 = smov 64   ;;  %s199_s27 = int_to_ptr.vmem [resolvable:$true] %s198_s27 }
   0x8   : > { %p1181_p5 = pneg %p186_p3  ;;  %s1313_s29 = smov 4  }
   0x9   : > { %251 = sbr.rel (%p186_p3) target bundleno = 392 (0x188), region = 40 }
   0xa   : > { %p1182_p6 = pnand %p1185_p4, %p1181_p5 }
   0xc   : > { %1184 = dma.hbm_to_vmem [thread:$0]  (!%p1182_p6), %s197_s25, 512, %s199_s27, [#allocation3], %s1312_s28, %s1312_s28, %s1313_s29  }
   0xe   : > { %1296 = dma.done.wait (%p1185_p4), [#allocation3], 512  }
   0xf   : > { %1298 = vsyncadd (%p1185_p4), [#allocation3], 4294966784  ;;  %p303_p7 = scmp.lt.s32.totalorder %s1301_s18, 1  ;;  %v1314_v0 = vmov 3   ;;  %v1315_v1 = vmov 0   ;;  %v1316_v2 = vmov 5   ;;  %v422_v14 = vlaneseq }
  0x10   : > { %1224 = vset.pattern.permute.xlu1 %v1314_v0  ;;  %1223 = vset.pattern.permute.xlu0 %v1315_v1  ;;  %v1317_v7 = vmov 1   ;;  %v1318_v8 = vmov 6   ;;  %v1319_v9 = vmov 2   ;;  %v1320_v10 = vmov 4   ;;  %v1168_v35 = vld [vmem:[#allocation2 + $0x18] sm:$0xff]  ;;  %v1167_v42 = vld [vmem:[#allocation2 + $0x10] sm:$0xff] }
  0x11   : > { %s1574_s18 = smov (!%p303_p7, %s1301_s18), 1  ;;  %1225 = vset.pattern.permute.xlu2 %v1316_v2  ;;  %v1321_v11 = vmov 7   ;;  %v1429_v15 = vand.u32 127, %v422_v14  ;;  %v1322_v17 = vmov 0.0   ;;  %vm740_vm2 = vcmask 261120   ;;  %399 = vmatpush.bf16.msra.mxu0 %v1168_v35  ;;  %v1166_v49 = vld [vmem:[#allocation2 + $0x8] sm:$0xff] }
  0x12   : > { %s1159_s30 = sshll.u32 %s1574_s18, 5  ;;  %s1410_s9 = sshll.u32 %s1574_s18, 4  ;;  %v1165_v54 = vld [vmem:[#allocation2] sm:$0xff]  ;;  %vm388_vm11 = vcmask 523264  }
  0x13   : > { %s310_s8 = scalar_lea.vmem %s1563_s0, %s1159_s30  ;;  %s326_s12 = scalar_lea.vmem %s1565_s2, %s1410_s9 }
  0x14   : > { %v1383_v3 = vld [vmem:[%s310_s8 + $0x10] sm:$0xff]  ;;  %v1385_v4 = vld [vmem:[%s310_s8] sm:$0xff]  ;;  %v1390_v5 = vld [vmem:[%s310_s8 + $0x18] sm:$0xff]  ;;  %s1461_s15 = scalar_lea.vmem %s1564_s1, %s1410_s9  ;;  %s1541_s23 = scalar_lea.vmem %s1568_s5, %s1410_s9 }
  0x15   : > { %431 = vperm.xlu0 %1223, %v1383_v3   ;;  %509 = vperm.xlu1 %1224, %v1385_v4   ;;  %v415_v6 = vld [vmem:[%s310_s8 + $0x8] sm:$0xff]  ;;  %v1420_v13 = vld [vmem:[%s326_s12] sm:$0xff] }
  0x16   : > { %571 = vperm.xlu2 %1225, %v1383_v3   ;;  %v1417_v12 = vld [vmem:[%s326_s12 + $0x8] sm:$0xff]  ;;  %400 = vmatpush.bf16.msra.mxu0 %v1167_v42  ;;  %v1163_v60 = vld [vmem:[%s1461_s15] sm:$0xff] }
  0x17   : > { %1173 = vmatpush.bf16.msra.mxu3 %v1417_v12  ;;  %1171 = vmatpush.bf16.msra.mxu1 %v1417_v12 }
  0x18   : > { %1172 = vmatpush.bf16.msra.mxu2 %v1417_v12 }
  0x1a   : > { %401 = vmatpush.bf16.msra.mxu0 %v1166_v49 }
  0x1b   : > { %1176 = vmatpush.bf16.msra.mxu3 %v1420_v13  ;;  %1174 = vmatpush.bf16.msra.mxu1 %v1420_v13 }
  0x1c   : > { %1175 = vmatpush.bf16.msra.mxu2 %v1420_v13 }
  0x1d   : > { %434 = vperm.xlu0 %1223, %v1390_v5   ;;  %512 = vperm.xlu1 %1224, %v415_v6  }
  0x1e   : > { %574 = vperm.xlu2 %1225, %v1390_v5   ;;  %402 = vmatpush.bf16.msra.mxu0 %v1165_v54 }
  0x21   : > { %1099 = vmatmul.msk.bf16.vlgmr.msra.gmra.mxu0 %vm388_vm11, %v1163_v60 }
  0x22   : > { %795 = vmatpush.bf16.msrb.mxu0 %v1417_v12 }
  0x25   : > { %1226 = vset.pattern.permute.xlu0 %v1317_v7  ;;  %1227 = vset.pattern.permute.xlu1 %v1317_v7 }
  0x26   : > { %453 = vperm.xlu0 %1226, %v1385_v4   ;;  %456 = vperm.xlu1 %1227, %v415_v6  }
  0x27   : > { %1228 = vset.pattern.permute.xlu2 %v1314_v0  ;;  %796 = vmatpush.bf16.msrb.mxu0 %v1420_v13 }
  0x28   : > { %515 = vperm.xlu2 %1228, %v1383_v3  }
  0x2e   : > { %1231 = vset.pattern.permute.xlu0 %v1318_v8  ;;  %1229 = vset.pattern.permute.xlu1 %v1314_v0 }
  0x2f   : > { %596 = vperm.xlu0 %1231, %v415_v6   ;;  %518 = vperm.xlu1 %1229, %v1390_v5  }
  0x30   : > { %1230 = vset.pattern.permute.xlu2 %v1318_v8 }
  0x31   : > { %593 = vperm.xlu2 %1230, %v1385_v4  }
  0x37   : > { %1232 = vset.pattern.permute.xlu1 %v1317_v7  ;;  %599 = vperm.xlu0 %1231, %v1383_v3  }
  0x38   : > { %459 = vperm.xlu1 %1232, %v1383_v3  }
  0x39   : > { %1233 = vset.pattern.permute.xlu2 %v1317_v7 }
  0x3a   : > { %462 = vperm.xlu2 %1233, %v1390_v5  }
  0x3f   : > { %1238 = vset.pattern.permute.xlu0 %v1319_v9 }
  0x40   : > { %1234 = vset.pattern.permute.xlu1 %v1320_v10  ;;  %484 = vperm.xlu0 %1238, %v415_v6  }
  0x41   : > { %537 = vperm.xlu1 %1234, %v1385_v4  }
  0x42   : > { %1235 = vset.pattern.permute.xlu2 %v1320_v10 }
  0x43   : > { %540 = vperm.xlu2 %1235, %v415_v6  }
  0x48   : > { %1243 = vset.pattern.permute.xlu0 %v1315_v1 }
  0x49   : > { %1236 = vset.pattern.permute.xlu1 %v1318_v8  ;;  %425 = vperm.xlu0 %1243, %v1385_v4  }
  0x4a   : > { %602 = vperm.xlu1 %1236, %v1390_v5  }
  0x4b   : > { %1237 = vset.pattern.permute.xlu2 %v1319_v9 }
  0x4c   : > { %481 = vperm.xlu2 %1237, %v1385_v4  }
  0x51   : > { %1248 = vset.pattern.permute.xlu0 %v1316_v2 }
  0x52   : > { %1239 = vset.pattern.permute.xlu1 %v1320_v10  ;;  %568 = vperm.xlu0 %1248, %v415_v6  }
  0x53   : > { %543 = vperm.xlu1 %1239, %v1383_v3  }
  0x54   : > { %1240 = vset.pattern.permute.xlu2 %v1320_v10 }
  0x55   : > { %546 = vperm.xlu2 %1240, %v1390_v5  }
  0x5a   : > { %1251 = vset.pattern.permute.xlu0 %v1321_v11 }
  0x5b   : > { %1241 = vset.pattern.permute.xlu1 %v1321_v11 }
  0x5c   : > { %621 = vperm.xlu1 %1241, %v1385_v4  }
  0x5d   : > { %1242 = vset.pattern.permute.xlu2 %v1321_v11 }
  0x5e   : > { %624 = vperm.xlu2 %1242, %v415_v6  }
  0x64   : > { %1244 = vset.pattern.permute.xlu1 %v1315_v1 }
  0x65   : > { %428 = vperm.xlu1 %1244, %v415_v6  }
  0x66   : > { %1245 = vset.pattern.permute.xlu2 %v1319_v9 }
  0x67   : > { %487 = vperm.xlu2 %1245, %v1383_v3  }
  0x6d   : > { %1246 = vset.pattern.permute.xlu1 %v1319_v9 }
  0x6e   : > { %490 = vperm.xlu1 %1246, %v1390_v5  }
  0x6f   : > { %1247 = vset.pattern.permute.xlu2 %v1316_v2 }
  0x70   : > { %v572_v16 = vpop.permute.xlu2 %571  ;;  %565 = vperm.xlu2 %1247, %v1385_v4  }
  0x71   : > { %vm578_vm0 = vcmp.eq.s32.totalorder %v572_v16, %v1429_v15 }
  0x72   : > { %v1123_v18 = vsel %vm578_vm0, 1.0, %v1322_v17 }
  0x73   : > { %v590_v19 = vpack.c.bf16 %v1123_v18, %v1123_v18 }
  0x75   : > { %v704_v22 = vunpack.c.l.b16 %v590_v19 }
  0x76   : > { %1249 = vset.pattern.permute.xlu1 %v1321_v11 }
  0x77   : > { %627 = vperm.xlu1 %1249, %v1383_v3  }
  0x78   : > { %v575_v20 = vpop.permute.xlu2 %574  ;;  %1250 = vset.pattern.permute.xlu2 %v1321_v11 }
  0x79   : > { %vm579_vm1 = vcmp.eq.s32.totalorder %v575_v20, %v1429_v15  ;;  %630 = vperm.xlu2 %1250, %v1390_v5  }
  0x7a   : > { %v1124_v21 = vsel %vm579_vm1, 1.0, %v1322_v17 }
  0x7b   : > { %v591_v23 = vpack.c.bf16 %v1124_v21, %v1124_v21 }
  0x7d   : > { %v705_v24 = vunpack.c.l.b16 %v591_v23  ;;  %v1164_v23 = vld [vmem:[%s1461_s15 + $0x8] sm:$0xff] }
  0x7e   : > { %1100 = vmatmul.msk.bf16.gmra.mxu0 %vm388_vm11, %v1164_v23 }
  0x7f   : > { %v707_v25 = vpack.c.b16 %v705_v24, %v704_v22 }
  0x81   : > { %1152 = vmatmul.msk.bf16.vlgmr.msra.gmra.mxu3 %vm740_vm2, %v707_v25 }
  0x82   : > { %v516_v26 = vpop.permute.xlu2 %515 }
  0x83   : > { %vm522_vm10 = vcmp.eq.s32.totalorder %v516_v26, %v1429_v15 }
  0x84   : > { %v1115_v57 = vsel %vm522_vm10, 1.0, %v1322_v17 }
  0x85   : > { %v534_v62 = vpack.c.bf16 %v1115_v57, %v1115_v57 }
  0x87   : > { %v432_v27 = vpop.permute.xlu0 %431  ;;  %v510_v28 = vpop.permute.xlu1 %509  ;;  %v684_v8 = vunpack.c.l.b16 %v534_v62 }
  0x88   : > { %vm438_vm3 = vcmp.eq.s32.totalorder %v432_v27, %v1429_v15  ;;  %vm520_vm4 = vcmp.eq.s32.totalorder %v510_v28, %v1429_v15 }
  0x89   : > { %v1103_v29 = vsel %vm438_vm3, 1.0, %v1322_v17  ;;  %v1113_v31 = vsel %vm520_vm4, 1.0, %v1322_v17 }
  0x8a   : > { %v450_v32 = vpack.c.bf16 %v1103_v29, %v1103_v29  ;;  %v532_v36 = vpack.c.bf16 %v1113_v31, %v1113_v31 }
  0x8b   : > { %v594_v30 = vpop.permute.xlu2 %593 }
  0x8c   : > { %v654_v39 = vunpack.c.l.b16 %v450_v32  ;;  %v682_v43 = vunpack.c.l.b16 %v532_v36  ;;  %vm604_vm9 = vcmp.eq.s32.totalorder %v594_v30, %v1429_v15 }
  0x8d   : > { %v1125_v55 = vsel %vm604_vm9, 1.0, %v1322_v17 }
  0x8e   : > { %v616_v61 = vpack.c.bf16 %v1125_v55, %v1125_v55 }
  0x8f   : > { %v435_v33 = vpop.permute.xlu0 %434  ;;  %v513_v34 = vpop.permute.xlu1 %512 }
  0x90   : > { %vm439_vm5 = vcmp.eq.s32.totalorder %v435_v33, %v1429_v15  ;;  %vm521_vm6 = vcmp.eq.s32.totalorder %v513_v34, %v1429_v15  ;;  %v712_v5 = vunpack.c.l.b16 %v616_v61 }
  0x91   : > { %v1104_v37 = vsel %vm439_vm5, 1.0, %v1322_v17  ;;  %v1114_v38 = vsel %vm521_vm6, 1.0, %v1322_v17 }
  0x92   : > { %v451_v40 = vpack.c.bf16 %v1104_v37, %v1104_v37  ;;  %v533_v41 = vpack.c.bf16 %v1114_v38, %v1114_v38 }
  0x94   : > { %v655_v44 = vunpack.c.l.b16 %v451_v40  ;;  %v683_v45 = vunpack.c.l.b16 %v533_v41  ;;  %v463_v46 = vpop.permute.xlu2 %462 }
  0x95   : > { %vm467_vm14 = vcmp.eq.s32.totalorder %v463_v46, %v1429_v15 }
  0x96   : > { %v657_v47 = vpack.c.b16 %v655_v44, %v654_v39  ;;  %v686_v48 = vpack.c.b16 %v683_v45, %v682_v43  ;;  %v1108_v18 = vsel %vm467_vm14, 1.0, %v1322_v17 }
  0x97   : > { %v479_v21 = vpack.c.bf16 %v1108_v18, %v1108_v18 }
  0x98   : > { %1142 = vmatmul.msk.bf16.vlgmr.msra.gmra.mxu1 %vm740_vm2, %v657_v47  ;;  %v454_v50 = vpop.permute.xlu0 %453  ;;  %1147 = vmatmul.msk.bf16.vlgmr.msra.gmra.mxu2 %vm740_vm2, %v686_v48  ;;  %v457_v51 = vpop.permute.xlu1 %456 }
  0x99   : > { %vm464_vm7 = vcmp.eq.s32.totalorder %v454_v50, %v1429_v15  ;;  %vm465_vm8 = vcmp.eq.s32.totalorder %v457_v51, %v1429_v15  ;;  %v665_v26 = vunpack.c.l.b16 %v479_v21 }
  0x9a   : > { %v1105_v52 = vsel %vm464_vm7, 1.0, %v1322_v17  ;;  %v1106_v53 = vsel %vm465_vm8, 1.0, %v1322_v17 }
  0x9b   : > { %v476_v58 = vpack.c.bf16 %v1105_v52, %v1105_v52  ;;  %v477_v59 = vpack.c.bf16 %v1106_v53, %v1106_v53 }
  0x9d   : > { %v541_v56 = vpop.permute.xlu2 %540  ;;  %v662_v1 = vunpack.c.l.b16 %v476_v58  ;;  %v663_v2 = vunpack.c.l.b16 %v477_v59 }
  0x9e   : > { %vm549_vm0 = vcmp.eq.s32.totalorder %v541_v56, %v1429_v15 }
  0x9f   : > { %v666_v11 = vpack.c.b16 %v663_v2, %v662_v1  ;;  %v1118_v24 = vsel %vm549_vm0, 1.0, %v1322_v17 }
  0xa0   : > { %v561_v28 = vpack.c.bf16 %v1118_v24, %v1118_v24 }
  0xa1   : > { %v597_v63 = vpop.permute.xlu0 %596  ;;  %v519_v0 = vpop.permute.xlu1 %518 }
  0xa2   : > { %vm605_vm12 = vcmp.eq.s32.totalorder %v597_v63, %v1429_v15  ;;  %vm523_vm13 = vcmp.eq.s32.totalorder %v519_v0, %v1429_v15  ;;  %v693_v32 = vunpack.c.l.b16 %v561_v28 }
  0xa3   : > { %v1126_v3 = vsel %vm605_vm12, 1.0, %v1322_v17  ;;  %v1116_v4 = vsel %vm523_vm13, 1.0, %v1322_v17 }
  0xa4   : > { %v617_v6 = vpack.c.bf16 %v1126_v3, %v1126_v3  ;;  %v535_v7 = vpack.c.bf16 %v1116_v4, %v1116_v4 }
  0xa6   : > { %v713_v9 = vunpack.c.l.b16 %v617_v6  ;;  %v685_v10 = vunpack.c.l.b16 %v535_v7  ;;  %v482_v12 = vpop.permute.xlu2 %481 }
  0xa7   : > { %vm492_vm4 = vcmp.eq.s32.totalorder %v482_v12, %v1429_v15 }
  0xa8   : > { %1143 = vmatmul.msk.bf16.gmra.mxu1 %vm740_vm2, %v666_v11  ;;  %v687_v14 = vpack.c.b16 %v685_v10, %v684_v8  ;;  %v716_v16 = vpack.c.b16 %v713_v9, %v712_v5  ;;  %v1109_v39 = vsel %vm492_vm4, 1.0, %v1322_v17  ;;  %vm926_vm4 = vcmask 519168  }
  0xa9   : > { %v600_v19 = vpop.permute.xlu0 %599  ;;  %v504_v43 = vpack.c.bf16 %v1109_v39, %v1109_v39 }
  0xaa   : > { %1148 = vmatmul.msk.bf16.gmra.mxu2 %vm740_vm2, %v687_v14  ;;  %1153 = vmatmul.msk.bf16.gmra.mxu3 %vm740_vm2, %v716_v16  ;;  %v460_v13 = vpop.permute.xlu1 %459  ;;  %vm606_vm3 = vcmp.eq.s32.totalorder %v600_v19, %v1429_v15 }
  0xab   : > { %vm466_vm15 = vcmp.eq.s32.totalorder %v460_v13, %v1429_v15  ;;  %v1127_v37 = vsel %vm606_vm3, 1.0, %v1322_v17  ;;  %v672_v52 = vunpack.c.l.b16 %v504_v43 }
  0xac   : > { %v1107_v20 = vsel %vm466_vm15, 1.0, %v1322_v17  ;;  %v618_v42 = vpack.c.bf16 %v1127_v37, %v1127_v37 }
  0xad   : > { %v478_v22 = vpack.c.bf16 %v1107_v20, %v1107_v20 }
  0xae   : > { %v714_v48 = vunpack.c.l.b16 %v618_v42 }
  0xaf   : > { %v547_v25 = vpop.permute.xlu2 %546  ;;  %v664_v27 = vunpack.c.l.b16 %v478_v22 }
  0xb0   : > { %vm551_vm7 = vcmp.eq.s32.totalorder %v547_v25, %v1429_v15 }
  0xb1   : > { %v667_v34 = vpack.c.b16 %v665_v26, %v664_v27  ;;  %v1120_v50 = vsel %vm551_vm7, 1.0, %v1322_v17 }
  0xb2   : > { %v485_v31 = vpop.permute.xlu0 %484  ;;  %v563_v55 = vpack.c.bf16 %v1120_v50, %v1120_v50  ;;  %v404_v50 = vpop.f32.mrf.mxu0 }
  0xb3   : > { %v538_v29 = vpop.permute.xlu1 %537  ;;  %vm493_vm5 = vcmp.eq.s32.totalorder %v485_v31, %v1429_v15 }
  0xb4   : > { %vm548_vm1 = vcmp.eq.s32.totalorder %v538_v29, %v1429_v15  ;;  %v1110_v40 = vsel %vm493_vm5, 1.0, %v1322_v17  ;;  %v695_v59 = vunpack.c.l.b16 %v563_v55 }
  0xb5   : > { %v1117_v30 = vsel %vm548_vm1, 1.0, %v1322_v17  ;;  %v505_v44 = vpack.c.bf16 %v1110_v40, %v1110_v40 }
  0xb6   : > { %v560_v33 = vpack.c.bf16 %v1117_v30, %v1117_v30 }
  0xb7   : > { %v673_v53 = vunpack.c.l.b16 %v505_v44 }
  0xb8   : > { %v692_v35 = vunpack.c.l.b16 %v560_v33  ;;  %1144 = vmatmul.msk.bf16.gmra.mxu1 %vm740_vm2, %v667_v34  ;;  %v625_v36 = vpop.permute.xlu2 %624 }
  0xb9   : > { %v676_v57 = vpack.c.b16 %v673_v53, %v672_v52  ;;  %vm633_vm9 = vcmp.eq.s32.totalorder %v625_v36, %v1429_v15 }
  0xba   : > { %v696_v38 = vpack.c.b16 %v693_v32, %v692_v35  ;;  %v1130_v63 = vsel %vm633_vm9, 1.0, %v1322_v17 }
  0xbb   : > { %v426_v47 = vpop.permute.xlu0 %425  ;;  %v645_v2 = vpack.c.bf16 %v1130_v63, %v1130_v63 }
  0xbc   : > { %1149 = vmatmul.msk.bf16.gmra.mxu2 %vm740_vm2, %v696_v38  ;;  %v603_v41 = vpop.permute.xlu1 %602  ;;  %vm436_vm13 = vcmp.eq.s32.totalorder %v426_v47, %v1429_v15 }
  0xbd   : > { %vm607_vm6 = vcmp.eq.s32.totalorder %v603_v41, %v1429_v15  ;;  %v723_v7 = vunpack.c.l.b16 %v645_v2  ;;  %v1101_v12 = vsel %vm436_vm13, 1.0, %v1322_v17 }
  0xbe   : > { %v1128_v45 = vsel %vm607_vm6, 1.0, %v1322_v17  ;;  %v448_v16 = vpack.c.bf16 %v1101_v12, %v1101_v12  ;;  %v1252_v12 = vld [vmem:[%s1567_s4] ss:$0 sm:$0xff] }
  0xbf   : > { %v619_v46 = vpack.c.bf16 %v1128_v45, %v1128_v45 }
  0xc0   : > { %v652_v21 = vunpack.c.l.b16 %v448_v16 }
  0xc1   : > { %v715_v49 = vunpack.c.l.b16 %v619_v46  ;;  %v488_v51 = vpop.permute.xlu2 %487 }
  0xc2   : > { %vm494_vm15 = vcmp.eq.s32.totalorder %v488_v51, %v1429_v15 }
  0xc3   : > { %v717_v54 = vpack.c.b16 %v715_v49, %v714_v48  ;;  %v1111_v25 = vsel %vm494_vm15, 1.0, %v1322_v17 }
  0xc4   : > { %v569_v61 = vpop.permute.xlu0 %568  ;;  %v506_v29 = vpack.c.bf16 %v1111_v25, %v1111_v25 }
  0xc5   : > { %1154 = vmatmul.msk.bf16.gmra.mxu3 %vm740_vm2, %v717_v54  ;;  %v544_v56 = vpop.permute.xlu1 %543  ;;  %vm577_vm11 = vcmp.eq.s32.totalorder %v569_v61, %v1429_v15 }
  0xc6   : > { %vm550_vm8 = vcmp.eq.s32.totalorder %v544_v56, %v1429_v15  ;;  %v1122_v5 = vsel %vm577_vm11, 1.0, %v1322_v17  ;;  %v674_v32 = vunpack.c.l.b16 %v506_v29 }
  0xc7   : > { %v1119_v58 = vsel %vm550_vm8, 1.0, %v1322_v17  ;;  %v589_v10 = vpack.c.bf16 %v1122_v5, %v1122_v5 }
  0xc8   : > { %v562_v60 = vpack.c.bf16 %v1119_v58, %v1119_v58  ;;  %1145 = vmatmul.msk.bf16.gmra.mxu1 %vm740_vm2, %v676_v57 }
  0xc9   : > { %v703_v18 = vunpack.c.l.b16 %v589_v10 }
  0xca   : > { %v694_v62 = vunpack.c.l.b16 %v562_v60  ;;  %v566_v0 = vpop.permute.xlu2 %565 }
  0xcb   : > { %vm576_vm10 = vcmp.eq.s32.totalorder %v566_v0, %v1429_v15 }
  0xcc   : > { %v697_v1 = vpack.c.b16 %v695_v59, %v694_v62  ;;  %v1121_v4 = vsel %vm576_vm10, 1.0, %v1322_v17 }
  0xcd   : > { %v588_v9 = vpack.c.bf16 %v1121_v4, %v1121_v4 }
  0xce   : > { %1150 = vmatmul.msk.bf16.gmra.mxu2 %vm740_vm2, %v697_v1  ;;  %v622_v3 = vpop.permute.xlu1 %621 }
  0xcf   : > { %vm632_vm12 = vcmp.eq.s32.totalorder %v622_v3, %v1429_v15  ;;  %v702_v13 = vunpack.c.l.b16 %v588_v9 }
  0xd0   : > { %v1129_v6 = vsel %vm632_vm12, 1.0, %v1322_v17 }
  0xd1   : > { %v644_v8 = vpack.c.bf16 %v1129_v6, %v1129_v6  ;;  %v706_v23 = vpack.c.b16 %v703_v18, %v702_v13 }
  0xd3   : > { %v722_v11 = vunpack.c.l.b16 %v644_v8  ;;  %v631_v27 = vpop.permute.xlu2 %630 }
  0xd4   : > { %vm635_vm1 = vcmp.eq.s32.totalorder %v631_v27, %v1429_v15 }
  0xd5   : > { %v726_v14 = vpack.c.b16 %v723_v7, %v722_v11  ;;  %v1132_v34 = vsel %vm635_vm1, 1.0, %v1322_v17 }
  0xd6   : > { %v647_v36 = vpack.c.bf16 %v1132_v34, %v1132_v34 }
  0xd7   : > { %1155 = vmatmul.msk.bf16.gmra.mxu3 %vm740_vm2, %v726_v14  ;;  %v429_v19 = vpop.permute.xlu1 %428 }
  0xd8   : > { %vm437_vm14 = vcmp.eq.s32.totalorder %v429_v19, %v1429_v15  ;;  %v725_v39 = vunpack.c.l.b16 %v647_v36 }
  0xd9   : > { %v1102_v20 = vsel %vm437_vm14, 1.0, %v1322_v17 }
  0xda   : > { %v449_v22 = vpack.c.bf16 %v1102_v20, %v1102_v20 }
  0xdc   : > { %v653_v24 = vunpack.c.l.b16 %v449_v22  ;;  %v405_v22 = vadd.f32 %v1252_v12, %v404_v50 }
  0xde   : > { %v656_v26 = vpack.c.b16 %v653_v24, %v652_v21  ;;  %1151 = vmatmul.msk.bf16.gmra.mxu2 %vm740_vm2, %v706_v23 }
  0xe0   : > { %v491_v28 = vpop.permute.xlu1 %490  ;;  %1141 = vmatmul.msk.bf16.vlgmr.msrb.gmra.mxu0 %vm740_vm2, %v656_v26 }
  0xe1   : > { %vm495_vm0 = vcmp.eq.s32.totalorder %v491_v28, %v1429_v15 }
  0xe2   : > { %v1112_v30 = vsel %vm495_vm0, 1.0, %v1322_v17 }
  0xe3   : > { %v507_v31 = vpack.c.bf16 %v1112_v30, %v1112_v30 }
  0xe5   : > { %v675_v33 = vunpack.c.l.b16 %v507_v31 }
  0xe7   : > { %v677_v35 = vpack.c.b16 %v675_v33, %v674_v32 }
  0xe9   : > { %1146 = vmatmul.msk.bf16.gmra.mxu1 %vm740_vm2, %v677_v35  ;;  %v628_v37 = vpop.permute.xlu1 %627 }
  0xea   : > { %vm634_vm3 = vcmp.eq.s32.totalorder %v628_v37, %v1429_v15 }
  0xeb   : > { %v1131_v38 = vsel %vm634_vm3, 1.0, %v1322_v17  ;;  %v406_v17 = vpop.f32.mrf.mxu0 }
  0xec   : > { %v646_v40 = vpack.c.bf16 %v1131_v38, %v1131_v38 }
  0xee   : > { %v724_v41 = vunpack.c.l.b16 %v646_v40  ;;  %v407_v40 = vadd.f32 %v1252_v12, %v406_v17 }
  0xf0   : > { %v727_v42 = vpack.c.b16 %v725_v39, %v724_v41 }
  0xf2   : > { %1156 = vmatmul.msk.bf16.gmra.mxu3 %vm740_vm2, %v727_v42 }
  0xfb   : > { %v409_v56 = vpop.f32.mrf.mxu0 }
 0x103   : > { %v1532_v62 = vpop.f32.mrf.mxu0 }
 0x104   : > { %v1528_v48 = vpop.f32.mrf.mxu3 }
 0x10c   : > { %v1530_v52 = vpop.f32.mrf.mxu3 }
 0x115   : > { %v803_v43 = vpop.f32.mrf.mxu1 }
 0x11b   : > { %v828_v44 = vpop.f32.mrf.mxu2 }
 0x11d   : > { %v805_v45 = vpop.f32.mrf.mxu1 }
 0x123   : > { %v830_v46 = vpop.f32.mrf.mxu2 }
 0x125   : > { %v808_v47 = vpop.f32.mrf.mxu1 }
 0x12d   : > { %v833_v49 = vpop.f32.mrf.mxu2  ;;  %v810_v51 = vpop.f32.mrf.mxu1 }
 0x12e   : > { %v858_v53 = vpop.f32.mrf.mxu3 }
 0x135   : > { %v835_v15 = vpop.f32.mrf.mxu2  ;;  %v813_v55 = vpop.f32.mrf.mxu1 }
 0x136   : > { %v860_v57 = vpop.f32.mrf.mxu3  ;;  %v880_v10 = vmax.f32 %v803_v43, %v813_v55 }
 0x13d   : > { %v815_v59 = vpop.f32.mrf.mxu1 }
 0x13e   : > { %v881_v29 = vmax.f32 %v805_v45, %v815_v59 }
 0x13f   : > { %v838_v54 = vpop.f32.mrf.mxu2 }
 0x145   : > { %v818_v63 = vpop.f32.mrf.mxu1 }
 0x147   : > { %v840_v58 = vpop.f32.mrf.mxu2 }
 0x148   : > { %v863_v60 = vpop.f32.mrf.mxu3 }
 0x14d   : > { %v820_v3 = vpop.f32.mrf.mxu1 }
 0x150   : > { %v865_v1 = vpop.f32.mrf.mxu3 }
 0x151   : > { %v843_v61 = vpop.f32.mrf.mxu2 }
 0x159   : > { %v845_v0 = vpop.f32.mrf.mxu2 }
 0x15a   : > { %v868_v8 = vpop.f32.mrf.mxu3 }
 0x15d   : > { %v798_v2 = vpop.f32.mrf.mxu0 }
 0x15e   : > { %v878_v4 = vmax.f32 %v798_v2, %v808_v47 }
 0x160   : > { %v882_v5 = vmax.f32 %v878_v4, %v818_v63 }
 0x161   : > { %v848_v6 = vpop.f32.mrf.mxu2 }
 0x162   : > { %v886_v7 = vmax.f32 %v882_v5, %v828_v44  ;;  %v870_v30 = vpop.f32.mrf.mxu3 }
 0x164   : > { %v890_v9 = vmax.f32 %v886_v7, %v838_v54 }
 0x165   : > { %v800_v11 = vpop.f32.mrf.mxu0 }
 0x166   : > { %v894_v14 = vmax.f32 %v890_v9, %v848_v6  ;;  %v879_v16 = vmax.f32 %v800_v11, %v810_v51  ;;  %v823_v13 = vpop.f32.mrf.mxu1 }
 0x167   : > { %v884_v18 = vmax.f32 %v880_v10, %v823_v13 }
 0x168   : > { %v898_v19 = vmax.f32 %v894_v14, %v858_v53  ;;  %v883_v20 = vmax.f32 %v879_v16, %v820_v3 }
 0x169   : > { %v888_v21 = vmax.f32 %v884_v18, %v833_v49  ;;  %v850_v25 = vpop.f32.mrf.mxu2 }
 0x16a   : > { %v902_v23 = vmax.f32 %v898_v19, %v868_v8  ;;  %v887_v24 = vmax.f32 %v883_v20, %v830_v46  ;;  %v410_v46 = vadd.f32 %v1252_v12, %v409_v56  ;;  %v412_v56 = vadd.f32 %v1252_v12, %v1532_v62 }
 0x16b   : > { %v892_v27 = vmax.f32 %v888_v21, %v843_v61 }
 0x16c   : > { %v906_v26 = vadd.f32 %v902_v23, %v405_v22  ;;  %v891_v28 = vmax.f32 %v887_v24, %v840_v58 }
 0x16d   : > { %v896_v37 = vmax.f32 %v892_v27, %v1528_v48 }
 0x16e   : > { %vm910_vm2 = vcmp.gt.f32.partialorder %v906_v26, 0.0  ;;  %v914_v31 = vmul.f32 0.2, %v906_v26  ;;  %v895_v32 = vmax.f32 %v891_v28, %v850_v25  ;;  %v825_v33 = vpop.f32.mrf.mxu1 }
 0x16f   : > { %v885_v34 = vmax.f32 %v881_v29, %v825_v33  ;;  %v900_v44 = vmax.f32 %v896_v37, %v863_v60 }
 0x170   : > { %v918_v35 = vsel %vm910_vm2, %v906_v26, %v914_v31  ;;  %v899_v36 = vmax.f32 %v895_v32, %v860_v57 }
 0x171   : > { %v922_v38 = vpack.c.bf16 %v918_v35, %v918_v35  ;;  %v889_v39 = vmax.f32 %v885_v34, %v835_v15 }
 0x172   : > { %v903_v41 = vmax.f32 %v899_v36, %v870_v30 }
 0x173   : > { %927 = vst.msk [vmem:[%s1541_s23] sm:$0xf] %vm926_vm4, %v922_v38  ;;  %v893_v43 = vmax.f32 %v889_v39, %v845_v0 }
 0x174   : > { %v907_v42 = vadd.f32 %v903_v41, %v407_v40 }
 0x175   : > { %v873_v45 = vpop.f32.mrf.mxu3  ;;  %v897_v48 = vmax.f32 %v893_v43, %v1530_v52 }
 0x176   : > { %vm911_vm5 = vcmp.gt.f32.partialorder %v907_v42, 0.0  ;;  %v915_v47 = vmul.f32 0.2, %v907_v42  ;;  %v904_v49 = vmax.f32 %v900_v44, %v873_v45 }
 0x177   : > { %v901_v54 = vmax.f32 %v897_v48, %v865_v1 }
 0x178   : > { %v919_v50 = vsel %vm911_vm5, %v907_v42, %v915_v47  ;;  %v908_v51 = vadd.f32 %v904_v49, %v410_v46 }
 0x179   : > { %v923_v53 = vpack.c.bf16 %v919_v50, %v919_v50 }
 0x17a   : > { %vm912_vm6 = vcmp.gt.f32.partialorder %v908_v51, 0.0  ;;  %v916_v15 = vmul.f32 0.2, %v908_v51 }
 0x17b   : > { %928 = vst.msk [vmem:[%s1541_s23 + $0x4] sm:$0xf] %vm926_vm4, %v923_v53 }
 0x17c   : > { %v920_v17 = vsel %vm912_vm6, %v908_v51, %v916_v15 }
 0x17d   : > { %v924_v55 = vpack.c.bf16 %v920_v17, %v920_v17  ;;  %v875_v57 = vpop.f32.mrf.mxu3 }
 0x17e   : > { %v905_v58 = vmax.f32 %v901_v54, %v875_v57 }
 0x17f   : > { %929 = vst.msk [vmem:[%s1541_s23 + $0x8] sm:$0xf] %vm926_vm4, %v924_v55 }
 0x180   : > { %v909_v59 = vadd.f32 %v905_v58, %v412_v56 }
 0x182   : > { %vm913_vm7 = vcmp.gt.f32.partialorder %v909_v59, 0.0  ;;  %v917_v60 = vmul.f32 0.2, %v909_v59 }
 0x184   : > { %v921_v61 = vsel %vm913_vm7, %v909_v59, %v917_v60 }
 0x185   : > { %v925_v52 = vpack.c.bf16 %v921_v61, %v921_v61 }
 0x187   : > { %930 = vst.msk [vmem:[%s1541_s23 + $0xc] sm:$0xf] %vm926_vm4, %v925_v52 }
 0x188 PF: > { %s16_s20 = sadd.s32 1, %s1309_s20   ;;  %s1569_s18 = smov %s1305_s19 }
 0x189   : > { %p13_p8 = scmp.ge.s32.totalorder %s16_s20, 4   ;;  %s1570_s19 = smov %s1572_s22 }
 0x18b   :  { %15 = sbr.rel (!%p13_p8) target bundleno = 2 (0x2), region = 81 }
 0x190   :  { %961 = vsyncpa [#allocation3], 1 }
 0x191   :  { %963 = vsyncpa [#allocation3 + $0x1], 1 }

// kernel: _lambda_.23
= control target key start
LH: loop header
LB: loop body
LE: loop exit
PB: predicated region body
PF: predicated region fallthrough
CT: control target
= control target key end

     0   :  { %s730_s9 = smov 0   ;;  %s732_s10 = smov 0   ;;  %s884_s0 = inlined_call_operand.vmem [shape: bf16[2,32,128], index: 0, kind: input, shape index: {}]   ;;  %s885_s1 = inlined_call_operand.vmem [shape: f32[2,1,32], index: 1, kind: input, shape index: {}]   ;;  %s886_s2 = inlined_call_operand.vmem [shape: s32[2,32,8], index: 2, kind: output, shape index: {}]  }
   0x1   :  { %s734_s11 = smov 0  }
   0x2 LB: > { %s24_s12 = sadd.s32 1, %s673_s10  ;;  %p491_p0 = scmp.ge.s32.totalorder %s677_s11, 1  ;;  %s677_s11 = sphi %s734_s11, %s12_s11   ;;  %s673_s10 = sphi %s732_s10, %s894_s10   ;;  %s669_s9 = sphi %s730_s9, %s893_s9  }
   0x3   : > { %p26_p1 = scmp.ge.s32.totalorder %s24_s12, 2  ;;  %p134_p2 = scmp.lt.s32.totalorder %s677_s11, 3 }
   0x5   : > { %s896_s12 = smov (%p26_p1, %s24_s12), 0  ;;  %p135_p3 = pnand %p491_p0, %p134_p2 }
   0x6   : > { %p163_p4 = scmp.lt.s32.totalorder (!%p135_p3), %s669_s9, 1  ;;  %s777_s24 = smov (!%p135_p3), 0  }
   0x7   : > { %138 = sbr.rel (%p135_p3) target bundleno = 542 (0x21e), region = 28 }
   0xc   : > { %s898_s9 = smov (!%p163_p4, %s669_s9), 1  ;;  %v250_v4 = vlaneseq  ;;  %v761_v19 = vmov 0   ;;  %v763_v20 = vmov 0   ;;  %v765_v21 = vmov 0  }
   0xd   : > { %s514_s13 = sshll.u32 %s898_s9, 4  ;;  %s515_s14 = sshll.u32 %s898_s9, 5  ;;  %v767_v22 = vmov 0  }
   0xe   : > { %s167_s17 = scalar_lea.vmem %s884_s0, %s514_s13  ;;  %s754_s20 = scalar_lea.vmem %s886_s2, %s515_s14  ;;  %v759_v5 = vand.u32 127, %v250_v4 }
   0xf   : > { %v519_v0 = vld [vmem:[%s167_s17 + $0x8] sm:$0xff]  ;;  %s170_s23 = scalar_lea.vmem %s885_s1, %s898_s9  ;;  %v518_v1 = vld [vmem:[%s167_s17] sm:$0xff] }
  0x10   : > { %225 = vmatpush.bf16.xpose.msra.mxu0 %v519_v0  ;;  %520 = vmatpush.bf16.xpose.msra.mxu1 %v519_v0  ;;  %v516_v2 = vld [vmem:[%s167_s17] sm:$0xff]  ;;  %v517_v3 = vld [vmem:[%s167_s17 + $0x8] sm:$0xff] }
  0x11   : > { %v618_v6 = vld [vmem:[%s170_s23] ss:$0 sm:$0xff] }
  0x18   : > { %226 = vmatpush.bf16.xpose.msra.mxu0 %v518_v1  ;;  %521 = vmatpush.bf16.xpose.msra.mxu1 %v518_v1 }
  0x1f   : > { %227 = vmatmul.bf16.vlgmr.msra.gmra.mxu0 %v516_v2  ;;  %232 = vmatmul.bf16.vlgmr.msra.gmra.mxu1 %v517_v3 }
  0x9c   : > { %v228_v7 = vpop.f32.mrf.mxu0  ;;  %v233_v8 = vpop.f32.mrf.mxu1 }
  0x9d   : > { %v238_v9 = vmul.f32 2.0, %v228_v7  ;;  %v240_v10 = vmul.f32 2.0, %v233_v8 }
  0x9f   : > { %v246_v11 = vsub.f32 %v238_v9, %v618_v6   ;;  %v248_v12 = vsub.f32 %v240_v10, %v618_v6  }
  0xa4   : > { %v230_v13 = vpop.f32.mrf.mxu0  ;;  %v235_v14 = vpop.f32.mrf.mxu1 }
  0xa5   : > { %v239_v15 = vmul.f32 2.0, %v230_v13  ;;  %v241_v16 = vmul.f32 2.0, %v235_v14 }
  0xa7   : > { %v247_v17 = vsub.f32 %v239_v15, %v618_v6   ;;  %v249_v18 = vsub.f32 %v241_v16, %v618_v6  }
  0xa8 LB: >> { %vm266_vm0 = vcmask 261120   ;;  %v347_v1 = vstv %s713_s24  ;;  %s257_s24 = sadd.s32 1, %s713_s24   ;;  %s713_s24 = sphi %s777_s24, %s257_s24   ;;  %v709_v11 = vphi %v246_v11, %v357_v11   ;;  %v705_v17 = vphi %v247_v17, %v358_v17   ;;  %v701_v12 = vphi %v248_v12, %v359_v12   ;;  %v697_v18 = vphi %v249_v18, %v360_v18   ;;  %v693_v22 = vphi %v767_v22, %v892_v22   ;;  %v689_v21 = vphi %v765_v21, %v891_v21   ;;  %v685_v20 = vphi %v763_v20, %v890_v20   ;;  %v681_v19 = vphi %v761_v19, %v889_v19  }
  0xa9   : >> { %v267_v23 = vsel %vm266_vm0, %v709_v11, -inf  ;;  %v273_v24 = vsel %vm266_vm0, %v701_v12, -inf  ;;  %v270_v25 = vsel %vm266_vm0, %v705_v17, -inf  ;;  %v276_v26 = vsel %vm266_vm0, %v697_v18, -inf  ;;  %p254_p5 = scmp.ge.s32.totalorder %s257_s24, 8  }
  0xaa   : >> { %268 = vmax.xlane.f32.xlu0 %v267_v23  ;;  %274 = vmax.xlane.f32.xlu1 %v273_v24  ;;  %vm828_vm9 = vcmp.eq.s32.totalorder %v759_v5, %v347_v1  ;;  %vm361_vm14 = vcmask (%p254_p5), 64512  }
  0xb2   : >> { %271 = vmax.xlane.f32.xlu0 %v270_v25  ;;  %277 = vmax.xlane.f32.xlu1 %v276_v26 }
 0x11d   : >> { %v269_v27 = vpop.xlane.xlu0 %268  ;;  %v275_v28 = vpop.xlane.xlu1 %274 }
 0x11e   : >> { %vm279_vm1 = vcmp.eq.f32.partialorder %v709_v11, %v269_v27  ;;  %vm281_vm2 = vcmp.eq.f32.partialorder %v701_v12, %v275_v28 }
 0x11f   : >> { %v283_v29 = vsel %vm279_vm1, %v759_v5, 32  ;;  %v285_v30 = vsel %vm281_vm2, %v759_v5, 32 }
 0x120   : >> { %v287_v31 = vsel %vm266_vm0, %v283_v29, 2147483647  ;;  %v317_v32 = vsel %vm266_vm0, %v285_v30, 2147483647 }
 0x121   : >> { %v289_v33 = vshra.s32 %v287_v31, 16  ;;  %v319_v34 = vshra.s32 %v317_v32, 16  ;;  %v288_v47 = vand.u32 65535, %v287_v31  ;;  %v318_v48 = vand.u32 65535, %v317_v32 }
 0x123   : >> { %v291_v35 = vcvt.s32.f32 %v289_v33  ;;  %v321_v36 = vcvt.s32.f32 %v319_v34  ;;  %v290_v51 = vcvt.s32.f32 %v288_v47  ;;  %v320_v52 = vcvt.s32.f32 %v318_v48 }
 0x125   : >> { %292 = vmin.xlane.f32.xlu2 %v291_v35  ;;  %v272_v37 = vpop.xlane.xlu0 %271  ;;  %322 = vmin.xlane.f32.xlu0 %v321_v36  ;;  %v278_v38 = vpop.xlane.xlu1 %277 }
 0x126   : >> { %vm280_vm3 = vcmp.eq.f32.partialorder %v705_v17, %v272_v37  ;;  %vm282_vm4 = vcmp.eq.f32.partialorder %v697_v18, %v278_v38 }
 0x127   : >> { %v284_v39 = vsel %vm280_vm3, %v759_v5, 32  ;;  %v286_v40 = vsel %vm282_vm4, %v759_v5, 32 }
 0x128   : >> { %v302_v41 = vsel %vm266_vm0, %v284_v39, 2147483647  ;;  %v332_v42 = vsel %vm266_vm0, %v286_v40, 2147483647 }
 0x129   : >> { %v304_v43 = vshra.s32 %v302_v41, 16  ;;  %v334_v44 = vshra.s32 %v332_v42, 16  ;;  %v303_v55 = vand.u32 65535, %v302_v41  ;;  %v333_v56 = vand.u32 65535, %v332_v42 }
 0x12b   : >> { %v306_v45 = vcvt.s32.f32 %v304_v43  ;;  %v336_v46 = vcvt.s32.f32 %v334_v44  ;;  %v305_v59 = vcvt.s32.f32 %v303_v55  ;;  %v335_v60 = vcvt.s32.f32 %v333_v56 }
 0x12d   : >> { %307 = vmin.xlane.f32.xlu2 %v306_v45  ;;  %337 = vmin.xlane.f32.xlu1 %v336_v46 }
 0x198   : >> { %v293_v49 = vpop.xlane.xlu2 %292  ;;  %v323_v50 = vpop.xlane.xlu0 %322 }
 0x199   : >> { %vm294_vm5 = vcmp.eq.f32.partialorder %v291_v35, %v293_v49  ;;  %vm324_vm6 = vcmp.eq.f32.partialorder %v321_v36, %v323_v50  ;;  %v299_v63 = vcvt.f32.s32 %v293_v49  ;;  %v329_v0 = vcvt.f32.s32 %v323_v50 }
 0x19a   : >> { %v295_v53 = vsel %vm294_vm5, %v290_v51, inf  ;;  %v325_v54 = vsel %vm324_vm6, %v320_v52, inf }
 0x19b   : >> { %296 = vmin.xlane.f32.xlu2 %v295_v53  ;;  %326 = vmin.xlane.f32.xlu1 %v325_v54  ;;  %v300_v4 = vshll.u32 %v299_v63, 16  ;;  %v330_v6 = vshll.u32 %v329_v0, 16 }
 0x1a0   : >> { %v308_v57 = vpop.xlane.xlu2 %307  ;;  %v338_v58 = vpop.xlane.xlu1 %337 }
 0x1a1   : >> { %vm309_vm7 = vcmp.eq.f32.partialorder %v306_v45, %v308_v57  ;;  %vm339_vm8 = vcmp.eq.f32.partialorder %v336_v46, %v338_v58  ;;  %v314_v14 = vcvt.f32.s32 %v308_v57  ;;  %v344_v15 = vcvt.f32.s32 %v338_v58 }
 0x1a2   : >> { %v310_v61 = vsel %vm309_vm7, %v305_v59, inf  ;;  %v340_v62 = vsel %vm339_vm8, %v335_v60, inf }
 0x1a3   : >> { %311 = vmin.xlane.f32.xlu0 %v310_v61  ;;  %341 = vmin.xlane.f32.xlu2 %v340_v62  ;;  %v315_v26 = vshll.u32 %v314_v14, 16  ;;  %v345_v27 = vshll.u32 %v344_v15, 16 }
 0x20e   : >> { %v297_v2 = vpop.xlane.xlu2 %296  ;;  %v327_v3 = vpop.xlane.xlu1 %326 }
 0x20f   : >> { %v298_v7 = vcvt.f32.s32 %v297_v2  ;;  %v328_v8 = vcvt.f32.s32 %v327_v3 }
 0x211   : >> { %v301_v10 = vadd.s32 %v300_v4, %v298_v7  ;;  %v331_v13 = vadd.s32 %v330_v6, %v328_v8 }
 0x213   : >> { %v349_v16 = vsel %vm828_vm9, %v301_v10, %v693_v22   ;;  %vm353_vm10 = vcmp.eq.s32.totalorder %v759_v5, %v301_v10  ;;  %v351_v23 = vsel %vm828_vm9, %v331_v13, %v685_v20   ;;  %vm355_vm11 = vcmp.eq.s32.totalorder %v759_v5, %v331_v13 }
 0x214   : >> { %v357_v11 = vsel %vm353_vm10, -inf, %v709_v11   ;;  %v359_v12 = vsel %vm355_vm11, -inf, %v701_v12   ;;  %v890_v20 = vmov %v351_v23  ;;  %362 = vst.msk [vmem:[%s754_s20] sm:$0xff] (%p254_p5), %vm361_vm14, %v349_v16 }
 0x215   : > { %364 = vst.msk [vmem:[%s754_s20 + $0x10] sm:$0xff] (%p254_p5), %vm361_vm14, %v351_v23 }
 0x216   : >> { %v312_v24 = vpop.xlane.xlu0 %311  ;;  %v342_v25 = vpop.xlane.xlu2 %341 }
 0x217   : >> { %v313_v28 = vcvt.f32.s32 %v312_v24  ;;  %v343_v29 = vcvt.f32.s32 %v342_v25 }
 0x219   : >> { %v316_v30 = vadd.s32 %v315_v26, %v313_v28  ;;  %v346_v22 = vadd.s32 %v345_v27, %v343_v29  ;;  %256 = sbr.rel (!%p254_p5) target bundleno = 168 (0xa8), region = 69 }
 0x21b   : >> { %v350_v31 = vsel %vm828_vm9, %v316_v30, %v689_v21   ;;  %vm354_vm12 = vcmp.eq.s32.totalorder %v759_v5, %v316_v30  ;;  %v352_v32 = vsel %vm828_vm9, %v346_v22, %v681_v19   ;;  %vm356_vm13 = vcmp.eq.s32.totalorder %v759_v5, %v346_v22 }
 0x21c   : >> { %v358_v17 = vsel %vm354_vm12, -inf, %v705_v17   ;;  %v360_v18 = vsel %vm356_vm13, -inf, %v697_v18   ;;  %v889_v19 = vmov %v352_v32  ;;  %v891_v21 = vmov %v350_v31  ;;  %363 = vst.msk [vmem:[%s754_s20 + $0x8] sm:$0xff] (%p254_p5), %vm361_vm14, %v350_v31 }
 0x21d   : >> { %v892_v22 = vmov %v349_v16  ;;  %365 = vst.msk [vmem:[%s754_s20 + $0x18] sm:$0xff] (%p254_p5), %vm361_vm14, %v352_v32 }
 0x21e PF: > { %s12_s11 = sadd.s32 1, %s677_s11   ;;  %s893_s9 = smov %s673_s10 }
 0x21f   : > { %p9_p6 = scmp.ge.s32.totalorder %s12_s11, 4   ;;  %s894_s10 = smov %s896_s12 }
 0x221   :  { %11 = sbr.rel (!%p9_p6) target bundleno = 2 (0x2), region = 80 }

// kernel: _lambda_.24
= control target key start
LH: loop header
LB: loop body
LE: loop exit
PB: predicated region body
PF: predicated region fallthrough
CT: control target
= control target key end

     0   :  { %7 = vsyncpa [#allocation3], 0  ;;  %s699_s9 = smov 0   ;;  %s701_s10 = smov 0   ;;  %s744_s0 = inlined_call_operand.vmem [shape: bf16[2,32,128], index: 0, kind: input, shape index: {}]   ;;  %s745_s1 = inlined_call_operand.hbm [shape: bf16[128,256], index: 1, kind: input, shape index: {}]   ;;  %s746_s2 = inlined_call_operand.vmem [shape: bf16[2,32,256], index: 2, kind: output, shape index: {}]  }
   0x1   :  { %s703_s11 = smov 0  }
   0x2 LB: > { %s465_s12 = sadd.s32 4294967295, %s679_s11   ;;  %s25_s13 = sadd.s32 1, %s675_s10  ;;  %s679_s11 = sphi %s703_s11, %s13_s11   ;;  %s675_s10 = sphi %s701_s10, %s748_s10   ;;  %s671_s9 = sphi %s699_s9, %s747_s9  }
   0x3   : > { %p27_p0 = scmp.ge.s32.totalorder %s25_s13, 2  ;;  %p467_p1 = scmp.ge.s32.totalorder %s679_s11, 1 }
   0x4   : > { %p107_p2 = scmp.lt.s32.totalorder %s679_s11, 3  ;;  %p594_p4 = scmp.eq.s32.totalorder %s465_s12, 0 }
   0x5   : > { %s750_s13 = smov (%p27_p0, %s25_s13), 0  ;;  %s118_s16 = sshll.u32 %s745_s1, 4  ;;  %s119_s16 = int_to_ptr.hbm [resolvable:$true] %s118_s16 }
   0x6   : > { %p108_p3 = pnand %p467_p1, %p107_p2  ;;  %s681_s17 = smov [#allocation2]  }
   0x7   : > { %s120_s18 = sshll.u32 %s681_s17, 4  ;;  %s682_s19 = smov 128   ;;  %s121_s18 = int_to_ptr.vmem [resolvable:$true] %s120_s18 }
   0x8   : > { %p590_p5 = pneg %p108_p3  ;;  %s683_s20 = smov 8  }
   0x9   : > { %149 = sbr.rel (%p108_p3) target bundleno = 193 (0xc1), region = 28 }
   0xa   : > { %p591_p6 = pnand %p594_p4, %p590_p5 }
   0xc   : > { %593 = dma.hbm_to_vmem [thread:$0]  (!%p591_p6), %s119_s16, 2048, %s121_s18, [#allocation3], %s682_s19, %s682_s19, %s683_s20  }
   0xe   : > { %666 = dma.done.wait (%p594_p4), [#allocation3], 2048  }
   0xf   : > { %668 = vsyncadd (%p594_p4), [#allocation3], 4294965248  ;;  %v542_v0 = vld [vmem:[#allocation2 + $0x70] sm:$0xf]  ;;  %v569_v1 = vld [vmem:[#allocation2 + $0x74] sm:$0xf0] }
  0x10   : > { %v568_v2 = vld [vmem:[#allocation2 + $0x74] sm:$0xf]  ;;  %v543_v3 = vor.u32 %v569_v1, %v542_v0  ;;  %v544_v4 = vld [vmem:[#allocation2 + $0x78] sm:$0xf0]  ;;  %v534_v5 = vld [vmem:[#allocation2 + $0x60] sm:$0xf] }
  0x11   : > { %v567_v6 = vld [vmem:[#allocation2 + $0x64] sm:$0xf0]  ;;  %v547_v7 = vor.u32 %v568_v2, %v544_v4  ;;  %v566_v8 = vld [vmem:[#allocation2 + $0x64] sm:$0xf]  ;;  %v536_v9 = vld [vmem:[#allocation2 + $0x68] sm:$0xf0] }
  0x12   : > { %314 = vmatpush.bf16.msra.mxu0 %v543_v3  ;;  %570 = vmatpush.bf16.msra.mxu2 %v543_v3  ;;  %v535_v10 = vor.u32 %v567_v6, %v534_v5  ;;  %v539_v11 = vor.u32 %v566_v8, %v536_v9  ;;  %v526_v12 = vld [vmem:[#allocation2 + $0x50] sm:$0xf]  ;;  %v565_v13 = vld [vmem:[#allocation2 + $0x54] sm:$0xf0]  ;;  %v564_v14 = vld [vmem:[#allocation2 + $0x54] sm:$0xf] }
  0x13   : > { %333 = vmatpush.bf16.msra.mxu1 %v547_v7  ;;  %578 = vmatpush.bf16.msra.mxu3 %v547_v7  ;;  %v528_v15 = vld [vmem:[#allocation2 + $0x58] sm:$0xf0]  ;;  %v527_v16 = vor.u32 %v565_v13, %v526_v12  ;;  %v518_v18 = vld [vmem:[#allocation2 + $0x40] sm:$0xf]  ;;  %v563_v19 = vld [vmem:[#allocation2 + $0x44] sm:$0xf0] }
  0x14   : > { %v531_v17 = vor.u32 %v564_v14, %v528_v15  ;;  %v562_v20 = vld [vmem:[#allocation2 + $0x44] sm:$0xf]  ;;  %v520_v21 = vld [vmem:[#allocation2 + $0x48] sm:$0xf0]  ;;  %v519_v22 = vor.u32 %v563_v19, %v518_v18  ;;  %v510_v24 = vld [vmem:[#allocation2 + $0x30] sm:$0xf] }
  0x15   : > { %v523_v23 = vor.u32 %v562_v20, %v520_v21  ;;  %v561_v25 = vld [vmem:[#allocation2 + $0x34] sm:$0xf0]  ;;  %v560_v26 = vld [vmem:[#allocation2 + $0x34] sm:$0xf]  ;;  %v512_v27 = vld [vmem:[#allocation2 + $0x38] sm:$0xf0] }
  0x16   : > { %315 = vmatpush.bf16.msra.mxu0 %v535_v10  ;;  %571 = vmatpush.bf16.msra.mxu2 %v535_v10  ;;  %v511_v28 = vor.u32 %v561_v25, %v510_v24  ;;  %v515_v29 = vor.u32 %v560_v26, %v512_v27  ;;  %v502_v30 = vld [vmem:[#allocation2 + $0x20] sm:$0xf]  ;;  %v559_v31 = vld [vmem:[#allocation2 + $0x24] sm:$0xf0]  ;;  %p182_p7 = scmp.lt.s32.totalorder %s671_s9, 1 }
  0x17   : > { %334 = vmatpush.bf16.msra.mxu1 %v539_v11  ;;  %579 = vmatpush.bf16.msra.mxu3 %v539_v11  ;;  %v558_v32 = vld [vmem:[#allocation2 + $0x24] sm:$0xf]  ;;  %v504_v33 = vld [vmem:[#allocation2 + $0x28] sm:$0xf0]  ;;  %v503_v34 = vor.u32 %v559_v31, %v502_v30  ;;  %v494_v36 = vld [vmem:[#allocation2 + $0x10] sm:$0xf] }
  0x18   : > { %v507_v35 = vor.u32 %v558_v32, %v504_v33  ;;  %v557_v37 = vld [vmem:[#allocation2 + $0x14] sm:$0xf0]  ;;  %s752_s9 = smov (!%p182_p7, %s671_s9), 1  ;;  %v556_v38 = vld [vmem:[#allocation2 + $0x14] sm:$0xf] }
  0x19   : > { %v496_v39 = vld [vmem:[#allocation2 + $0x18] sm:$0xf0]  ;;  %v495_v40 = vor.u32 %v557_v37, %v494_v36  ;;  %v486_v42 = vld [vmem:[#allocation2] sm:$0xf]  ;;  %v555_v43 = vld [vmem:[#allocation2 + $0x4] sm:$0xf0] }
  0x1a   : > { %316 = vmatpush.bf16.msra.mxu0 %v527_v16  ;;  %572 = vmatpush.bf16.msra.mxu2 %v527_v16  ;;  %v499_v41 = vor.u32 %v556_v38, %v496_v39  ;;  %s550_s21 = sshll.u32 %s752_s9, 4  ;;  %v554_v44 = vld [vmem:[#allocation2 + $0x4] sm:$0xf]  ;;  %v488_v45 = vld [vmem:[#allocation2 + $0x8] sm:$0xf0]  ;;  %v487_v46 = vor.u32 %v555_v43, %v486_v42  ;;  %s551_s25 = sshll.u32 %s752_s9, 5 }
  0x1b   : > { %335 = vmatpush.bf16.msra.mxu1 %v531_v17  ;;  %580 = vmatpush.bf16.msra.mxu3 %v531_v17  ;;  %s189_s24 = scalar_lea.vmem %s744_s0, %s550_s21  ;;  %v491_v47 = vor.u32 %v554_v44, %v488_v45  ;;  %s200_s28 = scalar_lea.vmem %s746_s2, %s551_s25 }
  0x1c   : > { %v552_v48 = vld [vmem:[%s189_s24] sm:$0xff]  ;;  %v553_v49 = vld [vmem:[%s189_s24 + $0x8] sm:$0xff] }
  0x1e   : > { %317 = vmatpush.bf16.msra.mxu0 %v519_v22  ;;  %573 = vmatpush.bf16.msra.mxu2 %v519_v22 }
  0x1f   : > { %336 = vmatpush.bf16.msra.mxu1 %v523_v23  ;;  %581 = vmatpush.bf16.msra.mxu3 %v523_v23 }
  0x22   : > { %318 = vmatpush.bf16.msra.mxu0 %v511_v28  ;;  %574 = vmatpush.bf16.msra.mxu2 %v511_v28 }
  0x23   : > { %337 = vmatpush.bf16.msra.mxu1 %v515_v29  ;;  %582 = vmatpush.bf16.msra.mxu3 %v515_v29 }
  0x26   : > { %319 = vmatpush.bf16.msra.mxu0 %v503_v34  ;;  %575 = vmatpush.bf16.msra.mxu2 %v503_v34 }
  0x27   : > { %338 = vmatpush.bf16.msra.mxu1 %v507_v35  ;;  %583 = vmatpush.bf16.msra.mxu3 %v507_v35 }
  0x2a   : > { %320 = vmatpush.bf16.msra.mxu0 %v495_v40  ;;  %576 = vmatpush.bf16.msra.mxu2 %v495_v40 }
  0x2b   : > { %339 = vmatpush.bf16.msra.mxu1 %v499_v41  ;;  %584 = vmatpush.bf16.msra.mxu3 %v499_v41 }
  0x2e   : > { %321 = vmatpush.bf16.msra.mxu0 %v487_v46  ;;  %577 = vmatpush.bf16.msra.mxu2 %v487_v46 }
  0x2f   : > { %340 = vmatpush.bf16.msra.mxu1 %v491_v47  ;;  %585 = vmatpush.bf16.msra.mxu3 %v491_v47 }
  0x31   : > { %322 = vmatmul.bf16.vlgmr.msra.gmra.mxu0 %v552_v48  ;;  %327 = vmatmul.bf16.vlgmr.msra.gmra.mxu2 %v553_v49 }
  0x32   : > { %341 = vmatmul.bf16.vlgmr.msra.gmra.mxu1 %v552_v48  ;;  %346 = vmatmul.bf16.vlgmr.msra.gmra.mxu3 %v553_v49 }
  0xae   : > { %v323_v50 = vpop.f32.mrf.mxu0 }
  0xaf   : > { %v342_v51 = vpop.f32.mrf.mxu1 }
  0xb0   : > { %v352_v52 = vpack.c.bf16 %v342_v51, %v323_v50 }
  0xb2   : > { %356 = vst [vmem:[%s200_s28] sm:$0xff] %v352_v52 }
  0xb4   : > { %v328_v53 = vpop.f32.mrf.mxu2 }
  0xb5   : > { %v347_v54 = vpop.f32.mrf.mxu3 }
  0xb6   : > { %v354_v55 = vpack.c.bf16 %v347_v54, %v328_v53  ;;  %v325_v56 = vpop.f32.mrf.mxu0 }
  0xb7   : > { %v344_v57 = vpop.f32.mrf.mxu1 }
  0xb8   : > { %358 = vst [vmem:[%s200_s28 + $0x10] sm:$0xff] %v354_v55  ;;  %v353_v58 = vpack.c.bf16 %v344_v57, %v325_v56 }
  0xba   : > { %357 = vst [vmem:[%s200_s28 + $0x8] sm:$0xff] %v353_v58 }
  0xbc   : > { %v330_v59 = vpop.f32.mrf.mxu2 }
  0xbd   : > { %v349_v60 = vpop.f32.mrf.mxu3 }
  0xbe   : > { %v355_v61 = vpack.c.bf16 %v349_v60, %v330_v59 }
  0xc0   : > { %359 = vst [vmem:[%s200_s28 + $0x18] sm:$0xff] %v355_v61 }
  0xc1 PF: > { %s13_s11 = sadd.s32 1, %s679_s11   ;;  %s747_s9 = smov %s675_s10 }
  0xc2   : > { %p10_p8 = scmp.ge.s32.totalorder %s13_s11, 4   ;;  %s748_s10 = smov %s750_s13 }
  0xc4   :  { %12 = sbr.rel (!%p10_p8) target bundleno = 2 (0x2), region = 63 }
  0xc9   :  { %392 = vsyncpa [#allocation3], 1 }
  0xca   :  { %394 = vsyncpa [#allocation3 + $0x1], 1 }

// kernel: _lambda_.22
= control target key start
LH: loop header
LB: loop body
LE: loop exit
PB: predicated region body
PF: predicated region fallthrough
CT: control target
= control target key end

     0   :  { %s1282_s18 = smov 0   ;;  %s1284_s19 = smov 0   ;;  %s1487_s0 = inlined_call_operand.vmem [shape: s32[2,32,8], index: 0, kind: input, shape index: {}]   ;;  %s1488_s1 = inlined_call_operand.vmem [shape: bf16[2,32,64], index: 1, kind: input, shape index: {}]   ;;  %s1489_s2 = inlined_call_operand.vmem [shape: bf16[2,32,128], index: 2, kind: input, shape index: {}]   ;;  %s1490_s3 = inlined_call_operand.vmem [shape: bf16[64,128], index: 3, kind: input, shape index: {}]   ;;  %s1491_s4 = inlined_call_operand.vmem [shape: f32[1,128], index: 4, kind: input, shape index: {}]   ;;  %s1492_s5 = inlined_call_operand.vmem [shape: bf16[2,32,128], index: 5, kind: output, shape index: {}]  }
   0x1   :  { %s1286_s20 = smov 0  }
   0x2 LB: > { %s27_s21 = sadd.s32 1, %s1237_s19  ;;  %p1034_p0 = scmp.ge.s32.totalorder %s1241_s20, 1  ;;  %s1241_s20 = sphi %s1286_s20, %s15_s20   ;;  %s1237_s19 = sphi %s1284_s19, %s1494_s19   ;;  %s1233_s18 = sphi %s1282_s18, %s1493_s18  }
   0x3   : > { %p29_p1 = scmp.ge.s32.totalorder %s27_s21, 2  ;;  %p235_p2 = scmp.lt.s32.totalorder %s1241_s20, 3 }
   0x5   : > { %s1496_s21 = smov (%p29_p1, %s27_s21), 0  ;;  %p236_p3 = pnand %p1034_p0, %p235_p2 }
   0x6   : > { %p286_p4 = scmp.lt.s32.totalorder (!%p236_p3), %s1233_s18, 1 }
   0x7   : > { %239 = sbr.rel (%p236_p3) target bundleno = 387 (0x183), region = 40 }
   0xc   : > { %v1243_v0 = vmov 3   ;;  %v1244_v1 = vmov 0   ;;  %s1498_s18 = smov (!%p286_p4, %s1233_s18), 1  ;;  %v1245_v2 = vmov 5   ;;  %v1246_v7 = vmov 1   ;;  %v1136_v35 = vld [vmem:[%s1490_s3 + $0x18] sm:$0xff] }
   0xd   : > { %1190 = vset.pattern.permute.xlu1 %v1243_v0  ;;  %1189 = vset.pattern.permute.xlu0 %v1244_v1  ;;  %s1127_s22 = sshll.u32 %s1498_s18, 5  ;;  %v1247_v8 = vmov 6   ;;  %v1248_v9 = vmov 2   ;;  %v1249_v10 = vmov 4   ;;  %s1335_s26 = sshll.u32 %s1498_s18, 4  ;;  %v1250_v11 = vmov 7  }
   0xe   : > { %1191 = vset.pattern.permute.xlu2 %v1245_v2  ;;  %s293_s25 = scalar_lea.vmem %s1487_s0, %s1127_s22  ;;  %s309_s29 = scalar_lea.vmem %s1489_s2, %s1335_s26  ;;  %v405_v14 = vlaneseq  ;;  %v1251_v17 = vmov 0.0   ;;  %vm723_vm2 = vcmask 261120   ;;  %382 = vmatpush.bf16.msra.mxu0 %v1136_v35  ;;  %v1135_v42 = vld [vmem:[%s1490_s3 + $0x10] sm:$0xff]  ;;  %v1134_v49 = vld [vmem:[%s1490_s3 + $0x8] sm:$0xff]  ;;  %v1133_v54 = vld [vmem:[%s1490_s3] sm:$0xff]  ;;  %vm371_vm11 = vcmask 523264  }
   0xf   : > { %v1308_v3 = vld [vmem:[%s293_s25 + $0x10] sm:$0xff]  ;;  %v1310_v4 = vld [vmem:[%s293_s25] sm:$0xff]  ;;  %v1315_v5 = vld [vmem:[%s293_s25 + $0x18] sm:$0xff]  ;;  %s1398_s15 = scalar_lea.vmem %s1488_s1, %s1335_s26  ;;  %s318_s23 = scalar_lea.vmem %s1492_s5, %s1335_s26 }
  0x10   : > { %414 = vperm.xlu0 %1189, %v1308_v3   ;;  %492 = vperm.xlu1 %1190, %v1310_v4   ;;  %v398_v6 = vld [vmem:[%s293_s25 + $0x8] sm:$0xff]  ;;  %v1345_v13 = vld [vmem:[%s309_s29] sm:$0xff]  ;;  %v1354_v15 = vand.u32 127, %v405_v14 }
  0x11   : > { %554 = vperm.xlu2 %1191, %v1308_v3   ;;  %v1342_v12 = vld [vmem:[%s309_s29 + $0x8] sm:$0xff]  ;;  %v1131_v60 = vld [vmem:[%s1398_s15] sm:$0xff] }
  0x12   : > { %1152 = vmatpush.bf16.msra.mxu3 %v1342_v12  ;;  %1150 = vmatpush.bf16.msra.mxu1 %v1342_v12 }
  0x13   : > { %1151 = vmatpush.bf16.msra.mxu2 %v1342_v12  ;;  %383 = vmatpush.bf16.msra.mxu0 %v1135_v42 }
  0x16   : > { %1155 = vmatpush.bf16.msra.mxu3 %v1345_v13  ;;  %1153 = vmatpush.bf16.msra.mxu1 %v1345_v13 }
  0x17   : > { %1154 = vmatpush.bf16.msra.mxu2 %v1345_v13  ;;  %384 = vmatpush.bf16.msra.mxu0 %v1134_v49 }
  0x18   : > { %417 = vperm.xlu0 %1189, %v1315_v5   ;;  %495 = vperm.xlu1 %1190, %v398_v6  }
  0x19   : > { %557 = vperm.xlu2 %1191, %v1315_v5  }
  0x1b   : > { %385 = vmatpush.bf16.msra.mxu0 %v1133_v54 }
  0x1e   : > { %1067 = vmatmul.msk.bf16.vlgmr.msra.gmra.mxu0 %vm371_vm11, %v1131_v60 }
  0x1f   : > { %778 = vmatpush.bf16.msrb.mxu0 %v1342_v12 }
  0x20   : > { %1192 = vset.pattern.permute.xlu0 %v1246_v7  ;;  %1193 = vset.pattern.permute.xlu1 %v1246_v7 }
  0x21   : > { %436 = vperm.xlu0 %1192, %v1310_v4   ;;  %439 = vperm.xlu1 %1193, %v398_v6  }
  0x22   : > { %1194 = vset.pattern.permute.xlu2 %v1243_v0 }
  0x23   : > { %498 = vperm.xlu2 %1194, %v1308_v3   ;;  %779 = vmatpush.bf16.msrb.mxu0 %v1345_v13 }
  0x29   : > { %1197 = vset.pattern.permute.xlu0 %v1247_v8  ;;  %1195 = vset.pattern.permute.xlu1 %v1243_v0 }
  0x2a   : > { %579 = vperm.xlu0 %1197, %v398_v6   ;;  %501 = vperm.xlu1 %1195, %v1315_v5  }
  0x2b   : > { %1196 = vset.pattern.permute.xlu2 %v1247_v8 }
  0x2c   : > { %576 = vperm.xlu2 %1196, %v1310_v4  }
  0x32   : > { %1198 = vset.pattern.permute.xlu1 %v1246_v7  ;;  %582 = vperm.xlu0 %1197, %v1308_v3  }
  0x33   : > { %442 = vperm.xlu1 %1198, %v1308_v3  }
  0x34   : > { %1199 = vset.pattern.permute.xlu2 %v1246_v7 }
  0x35   : > { %445 = vperm.xlu2 %1199, %v1315_v5  }
  0x3a   : > { %1204 = vset.pattern.permute.xlu0 %v1248_v9 }
  0x3b   : > { %1200 = vset.pattern.permute.xlu1 %v1249_v10  ;;  %467 = vperm.xlu0 %1204, %v398_v6  }
  0x3c   : > { %520 = vperm.xlu1 %1200, %v1310_v4  }
  0x3d   : > { %1201 = vset.pattern.permute.xlu2 %v1249_v10 }
  0x3e   : > { %523 = vperm.xlu2 %1201, %v398_v6  }
  0x43   : > { %1209 = vset.pattern.permute.xlu0 %v1244_v1 }
  0x44   : > { %1202 = vset.pattern.permute.xlu1 %v1247_v8  ;;  %408 = vperm.xlu0 %1209, %v1310_v4  }
  0x45   : > { %585 = vperm.xlu1 %1202, %v1315_v5  }
  0x46   : > { %1203 = vset.pattern.permute.xlu2 %v1248_v9 }
  0x47   : > { %464 = vperm.xlu2 %1203, %v1310_v4  }
  0x4c   : > { %1214 = vset.pattern.permute.xlu0 %v1245_v2 }
  0x4d   : > { %1205 = vset.pattern.permute.xlu1 %v1249_v10  ;;  %551 = vperm.xlu0 %1214, %v398_v6  }
  0x4e   : > { %526 = vperm.xlu1 %1205, %v1308_v3  }
  0x4f   : > { %1206 = vset.pattern.permute.xlu2 %v1249_v10 }
  0x50   : > { %529 = vperm.xlu2 %1206, %v1315_v5  }
  0x55   : > { %1217 = vset.pattern.permute.xlu0 %v1250_v11 }
  0x56   : > { %1207 = vset.pattern.permute.xlu1 %v1250_v11 }
  0x57   : > { %604 = vperm.xlu1 %1207, %v1310_v4  }
  0x58   : > { %1208 = vset.pattern.permute.xlu2 %v1250_v11 }
  0x59   : > { %607 = vperm.xlu2 %1208, %v398_v6  }
  0x5f   : > { %1210 = vset.pattern.permute.xlu1 %v1244_v1 }
  0x60   : > { %411 = vperm.xlu1 %1210, %v398_v6  }
  0x61   : > { %1211 = vset.pattern.permute.xlu2 %v1248_v9 }
  0x62   : > { %470 = vperm.xlu2 %1211, %v1308_v3  }
  0x68   : > { %1212 = vset.pattern.permute.xlu1 %v1248_v9 }
  0x69   : > { %473 = vperm.xlu1 %1212, %v1315_v5  }
  0x6a   : > { %1213 = vset.pattern.permute.xlu2 %v1245_v2 }
  0x6b   : > { %v555_v16 = vpop.permute.xlu2 %554  ;;  %548 = vperm.xlu2 %1213, %v1310_v4  }
  0x6c   : > { %vm561_vm0 = vcmp.eq.s32.totalorder %v555_v16, %v1354_v15 }
  0x6d   : > { %v1091_v18 = vsel %vm561_vm0, 1.0, %v1251_v17 }
  0x6e   : > { %v573_v19 = vpack.c.bf16 %v1091_v18, %v1091_v18 }
  0x70   : > { %v687_v22 = vunpack.c.l.b16 %v573_v19 }
  0x71   : > { %1215 = vset.pattern.permute.xlu1 %v1250_v11 }
  0x72   : > { %610 = vperm.xlu1 %1215, %v1308_v3  }
  0x73   : > { %v558_v20 = vpop.permute.xlu2 %557  ;;  %1216 = vset.pattern.permute.xlu2 %v1250_v11 }
  0x74   : > { %vm562_vm1 = vcmp.eq.s32.totalorder %v558_v20, %v1354_v15  ;;  %613 = vperm.xlu2 %1216, %v1315_v5  }
  0x75   : > { %v1092_v21 = vsel %vm562_vm1, 1.0, %v1251_v17 }
  0x76   : > { %v574_v23 = vpack.c.bf16 %v1092_v21, %v1092_v21 }
  0x78   : > { %v688_v24 = vunpack.c.l.b16 %v574_v23  ;;  %v1132_v23 = vld [vmem:[%s1398_s15 + $0x8] sm:$0xff] }
  0x79   : > { %1068 = vmatmul.msk.bf16.gmra.mxu0 %vm371_vm11, %v1132_v23 }
  0x7a   : > { %v690_v25 = vpack.c.b16 %v688_v24, %v687_v22 }
  0x7c   : > { %1120 = vmatmul.msk.bf16.vlgmr.msra.gmra.mxu3 %vm723_vm2, %v690_v25 }
  0x7d   : > { %v499_v26 = vpop.permute.xlu2 %498 }
  0x7e   : > { %vm505_vm10 = vcmp.eq.s32.totalorder %v499_v26, %v1354_v15 }
  0x7f   : > { %v1083_v57 = vsel %vm505_vm10, 1.0, %v1251_v17 }
  0x80   : > { %v517_v62 = vpack.c.bf16 %v1083_v57, %v1083_v57 }
  0x82   : > { %v415_v27 = vpop.permute.xlu0 %414  ;;  %v493_v28 = vpop.permute.xlu1 %492  ;;  %v667_v8 = vunpack.c.l.b16 %v517_v62 }
  0x83   : > { %vm421_vm3 = vcmp.eq.s32.totalorder %v415_v27, %v1354_v15  ;;  %vm503_vm4 = vcmp.eq.s32.totalorder %v493_v28, %v1354_v15 }
  0x84   : > { %v1071_v29 = vsel %vm421_vm3, 1.0, %v1251_v17  ;;  %v1081_v31 = vsel %vm503_vm4, 1.0, %v1251_v17 }
  0x85   : > { %v433_v32 = vpack.c.bf16 %v1071_v29, %v1071_v29  ;;  %v515_v36 = vpack.c.bf16 %v1081_v31, %v1081_v31 }
  0x86   : > { %v577_v30 = vpop.permute.xlu2 %576 }
  0x87   : > { %v637_v39 = vunpack.c.l.b16 %v433_v32  ;;  %v665_v43 = vunpack.c.l.b16 %v515_v36  ;;  %vm587_vm9 = vcmp.eq.s32.totalorder %v577_v30, %v1354_v15 }
  0x88   : > { %v1093_v55 = vsel %vm587_vm9, 1.0, %v1251_v17 }
  0x89   : > { %v599_v61 = vpack.c.bf16 %v1093_v55, %v1093_v55 }
  0x8a   : > { %v418_v33 = vpop.permute.xlu0 %417  ;;  %v496_v34 = vpop.permute.xlu1 %495 }
  0x8b   : > { %vm422_vm5 = vcmp.eq.s32.totalorder %v418_v33, %v1354_v15  ;;  %vm504_vm6 = vcmp.eq.s32.totalorder %v496_v34, %v1354_v15  ;;  %v695_v5 = vunpack.c.l.b16 %v599_v61 }
  0x8c   : > { %v1072_v37 = vsel %vm422_vm5, 1.0, %v1251_v17  ;;  %v1082_v38 = vsel %vm504_vm6, 1.0, %v1251_v17 }
  0x8d   : > { %v434_v40 = vpack.c.bf16 %v1072_v37, %v1072_v37  ;;  %v516_v41 = vpack.c.bf16 %v1082_v38, %v1082_v38 }
  0x8f   : > { %v638_v44 = vunpack.c.l.b16 %v434_v40  ;;  %v666_v45 = vunpack.c.l.b16 %v516_v41  ;;  %v446_v46 = vpop.permute.xlu2 %445 }
  0x90   : > { %vm450_vm14 = vcmp.eq.s32.totalorder %v446_v46, %v1354_v15 }
  0x91   : > { %v640_v47 = vpack.c.b16 %v638_v44, %v637_v39  ;;  %v669_v48 = vpack.c.b16 %v666_v45, %v665_v43  ;;  %v1076_v18 = vsel %vm450_vm14, 1.0, %v1251_v17 }
  0x92   : > { %v462_v21 = vpack.c.bf16 %v1076_v18, %v1076_v18 }
  0x93   : > { %1110 = vmatmul.msk.bf16.vlgmr.msra.gmra.mxu1 %vm723_vm2, %v640_v47  ;;  %v437_v50 = vpop.permute.xlu0 %436  ;;  %1115 = vmatmul.msk.bf16.vlgmr.msra.gmra.mxu2 %vm723_vm2, %v669_v48  ;;  %v440_v51 = vpop.permute.xlu1 %439 }
  0x94   : > { %vm447_vm7 = vcmp.eq.s32.totalorder %v437_v50, %v1354_v15  ;;  %vm448_vm8 = vcmp.eq.s32.totalorder %v440_v51, %v1354_v15  ;;  %v648_v26 = vunpack.c.l.b16 %v462_v21 }
  0x95   : > { %v1073_v52 = vsel %vm447_vm7, 1.0, %v1251_v17  ;;  %v1074_v53 = vsel %vm448_vm8, 1.0, %v1251_v17 }
  0x96   : > { %v459_v58 = vpack.c.bf16 %v1073_v52, %v1073_v52  ;;  %v460_v59 = vpack.c.bf16 %v1074_v53, %v1074_v53 }
  0x98   : > { %v524_v56 = vpop.permute.xlu2 %523  ;;  %v645_v1 = vunpack.c.l.b16 %v459_v58  ;;  %v646_v2 = vunpack.c.l.b16 %v460_v59 }
  0x99   : > { %vm532_vm0 = vcmp.eq.s32.totalorder %v524_v56, %v1354_v15 }
  0x9a   : > { %v649_v11 = vpack.c.b16 %v646_v2, %v645_v1  ;;  %v1086_v24 = vsel %vm532_vm0, 1.0, %v1251_v17 }
  0x9b   : > { %v544_v28 = vpack.c.bf16 %v1086_v24, %v1086_v24 }
  0x9c   : > { %v580_v63 = vpop.permute.xlu0 %579  ;;  %v502_v0 = vpop.permute.xlu1 %501 }
  0x9d   : > { %vm588_vm12 = vcmp.eq.s32.totalorder %v580_v63, %v1354_v15  ;;  %vm506_vm13 = vcmp.eq.s32.totalorder %v502_v0, %v1354_v15  ;;  %v676_v32 = vunpack.c.l.b16 %v544_v28 }
  0x9e   : > { %v1094_v3 = vsel %vm588_vm12, 1.0, %v1251_v17  ;;  %v1084_v4 = vsel %vm506_vm13, 1.0, %v1251_v17 }
  0x9f   : > { %v600_v6 = vpack.c.bf16 %v1094_v3, %v1094_v3  ;;  %v518_v7 = vpack.c.bf16 %v1084_v4, %v1084_v4 }
  0xa1   : > { %v696_v9 = vunpack.c.l.b16 %v600_v6  ;;  %v668_v10 = vunpack.c.l.b16 %v518_v7  ;;  %v465_v12 = vpop.permute.xlu2 %464 }
  0xa2   : > { %vm475_vm4 = vcmp.eq.s32.totalorder %v465_v12, %v1354_v15 }
  0xa3   : > { %1111 = vmatmul.msk.bf16.gmra.mxu1 %vm723_vm2, %v649_v11  ;;  %v670_v14 = vpack.c.b16 %v668_v10, %v667_v8  ;;  %v699_v16 = vpack.c.b16 %v696_v9, %v695_v5  ;;  %v1077_v39 = vsel %vm475_vm4, 1.0, %v1251_v17 }
  0xa4   : > { %v583_v19 = vpop.permute.xlu0 %582  ;;  %v487_v43 = vpack.c.bf16 %v1077_v39, %v1077_v39 }
  0xa5   : > { %1116 = vmatmul.msk.bf16.gmra.mxu2 %vm723_vm2, %v670_v14  ;;  %1121 = vmatmul.msk.bf16.gmra.mxu3 %vm723_vm2, %v699_v16  ;;  %v443_v13 = vpop.permute.xlu1 %442  ;;  %vm589_vm3 = vcmp.eq.s32.totalorder %v583_v19, %v1354_v15 }
  0xa6   : > { %vm449_vm15 = vcmp.eq.s32.totalorder %v443_v13, %v1354_v15  ;;  %v1095_v37 = vsel %vm589_vm3, 1.0, %v1251_v17  ;;  %v655_v52 = vunpack.c.l.b16 %v487_v43 }
  0xa7   : > { %v1075_v20 = vsel %vm449_vm15, 1.0, %v1251_v17  ;;  %v601_v42 = vpack.c.bf16 %v1095_v37, %v1095_v37 }
  0xa8   : > { %v461_v22 = vpack.c.bf16 %v1075_v20, %v1075_v20 }
  0xa9   : > { %v697_v48 = vunpack.c.l.b16 %v601_v42 }
  0xaa   : > { %v530_v25 = vpop.permute.xlu2 %529  ;;  %v647_v27 = vunpack.c.l.b16 %v461_v22 }
  0xab   : > { %vm534_vm7 = vcmp.eq.s32.totalorder %v530_v25, %v1354_v15 }
  0xac   : > { %v650_v34 = vpack.c.b16 %v648_v26, %v647_v27  ;;  %v1088_v50 = vsel %vm534_vm7, 1.0, %v1251_v17 }
  0xad   : > { %v468_v31 = vpop.permute.xlu0 %467  ;;  %v546_v55 = vpack.c.bf16 %v1088_v50, %v1088_v50  ;;  %v387_v50 = vpop.f32.mrf.mxu0 }
  0xae   : > { %v521_v29 = vpop.permute.xlu1 %520  ;;  %vm476_vm5 = vcmp.eq.s32.totalorder %v468_v31, %v1354_v15 }
  0xaf   : > { %vm531_vm1 = vcmp.eq.s32.totalorder %v521_v29, %v1354_v15  ;;  %v1078_v40 = vsel %vm476_vm5, 1.0, %v1251_v17  ;;  %v678_v59 = vunpack.c.l.b16 %v546_v55 }
  0xb0   : > { %v1085_v30 = vsel %vm531_vm1, 1.0, %v1251_v17  ;;  %v488_v44 = vpack.c.bf16 %v1078_v40, %v1078_v40 }
  0xb1   : > { %v543_v33 = vpack.c.bf16 %v1085_v30, %v1085_v30 }
  0xb2   : > { %v656_v53 = vunpack.c.l.b16 %v488_v44 }
  0xb3   : > { %v675_v35 = vunpack.c.l.b16 %v543_v33  ;;  %1112 = vmatmul.msk.bf16.gmra.mxu1 %vm723_vm2, %v650_v34  ;;  %v608_v36 = vpop.permute.xlu2 %607 }
  0xb4   : > { %v659_v57 = vpack.c.b16 %v656_v53, %v655_v52  ;;  %vm616_vm9 = vcmp.eq.s32.totalorder %v608_v36, %v1354_v15 }
  0xb5   : > { %v679_v38 = vpack.c.b16 %v676_v32, %v675_v35  ;;  %v1098_v63 = vsel %vm616_vm9, 1.0, %v1251_v17 }
  0xb6   : > { %v409_v47 = vpop.permute.xlu0 %408  ;;  %v628_v2 = vpack.c.bf16 %v1098_v63, %v1098_v63 }
  0xb7   : > { %1117 = vmatmul.msk.bf16.gmra.mxu2 %vm723_vm2, %v679_v38  ;;  %v586_v41 = vpop.permute.xlu1 %585  ;;  %vm419_vm13 = vcmp.eq.s32.totalorder %v409_v47, %v1354_v15 }
  0xb8   : > { %vm590_vm6 = vcmp.eq.s32.totalorder %v586_v41, %v1354_v15  ;;  %v706_v7 = vunpack.c.l.b16 %v628_v2  ;;  %v1069_v12 = vsel %vm419_vm13, 1.0, %v1251_v17 }
  0xb9   : > { %v1096_v45 = vsel %vm590_vm6, 1.0, %v1251_v17  ;;  %v431_v16 = vpack.c.bf16 %v1069_v12, %v1069_v12 }
  0xba   : > { %v602_v46 = vpack.c.bf16 %v1096_v45, %v1096_v45 }
  0xbb   : > { %v635_v21 = vunpack.c.l.b16 %v431_v16 }
  0xbc   : > { %v698_v49 = vunpack.c.l.b16 %v602_v46  ;;  %v471_v51 = vpop.permute.xlu2 %470 }
  0xbd   : > { %vm477_vm15 = vcmp.eq.s32.totalorder %v471_v51, %v1354_v15 }
  0xbe   : > { %v700_v54 = vpack.c.b16 %v698_v49, %v697_v48  ;;  %v1079_v25 = vsel %vm477_vm15, 1.0, %v1251_v17 }
  0xbf   : > { %v552_v61 = vpop.permute.xlu0 %551  ;;  %v489_v29 = vpack.c.bf16 %v1079_v25, %v1079_v25 }
  0xc0   : > { %1122 = vmatmul.msk.bf16.gmra.mxu3 %vm723_vm2, %v700_v54  ;;  %v527_v56 = vpop.permute.xlu1 %526  ;;  %vm560_vm11 = vcmp.eq.s32.totalorder %v552_v61, %v1354_v15 }
  0xc1   : > { %vm533_vm8 = vcmp.eq.s32.totalorder %v527_v56, %v1354_v15  ;;  %v1090_v5 = vsel %vm560_vm11, 1.0, %v1251_v17  ;;  %v657_v32 = vunpack.c.l.b16 %v489_v29 }
  0xc2   : > { %v1087_v58 = vsel %vm533_vm8, 1.0, %v1251_v17  ;;  %v572_v10 = vpack.c.bf16 %v1090_v5, %v1090_v5 }
  0xc3   : > { %v545_v60 = vpack.c.bf16 %v1087_v58, %v1087_v58  ;;  %1113 = vmatmul.msk.bf16.gmra.mxu1 %vm723_vm2, %v659_v57 }
  0xc4   : > { %v686_v18 = vunpack.c.l.b16 %v572_v10 }
  0xc5   : > { %v677_v62 = vunpack.c.l.b16 %v545_v60  ;;  %v549_v0 = vpop.permute.xlu2 %548 }
  0xc6   : > { %vm559_vm10 = vcmp.eq.s32.totalorder %v549_v0, %v1354_v15 }
  0xc7   : > { %v680_v1 = vpack.c.b16 %v678_v59, %v677_v62  ;;  %v1089_v4 = vsel %vm559_vm10, 1.0, %v1251_v17 }
  0xc8   : > { %v571_v9 = vpack.c.bf16 %v1089_v4, %v1089_v4 }
  0xc9   : > { %1118 = vmatmul.msk.bf16.gmra.mxu2 %vm723_vm2, %v680_v1  ;;  %v605_v3 = vpop.permute.xlu1 %604 }
  0xca   : > { %vm615_vm12 = vcmp.eq.s32.totalorder %v605_v3, %v1354_v15  ;;  %v685_v13 = vunpack.c.l.b16 %v571_v9 }
  0xcb   : > { %v1097_v6 = vsel %vm615_vm12, 1.0, %v1251_v17 }
  0xcc   : > { %v627_v8 = vpack.c.bf16 %v1097_v6, %v1097_v6  ;;  %v689_v23 = vpack.c.b16 %v686_v18, %v685_v13 }
  0xce   : > { %v705_v11 = vunpack.c.l.b16 %v627_v8  ;;  %v614_v27 = vpop.permute.xlu2 %613 }
  0xcf   : > { %vm618_vm1 = vcmp.eq.s32.totalorder %v614_v27, %v1354_v15 }
  0xd0   : > { %v709_v14 = vpack.c.b16 %v706_v7, %v705_v11  ;;  %v1100_v34 = vsel %vm618_vm1, 1.0, %v1251_v17 }
  0xd1   : > { %v630_v36 = vpack.c.bf16 %v1100_v34, %v1100_v34 }
  0xd2   : > { %1123 = vmatmul.msk.bf16.gmra.mxu3 %vm723_vm2, %v709_v14  ;;  %v412_v19 = vpop.permute.xlu1 %411 }
  0xd3   : > { %vm420_vm14 = vcmp.eq.s32.totalorder %v412_v19, %v1354_v15  ;;  %v708_v39 = vunpack.c.l.b16 %v630_v36 }
  0xd4   : > { %v1070_v20 = vsel %vm420_vm14, 1.0, %v1251_v17 }
  0xd5   : > { %v432_v22 = vpack.c.bf16 %v1070_v20, %v1070_v20 }
  0xd7   : > { %v636_v24 = vunpack.c.l.b16 %v432_v22 }
  0xd9   : > { %v639_v26 = vpack.c.b16 %v636_v24, %v635_v21  ;;  %1119 = vmatmul.msk.bf16.gmra.mxu2 %vm723_vm2, %v689_v23  ;;  %v1218_v21 = vld [vmem:[%s1491_s4] ss:$0 sm:$0xff] }
  0xdb   : > { %1109 = vmatmul.msk.bf16.vlgmr.msrb.gmra.mxu0 %vm723_vm2, %v639_v26  ;;  %v474_v28 = vpop.permute.xlu1 %473 }
  0xdc   : > { %vm478_vm0 = vcmp.eq.s32.totalorder %v474_v28, %v1354_v15 }
  0xdd   : > { %v1080_v30 = vsel %vm478_vm0, 1.0, %v1251_v17 }
  0xde   : > { %v490_v31 = vpack.c.bf16 %v1080_v30, %v1080_v30  ;;  %v388_v30 = vadd.f32 %v1218_v21, %v387_v50 }
  0xe0   : > { %v658_v33 = vunpack.c.l.b16 %v490_v31 }
  0xe2   : > { %v660_v35 = vpack.c.b16 %v658_v33, %v657_v32 }
  0xe4   : > { %1114 = vmatmul.msk.bf16.gmra.mxu1 %vm723_vm2, %v660_v35  ;;  %v611_v37 = vpop.permute.xlu1 %610 }
  0xe5   : > { %vm617_vm3 = vcmp.eq.s32.totalorder %v611_v37, %v1354_v15 }
  0xe6   : > { %v1099_v38 = vsel %vm617_vm3, 1.0, %v1251_v17  ;;  %v389_v17 = vpop.f32.mrf.mxu0 }
  0xe7   : > { %v629_v40 = vpack.c.bf16 %v1099_v38, %v1099_v38  ;;  %v390_v37 = vadd.f32 %v1218_v21, %v389_v17 }
  0xe9   : > { %v707_v41 = vunpack.c.l.b16 %v629_v40 }
  0xeb   : > { %v710_v42 = vpack.c.b16 %v708_v39, %v707_v41 }
  0xed   : > { %1124 = vmatmul.msk.bf16.gmra.mxu3 %vm723_vm2, %v710_v42 }
  0xf6   : > { %v392_v56 = vpop.f32.mrf.mxu0 }
  0xf7   : > { %v393_v50 = vadd.f32 %v1218_v21, %v392_v56 }
  0xfe   : > { %v394_v62 = vpop.f32.mrf.mxu0 }
  0xff   : > { %v1465_v48 = vpop.f32.mrf.mxu3 }
 0x107   : > { %v1467_v52 = vpop.f32.mrf.mxu3 }
 0x110   : > { %v786_v43 = vpop.f32.mrf.mxu1 }
 0x116   : > { %v811_v44 = vpop.f32.mrf.mxu2 }
 0x118   : > { %v788_v45 = vpop.f32.mrf.mxu1 }
 0x11e   : > { %v813_v46 = vpop.f32.mrf.mxu2 }
 0x120   : > { %v791_v47 = vpop.f32.mrf.mxu1 }
 0x128   : > { %v816_v49 = vpop.f32.mrf.mxu2  ;;  %v793_v51 = vpop.f32.mrf.mxu1 }
 0x129   : > { %v841_v53 = vpop.f32.mrf.mxu3 }
 0x130   : > { %v818_v15 = vpop.f32.mrf.mxu2  ;;  %v796_v55 = vpop.f32.mrf.mxu1 }
 0x131   : > { %v843_v57 = vpop.f32.mrf.mxu3  ;;  %v863_v10 = vmax.f32 %v786_v43, %v796_v55 }
 0x138   : > { %v798_v59 = vpop.f32.mrf.mxu1 }
 0x139   : > { %v864_v27 = vmax.f32 %v788_v45, %v798_v59 }
 0x13a   : > { %v821_v54 = vpop.f32.mrf.mxu2 }
 0x140   : > { %v801_v63 = vpop.f32.mrf.mxu1 }
 0x142   : > { %v823_v58 = vpop.f32.mrf.mxu2 }
 0x143   : > { %v846_v60 = vpop.f32.mrf.mxu3 }
 0x148   : > { %v803_v3 = vpop.f32.mrf.mxu1 }
 0x14b   : > { %v848_v1 = vpop.f32.mrf.mxu3 }
 0x14c   : > { %v826_v61 = vpop.f32.mrf.mxu2 }
 0x154   : > { %v828_v0 = vpop.f32.mrf.mxu2 }
 0x155   : > { %v851_v8 = vpop.f32.mrf.mxu3 }
 0x158   : > { %v781_v2 = vpop.f32.mrf.mxu0 }
 0x159   : > { %v861_v4 = vmax.f32 %v781_v2, %v791_v47 }
 0x15b   : > { %v865_v5 = vmax.f32 %v861_v4, %v801_v63 }
 0x15c   : > { %v831_v6 = vpop.f32.mrf.mxu2 }
 0x15d   : > { %v869_v7 = vmax.f32 %v865_v5, %v811_v44  ;;  %v853_v28 = vpop.f32.mrf.mxu3 }
 0x15f   : > { %v873_v9 = vmax.f32 %v869_v7, %v821_v54 }
 0x160   : > { %v783_v11 = vpop.f32.mrf.mxu0 }
 0x161   : > { %v877_v12 = vmax.f32 %v873_v9, %v831_v6  ;;  %v862_v14 = vmax.f32 %v783_v11, %v793_v51  ;;  %v806_v16 = vpop.f32.mrf.mxu1 }
 0x162   : > { %v867_v13 = vmax.f32 %v863_v10, %v806_v16 }
 0x163   : > { %v881_v18 = vmax.f32 %v877_v12, %v841_v53  ;;  %v866_v19 = vmax.f32 %v862_v14, %v803_v3  ;;  %v395_v53 = vadd.f32 %v1218_v21, %v394_v62 }
 0x164   : > { %v871_v20 = vmax.f32 %v867_v13, %v816_v49  ;;  %v833_v24 = vpop.f32.mrf.mxu2 }
 0x165   : > { %v870_v22 = vmax.f32 %v866_v19, %v813_v46  ;;  %v885_v25 = vmax.f32 %v881_v18, %v851_v8 }
 0x166   : > { %v875_v23 = vmax.f32 %v871_v20, %v826_v61 }
 0x167   : > { %v874_v26 = vmax.f32 %v870_v22, %v823_v58  ;;  %v889_v34 = vadd.f32 %v885_v25, %v388_v30 }
 0x168   : > { %v879_v29 = vmax.f32 %v875_v23, %v1465_v48 }
 0x169   : > { %v878_v31 = vmax.f32 %v874_v26, %v833_v24  ;;  %v808_v32 = vpop.f32.mrf.mxu1  ;;  %v897_v39 = vmul.f32 0.2, %v889_v34  ;;  %vm893_vm2 = vcmp.gt.f32.partialorder %v889_v34, 0.0 }
 0x16a   : > { %v868_v33 = vmax.f32 %v864_v27, %v808_v32  ;;  %v883_v44 = vmax.f32 %v879_v29, %v846_v60 }
 0x16b   : > { %v882_v35 = vmax.f32 %v878_v31, %v843_v57  ;;  %v901_v45 = vsel %vm893_vm2, %v889_v34, %v897_v39 }
 0x16c   : > { %v872_v36 = vmax.f32 %v868_v33, %v818_v15 }
 0x16d   : > { %v886_v38 = vmax.f32 %v882_v35, %v853_v28 }
 0x16e   : > { %v876_v41 = vmax.f32 %v872_v36, %v828_v0 }
 0x16f   : > { %v890_v40 = vadd.f32 %v886_v38, %v390_v37 }
 0x170   : > { %v856_v42 = vpop.f32.mrf.mxu3  ;;  %v880_v48 = vmax.f32 %v876_v41, %v1467_v52 }
 0x171   : > { %vm894_vm4 = vcmp.gt.f32.partialorder %v890_v40, 0.0  ;;  %v898_v43 = vmul.f32 0.2, %v890_v40  ;;  %v887_v47 = vmax.f32 %v883_v44, %v856_v42 }
 0x172   : > { %v884_v15 = vmax.f32 %v880_v48, %v848_v1 }
 0x173   : > { %v902_v46 = vsel %vm894_vm4, %v890_v40, %v898_v43  ;;  %v891_v51 = vadd.f32 %v887_v47, %v393_v50 }
 0x174   : > { %v1142_v49 = vpack.c.bf16 %v902_v46, %v901_v45 }
 0x175   : > { %v899_v55 = vmul.f32 0.2, %v891_v51  ;;  %vm895_vm5 = vcmp.gt.f32.partialorder %v891_v51, 0.0 }
 0x176   : > { %1143 = vst [vmem:[%s318_s23] sm:$0xff] %v1142_v49  }
 0x177   : > { %v903_v59 = vsel %vm895_vm5, %v891_v51, %v899_v55 }
 0x178   : > { %v858_v17 = vpop.f32.mrf.mxu3 }
 0x179   : > { %v888_v54 = vmax.f32 %v884_v15, %v858_v17 }
 0x17b   : > { %v892_v57 = vadd.f32 %v888_v54, %v395_v53 }
 0x17d   : > { %vm896_vm6 = vcmp.gt.f32.partialorder %v892_v57, 0.0  ;;  %v900_v58 = vmul.f32 0.2, %v892_v57 }
 0x17f   : > { %v904_v60 = vsel %vm896_vm6, %v892_v57, %v900_v58 }
 0x180   : > { %v1147_v61 = vpack.c.bf16 %v904_v60, %v903_v59 }
 0x182   : > { %1149 = vst [vmem:[%s318_s23 + $0x8] sm:$0xff] %v1147_v61  }
 0x183 PF: > { %s15_s20 = sadd.s32 1, %s1241_s20   ;;  %s1493_s18 = smov %s1237_s19 }
 0x184   : > { %p12_p5 = scmp.ge.s32.totalorder %s15_s20, 4   ;;  %s1494_s19 = smov %s1496_s21 }
 0x186   :  { %14 = sbr.rel (!%p12_p5) target bundleno = 2 (0x2), region = 76 }

// kernel: _lambda_.25
= control target key start
LH: loop header
LB: loop body
LE: loop exit
PB: predicated region body
PF: predicated region fallthrough
CT: control target
= control target key end

     0   :  { %s1577_s18 = smov 0   ;;  %s1579_s19 = smov 0   ;;  %s2019_s0 = inlined_call_operand.vmem [shape: s32[2,32,8], index: 0, kind: input, shape index: {}]   ;;  %s2020_s1 = inlined_call_operand.vmem [shape: bf16[2,32,128], index: 1, kind: input, shape index: {}]   ;;  %s2021_s2 = inlined_call_operand.vmem [shape: bf16[2,32,256], index: 2, kind: input, shape index: {}]   ;;  %s2022_s3 = inlined_call_operand.vmem [shape: bf16[128,256], index: 3, kind: input, shape index: {}]   ;;  %s2023_s4 = inlined_call_operand.vmem [shape: f32[1,256], index: 4, kind: input, shape index: {}]   ;;  %s2024_s5 = inlined_call_operand.vmem [shape: bf16[2,32,256], index: 5, kind: output, shape index: {}]  }
   0x1   :  { %s1581_s20 = smov 0  }
   0x2 LB: > { %s27_s21 = sadd.s32 1, %s1532_s19  ;;  %p1263_p0 = scmp.ge.s32.totalorder %s1536_s20, 1  ;;  %s1536_s20 = sphi %s1581_s20, %s15_s20   ;;  %s1532_s19 = sphi %s1579_s19, %s2036_s19   ;;  %s1528_s18 = sphi %s1577_s18, %s2035_s18  }
   0x3   : > { %p29_p1 = scmp.ge.s32.totalorder %s27_s21, 2  ;;  %p235_p2 = scmp.lt.s32.totalorder %s1536_s20, 3 }
   0x5   : > { %s2038_s21 = smov (%p29_p1, %s27_s21), 0  ;;  %p236_p3 = pnand %p1263_p0, %p235_p2 }
   0x7   : > { %239 = sbr.rel (%p236_p3) target bundleno = 443 (0x1bb), region = 40 }
   0xc   : > { %p287_p4 = scmp.lt.s32.totalorder %s1528_s18, 1  ;;  %v1538_v0 = vmov 3   ;;  %v1539_v1 = vmov 4   ;;  %v1540_v6 = vmov 0   ;;  %v1541_v7 = vmov 5  }
   0xd   : > { %1490 = vset.pattern.permute.xlu1 %v1538_v0  ;;  %1489 = vset.pattern.permute.xlu0 %v1538_v0  ;;  %v1542_v8 = vmov 1   ;;  %v1338_v9 = vld [vmem:[%s2022_s3 + $0x70] sm:$0xf]  ;;  %v1447_v10 = vld [vmem:[%s2022_s3 + $0x74] sm:$0xf0]  ;;  %v1543_v31 = vmov 2  }
   0xe   : > { %s2040_s18 = smov (!%p287_p4, %s1528_s18), 1  ;;  %1491 = vset.pattern.permute.xlu2 %v1539_v1  ;;  %v1446_v11 = vld [vmem:[%s2022_s3 + $0x74] sm:$0xf]  ;;  %v1339_v12 = vor.u32 %v1447_v10, %v1338_v9  ;;  %v1340_v13 = vld [vmem:[%s2022_s3 + $0x78] sm:$0xf0]  ;;  %v1544_v34 = vmov 6  }
   0xf   : > { %s1598_s22 = sshll.u32 %s2040_s18, 5  ;;  %v1343_v14 = vor.u32 %v1446_v11, %v1340_v13  ;;  %v1330_v15 = vld [vmem:[%s2022_s3 + $0x60] sm:$0xf]  ;;  %v1445_v16 = vld [vmem:[%s2022_s3 + $0x64] sm:$0xf0]  ;;  %s1427_s30 = sshll.u32 %s2040_s18, 4  ;;  %v487_v13 = vlaneseq }
  0x10   : > { %s294_s25 = scalar_lea.vmem %s2019_s0, %s1598_s22  ;;  %441 = vmatpush.bf16.msra.mxu0 %v1339_v12  ;;  %v1444_v17 = vld [vmem:[%s2022_s3 + $0x64] sm:$0xf]  ;;  %v1331_v18 = vor.u32 %v1445_v16, %v1330_v15  ;;  %v1332_v19 = vld [vmem:[%s2022_s3 + $0x68] sm:$0xf0]  ;;  %v1322_v20 = vld [vmem:[%s2022_s3 + $0x50] sm:$0xf]  ;;  %s1744_s8 = scalar_lea.vmem %s2020_s1, %s1427_s30 }
  0x11   : > { %v1604_v2 = vld [vmem:[%s294_s25 + $0x10] sm:$0xff]  ;;  %v1606_v3 = vld [vmem:[%s294_s25] sm:$0xff]  ;;  %v1611_v4 = vld [vmem:[%s294_s25 + $0x18] sm:$0xff]  ;;  %460 = vmatpush.bf16.msra.mxu1 %v1343_v14  ;;  %v1335_v22 = vor.u32 %v1444_v17, %v1332_v19  ;;  %s310_s11 = scalar_lea.vmem %s2021_s2, %s1598_s22  ;;  %v1545_v60 = vmov 7   ;;  %v1758_v14 = vand.u32 127, %v487_v13  ;;  %vm813_vm2 = vcmask 261120   ;;  %s1979_s15 = scalar_lea.vmem %s2024_s5, %s1598_s22 }
  0x12   : > { %580 = vperm.xlu1 %1490, %v1604_v2   ;;  %574 = vperm.xlu0 %1489, %v1606_v3   ;;  %v1613_v5 = vld [vmem:[%s294_s25 + $0x8] sm:$0xff]  ;;  %v1443_v21 = vld [vmem:[%s2022_s3 + $0x54] sm:$0xf0]  ;;  %v1442_v23 = vld [vmem:[%s2022_s3 + $0x54] sm:$0xf] }
  0x13   : > { %602 = vperm.xlu2 %1491, %v1606_v3   ;;  %v1324_v24 = vld [vmem:[%s2022_s3 + $0x58] sm:$0xf0]  ;;  %v1323_v25 = vor.u32 %v1443_v21, %v1322_v20  ;;  %v1314_v27 = vld [vmem:[%s2022_s3 + $0x40] sm:$0xf]  ;;  %v1441_v28 = vld [vmem:[%s2022_s3 + $0x44] sm:$0xf0] }
  0x14   : > { %442 = vmatpush.bf16.msra.mxu0 %v1331_v18  ;;  %v1327_v26 = vor.u32 %v1442_v23, %v1324_v24  ;;  %v1440_v29 = vld [vmem:[%s2022_s3 + $0x44] sm:$0xf]  ;;  %v1316_v30 = vld [vmem:[%s2022_s3 + $0x48] sm:$0xf0]  ;;  %v1315_v32 = vor.u32 %v1441_v28, %v1314_v27  ;;  %v1306_v35 = vld [vmem:[%s2022_s3 + $0x30] sm:$0xf] }
  0x15   : > { %461 = vmatpush.bf16.msra.mxu1 %v1335_v22  ;;  %v1319_v33 = vor.u32 %v1440_v29, %v1316_v30  ;;  %v1439_v36 = vld [vmem:[%s2022_s3 + $0x34] sm:$0xf0]  ;;  %v1438_v37 = vld [vmem:[%s2022_s3 + $0x34] sm:$0xf]  ;;  %v1308_v38 = vld [vmem:[%s2022_s3 + $0x38] sm:$0xf0] }
  0x16   : > { %v1307_v39 = vor.u32 %v1439_v36, %v1306_v35  ;;  %v1311_v40 = vor.u32 %v1438_v37, %v1308_v38  ;;  %v1298_v41 = vld [vmem:[%s2022_s3 + $0x20] sm:$0xf]  ;;  %v1437_v42 = vld [vmem:[%s2022_s3 + $0x24] sm:$0xf0]  ;;  %v1436_v43 = vld [vmem:[%s2022_s3 + $0x24] sm:$0xf] }
  0x17   : > { %v1300_v44 = vld [vmem:[%s2022_s3 + $0x28] sm:$0xf0]  ;;  %v1299_v45 = vor.u32 %v1437_v42, %v1298_v41  ;;  %v1290_v47 = vld [vmem:[%s2022_s3 + $0x10] sm:$0xf]  ;;  %v1435_v48 = vld [vmem:[%s2022_s3 + $0x14] sm:$0xf0] }
  0x18   : > { %443 = vmatpush.bf16.msra.mxu0 %v1323_v25  ;;  %v1303_v46 = vor.u32 %v1436_v43, %v1300_v44  ;;  %v1434_v49 = vld [vmem:[%s2022_s3 + $0x14] sm:$0xf]  ;;  %v1292_v50 = vld [vmem:[%s2022_s3 + $0x18] sm:$0xf0]  ;;  %v1291_v51 = vor.u32 %v1435_v48, %v1290_v47  ;;  %v1282_v53 = vld [vmem:[%s2022_s3] sm:$0xf] }
  0x19   : > { %462 = vmatpush.bf16.msra.mxu1 %v1327_v26  ;;  %v1295_v52 = vor.u32 %v1434_v49, %v1292_v50  ;;  %v1433_v54 = vld [vmem:[%s2022_s3 + $0x4] sm:$0xf0]  ;;  %v1432_v55 = vld [vmem:[%s2022_s3 + $0x4] sm:$0xf]  ;;  %v1284_v56 = vld [vmem:[%s2022_s3 + $0x8] sm:$0xf0] }
  0x1a   : > { %583 = vperm.xlu1 %1490, %v1611_v4   ;;  %577 = vperm.xlu0 %1489, %v1613_v5   ;;  %v1283_v57 = vor.u32 %v1433_v54, %v1282_v53  ;;  %v1287_v58 = vor.u32 %v1432_v55, %v1284_v56  ;;  %v1430_v59 = vld [vmem:[%s1744_s8] sm:$0xff]  ;;  %v1386_v61 = vld [vmem:[%s310_s11 + $0x10] sm:$0xf]  ;;  %v1451_v62 = vld [vmem:[%s310_s11 + $0x14] sm:$0xf0]  ;;  %v1546_v18 = vmov 0.0  }
  0x1b   : > { %605 = vperm.xlu2 %1491, %v1613_v5   ;;  %v1450_v63 = vld [vmem:[%s310_s11 + $0x14] sm:$0xf]  ;;  %v1387_v0 = vor.u32 %v1451_v62, %v1386_v61  ;;  %v1448_v9 = vld [vmem:[%s310_s11 + $0x4] sm:$0xf]  ;;  %v1380_v11 = vld [vmem:[%s310_s11 + $0x8] sm:$0xf0] }
  0x1c   : > { %444 = vmatpush.bf16.msra.mxu0 %v1315_v32 }
  0x1d   : > { %463 = vmatpush.bf16.msra.mxu1 %v1319_v33  ;;  %1452 = vmatpush.bf16.msra.mxu2 %v1387_v0 }
  0x20   : > { %445 = vmatpush.bf16.msra.mxu0 %v1307_v39 }
  0x21   : > { %464 = vmatpush.bf16.msra.mxu1 %v1311_v40 }
  0x22   : > { %1493 = vset.pattern.permute.xlu1 %v1539_v1  ;;  %1492 = vset.pattern.permute.xlu0 %v1539_v1  ;;  %v1388_v1 = vld [vmem:[%s310_s11 + $0x18] sm:$0xf0] }
  0x23   : > { %611 = vperm.xlu1 %1493, %v1611_v4   ;;  %608 = vperm.xlu0 %1492, %v1604_v2  }
  0x24   : > { %1494 = vset.pattern.permute.xlu2 %v1540_v6  ;;  %446 = vmatpush.bf16.msra.mxu0 %v1299_v45 }
  0x25   : > { %490 = vperm.xlu2 %1494, %v1606_v3   ;;  %465 = vmatpush.bf16.msra.mxu1 %v1303_v46 }
  0x28   : > { %447 = vmatpush.bf16.msra.mxu0 %v1291_v51 }
  0x29   : > { %466 = vmatpush.bf16.msra.mxu1 %v1295_v52 }
  0x2b   : > { %1495 = vset.pattern.permute.xlu1 %v1540_v6  ;;  %1497 = vset.pattern.permute.xlu0 %v1541_v7 }
  0x2c   : > { %493 = vperm.xlu1 %1495, %v1613_v5   ;;  %633 = vperm.xlu0 %1497, %v1613_v5  }
  0x2d   : > { %1496 = vset.pattern.permute.xlu2 %v1541_v7  ;;  %448 = vmatpush.bf16.msra.mxu0 %v1283_v57 }
  0x2e   : > { %630 = vperm.xlu2 %1496, %v1606_v3   ;;  %467 = vmatpush.bf16.msra.mxu1 %v1287_v58 }
  0x30   : > { %449 = vmatmul.bf16.vlgmr.msra.gmra.mxu0 %v1430_v59 }
  0x31   : > { %468 = vmatmul.bf16.vlgmr.msra.gmra.mxu1 %v1430_v59  ;;  %868 = vmatpush.bf16.msrb.mxu0 %v1387_v0 }
  0x34   : > { %496 = vperm.xlu1 %1495, %v1604_v2   ;;  %1501 = vset.pattern.permute.xlu0 %v1542_v8 }
  0x35   : > { %518 = vperm.xlu0 %1501, %v1606_v3  }
  0x36   : > { %1498 = vset.pattern.permute.xlu2 %v1540_v6  ;;  %v1391_v6 = vor.u32 %v1450_v63, %v1388_v1 }
  0x37   : > { %499 = vperm.xlu2 %1498, %v1611_v4  }
  0x38   : > { %1454 = vmatpush.bf16.msra.mxu3 %v1391_v6  ;;  %957 = vmatpush.bf16.msrb.mxu1 %v1391_v6 }
  0x3c   : > { %1499 = vset.pattern.permute.xlu1 %v1541_v7 }
  0x3d   : > { %636 = vperm.xlu1 %1499, %v1604_v2   ;;  %527 = vperm.xlu0 %1501, %v1611_v4  }
  0x3f   : > { %1500 = vset.pattern.permute.xlu2 %v1541_v7  ;;  %v1378_v7 = vld [vmem:[%s310_s11] sm:$0xf] }
  0x40   : > { %639 = vperm.xlu2 %1500, %v1611_v4  }
  0x45   : > { %1502 = vset.pattern.permute.xlu1 %v1542_v8  ;;  %1507 = vset.pattern.permute.xlu0 %v1543_v31 }
  0x46   : > { %521 = vperm.xlu1 %1502, %v1613_v5   ;;  %546 = vperm.xlu0 %1507, %v1606_v3  }
  0x48   : > { %1503 = vset.pattern.permute.xlu2 %v1544_v34 }
  0x49   : > { %658 = vperm.xlu2 %1503, %v1606_v3  }
  0x4e   : > { %1504 = vset.pattern.permute.xlu1 %v1544_v34  ;;  %555 = vperm.xlu0 %1507, %v1611_v4  }
  0x4f   : > { %661 = vperm.xlu1 %1504, %v1613_v5  }
  0x51   : > { %1505 = vset.pattern.permute.xlu2 %v1542_v8  ;;  %v1449_v8 = vld [vmem:[%s310_s11 + $0x4] sm:$0xf0] }
  0x52   : > { %524 = vperm.xlu2 %1505, %v1604_v2   ;;  %v1379_v10 = vor.u32 %v1449_v8, %v1378_v7 }
  0x54   : > { %1453 = vmatpush.bf16.msra.mxu2 %v1379_v10  ;;  %869 = vmatpush.bf16.msrb.mxu0 %v1379_v10 }
  0x56   : > { %1513 = vset.pattern.permute.xlu0 %v1545_v60 }
  0x57   : > { %664 = vperm.xlu1 %1504, %v1604_v2  }
  0x5a   : > { %1506 = vset.pattern.permute.xlu2 %v1544_v34 }
  0x5b   : > { %667 = vperm.xlu2 %1506, %v1611_v4  }
  0x5f   : > { %1508 = vset.pattern.permute.xlu1 %v1543_v31 }
  0x60   : > { %549 = vperm.xlu1 %1508, %v1613_v5  }
  0x63   : > { %1509 = vset.pattern.permute.xlu2 %v1545_v60 }
  0x64   : > { %686 = vperm.xlu2 %1509, %v1606_v3   ;;  %v1383_v3 = vor.u32 %v1448_v9, %v1380_v11 }
  0x66   : > { %1455 = vmatpush.bf16.msra.mxu3 %v1383_v3  ;;  %958 = vmatpush.bf16.msrb.mxu1 %v1383_v3 }
  0x68   : > { %1510 = vset.pattern.permute.xlu1 %v1545_v60 }
  0x69   : > { %689 = vperm.xlu1 %1510, %v1613_v5   ;;  %v1431_v5 = vld [vmem:[%s1744_s8 + $0x8] sm:$0xff] }
  0x6a   : > { %454 = vmatmul.bf16.gmra.mxu0 %v1431_v5  ;;  %473 = vmatmul.bf16.gmra.mxu1 %v1431_v5 }
  0x6c   : > { %1511 = vset.pattern.permute.xlu2 %v1543_v31 }
  0x6d   : > { %552 = vperm.xlu2 %1511, %v1604_v2   ;;  %v603_v12 = vpop.permute.xlu2 %602 }
  0x6e   : > { %vm613_vm7 = vcmp.eq.s32.totalorder %v603_v12, %v1758_v14 }
  0x6f   : > { %v1360_v47 = vsel %vm613_vm7, 1.0, %v1546_v18 }
  0x70   : > { %v625_v52 = vpack.c.bf16 %v1360_v47, %v1360_v47 }
  0x71   : > { %692 = vperm.xlu1 %1510, %v1604_v2  }
  0x72   : > { %v757_v57 = vunpack.c.l.b16 %v625_v52 }
  0x75   : > { %1512 = vset.pattern.permute.xlu2 %v1545_v60  ;;  %v606_v15 = vpop.permute.xlu2 %605 }
  0x76   : > { %695 = vperm.xlu2 %1512, %v1611_v4   ;;  %vm614_vm8 = vcmp.eq.s32.totalorder %v606_v15, %v1758_v14 }
  0x77   : > { %v1361_v48 = vsel %vm614_vm8, 1.0, %v1546_v18 }
  0x78   : > { %v626_v53 = vpack.c.bf16 %v1361_v48, %v1361_v48 }
  0x7a   : > { %v758_v58 = vunpack.c.l.b16 %v626_v53 }
  0x7c   : > { %v761_v63 = vpack.c.b16 %v758_v58, %v757_v57 }
  0x7f   : > { %v491_v23 = vpop.permute.xlu2 %490 }
  0x80   : > { %vm501_vm5 = vcmp.eq.s32.totalorder %v491_v23, %v1758_v14 }
  0x81   : > { %v1344_v31 = vsel %vm501_vm5, 1.0, %v1546_v18 }
  0x82   : > { %v513_v34 = vpack.c.bf16 %v1344_v31, %v1344_v31 }
  0x84   : > { %v575_v16 = vpop.permute.xlu0 %574  ;;  %v581_v17 = vpop.permute.xlu1 %580  ;;  %v717_v41 = vunpack.c.l.b16 %v513_v34 }
  0x85   : > { %vm585_vm0 = vcmp.eq.s32.totalorder %v575_v16, %v1758_v14  ;;  %vm587_vm3 = vcmp.eq.s32.totalorder %v581_v17, %v1758_v14 }
  0x86   : > { %v1356_v19 = vsel %vm585_vm0, 1.0, %v1546_v18  ;;  %v1358_v28 = vsel %vm587_vm3, 1.0, %v1546_v18 }
  0x87   : > { %v597_v21 = vpack.c.bf16 %v1356_v19, %v1356_v19  ;;  %v599_v32 = vpack.c.bf16 %v1358_v28, %v1358_v28 }
  0x88   : > { %v1771_v30 = vpop.permute.xlu2 %630 }
  0x89   : > { %v747_v24 = vunpack.c.l.b16 %v597_v21  ;;  %v749_v37 = vunpack.c.l.b16 %v599_v32  ;;  %vm641_vm15 = vcmp.eq.s32.totalorder %v1771_v30, %v1758_v14 }
  0x8a   : > { %v1364_v23 = vsel %vm641_vm15, 1.0, %v1546_v18 }
  0x8c   : > { %v578_v2 = vpop.permute.xlu0 %577  ;;  %v584_v20 = vpop.permute.xlu1 %583 }
  0x8d   : > { %vm586_vm1 = vcmp.eq.s32.totalorder %v578_v2, %v1758_v14  ;;  %vm588_vm4 = vcmp.eq.s32.totalorder %v584_v20, %v1758_v14 }
  0x8e   : > { %v1357_v22 = vsel %vm586_vm1, 1.0, %v1546_v18  ;;  %v1359_v29 = vsel %vm588_vm4, 1.0, %v1546_v18 }
  0x8f   : > { %v598_v4 = vpack.c.bf16 %v1357_v22, %v1357_v22  ;;  %v600_v33 = vpack.c.bf16 %v1359_v29, %v1359_v29 }
  0x91   : > { %v748_v25 = vunpack.c.l.b16 %v598_v4  ;;  %v750_v38 = vunpack.c.l.b16 %v600_v33  ;;  %v500_v42 = vpop.permute.xlu2 %499 }
  0x92   : > { %vm504_vm9 = vcmp.eq.s32.totalorder %v500_v42, %v1758_v14 }
  0x93   : > { %v751_v26 = vpack.c.b16 %v748_v25, %v747_v24  ;;  %v752_v44 = vpack.c.b16 %v750_v38, %v749_v37  ;;  %v1347_v50 = vsel %vm504_vm9, 1.0, %v1546_v18 }
  0x94   : > { %v516_v55 = vpack.c.bf16 %v1347_v50, %v1347_v50 }
  0x95   : > { %1398 = vmatmul.msk.bf16.vlgmr.msra.gmra.mxu2 %vm813_vm2, %v751_v26  ;;  %1414 = vmatmul.msk.bf16.vlgmr.msra.gmra.mxu3 %vm813_vm2, %v751_v26  ;;  %v612_v27 = vpop.permute.xlu1 %611  ;;  %v609_v36 = vpop.permute.xlu0 %608 }
  0x96   : > { %v720_v60 = vunpack.c.l.b16 %v516_v55  ;;  %vm616_vm11 = vcmp.eq.s32.totalorder %v612_v27, %v1758_v14  ;;  %vm615_vm12 = vcmp.eq.s32.totalorder %v609_v36, %v1758_v14  ;;  %v653_v27 = vpack.c.bf16 %v1364_v23, %v1364_v23 }
  0x97   : > { %v1363_v1 = vsel %vm616_vm11, 1.0, %v1546_v18  ;;  %v1362_v6 = vsel %vm615_vm12, 1.0, %v1546_v18 }
  0x98   : > { %v628_v10 = vpack.c.bf16 %v1363_v1, %v1363_v1  ;;  %v627_v11 = vpack.c.bf16 %v1362_v6, %v1362_v6  ;;  %v767_v32 = vunpack.c.l.b16 %v653_v27 }
  0x9a   : > { %v1788_v56 = vpop.permute.xlu2 %639  ;;  %v760_v13 = vunpack.c.l.b16 %v628_v10  ;;  %v759_v15 = vunpack.c.l.b16 %v627_v11 }
  0x9b   : > { %vm644_vm4 = vcmp.eq.s32.totalorder %v1788_v56, %v1758_v14 }
  0x9c   : > { %v762_v19 = vpack.c.b16 %v760_v13, %v759_v15 }
  0x9e   : > { %v494_v35 = vpop.permute.xlu1 %493  ;;  %v634_v51 = vpop.permute.xlu0 %633 }
  0x9f   : > { %vm502_vm6 = vcmp.eq.s32.totalorder %v494_v35, %v1758_v14  ;;  %vm642_vm0 = vcmp.eq.s32.totalorder %v634_v51, %v1758_v14 }
  0xa0   : > { %v1345_v39 = vsel %vm502_vm6, 1.0, %v1546_v18  ;;  %v1365_v4 = vsel %vm642_vm0, 1.0, %v1546_v18 }
  0xa1   : > { %v514_v40 = vpack.c.bf16 %v1345_v39, %v1345_v39  ;;  %v654_v28 = vpack.c.bf16 %v1365_v4, %v1365_v4 }
  0xa3   : > { %v718_v43 = vunpack.c.l.b16 %v514_v40  ;;  %v1802_v9 = vpop.permute.xlu2 %658  ;;  %v768_v33 = vunpack.c.l.b16 %v654_v28 }
  0xa4   : > { %vm669_vm8 = vcmp.eq.s32.totalorder %v1802_v9, %v1758_v14 }
  0xa5   : > { %v721_v45 = vpack.c.b16 %v718_v43, %v717_v41  ;;  %1399 = vmatmul.msk.bf16.gmra.mxu2 %vm813_vm2, %v752_v44  ;;  %1415 = vmatmul.msk.bf16.gmra.mxu3 %vm813_vm2, %v752_v44  ;;  %v771_v38 = vpack.c.b16 %v768_v33, %v767_v32  ;;  %v1367_v41 = vsel %vm644_vm4, 1.0, %v1546_v18  ;;  %v1368_v57 = vsel %vm669_vm8, 1.0, %v1546_v18 }
  0xa6   : > { %v497_v46 = vpop.permute.xlu1 %496 }
  0xa7   : > { %1392 = vmatmul.msk.bf16.vlgmr.msrb.gmra.mxu0 %vm813_vm2, %v721_v45  ;;  %1408 = vmatmul.msk.bf16.vlgmr.msrb.gmra.mxu1 %vm813_vm2, %v721_v45  ;;  %vm503_vm10 = vcmp.eq.s32.totalorder %v497_v46, %v1758_v14  ;;  %v519_v62 = vpop.permute.xlu0 %518  ;;  %v656_v46 = vpack.c.bf16 %v1367_v41, %v1367_v41 }
  0xa8   : > { %v1346_v49 = vsel %vm503_vm10, 1.0, %v1546_v18  ;;  %vm529_vm13 = vcmp.eq.s32.totalorder %v519_v62, %v1758_v14 }
  0xa9   : > { %v515_v54 = vpack.c.bf16 %v1346_v49, %v1346_v49  ;;  %v1348_v8 = vsel %vm529_vm13, 1.0, %v1546_v18  ;;  %v770_v50 = vunpack.c.l.b16 %v656_v46 }
  0xaa   : > { %v541_v12 = vpack.c.bf16 %v1348_v8, %v1348_v8 }
  0xab   : > { %v719_v59 = vunpack.c.l.b16 %v515_v54 }
  0xac   : > { %v727_v17 = vunpack.c.l.b16 %v541_v12  ;;  %v525_v20 = vpop.permute.xlu2 %524 }
  0xad   : > { %v722_v0 = vpack.c.b16 %v720_v60, %v719_v59  ;;  %vm531_vm1 = vcmp.eq.s32.totalorder %v525_v20, %v1758_v14 }
  0xae   : > { %v1350_v24 = vsel %vm531_vm1, 1.0, %v1546_v18 }
  0xaf   : > { %v1790_v61 = vpop.permute.xlu1 %636  ;;  %v528_v21 = vpop.permute.xlu0 %527  ;;  %v543_v29 = vpack.c.bf16 %v1350_v24, %v1350_v24 }
  0xb0   : > { %vm532_vm3 = vcmp.eq.s32.totalorder %v528_v21, %v1758_v14  ;;  %vm643_vm5 = vcmp.eq.s32.totalorder %v1790_v61, %v1758_v14  ;;  %v681_v61 = vpack.c.bf16 %v1368_v57, %v1368_v57 }
  0xb1   : > { %v1351_v25 = vsel %vm532_vm3, 1.0, %v1546_v18  ;;  %v729_v34 = vunpack.c.l.b16 %v543_v29  ;;  %v1366_v40 = vsel %vm643_vm5, 1.0, %v1546_v18 }
  0xb2   : > { %v544_v30 = vpack.c.bf16 %v1351_v25, %v1351_v25  ;;  %v655_v45 = vpack.c.bf16 %v1366_v40, %v1366_v40  ;;  %v777_v1 = vunpack.c.l.b16 %v681_v61 }
  0xb4   : > { %v730_v35 = vunpack.c.l.b16 %v544_v30  ;;  %v769_v49 = vunpack.c.l.b16 %v655_v45 }
  0xb5   : > { %1400 = vmatmul.msk.bf16.gmra.mxu2 %vm813_vm2, %v761_v63  ;;  %1416 = vmatmul.msk.bf16.gmra.mxu3 %vm813_vm2, %v761_v63  ;;  %v1823_v31 = vpop.permute.xlu2 %667 }
  0xb6   : > { %v732_v39 = vpack.c.b16 %v730_v35, %v729_v34  ;;  %v772_v55 = vpack.c.b16 %v770_v50, %v769_v49  ;;  %vm672_vm13 = vcmp.eq.s32.totalorder %v1823_v31, %v1758_v14 }
  0xb7   : > { %1393 = vmatmul.msk.bf16.gmra.mxu0 %vm813_vm2, %v722_v0  ;;  %1409 = vmatmul.msk.bf16.gmra.mxu1 %vm813_vm2, %v722_v0 }
  0xb8   : > { %v522_v7 = vpop.permute.xlu1 %521  ;;  %v547_v37 = vpop.permute.xlu0 %546 }
  0xb9   : > { %vm530_vm14 = vcmp.eq.s32.totalorder %v522_v7, %v1758_v14  ;;  %vm557_vm7 = vcmp.eq.s32.totalorder %v547_v37, %v1758_v14 }
  0xba   : > { %v1349_v3 = vsel %vm530_vm14, 1.0, %v1546_v18  ;;  %v1352_v43 = vsel %vm557_vm7, 1.0, %v1546_v18 }
  0xbb   : > { %v542_v5 = vpack.c.bf16 %v1349_v3, %v1349_v3  ;;  %v569_v48 = vpack.c.bf16 %v1352_v43, %v1352_v43  ;;  %v1371_v3 = vsel %vm672_vm13, 1.0, %v1546_v18 }
  0xbc   : > { %v684_v12 = vpack.c.bf16 %v1371_v3, %v1371_v3 }
  0xbd   : > { %v728_v16 = vunpack.c.l.b16 %v542_v5  ;;  %v737_v52 = vunpack.c.l.b16 %v569_v48 }
  0xbe   : > { %v687_v44 = vpop.permute.xlu2 %686  ;;  %v780_v15 = vunpack.c.l.b16 %v684_v12 }
  0xbf   : > { %v731_v22 = vpack.c.b16 %v728_v16, %v727_v17  ;;  %vm697_vm14 = vcmp.eq.s32.totalorder %v687_v44, %v1758_v14 }
  0xc0   : > { %v556_v54 = vpop.permute.xlu0 %555  ;;  %v1372_v20 = vsel %vm697_vm14, 1.0, %v1546_v18 }
  0xc1   : > { %v1806_v2 = vpop.permute.xlu1 %661  ;;  %vm560_vm11 = vcmp.eq.s32.totalorder %v556_v54, %v1758_v14 }
  0xc2   : > { %vm670_vm9 = vcmp.eq.s32.totalorder %v1806_v2, %v1758_v14  ;;  %v1355_v60 = vsel %vm560_vm11, 1.0, %v1546_v18  ;;  %v1869_v2 = vpop.f32.mrf.mxu1 }
  0xc3   : > { %v1369_v58 = vsel %vm670_vm9, 1.0, %v1546_v18  ;;  %v572_v0 = vpack.c.bf16 %v1355_v60, %v1355_v60 }
  0xc4   : > { %v682_v62 = vpack.c.bf16 %v1369_v58, %v1369_v58 }
  0xc5   : > { %1401 = vmatmul.msk.bf16.gmra.mxu2 %vm813_vm2, %v762_v19  ;;  %1417 = vmatmul.msk.bf16.gmra.mxu3 %vm813_vm2, %v762_v19  ;;  %v740_v8 = vunpack.c.l.b16 %v572_v0  ;;  %v1867_v19 = vpop.f32.mrf.mxu0 }
  0xc6   : > { %v778_v6 = vunpack.c.l.b16 %v682_v62 }
  0xc7   : > { %1394 = vmatmul.msk.bf16.gmra.mxu0 %vm813_vm2, %v731_v22  ;;  %1410 = vmatmul.msk.bf16.gmra.mxu1 %vm813_vm2, %v731_v22  ;;  %v553_v53 = vpop.permute.xlu2 %552  ;;  %v709_v22 = vpack.c.bf16 %v1372_v20, %v1372_v20 }
  0xc8   : > { %vm559_vm10 = vcmp.eq.s32.totalorder %v553_v53, %v1758_v14  ;;  %v781_v9 = vpack.c.b16 %v778_v6, %v777_v1 }
  0xc9   : > { %v1821_v26 = vpop.permute.xlu1 %664  ;;  %v1354_v59 = vsel %vm559_vm10, 1.0, %v1546_v18  ;;  %v787_v4 = vunpack.c.l.b16 %v709_v22 }
  0xca   : > { %v571_v63 = vpack.c.bf16 %v1354_v59, %v1354_v59  ;;  %vm671_vm12 = vcmp.eq.s32.totalorder %v1821_v26, %v1758_v14  ;;  %v1875_v26 = vpop.f32.mrf.mxu1 }
  0xcb   : > { %v1370_v11 = vsel %vm671_vm12, 1.0, %v1546_v18 }
  0xcc   : > { %v739_v7 = vunpack.c.l.b16 %v571_v63  ;;  %v683_v5 = vpack.c.bf16 %v1370_v11, %v1370_v11 }
  0xcd   : > { %v1873_v25 = vpop.f32.mrf.mxu0 }
  0xce   : > { %v742_v10 = vpack.c.b16 %v740_v8, %v739_v7  ;;  %v779_v13 = vunpack.c.l.b16 %v683_v5 }
  0xd0   : > { %v782_v16 = vpack.c.b16 %v780_v15, %v779_v13  ;;  %v696_v28 = vpop.permute.xlu2 %695 }
  0xd1   : > { %vm700_vm1 = vcmp.eq.s32.totalorder %v696_v28, %v1758_v14 }
  0xd2   : > { %v550_v36 = vpop.permute.xlu1 %549  ;;  %v1375_v31 = vsel %vm700_vm1, 1.0, %v1546_v18 }
  0xd3   : > { %vm558_vm6 = vcmp.eq.s32.totalorder %v550_v36, %v1758_v14  ;;  %v712_v35 = vpack.c.bf16 %v1375_v31, %v1375_v31 }
  0xd4   : > { %v1353_v42 = vsel %vm558_vm6, 1.0, %v1546_v18 }
  0xd5   : > { %1402 = vmatmul.msk.bf16.gmra.mxu2 %vm813_vm2, %v771_v38  ;;  %1418 = vmatmul.msk.bf16.gmra.mxu3 %vm813_vm2, %v771_v38  ;;  %v570_v47 = vpack.c.bf16 %v1353_v42, %v1353_v42 }
  0xd7   : > { %1395 = vmatmul.msk.bf16.gmra.mxu0 %vm813_vm2, %v732_v39  ;;  %1411 = vmatmul.msk.bf16.gmra.mxu1 %vm813_vm2, %v732_v39  ;;  %v738_v51 = vunpack.c.l.b16 %v570_v47 }
  0xd9   : > { %v741_v56 = vpack.c.b16 %v738_v51, %v737_v52 }
  0xdb   : > { %v690_v17 = vpop.permute.xlu1 %689 }
  0xdc   : > { %vm698_vm15 = vcmp.eq.s32.totalorder %v690_v17, %v1758_v14 }
  0xdd   : > { %v1373_v21 = vsel %vm698_vm15, 1.0, %v1546_v18 }
  0xde   : > { %v710_v23 = vpack.c.bf16 %v1373_v21, %v1373_v21 }
  0xe0   : > { %v788_v24 = vunpack.c.l.b16 %v710_v23 }
  0xe2   : > { %v791_v29 = vpack.c.b16 %v788_v24, %v787_v4 }
  0xe3   : > { %v693_v27 = vpop.permute.xlu1 %692 }
  0xe4   : > { %vm699_vm0 = vcmp.eq.s32.totalorder %v693_v27, %v1758_v14  ;;  %v790_v14 = vunpack.c.l.b16 %v712_v35 }
  0xe5   : > { %1403 = vmatmul.msk.bf16.gmra.mxu2 %vm813_vm2, %v772_v55  ;;  %1419 = vmatmul.msk.bf16.gmra.mxu3 %vm813_vm2, %v772_v55  ;;  %v1374_v30 = vsel %vm699_vm0, 1.0, %v1546_v18 }
  0xe6   : > { %v711_v34 = vpack.c.bf16 %v1374_v30, %v1374_v30 }
  0xe7   : > { %1396 = vmatmul.msk.bf16.gmra.mxu0 %vm813_vm2, %v741_v56  ;;  %1412 = vmatmul.msk.bf16.gmra.mxu1 %vm813_vm2, %v741_v56  ;;  %v1887_v36 = vpop.f32.mrf.mxu0  ;;  %v1889_v37 = vpop.f32.mrf.mxu1 }
  0xe8   : > { %2025 = vst [vmem:[#allocation2_spill] sm:$0xff] %v1889_v37  ;;  %v789_v38 = vunpack.c.l.b16 %v711_v34 }
  0xea   : > { %v792_v41 = vpack.c.b16 %v790_v14, %v789_v38 }
  0xef   : > { %v1895_v42 = vpop.f32.mrf.mxu0  ;;  %v1897_v18 = vpop.f32.mrf.mxu1 }
  0xf0   : > { %2026 = vst [vmem:[#allocation3_spill] sm:$0xff] %v1895_v42 }
  0xf1   : > { %2027 = vst [vmem:[#allocation4_spill] sm:$0xff] %v1897_v18 }
  0xf5   : > { %1404 = vmatmul.msk.bf16.gmra.mxu2 %vm813_vm2, %v781_v9  ;;  %1420 = vmatmul.msk.bf16.gmra.mxu3 %vm813_vm2, %v781_v9 }
  0xf7   : > { %1397 = vmatmul.msk.bf16.gmra.mxu0 %vm813_vm2, %v742_v10  ;;  %1413 = vmatmul.msk.bf16.gmra.mxu1 %vm813_vm2, %v742_v10 }
 0x105   : > { %1405 = vmatmul.msk.bf16.gmra.mxu2 %vm813_vm2, %v782_v16  ;;  %1421 = vmatmul.msk.bf16.gmra.mxu3 %vm813_vm2, %v782_v16 }
 0x115   : > { %1406 = vmatmul.msk.bf16.gmra.mxu2 %vm813_vm2, %v791_v29  ;;  %1422 = vmatmul.msk.bf16.gmra.mxu3 %vm813_vm2, %v791_v29 }
 0x118   : > { %v1883_v32 = vpop.f32.mrf.mxu2  ;;  %v1885_v33 = vpop.f32.mrf.mxu3 }
 0x120   : > { %v1891_v39 = vpop.f32.mrf.mxu2  ;;  %v1893_v40 = vpop.f32.mrf.mxu3 }
 0x124   : > { %v871_v45 = vpop.f32.mrf.mxu0  ;;  %v960_v46 = vpop.f32.mrf.mxu1 }
 0x125   : > { %1407 = vmatmul.msk.bf16.gmra.mxu2 %vm813_vm2, %v792_v41  ;;  %1423 = vmatmul.msk.bf16.gmra.mxu3 %vm813_vm2, %v792_v41 }
 0x128   : > { %v1901_v43 = vpop.f32.mrf.mxu2  ;;  %v1903_v44 = vpop.f32.mrf.mxu3 }
 0x12c   : > { %v873_v51 = vpop.f32.mrf.mxu0  ;;  %v962_v52 = vpop.f32.mrf.mxu1 }
 0x130   : > { %v1905_v47 = vpop.f32.mrf.mxu2  ;;  %v1907_v48 = vpop.f32.mrf.mxu3 }
 0x134   : > { %v876_v55 = vpop.f32.mrf.mxu0  ;;  %v965_v56 = vpop.f32.mrf.mxu1 }
 0x138   : > { %v911_v49 = vpop.f32.mrf.mxu2  ;;  %v1000_v50 = vpop.f32.mrf.mxu3 }
 0x13c   : > { %v1917_v59 = vpop.f32.mrf.mxu0  ;;  %v1919_v60 = vpop.f32.mrf.mxu1 }
 0x140   : > { %v1909_v53 = vpop.f32.mrf.mxu2  ;;  %v1911_v54 = vpop.f32.mrf.mxu3 }
 0x144   : > { %v881_v63 = vpop.f32.mrf.mxu0  ;;  %v970_v0 = vpop.f32.mrf.mxu1 }
 0x145   : > { %v1040_v27 = vmax.f32 %v871_v45, %v881_v63  ;;  %v1041_v28 = vmax.f32 %v960_v46, %v970_v0  ;;  %v343_v0 = vld [vmem:[%s2023_s4] sm:$0x3] }
 0x148   : > { %v1913_v57 = vpop.f32.mrf.mxu2  ;;  %v1915_v58 = vpop.f32.mrf.mxu3 }
 0x14c   : > { %v883_v9 = vpop.f32.mrf.mxu0  ;;  %v972_v10 = vpop.f32.mrf.mxu1 }
 0x14d   : > { %v1042_v18 = vmax.f32 %v873_v51, %v883_v9  ;;  %v1043_v42 = vmax.f32 %v962_v52, %v972_v10  ;;  %v1956_v51 = vperm.slane %v343_v0, 0 }
 0x150   : > { %v1921_v61 = vpop.f32.mrf.mxu2  ;;  %v1923_v62 = vpop.f32.mrf.mxu3 }
 0x154   : > { %v886_v5 = vpop.f32.mrf.mxu0  ;;  %v975_v12 = vpop.f32.mrf.mxu1 }
 0x155   : > { %v1045_v9 = vmax.f32 %v965_v56, %v975_v12 }
 0x158   : > { %v921_v1 = vpop.f32.mrf.mxu2  ;;  %v1010_v6 = vpop.f32.mrf.mxu3 }
 0x15c   : > { %v1937_v16 = vpop.f32.mrf.mxu0  ;;  %v1939_v17 = vpop.f32.mrf.mxu1 }
 0x160   : > { %v1925_v7 = vpop.f32.mrf.mxu2  ;;  %v1927_v8 = vpop.f32.mrf.mxu3 }
 0x164   : > { %v891_v22 = vpop.f32.mrf.mxu0  ;;  %v980_v23 = vpop.f32.mrf.mxu1 }
 0x165   : > { %v1048_v31 = vmax.f32 %v1040_v27, %v891_v22  ;;  %v1049_v34 = vmax.f32 %v1041_v28, %v980_v23  ;;  %v1044_v27 = vmax.f32 %v876_v55, %v886_v5 }
 0x167   : > { %v1056_v14 = vmax.f32 %v1048_v31, %v1883_v32  ;;  %v1057_v41 = vmax.f32 %v1049_v34, %v1885_v33 }
 0x168   : > { %v1929_v11 = vpop.f32.mrf.mxu2  ;;  %v1931_v3 = vpop.f32.mrf.mxu3 }
 0x169   : > { %v1064_v46 = vmax.f32 %v1056_v14, %v911_v49  ;;  %v1065_v63 = vmax.f32 %v1057_v41, %v1000_v50 }
 0x16b   : > { %v1073_v52 = vmax.f32 %v1065_v63, %v1010_v6 }
 0x16c   : > { %v893_v35 = vpop.f32.mrf.mxu0  ;;  %v982_v38 = vpop.f32.mrf.mxu1 }
 0x170   : > { %v1933_v13 = vpop.f32.mrf.mxu2  ;;  %v1935_v15 = vpop.f32.mrf.mxu3 }
 0x171   : > { %2028 = vst [vmem:[#allocation5_spill] sm:$0xff] %v1933_v13  ;;  %v1051_v13 = vmax.f32 %v1043_v42, %v982_v38  ;;  %v1958_v42 = vperm.slane %v343_v0, 1 }
 0x172   : > { %2029 = vst [vmem:[#allocation6_spill] sm:$0xff] %v1935_v15  ;;  %v1050_v15 = vmax.f32 %v1042_v18, %v893_v35  ;;  %v1072_v18 = vmax.f32 %v1064_v46, %v921_v1 }
 0x173   : > { %v1059_v33 = vmax.f32 %v1051_v13, %v1893_v40  ;;  %v470_v40 = vadd.f32 %v1869_v2, %v1958_v42  ;;  %v1046_v2 = vmax.f32 %v1917_v59, %v1937_v16 }
 0x174   : > { %v896_v22 = vpop.f32.mrf.mxu0  ;;  %v985_v23 = vpop.f32.mrf.mxu1  ;;  %v1058_v32 = vmax.f32 %v1050_v15, %v1891_v39  ;;  %v451_v39 = vadd.f32 %v1867_v19, %v1956_v51 }
 0x175   : > { %v1052_v49 = vmax.f32 %v1044_v27, %v896_v22  ;;  %v1053_v28 = vmax.f32 %v1045_v9, %v985_v23  ;;  %v1067_v34 = vmax.f32 %v1059_v33, %v1911_v54 }
 0x176   : > { %v1066_v31 = vmax.f32 %v1058_v32, %v1909_v53 }
 0x177   : > { %v1060_v56 = vmax.f32 %v1052_v49, %v1901_v43  ;;  %v1061_v15 = vmax.f32 %v1053_v28, %v1903_v44  ;;  %v1075_v54 = vmax.f32 %v1067_v34, %v1927_v8  ;;  %v1047_v43 = vmax.f32 %v1919_v60, %v1939_v17 }
 0x178   : > { %v931_v20 = vpop.f32.mrf.mxu2  ;;  %v1020_v21 = vpop.f32.mrf.mxu3  ;;  %v1074_v53 = vmax.f32 %v1066_v31, %v1925_v7  ;;  %v472_v60 = vadd.f32 %v1875_v26, %v1958_v42 }
 0x179   : > { %v1080_v50 = vmax.f32 %v1072_v18, %v931_v20  ;;  %v1081_v10 = vmax.f32 %v1073_v52, %v1020_v21  ;;  %v1068_v38 = vmax.f32 %v1060_v56, %v1913_v57  ;;  %v1069_v63 = vmax.f32 %v1061_v15, %v1915_v58 }
 0x17a   : > { %v453_v57 = vadd.f32 %v1873_v25, %v1956_v51 }
 0x17b   : > { %v1076_v58 = vmax.f32 %v1068_v38, %v1929_v11  ;;  %v1077_v32 = vmax.f32 %v1069_v63, %v1931_v3  ;;  %v456_v3 = vadd.f32 %v1887_v36, %v1956_v51 }
 0x17c   : > { %v898_v20 = vpop.f32.mrf.mxu0  ;;  %v987_v21 = vpop.f32.mrf.mxu1 }
 0x17d   : > { %v1054_v8 = vmax.f32 %v1046_v2, %v898_v20  ;;  %v1055_v46 = vmax.f32 %v1047_v43, %v987_v21  ;;  %v2034_v20 = vld [vmem:[#allocation4_spill] sm:$0xff] }
 0x17e   : > { %v477_v21 = vadd.f32 %v2034_v20, %v1958_v42 }
 0x17f   : > { %v1062_v23 = vmax.f32 %v1054_v8, %v1905_v47  ;;  %v1063_v27 = vmax.f32 %v1055_v46, %v1907_v48 }
 0x180   : > { %v933_v4 = vpop.f32.mrf.mxu2  ;;  %v1022_v24 = vpop.f32.mrf.mxu3 }
 0x181   : > { %v1082_v14 = vmax.f32 %v1074_v53, %v933_v4  ;;  %v1083_v44 = vmax.f32 %v1075_v54, %v1022_v24  ;;  %v1070_v49 = vmax.f32 %v1062_v23, %v1921_v61  ;;  %v1071_v47 = vmax.f32 %v1063_v27, %v1923_v62  ;;  %v2033_v53 = vld [vmem:[#allocation3_spill] sm:$0xff] }
 0x182   : > { %v458_v54 = vadd.f32 %v2033_v53, %v1956_v51 }
 0x188   : > { %v1941_v29 = vpop.f32.mrf.mxu2  ;;  %v1943_v30 = vpop.f32.mrf.mxu3 }
 0x189   : > { %v1084_v26 = vmax.f32 %v1076_v58, %v1941_v29  ;;  %v1085_v18 = vmax.f32 %v1077_v32, %v1943_v30 }
 0x190   : > { %v1947_v37 = vpop.f32.mrf.mxu2  ;;  %v1949_v45 = vpop.f32.mrf.mxu3 }
 0x198   : > { %v941_v55 = vpop.f32.mrf.mxu2  ;;  %v1030_v5 = vpop.f32.mrf.mxu3 }
 0x199   : > { %v1088_v13 = vmax.f32 %v1080_v50, %v941_v55  ;;  %v1089_v1 = vmax.f32 %v1081_v10, %v1030_v5  ;;  %v2030_v10 = vld [vmem:[#allocation2_spill] sm:$0xff]  ;;  %v2031_v55 = vld [vmem:[#allocation5_spill] sm:$0xff] }
 0x19a   : > { %v475_v28 = vadd.f32 %v2030_v10, %v1958_v42  ;;  %v1078_v5 = vmax.f32 %v1070_v49, %v2031_v55 }
 0x19b   : > { %v1096_v6 = vadd.f32 %v1088_v13, %v451_v39  ;;  %v1097_v12 = vadd.f32 %v1089_v1, %v470_v40  ;;  %v2032_v39 = vld [vmem:[#allocation6_spill] sm:$0xff] }
 0x19c   : > { %v1079_v61 = vmax.f32 %v1071_v47, %v2032_v39  ;;  %v1086_v13 = vmax.f32 %v1078_v5, %v1947_v37 }
 0x19d   : > { %vm1104_vm2 = vcmp.gt.f32.partialorder %v1096_v6, 0.0  ;;  %v1112_v19 = vmul.f32 0.2, %v1096_v6  ;;  %vm1105_vm3 = vcmp.gt.f32.partialorder %v1097_v12, 0.0  ;;  %v1113_v35 = vmul.f32 0.2, %v1097_v12 }
 0x19e   : > { %v1087_v36 = vmax.f32 %v1079_v61, %v1949_v45 }
 0x19f   : > { %v1120_v41 = vsel %vm1104_vm2, %v1096_v6, %v1112_v19  ;;  %v1121_v7 = vsel %vm1105_vm3, %v1097_v12, %v1113_v35 }
 0x1a0   : > { %v1128_v59 = vpack.c.bf16 %v1121_v7, %v1120_v41  ;;  %v943_v16 = vpop.f32.mrf.mxu2  ;;  %v1032_v0 = vpop.f32.mrf.mxu3 }
 0x1a1   : > { %v1090_v17 = vmax.f32 %v1082_v14, %v943_v16  ;;  %v1091_v4 = vmax.f32 %v1083_v44, %v1032_v0 }
 0x1a2   : > { %1132 = vst [vmem:[%s1979_s15] sm:$0xff] %v1128_v59 }
 0x1a3   : > { %v1098_v24 = vadd.f32 %v1090_v17, %v453_v57  ;;  %v1099_v22 = vadd.f32 %v1091_v4, %v472_v60 }
 0x1a5   : > { %vm1106_vm4 = vcmp.gt.f32.partialorder %v1098_v24, 0.0  ;;  %v1114_v33 = vmul.f32 0.2, %v1098_v24  ;;  %vm1107_vm5 = vcmp.gt.f32.partialorder %v1099_v22, 0.0  ;;  %v1115_v25 = vmul.f32 0.2, %v1099_v22 }
 0x1a7   : > { %v1122_v52 = vsel %vm1106_vm4, %v1098_v24, %v1114_v33  ;;  %v1123_v9 = vsel %vm1107_vm5, %v1099_v22, %v1115_v25 }
 0x1a8   : > { %v1129_v48 = vpack.c.bf16 %v1123_v9, %v1122_v52  ;;  %v946_v50 = vpop.f32.mrf.mxu2  ;;  %v1035_v11 = vpop.f32.mrf.mxu3 }
 0x1a9   : > { %v1092_v31 = vmax.f32 %v1084_v26, %v946_v50  ;;  %v1093_v34 = vmax.f32 %v1085_v18, %v1035_v11 }
 0x1aa   : > { %1133 = vst [vmem:[%s1979_s15 + $0x8] sm:$0xff] %v1129_v48 }
 0x1ab   : > { %v1100_v29 = vadd.f32 %v1092_v31, %v456_v3  ;;  %v1101_v30 = vadd.f32 %v1093_v34, %v475_v28 }
 0x1ad   : > { %vm1108_vm6 = vcmp.gt.f32.partialorder %v1100_v29, 0.0  ;;  %v1116_v62 = vmul.f32 0.2, %v1100_v29  ;;  %vm1109_vm7 = vcmp.gt.f32.partialorder %v1101_v30, 0.0  ;;  %v1117_v40 = vmul.f32 0.2, %v1101_v30 }
 0x1af   : > { %v1124_v1 = vsel %vm1108_vm6, %v1100_v29, %v1116_v62  ;;  %v1125_v56 = vsel %vm1109_vm7, %v1101_v30, %v1117_v40 }
 0x1b0   : > { %v1130_v6 = vpack.c.bf16 %v1125_v56, %v1124_v1  ;;  %v948_v12 = vpop.f32.mrf.mxu2  ;;  %v1037_v15 = vpop.f32.mrf.mxu3 }
 0x1b1   : > { %v1094_v19 = vmax.f32 %v1086_v13, %v948_v12  ;;  %v1095_v35 = vmax.f32 %v1087_v36, %v1037_v15 }
 0x1b2   : > { %1134 = vst [vmem:[%s1979_s15 + $0x10] sm:$0xff] %v1130_v6 }
 0x1b3   : > { %v1102_v2 = vadd.f32 %v1094_v19, %v458_v54  ;;  %v1103_v43 = vadd.f32 %v1095_v35, %v477_v21 }
 0x1b5   : > { %vm1110_vm8 = vcmp.gt.f32.partialorder %v1102_v2, 0.0  ;;  %v1118_v37 = vmul.f32 0.2, %v1102_v2  ;;  %vm1111_vm9 = vcmp.gt.f32.partialorder %v1103_v43, 0.0  ;;  %v1119_v45 = vmul.f32 0.2, %v1103_v43 }
 0x1b7   : > { %v1126_v38 = vsel %vm1110_vm8, %v1102_v2, %v1118_v37  ;;  %v1127_v14 = vsel %vm1111_vm9, %v1103_v43, %v1119_v45 }
 0x1b8   : > { %v1131_v44 = vpack.c.bf16 %v1127_v14, %v1126_v38 }
 0x1ba   : > { %1135 = vst [vmem:[%s1979_s15 + $0x18] sm:$0xff] %v1131_v44 }
 0x1bb PF: > { %s15_s20 = sadd.s32 1, %s1536_s20   ;;  %s2035_s18 = smov %s1532_s19 }
 0x1bc   : > { %p12_p5 = scmp.ge.s32.totalorder %s15_s20, 4   ;;  %s2036_s19 = smov %s2038_s21 }
 0x1be   :  { %14 = sbr.rel (!%p12_p5) target bundleno = 2 (0x2), region = 76 }

// kernel: _lambda_.27
= control target key start
LH: loop header
LB: loop body
LE: loop exit
PB: predicated region body
PF: predicated region fallthrough
CT: control target
= control target key end

     0   :  { %8 = vsyncpa [#allocation3], 0  ;;  %s3476_s0 = inlined_call_operand.vmem [shape: bf16[2,2048], index: 0, kind: input, shape index: {}]   ;;  %s3477_s1 = inlined_call_operand.hbm [shape: bf16[2048,256], index: 1, kind: input, shape index: {}]   ;;  %s3478_s2 = inlined_call_operand.vmem [shape: f32[1,256], index: 2, kind: input, shape index: {}]   ;;  %s3479_s3 = inlined_call_operand.hbm [shape: f32[2,256], index: 3, kind: output, shape index: {}]  }
   0x1   :  { %9 = vsyncpa [#allocation4], 0  ;;  %s16_s14 = sshll.u32 %s3477_s1, 4  ;;  %s3395_s15 = smov [#allocation2]   ;;  %s17_s14 = int_to_ptr.hbm [resolvable:$true] %s16_s14 }
   0x2   :  { %s18_s16 = sshll.u32 %s3395_s15, 4  ;;  %s3396_s17 = smov 128   ;;  %s19_s16 = int_to_ptr.vmem [resolvable:$true] %s18_s16 }
   0x3   :  { %s3397_s18 = smov 8  }
   0x4   :  { %24 = dma.hbm_to_vmem [thread:$0]  %s17_s14, 32768, %s19_s16, [#allocation3], %s3396_s17, %s3396_s17, %s3397_s18  }
   0x5   :  { %3391 = dma.done.wait [#allocation3], 32768  }
   0x6   :  { %3392 = vsyncadd [#allocation3], 4294934528  ;;  %v2109_v0 = vld [vmem:[#allocation2 + $0x70] sm:$0xf]  ;;  %v3090_v1 = vld [vmem:[#allocation2 + $0x74] sm:$0xf0] }
   0x7   :  { %v2173_v2 = vld [vmem:[#allocation2 + $0xf0] sm:$0xf]  ;;  %v2110_v3 = vor.u32 %v3090_v1, %v2109_v0  ;;  %v3106_v4 = vld [vmem:[#allocation2 + $0xf4] sm:$0xf0]  ;;  %v2101_v11 = vld [vmem:[#allocation2 + $0x60] sm:$0xf] }
   0x8   :  { %v2237_v5 = vld [vmem:[#allocation2 + $0x170] sm:$0xf]  ;;  %v3122_v6 = vld [vmem:[#allocation2 + $0x174] sm:$0xf0]  ;;  %v2174_v7 = vor.u32 %v3106_v4, %v2173_v2  ;;  %v3088_v13 = vld [vmem:[#allocation2 + $0x64] sm:$0xf0] }
   0x9   :  { %v2238_v8 = vor.u32 %v3122_v6, %v2237_v5  ;;  %v2301_v9 = vld [vmem:[#allocation2 + $0x1f0] sm:$0xf]  ;;  %v3138_v10 = vld [vmem:[#allocation2 + $0x1f4] sm:$0xf0]  ;;  %1611 = vmatpush.bf16.msra.mxu0 %v2110_v3  ;;  %v2165_v14 = vld [vmem:[#allocation2 + $0xe0] sm:$0xf]  ;;  %v2102_v16 = vor.u32 %v3088_v13, %v2101_v11 }
   0xa   :  { %v2302_v12 = vor.u32 %v3138_v10, %v2301_v9  ;;  %v3104_v15 = vld [vmem:[#allocation2 + $0xe4] sm:$0xf0]  ;;  %1624 = vmatpush.bf16.msra.mxu1 %v2174_v7  ;;  %v2229_v18 = vld [vmem:[#allocation2 + $0x160] sm:$0xf]  ;;  %v2093_v23 = vld [vmem:[#allocation2 + $0x50] sm:$0xf] }
   0xb   :  { %1637 = vmatpush.bf16.msra.mxu2 %v2238_v8  ;;  %v2166_v17 = vor.u32 %v3104_v15, %v2165_v14  ;;  %v3120_v19 = vld [vmem:[#allocation2 + $0x164] sm:$0xf0]  ;;  %v2293_v20 = vld [vmem:[#allocation2 + $0x1e0] sm:$0xf]  ;;  %v3086_v24 = vld [vmem:[#allocation2 + $0x54] sm:$0xf0] }
   0xc   :  { %1650 = vmatpush.bf16.msra.mxu3 %v2302_v12  ;;  %v2230_v21 = vor.u32 %v3120_v19, %v2229_v18  ;;  %v3136_v22 = vld [vmem:[#allocation2 + $0x1e4] sm:$0xf0]  ;;  %v2157_v26 = vld [vmem:[#allocation2 + $0xd0] sm:$0xf]  ;;  %v3102_v27 = vld [vmem:[#allocation2 + $0xd4] sm:$0xf0]  ;;  %v2094_v29 = vor.u32 %v3086_v24, %v2093_v23 }
   0xd   :  { %v2294_v25 = vor.u32 %v3136_v22, %v2293_v20  ;;  %v2221_v28 = vld [vmem:[#allocation2 + $0x150] sm:$0xf]  ;;  %1612 = vmatpush.bf16.msra.mxu0 %v2102_v16  ;;  %v3118_v30 = vld [vmem:[#allocation2 + $0x154] sm:$0xf0]  ;;  %v2158_v33 = vor.u32 %v3102_v27, %v2157_v26  ;;  %v2085_v35 = vld [vmem:[#allocation2 + $0x40] sm:$0xf] }
   0xe   :  { %v2285_v31 = vld [vmem:[#allocation2 + $0x1d0] sm:$0xf]  ;;  %v3134_v32 = vld [vmem:[#allocation2 + $0x1d4] sm:$0xf0]  ;;  %1625 = vmatpush.bf16.msra.mxu1 %v2166_v17  ;;  %v2222_v34 = vor.u32 %v3118_v30, %v2221_v28  ;;  %v3084_v36 = vld [vmem:[#allocation2 + $0x44] sm:$0xf0] }
   0xf   :  { %1638 = vmatpush.bf16.msra.mxu2 %v2230_v21  ;;  %v2149_v37 = vld [vmem:[#allocation2 + $0xc0] sm:$0xf]  ;;  %v2286_v38 = vor.u32 %v3134_v32, %v2285_v31  ;;  %v3100_v39 = vld [vmem:[#allocation2 + $0xc4] sm:$0xf0]  ;;  %v2086_v44 = vor.u32 %v3084_v36, %v2085_v35  ;;  %v2077_v47 = vld [vmem:[#allocation2 + $0x30] sm:$0xf] }
  0x10   :  { %1651 = vmatpush.bf16.msra.mxu3 %v2294_v25  ;;  %v2213_v40 = vld [vmem:[#allocation2 + $0x140] sm:$0xf]  ;;  %v3116_v41 = vld [vmem:[#allocation2 + $0x144] sm:$0xf0]  ;;  %v2150_v45 = vor.u32 %v3100_v39, %v2149_v37  ;;  %v3082_v48 = vld [vmem:[#allocation2 + $0x34] sm:$0xf0] }
  0x11   :  { %v2277_v42 = vld [vmem:[#allocation2 + $0x1c0] sm:$0xf]  ;;  %v3132_v43 = vld [vmem:[#allocation2 + $0x1c4] sm:$0xf0]  ;;  %1613 = vmatpush.bf16.msra.mxu0 %v2094_v29  ;;  %v2214_v46 = vor.u32 %v3116_v41, %v2213_v40  ;;  %v2141_v49 = vld [vmem:[#allocation2 + $0xb0] sm:$0xf]  ;;  %v2078_v56 = vor.u32 %v3082_v48, %v2077_v47 }
  0x12   :  { %1626 = vmatpush.bf16.msra.mxu1 %v2158_v33  ;;  %v2278_v50 = vor.u32 %v3132_v43, %v2277_v42  ;;  %v3098_v51 = vld [vmem:[#allocation2 + $0xb4] sm:$0xf0]  ;;  %v2205_v52 = vld [vmem:[#allocation2 + $0x130] sm:$0xf]  ;;  %v2069_v59 = vld [vmem:[#allocation2 + $0x20] sm:$0xf] }
  0x13   :  { %1639 = vmatpush.bf16.msra.mxu2 %v2222_v34  ;;  %v3114_v53 = vld [vmem:[#allocation2 + $0x134] sm:$0xf0]  ;;  %v2269_v54 = vld [vmem:[#allocation2 + $0x1b0] sm:$0xf]  ;;  %v2142_v57 = vor.u32 %v3098_v51, %v2141_v49  ;;  %v3080_v60 = vld [vmem:[#allocation2 + $0x24] sm:$0xf0] }
  0x14   :  { %1652 = vmatpush.bf16.msra.mxu3 %v2286_v38  ;;  %v3130_v55 = vld [vmem:[#allocation2 + $0x1b4] sm:$0xf0]  ;;  %v2206_v58 = vor.u32 %v3114_v53, %v2205_v52  ;;  %v2133_v61 = vld [vmem:[#allocation2 + $0xa0] sm:$0xf]  ;;  %v3096_v63 = vld [vmem:[#allocation2 + $0xa4] sm:$0xf0]  ;;  %v2070_v4 = vor.u32 %v3080_v60, %v2069_v59 }
  0x15   :  { %1614 = vmatpush.bf16.msra.mxu0 %v2086_v44  ;;  %v2270_v62 = vor.u32 %v3130_v55, %v2269_v54  ;;  %v2197_v0 = vld [vmem:[#allocation2 + $0x120] sm:$0xf]  ;;  %v3112_v1 = vld [vmem:[#allocation2 + $0x124] sm:$0xf0]  ;;  %v2134_v5 = vor.u32 %v3096_v63, %v2133_v61  ;;  %v2061_v7 = vld [vmem:[#allocation2 + $0x10] sm:$0xf] }
  0x16   :  { %1627 = vmatpush.bf16.msra.mxu1 %v2150_v45  ;;  %v2261_v2 = vld [vmem:[#allocation2 + $0x1a0] sm:$0xf]  ;;  %v3128_v3 = vld [vmem:[#allocation2 + $0x1a4] sm:$0xf0]  ;;  %v2198_v6 = vor.u32 %v3112_v1, %v2197_v0  ;;  %v3078_v8 = vld [vmem:[#allocation2 + $0x14] sm:$0xf0] }
  0x17   :  { %1640 = vmatpush.bf16.msra.mxu2 %v2214_v46  ;;  %v2125_v9 = vld [vmem:[#allocation2 + $0x90] sm:$0xf]  ;;  %v2262_v10 = vor.u32 %v3128_v3, %v2261_v2  ;;  %v3094_v11 = vld [vmem:[#allocation2 + $0x94] sm:$0xf0]  ;;  %v2062_v16 = vor.u32 %v3078_v8, %v2061_v7  ;;  %v2053_v17 = vld [vmem:[#allocation2] sm:$0xf] }
  0x18   :  { %1653 = vmatpush.bf16.msra.mxu3 %v2278_v50  ;;  %v2189_v12 = vld [vmem:[#allocation2 + $0x110] sm:$0xf]  ;;  %v3110_v13 = vld [vmem:[#allocation2 + $0x114] sm:$0xf0]  ;;  %v3076_v18 = vld [vmem:[#allocation2 + $0x4] sm:$0xf0]  ;;  %v2126_v19 = vor.u32 %v3094_v11, %v2125_v9 }
  0x19   :  { %1615 = vmatpush.bf16.msra.mxu0 %v2078_v56  ;;  %v2253_v14 = vld [vmem:[#allocation2 + $0x190] sm:$0xf]  ;;  %v3126_v15 = vld [vmem:[#allocation2 + $0x194] sm:$0xf0]  ;;  %v2190_v20 = vor.u32 %v3110_v13, %v2189_v12  ;;  %v2117_v21 = vld [vmem:[#allocation2 + $0x80] sm:$0xf]  ;;  %v2054_v31 = vor.u32 %v3076_v18, %v2053_v17 }
  0x1a   :  { %1628 = vmatpush.bf16.msra.mxu1 %v2142_v57  ;;  %v3092_v22 = vld [vmem:[#allocation2 + $0x84] sm:$0xf0]  ;;  %v2181_v23 = vld [vmem:[#allocation2 + $0x100] sm:$0xf]  ;;  %v2254_v24 = vor.u32 %v3126_v15, %v2253_v14  ;;  %v2365_v28 = vld [vmem:[#allocation2 + $0x270] sm:$0xf] }
  0x1b   :  { %1641 = vmatpush.bf16.msra.mxu2 %v2206_v58  ;;  %v3108_v25 = vld [vmem:[#allocation2 + $0x104] sm:$0xf0]  ;;  %v2245_v26 = vld [vmem:[#allocation2 + $0x180] sm:$0xf]  ;;  %v3154_v29 = vld [vmem:[#allocation2 + $0x274] sm:$0xf0]  ;;  %v2118_v35 = vor.u32 %v3092_v22, %v2117_v21 }
  0x1c   :  { %1654 = vmatpush.bf16.msra.mxu3 %v2270_v62  ;;  %v3124_v27 = vld [vmem:[#allocation2 + $0x184] sm:$0xf0]  ;;  %v2429_v30 = vld [vmem:[#allocation2 + $0x2f0] sm:$0xf]  ;;  %v3170_v32 = vld [vmem:[#allocation2 + $0x2f4] sm:$0xf0]  ;;  %v2182_v36 = vor.u32 %v3108_v25, %v2181_v23  ;;  %v2366_v40 = vor.u32 %v3154_v29, %v2365_v28 }
  0x1d   :  { %1616 = vmatpush.bf16.msra.mxu0 %v2070_v4  ;;  %v2493_v33 = vld [vmem:[#allocation2 + $0x370] sm:$0xf]  ;;  %v3186_v34 = vld [vmem:[#allocation2 + $0x374] sm:$0xf0]  ;;  %v2246_v39 = vor.u32 %v3124_v27, %v2245_v26  ;;  %v2430_v41 = vor.u32 %v3170_v32, %v2429_v30  ;;  %v2357_v43 = vld [vmem:[#allocation2 + $0x260] sm:$0xf] }
  0x1e   :  { %1629 = vmatpush.bf16.msra.mxu1 %v2134_v5  ;;  %v2557_v37 = vld [vmem:[#allocation2 + $0x3f0] sm:$0xf]  ;;  %v3202_v38 = vld [vmem:[#allocation2 + $0x3f4] sm:$0xf0]  ;;  %v2494_v42 = vor.u32 %v3186_v34, %v2493_v33  ;;  %v3152_v44 = vld [vmem:[#allocation2 + $0x264] sm:$0xf0] }
  0x1f   :  { %1642 = vmatpush.bf16.msra.mxu2 %v2198_v6  ;;  %v2421_v45 = vld [vmem:[#allocation2 + $0x2e0] sm:$0xf]  ;;  %v2558_v46 = vor.u32 %v3202_v38, %v2557_v37  ;;  %v3168_v47 = vld [vmem:[#allocation2 + $0x2e4] sm:$0xf0]  ;;  %v2358_v52 = vor.u32 %v3152_v44, %v2357_v43  ;;  %v2349_v53 = vld [vmem:[#allocation2 + $0x250] sm:$0xf] }
  0x20   :  { %1655 = vmatpush.bf16.msra.mxu3 %v2262_v10  ;;  %v2485_v48 = vld [vmem:[#allocation2 + $0x360] sm:$0xf]  ;;  %v3184_v49 = vld [vmem:[#allocation2 + $0x364] sm:$0xf0]  ;;  %v3150_v54 = vld [vmem:[#allocation2 + $0x254] sm:$0xf0]  ;;  %v2422_v55 = vor.u32 %v3168_v47, %v2421_v45 }
  0x21   :  { %1617 = vmatpush.bf16.msra.mxu0 %v2062_v16  ;;  %v2549_v50 = vld [vmem:[#allocation2 + $0x3e0] sm:$0xf]  ;;  %v3200_v51 = vld [vmem:[#allocation2 + $0x3e4] sm:$0xf0]  ;;  %v2486_v56 = vor.u32 %v3184_v49, %v2485_v48  ;;  %v2413_v57 = vld [vmem:[#allocation2 + $0x2d0] sm:$0xf]  ;;  %v2350_v1 = vor.u32 %v3150_v54, %v2349_v53 }
  0x22   :  { %1630 = vmatpush.bf16.msra.mxu1 %v2126_v19  ;;  %v3166_v58 = vld [vmem:[#allocation2 + $0x2d4] sm:$0xf0]  ;;  %v2550_v60 = vor.u32 %v3200_v51, %v2549_v50  ;;  %v2477_v61 = vld [vmem:[#allocation2 + $0x350] sm:$0xf]  ;;  %v2341_v4 = vld [vmem:[#allocation2 + $0x240] sm:$0xf] }
  0x23   :  { %1643 = vmatpush.bf16.msra.mxu2 %v2190_v20  ;;  %v31_v59 = vld [vmem:[%s3476_s0] sm:$0xff]  ;;  %v2541_v63 = vld [vmem:[#allocation2 + $0x3d0] sm:$0xf]  ;;  %v2414_v2 = vor.u32 %v3166_v58, %v2413_v57  ;;  %v3148_v5 = vld [vmem:[#allocation2 + $0x244] sm:$0xf0]  ;;  %s2041_s26 = sshll.u32 %s3479_s3, 4  ;;  %s2042_s26 = int_to_ptr.hbm [resolvable:$true] %s2041_s26 }
  0x24   :  { %1656 = vmatpush.bf16.msra.mxu3 %v2254_v24  ;;  %v3182_v62 = vld [vmem:[#allocation2 + $0x354] sm:$0xf0]  ;;  %296 = vst [vmem:[#allocation1] ss:$9 sm:$0xff] %v31_v59  ;;  %v2405_v6 = vld [vmem:[#allocation2 + $0x2c0] sm:$0xf]  ;;  %v2342_v14 = vor.u32 %v3148_v5, %v2341_v4 }
  0x25   :  { %1618 = vmatpush.bf16.msra.mxu0 %v2054_v31  ;;  %v3198_v0 = vld [vmem:[#allocation2 + $0x3d4] sm:$0xf0]  ;;  %v2478_v3 = vor.u32 %v3182_v62, %v2477_v61  ;;  %v3164_v8 = vld [vmem:[#allocation2 + $0x2c4] sm:$0xf0]  ;;  %v2469_v9 = vld [vmem:[#allocation2 + $0x340] sm:$0xf] }
  0x26   :  { %1631 = vmatpush.bf16.msra.mxu1 %v2118_v35  ;;  %v2542_v7 = vor.u32 %v3198_v0, %v2541_v63  ;;  %v3180_v10 = vld [vmem:[#allocation2 + $0x344] sm:$0xf0]  ;;  %v2533_v11 = vld [vmem:[#allocation2 + $0x3c0] sm:$0xf]  ;;  %v2333_v13 = vld [vmem:[#allocation2 + $0x230] sm:$0xf]  ;;  %v2406_v18 = vor.u32 %v3164_v8, %v2405_v6 }
  0x27   :  { %1644 = vmatpush.bf16.msra.mxu2 %v2182_v36  ;;  %v3196_v12 = vld [vmem:[#allocation2 + $0x3c4] sm:$0xf0]  ;;  %v3146_v15 = vld [vmem:[#allocation2 + $0x234] sm:$0xf0]  ;;  %v2397_v16 = vld [vmem:[#allocation2 + $0x2b0] sm:$0xf]  ;;  %v2470_v19 = vor.u32 %v3180_v10, %v2469_v9 }
  0x28   :  { %1657 = vmatpush.bf16.msra.mxu3 %v2246_v39  ;;  %v3162_v17 = vld [vmem:[#allocation2 + $0x2b4] sm:$0xf0]  ;;  %v2534_v23 = vor.u32 %v3196_v12, %v2533_v11  ;;  %v2461_v24 = vld [vmem:[#allocation2 + $0x330] sm:$0xf]  ;;  %v2334_v29 = vor.u32 %v3146_v15, %v2333_v13  ;;  %v2325_v32 = vld [vmem:[#allocation2 + $0x220] sm:$0xf] }
  0x29   :  { %1663 = vmatpush.bf16.msrb.mxu0 %v2366_v40  ;;  %v3178_v25 = vld [vmem:[#allocation2 + $0x334] sm:$0xf0]  ;;  %v2525_v27 = vld [vmem:[#allocation2 + $0x3b0] sm:$0xf]  ;;  %v2398_v30 = vor.u32 %v3162_v17, %v2397_v16  ;;  %v3144_v33 = vld [vmem:[#allocation2 + $0x224] sm:$0xf0] }
  0x2a   :  { %1676 = vmatpush.bf16.msrb.mxu1 %v2430_v41  ;;  %v3194_v28 = vld [vmem:[#allocation2 + $0x3b4] sm:$0xf0]  ;;  %v2462_v31 = vor.u32 %v3178_v25, %v2461_v24  ;;  %v2389_v34 = vld [vmem:[#allocation2 + $0x2a0] sm:$0xf]  ;;  %v3160_v36 = vld [vmem:[#allocation2 + $0x2a4] sm:$0xf0]  ;;  %v2326_v41 = vor.u32 %v3144_v33, %v2325_v32 }
  0x2b   :  { %1689 = vmatpush.bf16.msrb.mxu2 %v2494_v42  ;;  %v3425_v20 = vld [vmem:[#allocation1 + $0x12] sm:$0xff]  ;;  %v3427_v21 = vld [vmem:[#allocation1] sm:$0xff]  ;;  %v3432_v26 = vld [vmem:[#allocation1 + $0x9] sm:$0xff]  ;;  %v2526_v35 = vor.u32 %v3194_v28, %v2525_v27  ;;  %v2390_v43 = vor.u32 %v3160_v36, %v2389_v34  ;;  %vm2030_vm0 = vcmask 1041408  }
  0x2c   :  { %1702 = vmatpush.bf16.msrb.mxu3 %v2558_v46  ;;  %v3429_v22 = vld [vmem:[#allocation1 + $0x1b] sm:$0xff]  ;;  %1645 = vmatmul.bf16.vlgmr.msra.gmra.mxu2 %v3425_v20  ;;  %v2453_v37 = vld [vmem:[#allocation2 + $0x320] sm:$0xf]  ;;  %v3176_v38 = vld [vmem:[#allocation2 + $0x324] sm:$0xf0] }
  0x2d   :  { %1664 = vmatpush.bf16.msrb.mxu0 %v2358_v52  ;;  %1658 = vmatmul.bf16.vlgmr.msra.gmra.mxu3 %v3429_v22  ;;  %v2517_v39 = vld [vmem:[#allocation2 + $0x3a0] sm:$0xf]  ;;  %v3192_v40 = vld [vmem:[#allocation2 + $0x3a4] sm:$0xf0]  ;;  %v2317_v42 = vld [vmem:[#allocation2 + $0x210] sm:$0xf]  ;;  %v2454_v44 = vor.u32 %v3176_v38, %v2453_v37 }
  0x2e   :  { %1677 = vmatpush.bf16.msrb.mxu1 %v2422_v55  ;;  %1619 = vmatmul.bf16.vlgmr.msra.gmra.mxu0 %v3427_v21  ;;  %v3142_v45 = vld [vmem:[#allocation2 + $0x214] sm:$0xf0]  ;;  %v2381_v46 = vld [vmem:[#allocation2 + $0x290] sm:$0xf]  ;;  %v2518_v48 = vor.u32 %v3192_v40, %v2517_v39  ;;  %v2309_v53 = vld [vmem:[#allocation2 + $0x200] sm:$0xf] }
  0x2f   :  { %1690 = vmatpush.bf16.msrb.mxu2 %v2486_v56  ;;  %1632 = vmatmul.bf16.vlgmr.msra.gmra.mxu1 %v3432_v26  ;;  %v3158_v47 = vld [vmem:[#allocation2 + $0x294] sm:$0xf0]  ;;  %v2445_v49 = vld [vmem:[#allocation2 + $0x310] sm:$0xf]  ;;  %v3140_v54 = vld [vmem:[#allocation2 + $0x204] sm:$0xf0]  ;;  %v2318_v55 = vor.u32 %v3142_v45, %v2317_v42 }
  0x30   :  { %1703 = vmatpush.bf16.msrb.mxu3 %v2550_v60  ;;  %v3174_v50 = vld [vmem:[#allocation2 + $0x314] sm:$0xf0]  ;;  %v2509_v51 = vld [vmem:[#allocation2 + $0x390] sm:$0xf]  ;;  %v2373_v56 = vld [vmem:[#allocation2 + $0x280] sm:$0xf]  ;;  %v2382_v62 = vor.u32 %v3158_v47, %v2381_v46  ;;  %v2310_v9 = vor.u32 %v3140_v54, %v2309_v53 }
  0x31   :  { %1665 = vmatpush.bf16.msrb.mxu0 %v2350_v1  ;;  %v3190_v52 = vld [vmem:[#allocation2 + $0x394] sm:$0xf0]  ;;  %v3156_v57 = vld [vmem:[#allocation2 + $0x284] sm:$0xf0]  ;;  %v2437_v58 = vld [vmem:[#allocation2 + $0x300] sm:$0xf]  ;;  %v2446_v63 = vor.u32 %v3174_v50, %v2445_v49 }
  0x32   :  { %1678 = vmatpush.bf16.msrb.mxu1 %v2414_v2  ;;  %v3172_v59 = vld [vmem:[#allocation2 + $0x304] sm:$0xf0]  ;;  %v3437_v60 = vld [vmem:[#allocation1 + $0x36] sm:$0xff]  ;;  %v32_v61 = vld [vmem:[%s3476_s0 + $0x8] sm:$0xff]  ;;  %v2374_v13 = vor.u32 %v3156_v57, %v2373_v56 }
  0x33   :  { %1691 = vmatpush.bf16.msrb.mxu2 %v2478_v3  ;;  %v3442_v0 = vld [vmem:[#allocation1 + $0x24] sm:$0xff]  ;;  %v3446_v2 = vld [vmem:[#allocation1 + $0x2d] sm:$0xff]  ;;  %v2510_v3 = vor.u32 %v3190_v52, %v2509_v51  ;;  %v2621_v6 = vld [vmem:[#allocation2 + $0x470] sm:$0xf] }
  0x34   :  { %1704 = vmatpush.bf16.msrb.mxu3 %v2542_v7  ;;  %v3444_v1 = vld [vmem:[#allocation1 + $0x3f] sm:$0xff]  ;;  %v2501_v4 = vld [vmem:[#allocation2 + $0x380] sm:$0xf]  ;;  %v3188_v5 = vld [vmem:[#allocation2 + $0x384] sm:$0xf0] }
  0x35   :  { %1666 = vmatpush.bf16.msrb.mxu0 %v2342_v14  ;;  %306 = vst [vmem:[#allocation1] ss:$9 sm:$0xff] %v32_v61  ;;  %v3218_v7 = vld [vmem:[#allocation2 + $0x474] sm:$0xf0]  ;;  %v2685_v8 = vld [vmem:[#allocation2 + $0x4f0] sm:$0xf]  ;;  %v2438_v14 = vor.u32 %v3172_v59, %v2437_v58  ;;  %v2502_v17 = vor.u32 %v3188_v5, %v2501_v4 }
  0x36   :  { %1679 = vmatpush.bf16.msrb.mxu1 %v2406_v18  ;;  %v3234_v10 = vld [vmem:[#allocation2 + $0x4f4] sm:$0xf0]  ;;  %v2749_v11 = vld [vmem:[#allocation2 + $0x570] sm:$0xf]  ;;  %v2622_v18 = vor.u32 %v3218_v7, %v2621_v6  ;;  %v2613_v24 = vld [vmem:[#allocation2 + $0x460] sm:$0xf] }
  0x37   :  { %1692 = vmatpush.bf16.msrb.mxu2 %v2470_v19  ;;  %v3250_v12 = vld [vmem:[#allocation2 + $0x574] sm:$0xf0]  ;;  %v2813_v15 = vld [vmem:[#allocation2 + $0x5f0] sm:$0xf]  ;;  %v2686_v19 = vor.u32 %v3234_v10, %v2685_v8  ;;  %v3216_v25 = vld [vmem:[#allocation2 + $0x464] sm:$0xf0] }
  0x38   :  { %1705 = vmatpush.bf16.msrb.mxu3 %v2534_v23  ;;  %v3266_v16 = vld [vmem:[#allocation2 + $0x5f4] sm:$0xf0]  ;;  %v2750_v23 = vor.u32 %v3250_v12, %v2749_v11  ;;  %v2677_v27 = vld [vmem:[#allocation2 + $0x4e0] sm:$0xf]  ;;  %v3264_v33 = vld [vmem:[#allocation2 + $0x5e4] sm:$0xf0]  ;;  %v2614_v34 = vor.u32 %v3216_v25, %v2613_v24 }
  0x39   :  { %1667 = vmatpush.bf16.msrb.mxu0 %v2334_v29  ;;  %v2814_v28 = vor.u32 %v3266_v16, %v2813_v15  ;;  %v3232_v29 = vld [vmem:[#allocation2 + $0x4e4] sm:$0xf0]  ;;  %v2805_v32 = vld [vmem:[#allocation2 + $0x5e0] sm:$0xf]  ;;  %v2605_v37 = vld [vmem:[#allocation2 + $0x450] sm:$0xf] }
  0x3a   :  { %1680 = vmatpush.bf16.msrb.mxu1 %v2398_v30  ;;  %v2741_v30 = vld [vmem:[#allocation2 + $0x560] sm:$0xf]  ;;  %v3214_v38 = vld [vmem:[#allocation2 + $0x454] sm:$0xf0]  ;;  %v2669_v39 = vld [vmem:[#allocation2 + $0x4d0] sm:$0xf]  ;;  %v2806_v40 = vor.u32 %v3264_v33, %v2805_v32 }
  0x3b   :  { %1693 = vmatpush.bf16.msrb.mxu2 %v2462_v31  ;;  %v3248_v31 = vld [vmem:[#allocation2 + $0x564] sm:$0xf0]  ;;  %v2733_v42 = vld [vmem:[#allocation2 + $0x550] sm:$0xf]  ;;  %v3262_v45 = vld [vmem:[#allocation2 + $0x5d4] sm:$0xf0]  ;;  %v2606_v46 = vor.u32 %v3214_v38, %v2605_v37 }
  0x3c   :  { %1706 = vmatpush.bf16.msrb.mxu3 %v2526_v35  ;;  %v2678_v35 = vor.u32 %v3232_v29, %v2677_v27  ;;  %v2742_v36 = vor.u32 %v3248_v31, %v2741_v30  ;;  %v2597_v49 = vld [vmem:[#allocation2 + $0x440] sm:$0xf]  ;;  %v3212_v50 = vld [vmem:[#allocation2 + $0x444] sm:$0xf0]  ;;  %v3226_v5 = vld [vmem:[#allocation2 + $0x4b4] sm:$0xf0] }
  0x3d   :  { %1668 = vmatpush.bf16.msrb.mxu0 %v2326_v41  ;;  %v3230_v41 = vld [vmem:[#allocation2 + $0x4d4] sm:$0xf0]  ;;  %v2661_v51 = vld [vmem:[#allocation2 + $0x4c0] sm:$0xf]  ;;  %v3228_v53 = vld [vmem:[#allocation2 + $0x4c4] sm:$0xf0]  ;;  %v2598_v58 = vor.u32 %v3212_v50, %v2597_v49 }
  0x3e   :  { %1681 = vmatpush.bf16.msrb.mxu1 %v2390_v43  ;;  %v3246_v43 = vld [vmem:[#allocation2 + $0x554] sm:$0xf0]  ;;  %v2670_v47 = vor.u32 %v3230_v41, %v2669_v39  ;;  %v2725_v54 = vld [vmem:[#allocation2 + $0x540] sm:$0xf]  ;;  %v3260_v57 = vld [vmem:[#allocation2 + $0x5c4] sm:$0xf0]  ;;  %v2662_v59 = vor.u32 %v3228_v53, %v2661_v51 }
  0x3f   :  { %1694 = vmatpush.bf16.msrb.mxu2 %v2454_v44  ;;  %v2797_v44 = vld [vmem:[#allocation2 + $0x5d0] sm:$0xf]  ;;  %v2789_v56 = vld [vmem:[#allocation2 + $0x5c0] sm:$0xf]  ;;  %v3242_v7 = vld [vmem:[#allocation2 + $0x534] sm:$0xf0] }
  0x40   :  { %1707 = vmatpush.bf16.msrb.mxu3 %v2518_v48  ;;  %v2734_v48 = vor.u32 %v3246_v43, %v2733_v42  ;;  %v2798_v52 = vor.u32 %v3262_v45, %v2797_v44  ;;  %v2790_v4 = vor.u32 %v3260_v57, %v2789_v56  ;;  %v2717_v6 = vld [vmem:[#allocation2 + $0x530] sm:$0xf]  ;;  %v2645_v15 = vld [vmem:[#allocation2 + $0x4a0] sm:$0xf]  ;;  %v3256_v24 = vld [vmem:[#allocation2 + $0x5a4] sm:$0xf0] }
  0x41   :  { %1669 = vmatpush.bf16.msrb.mxu0 %v2318_v55  ;;  %v3244_v55 = vld [vmem:[#allocation2 + $0x544] sm:$0xf0]  ;;  %v2781_v8 = vld [vmem:[#allocation2 + $0x5b0] sm:$0xf]  ;;  %v2718_v12 = vor.u32 %v3242_v7, %v2717_v6  ;;  %v3206_v30 = vld [vmem:[#allocation2 + $0x414] sm:$0xf0] }
  0x42   :  { %1682 = vmatpush.bf16.msrb.mxu1 %v2382_v62  ;;  %v2726_v61 = vor.u32 %v3244_v55, %v2725_v54  ;;  %v2589_v62 = vld [vmem:[#allocation2 + $0x430] sm:$0xf]  ;;  %v3222_v33 = vld [vmem:[#allocation2 + $0x494] sm:$0xf0]  ;;  %v2565_v39 = vld [vmem:[#allocation2 + $0x400] sm:$0xf] }
  0x43   :  { %1695 = vmatpush.bf16.msrb.mxu2 %v2446_v63  ;;  %v3210_v63 = vld [vmem:[#allocation2 + $0x434] sm:$0xf0]  ;;  %v2573_v29 = vld [vmem:[#allocation2 + $0x410] sm:$0xf]  ;;  %v2629_v43 = vld [vmem:[#allocation2 + $0x480] sm:$0xf] }
  0x44   :  { %1708 = vmatpush.bf16.msrb.mxu3 %v2510_v3  ;;  %v2653_v3 = vld [vmem:[#allocation2 + $0x4b0] sm:$0xf]  ;;  %v2590_v10 = vor.u32 %v3210_v63, %v2589_v62  ;;  %v3254_v37 = vld [vmem:[#allocation2 + $0x594] sm:$0xf0]  ;;  %v2574_v38 = vor.u32 %v3206_v30, %v2573_v29  ;;  %v3220_v44 = vld [vmem:[#allocation2 + $0x484] sm:$0xf0] }
  0x45   :  { %1670 = vmatpush.bf16.msrb.mxu0 %v2310_v9  ;;  %v3258_v9 = vld [vmem:[#allocation2 + $0x5b4] sm:$0xf0]  ;;  %v2654_v11 = vor.u32 %v3226_v5, %v2653_v3  ;;  %v2637_v31 = vld [vmem:[#allocation2 + $0x490] sm:$0xf]  ;;  %v2693_v45 = vld [vmem:[#allocation2 + $0x500] sm:$0xf]  ;;  %v2630_v57 = vor.u32 %v3220_v44, %v2629_v43 }
  0x46   :  { %1683 = vmatpush.bf16.msrb.mxu1 %v2374_v13  ;;  %v2581_v13 = vld [vmem:[#allocation2 + $0x420] sm:$0xf]  ;;  %v2782_v16 = vor.u32 %v3258_v9, %v2781_v8  ;;  %v2638_v41 = vor.u32 %v3222_v33, %v2637_v31  ;;  %v3252_v49 = vld [vmem:[#allocation2 + $0x584] sm:$0xf0]  ;;  %v2877_v50 = vld [vmem:[#allocation2 + $0x670] sm:$0xf] }
  0x47   :  { %1696 = vmatpush.bf16.msrb.mxu2 %v2438_v14  ;;  %v3208_v14 = vld [vmem:[#allocation2 + $0x424] sm:$0xf0]  ;;  %v3282_v51 = vld [vmem:[#allocation2 + $0x674] sm:$0xf0]  ;;  %v3005_v55 = vld [vmem:[#allocation2 + $0x770] sm:$0xf] }
  0x48   :  { %1709 = vmatpush.bf16.msrb.mxu3 %v2502_v17  ;;  %1671 = vmatmul.bf16.vlgmr.msrb.gmra.mxu0 %v3442_v0  ;;  %v3224_v17 = vld [vmem:[#allocation2 + $0x4a4] sm:$0xf0]  ;;  %v2582_v25 = vor.u32 %v3208_v14, %v2581_v13  ;;  %v3298_v54 = vld [vmem:[#allocation2 + $0x6f4] sm:$0xf0]  ;;  %v2878_v63 = vor.u32 %v3282_v51, %v2877_v50  ;;  %v2869_v5 = vld [vmem:[#allocation2 + $0x660] sm:$0xf] }
  0x49   :  { %1715 = vmatpush.bf16.msra.mxu0 %v2622_v18  ;;  %1684 = vmatmul.bf16.vlgmr.msrb.gmra.mxu1 %v3446_v2  ;;  %v2709_v18 = vld [vmem:[#allocation2 + $0x520] sm:$0xf]  ;;  %v2646_v27 = vor.u32 %v3224_v17, %v2645_v15  ;;  %v3314_v56 = vld [vmem:[#allocation2 + $0x774] sm:$0xf0]  ;;  %v3280_v6 = vld [vmem:[#allocation2 + $0x664] sm:$0xf0] }
  0x4a   :  { %1728 = vmatpush.bf16.msra.mxu1 %v2686_v19  ;;  %1697 = vmatmul.bf16.vlgmr.msrb.gmra.mxu2 %v3437_v60  ;;  %v3240_v19 = vld [vmem:[#allocation2 + $0x524] sm:$0xf0]  ;;  %v2933_v7 = vld [vmem:[#allocation2 + $0x6e0] sm:$0xf]  ;;  %v310_v17 = vld [vmem:[#allocation1 + $0x1b] sm:$0xff] }
  0x4b   :  { %1741 = vmatpush.bf16.msra.mxu2 %v2750_v23  ;;  %1710 = vmatmul.bf16.vlgmr.msrb.gmra.mxu3 %v3444_v1  ;;  %v2773_v23 = vld [vmem:[#allocation2 + $0x5a0] sm:$0xf]  ;;  %v3296_v9 = vld [vmem:[#allocation2 + $0x6e4] sm:$0xf0]  ;;  %v3294_v29 = vld [vmem:[#allocation2 + $0x6d4] sm:$0xf0] }
  0x4c   :  { %1754 = vmatpush.bf16.msra.mxu3 %v2814_v28  ;;  %v2710_v28 = vor.u32 %v3240_v19, %v2709_v18  ;;  %v2774_v32 = vor.u32 %v3256_v24, %v2773_v23  ;;  %v3061_v13 = vld [vmem:[#allocation2 + $0x7e0] sm:$0xf]  ;;  %v3328_v14 = vld [vmem:[#allocation2 + $0x7e4] sm:$0xf0]  ;;  %v2870_v18 = vor.u32 %v3280_v6, %v2869_v5  ;;  %v2934_v19 = vor.u32 %v3296_v9, %v2933_v7  ;;  %v2861_v24 = vld [vmem:[#allocation2 + $0x650] sm:$0xf] }
  0x4d   :  { %1716 = vmatpush.bf16.msra.mxu0 %v2614_v34  ;;  %v2701_v34 = vld [vmem:[#allocation2 + $0x510] sm:$0xf]  ;;  %v3310_v31 = vld [vmem:[#allocation2 + $0x754] sm:$0xf0]  ;;  %v3308_v43 = vld [vmem:[#allocation2 + $0x744] sm:$0xf0] }
  0x4e   :  { %1729 = vmatpush.bf16.msra.mxu1 %v2678_v35  ;;  %v3238_v35 = vld [vmem:[#allocation2 + $0x514] sm:$0xf0]  ;;  %v309_v15 = vld [vmem:[#allocation1 + $0x12] sm:$0xff]  ;;  %v3045_v44 = vld [vmem:[#allocation2 + $0x7c0] sm:$0xf] }
  0x4f   :  { %1742 = vmatpush.bf16.msra.mxu2 %v2742_v36  ;;  %v2765_v36 = vld [vmem:[#allocation2 + $0x590] sm:$0xf]  ;;  %v2702_v42 = vor.u32 %v3238_v35, %v2701_v34  ;;  %v3326_v33 = vld [vmem:[#allocation2 + $0x7d4] sm:$0xf0]  ;;  %v3288_v5 = vld [vmem:[#allocation2 + $0x6a4] sm:$0xf0] }
  0x50   :  { %1755 = vmatpush.bf16.msra.mxu3 %v2806_v40  ;;  %v3204_v40 = vld [vmem:[#allocation2 + $0x404] sm:$0xf0]  ;;  %v2989_v30 = vld [vmem:[#allocation2 + $0x750] sm:$0xf]  ;;  %v3274_v50 = vld [vmem:[#allocation2 + $0x634] sm:$0xf0] }
  0x51   :  { %1717 = vmatpush.bf16.msra.mxu0 %v2606_v46  ;;  %v2766_v46 = vor.u32 %v3254_v37, %v2765_v36  ;;  %v2566_v53 = vor.u32 %v3204_v40, %v2565_v39  ;;  %v2990_v36 = vor.u32 %v3310_v31, %v2989_v30  ;;  %v2853_v37 = vld [vmem:[#allocation2 + $0x640] sm:$0xf]  ;;  %v2909_v51 = vld [vmem:[#allocation2 + $0x6b0] sm:$0xf]  ;;  %v3304_v7 = vld [vmem:[#allocation2 + $0x724] sm:$0xf0] }
  0x52   :  { %1730 = vmatpush.bf16.msra.mxu1 %v2670_v47  ;;  %v3236_v47 = vld [vmem:[#allocation2 + $0x504] sm:$0xf0]  ;;  %v2917_v39 = vld [vmem:[#allocation2 + $0x6c0] sm:$0xf] }
  0x53   :  { %1743 = vmatpush.bf16.msra.mxu2 %v2734_v48  ;;  %v2757_v48 = vld [vmem:[#allocation2 + $0x580] sm:$0xf]  ;;  %v3320_v9 = vld [vmem:[#allocation2 + $0x7a4] sm:$0xf0] }
  0x54   :  { %1756 = vmatpush.bf16.msra.mxu3 %v2798_v52  ;;  %v2941_v52 = vld [vmem:[#allocation2 + $0x6f0] sm:$0xf]  ;;  %v2758_v62 = vor.u32 %v3252_v49, %v2757_v48  ;;  %v2965_v6 = vld [vmem:[#allocation2 + $0x720] sm:$0xf] }
  0x55   :  { %1718 = vmatpush.bf16.msra.mxu0 %v2598_v58  ;;  %v2694_v58 = vor.u32 %v3236_v47, %v2693_v45  ;;  %v2942_v3 = vor.u32 %v3298_v54, %v2941_v52  ;;  %v3324_v45 = vld [vmem:[#allocation2 + $0x7c4] sm:$0xf0]  ;;  %v2845_v49 = vld [vmem:[#allocation2 + $0x630] sm:$0xf]  ;;  %v2885_v31 = vld [vmem:[#allocation2 + $0x680] sm:$0xf] }
  0x56   :  { %1731 = vmatpush.bf16.msra.mxu1 %v2662_v59  ;;  %v3069_v59 = vld [vmem:[#allocation2 + $0x7f0] sm:$0xf]  ;;  %v3046_v52 = vor.u32 %v3324_v45, %v3045_v44  ;;  %v2239_v44 = vld [vmem:[#allocation2 + $0x178] sm:$0xf0] }
  0x57   :  { %1744 = vmatpush.bf16.msra.mxu2 %v2726_v61  ;;  %v3330_v61 = vld [vmem:[#allocation2 + $0x7f4] sm:$0xf0]  ;;  %v2973_v54 = vld [vmem:[#allocation2 + $0x730] sm:$0xf] }
  0x58   :  { %1757 = vmatpush.bf16.msra.mxu3 %v2790_v4  ;;  %v3006_v4 = vor.u32 %v3314_v56, %v3005_v55  ;;  %v3070_v8 = vor.u32 %v3330_v61, %v3069_v59  ;;  %v3306_v55 = vld [vmem:[#allocation2 + $0x734] sm:$0xf0]  ;;  %v3037_v56 = vld [vmem:[#allocation2 + $0x7b0] sm:$0xf] }
  0x59   :  { %1719 = vmatpush.bf16.msra.mxu0 %v2590_v10  ;;  %v2997_v10 = vld [vmem:[#allocation2 + $0x760] sm:$0xf]  ;;  %v2974_v61 = vor.u32 %v3306_v55, %v2973_v54  ;;  %v2103_v54 = vld [vmem:[#allocation2 + $0x68] sm:$0xf0]  ;;  %v3103_v55 = vld [vmem:[#allocation2 + $0xe4] sm:$0xf] }
  0x5a   :  { %1732 = vmatpush.bf16.msra.mxu1 %v2654_v11  ;;  %v3312_v11 = vld [vmem:[#allocation2 + $0x764] sm:$0xf0] }
  0x5b   :  { %1745 = vmatpush.bf16.msra.mxu2 %v2718_v12  ;;  %v307_v12 = vld [vmem:[#allocation1] sm:$0xff]  ;;  %v2998_v23 = vor.u32 %v3312_v11, %v2997_v10 }
  0x5c   :  { %1758 = vmatpush.bf16.msra.mxu3 %v2782_v16  ;;  %v308_v16 = vld [vmem:[#allocation1 + $0x9] sm:$0xff] }
  0x5d   :  { %1720 = vmatpush.bf16.msra.mxu0 %v2582_v25  ;;  %v3278_v25 = vld [vmem:[#allocation2 + $0x654] sm:$0xf0] }
  0x5e   :  { %1733 = vmatpush.bf16.msra.mxu1 %v2646_v27  ;;  %v2925_v27 = vld [vmem:[#allocation2 + $0x6d0] sm:$0xf]  ;;  %v2862_v34 = vor.u32 %v3278_v25, %v2861_v24  ;;  %v3318_v24 = vld [vmem:[#allocation2 + $0x794] sm:$0xf0] }
  0x5f   :  { %1746 = vmatpush.bf16.msra.mxu2 %v2710_v28  ;;  %v3062_v28 = vor.u32 %v3328_v14, %v3061_v13  ;;  %v2926_v35 = vor.u32 %v3294_v29, %v2925_v27  ;;  %v2829_v13 = vld [vmem:[#allocation2 + $0x610] sm:$0xf]  ;;  %v3270_v14 = vld [vmem:[#allocation2 + $0x614] sm:$0xf0]  ;;  %v2821_v27 = vld [vmem:[#allocation2 + $0x600] sm:$0xf] }
  0x60   :  { %1759 = vmatpush.bf16.msra.mxu3 %v2774_v32  ;;  %v3053_v32 = vld [vmem:[#allocation2 + $0x7d0] sm:$0xf]  ;;  %v2830_v25 = vor.u32 %v3270_v14, %v2829_v13  ;;  %v2159_v13 = vld [vmem:[#allocation2 + $0xd8] sm:$0xf0]  ;;  %v3117_v14 = vld [vmem:[#allocation2 + $0x154] sm:$0xf] }
  0x61   :  { %1721 = vmatpush.bf16.msra.mxu0 %v2574_v38  ;;  %v3276_v38 = vld [vmem:[#allocation2 + $0x644] sm:$0xf0]  ;;  %v3054_v40 = vor.u32 %v3326_v33, %v3053_v32  ;;  %v2949_v33 = vld [vmem:[#allocation2 + $0x700] sm:$0xf] }
  0x62   :  { %1734 = vmatpush.bf16.msra.mxu1 %v2638_v41  ;;  %v3292_v41 = vld [vmem:[#allocation2 + $0x6c4] sm:$0xf0] }
  0x63   :  { %1747 = vmatpush.bf16.msra.mxu2 %v2702_v42  ;;  %v2981_v42 = vld [vmem:[#allocation2 + $0x740] sm:$0xf]  ;;  %v2918_v47 = vor.u32 %v3292_v41, %v2917_v39  ;;  %v3284_v32 = vld [vmem:[#allocation2 + $0x684] sm:$0xf0]  ;;  %v2111_v39 = vld [vmem:[#allocation2 + $0x78] sm:$0xf0] }
  0x64   :  { %1760 = vmatpush.bf16.msra.mxu3 %v2766_v46  ;;  %v2854_v46 = vor.u32 %v3276_v38, %v2853_v37  ;;  %v2982_v48 = vor.u32 %v3308_v43, %v2981_v42  ;;  %v3316_v37 = vld [vmem:[#allocation2 + $0x784] sm:$0xf0]  ;;  %v3089_v38 = vld [vmem:[#allocation2 + $0x74] sm:$0xf]  ;;  %v2175_v42 = vld [vmem:[#allocation2 + $0xf8] sm:$0xf0]  ;;  %v2886_v45 = vor.u32 %v3284_v32, %v2885_v31 }
  0x65   :  { %1722 = vmatpush.bf16.msra.mxu0 %v2566_v53  ;;  %v3290_v53 = vld [vmem:[#allocation2 + $0x6b4] sm:$0xf0]  ;;  %v3121_v43 = vld [vmem:[#allocation2 + $0x174] sm:$0xf]  ;;  %v2215_v31 = vld [vmem:[#allocation2 + $0x148] sm:$0xf0] }
  0x66   :  { %1735 = vmatpush.bf16.msra.mxu1 %v2630_v57  ;;  %v3322_v57 = vld [vmem:[#allocation2 + $0x7b4] sm:$0xf0]  ;;  %v2910_v59 = vor.u32 %v3290_v53, %v2909_v51  ;;  %v3087_v53 = vld [vmem:[#allocation2 + $0x64] sm:$0xf] }
  0x67   :  { %1748 = vmatpush.bf16.msra.mxu2 %v2694_v58  ;;  %v2846_v58 = vor.u32 %v3274_v50, %v2845_v49  ;;  %v2114_v50 = vor.u32 %v3089_v38, %v2111_v39  ;;  %v3131_v32 = vld [vmem:[#allocation2 + $0x1c4] sm:$0xf]  ;;  %v2079_v38 = vld [vmem:[#allocation2 + $0x38] sm:$0xf0]  ;;  %v3097_v39 = vld [vmem:[#allocation2 + $0xb4] sm:$0xf] }
  0x68   :  { %1761 = vmatpush.bf16.msra.mxu3 %v2758_v62  ;;  %1723 = vmatmul.bf16.vlgmr.msra.gmra.mxu0 %v307_v12  ;;  %v2837_v62 = vld [vmem:[#allocation2 + $0x620] sm:$0xf]  ;;  %v2966_v12 = vor.u32 %v3304_v7, %v2965_v6  ;;  %v2106_v6 = vor.u32 %v3087_v53, %v2103_v54  ;;  %v2135_v53 = vld [vmem:[#allocation2 + $0xa8] sm:$0xf0]  ;;  %v3111_v54 = vld [vmem:[#allocation2 + $0x124] sm:$0xf] }
  0x69   :  { %1767 = vmatpush.bf16.msrb.mxu0 %v2878_v63  ;;  %1736 = vmatmul.bf16.vlgmr.msra.gmra.mxu1 %v308_v16  ;;  %v3272_v63 = vld [vmem:[#allocation2 + $0x624] sm:$0xf0] }
  0x6a   :  { %1780 = vmatpush.bf16.msrb.mxu1 %v2942_v3  ;;  %1749 = vmatmul.bf16.vlgmr.msra.gmra.mxu2 %v309_v15  ;;  %v2901_v3 = vld [vmem:[#allocation2 + $0x6a0] sm:$0xf]  ;;  %v2838_v10 = vor.u32 %v3272_v63, %v2837_v62  ;;  %v2893_v15 = vld [vmem:[#allocation2 + $0x690] sm:$0xf]  ;;  %v3135_v62 = vld [vmem:[#allocation2 + $0x1e4] sm:$0xf] }
  0x6b   :  { %1793 = vmatpush.bf16.msrb.mxu2 %v3006_v4  ;;  %1762 = vmatmul.bf16.vlgmr.msra.gmra.mxu3 %v310_v17  ;;  %v3038_v4 = vor.u32 %v3322_v57, %v3037_v56  ;;  %v2902_v11 = vor.u32 %v3288_v5, %v2901_v3  ;;  %v3286_v17 = vld [vmem:[#allocation2 + $0x694] sm:$0xf0]  ;;  %v2167_v57 = vld [vmem:[#allocation2 + $0xe8] sm:$0xf0] }
  0x6c   :  { %1806 = vmatpush.bf16.msrb.mxu3 %v3070_v8  ;;  %v3029_v8 = vld [vmem:[#allocation2 + $0x7a0] sm:$0xf]  ;;  %v2894_v29 = vor.u32 %v3286_v17, %v2893_v15  ;;  %v2295_v63 = vld [vmem:[#allocation2 + $0x1e8] sm:$0xf0]  ;;  %v314_v5 = vld [vmem:[#allocation1 + $0x3f] sm:$0xff]  ;;  %v2170_v7 = vor.u32 %v3103_v55, %v2167_v57 }
  0x6d   :  { %1768 = vmatpush.bf16.msrb.mxu0 %v2870_v18  ;;  %v3030_v16 = vor.u32 %v3320_v9, %v3029_v8  ;;  %v2957_v18 = vld [vmem:[#allocation2 + $0x710] sm:$0xf]  ;;  %v3085_v9 = vld [vmem:[#allocation2 + $0x54] sm:$0xf]  ;;  %v2223_v15 = vld [vmem:[#allocation2 + $0x158] sm:$0xf0] }
  0x6e   :  { %1781 = vmatpush.bf16.msrb.mxu1 %v2934_v19  ;;  %v3302_v19 = vld [vmem:[#allocation2 + $0x714] sm:$0xf0]  ;;  %v313_v3 = vld [vmem:[#allocation1 + $0x36] sm:$0xff]  ;;  %v2287_v17 = vld [vmem:[#allocation2 + $0x1d8] sm:$0xf0] }
  0x6f   :  { %1794 = vmatpush.bf16.msrb.mxu2 %v2998_v23  ;;  %v3021_v23 = vld [vmem:[#allocation2 + $0x790] sm:$0xf]  ;;  %v2958_v30 = vor.u32 %v3302_v19, %v2957_v18  ;;  %v2199_v55 = vld [vmem:[#allocation2 + $0x128] sm:$0xf0] }
  0x70   :  { %1807 = vmatpush.bf16.msrb.mxu3 %v3062_v28  ;;  %v3268_v28 = vld [vmem:[#allocation2 + $0x604] sm:$0xf0]  ;;  %v2263_v57 = vld [vmem:[#allocation2 + $0x1a8] sm:$0xf0] }
  0x71   :  { %1769 = vmatpush.bf16.msrb.mxu0 %v2862_v34  ;;  %v3022_v34 = vor.u32 %v3318_v24, %v3021_v23  ;;  %v2822_v41 = vor.u32 %v3268_v28, %v2821_v27  ;;  %v2226_v23 = vor.u32 %v3117_v14, %v2223_v15  ;;  %v3083_v24 = vld [vmem:[#allocation2 + $0x44] sm:$0xf] }
  0x72   :  { %1782 = vmatpush.bf16.msrb.mxu1 %v2926_v35  ;;  %v3300_v35 = vld [vmem:[#allocation2 + $0x704] sm:$0xf0]  ;;  %v3099_v27 = vld [vmem:[#allocation2 + $0xc4] sm:$0xf] }
  0x73   :  { %1795 = vmatpush.bf16.msrb.mxu2 %v2990_v36  ;;  %v3013_v36 = vld [vmem:[#allocation2 + $0x780] sm:$0xf]  ;;  %v3091_v15 = vld [vmem:[#allocation2 + $0x84] sm:$0xf] }
  0x74   :  { %1808 = vmatpush.bf16.msrb.mxu3 %v3054_v40  ;;  %v3105_v40 = vld [vmem:[#allocation2 + $0xf4] sm:$0xf]  ;;  %v3014_v49 = vor.u32 %v3316_v37, %v3013_v36 }
  0x75   :  { %1770 = vmatpush.bf16.msrb.mxu0 %v2854_v46  ;;  %v2950_v46 = vor.u32 %v3300_v35, %v2949_v33  ;;  %v2178_v51 = vor.u32 %v3105_v40, %v2175_v42  ;;  %v2279_v33 = vld [vmem:[#allocation2 + $0x1c8] sm:$0xf0]  ;;  %v3081_v37 = vld [vmem:[#allocation2 + $0x34] sm:$0xf] }
  0x76   :  { %1783 = vmatpush.bf16.msrb.mxu1 %v2918_v47  ;;  %v3137_v47 = vld [vmem:[#allocation2 + $0x1f4] sm:$0xf]  ;;  %v2282_v40 = vor.u32 %v3131_v32, %v2279_v33  ;;  %v2495_v32 = vld [vmem:[#allocation2 + $0x378] sm:$0xf0] }
  0x77   :  { %1796 = vmatpush.bf16.msrb.mxu2 %v2982_v48  ;;  %v2303_v48 = vld [vmem:[#allocation2 + $0x1f8] sm:$0xf0]  ;;  %v3113_v42 = vld [vmem:[#allocation2 + $0x134] sm:$0xf] }
  0x78   :  { %1809 = vmatpush.bf16.msrb.mxu3 %v3046_v52  ;;  %v2242_v52 = vor.u32 %v3121_v43, %v2239_v44  ;;  %v2306_v56 = vor.u32 %v3137_v47, %v2303_v48  ;;  %v2207_v43 = vld [vmem:[#allocation2 + $0x138] sm:$0xf0]  ;;  %v3129_v44 = vld [vmem:[#allocation2 + $0x1b4] sm:$0xf] }
  0x79   :  { %1771 = vmatpush.bf16.msrb.mxu0 %v2846_v58  ;;  %v3119_v58 = vld [vmem:[#allocation2 + $0x164] sm:$0xf]  ;;  %v2210_v48 = vor.u32 %v3113_v42, %v2207_v43  ;;  %v2359_v42 = vld [vmem:[#allocation2 + $0x268] sm:$0xf0] }
  0x7a   :  { %1784 = vmatpush.bf16.msrb.mxu1 %v2910_v59  ;;  %v2231_v59 = vld [vmem:[#allocation2 + $0x168] sm:$0xf0]  ;;  %v3167_v43 = vld [vmem:[#allocation2 + $0x2e4] sm:$0xf] }
  0x7b   :  { %1797 = vmatpush.bf16.msrb.mxu2 %v2974_v61  ;;  %v311_v61 = vld [vmem:[#allocation1 + $0x24] sm:$0xff]  ;;  %v2234_v8 = vor.u32 %v3119_v58, %v2231_v59 }
  0x7c   :  { %1810 = vmatpush.bf16.msrb.mxu3 %v3038_v4  ;;  %v312_v4 = vld [vmem:[#allocation1 + $0x2d] sm:$0xff] }
  0x7d   :  { %1772 = vmatpush.bf16.msrb.mxu0 %v2838_v10  ;;  %v2095_v10 = vld [vmem:[#allocation2 + $0x58] sm:$0xf0] }
  0x7e   :  { %1785 = vmatpush.bf16.msrb.mxu1 %v2902_v11  ;;  %v3101_v11 = vld [vmem:[#allocation2 + $0xd4] sm:$0xf]  ;;  %v2098_v18 = vor.u32 %v3085_v9, %v2095_v10  ;;  %v2255_v9 = vld [vmem:[#allocation2 + $0x198] sm:$0xf0] }
  0x7f   :  { %1798 = vmatpush.bf16.msrb.mxu2 %v2966_v12  ;;  %v2298_v12 = vor.u32 %v3135_v62, %v2295_v63  ;;  %v2162_v19 = vor.u32 %v3101_v11, %v2159_v13  ;;  %v3077_v62 = vld [vmem:[#allocation2 + $0x14] sm:$0xf]  ;;  %v2063_v63 = vld [vmem:[#allocation2 + $0x18] sm:$0xf0]  ;;  %v3075_v11 = vld [vmem:[#allocation2 + $0x4] sm:$0xf] }
  0x80   :  { %1811 = vmatpush.bf16.msrb.mxu3 %v3030_v16  ;;  %v3133_v16 = vld [vmem:[#allocation2 + $0x1d4] sm:$0xf]  ;;  %v2066_v10 = vor.u32 %v3077_v62, %v2063_v63  ;;  %v2543_v62 = vld [vmem:[#allocation2 + $0x3d8] sm:$0xf0] }
  0x81   :  { %1773 = vmatpush.bf16.msrb.mxu0 %v2830_v25  ;;  %v2087_v25 = vld [vmem:[#allocation2 + $0x48] sm:$0xf0]  ;;  %v2290_v28 = vor.u32 %v3133_v16, %v2287_v17  ;;  %v3107_v17 = vld [vmem:[#allocation2 + $0x104] sm:$0xf] }
  0x82   :  { %1786 = vmatpush.bf16.msrb.mxu1 %v2894_v29  ;;  %v2151_v29 = vld [vmem:[#allocation2 + $0xc8] sm:$0xf0] }
  0x83   :  { %1799 = vmatpush.bf16.msrb.mxu2 %v2958_v30  ;;  %v3115_v30 = vld [vmem:[#allocation2 + $0x144] sm:$0xf]  ;;  %v2154_v35 = vor.u32 %v3099_v27, %v2151_v29  ;;  %v2119_v16 = vld [vmem:[#allocation2 + $0x88] sm:$0xf0]  ;;  %v2367_v27 = vld [vmem:[#allocation2 + $0x278] sm:$0xf0] }
  0x84   :  { %1812 = vmatpush.bf16.msrb.mxu3 %v3022_v34  ;;  %v2090_v34 = vor.u32 %v3083_v24, %v2087_v25  ;;  %v2218_v36 = vor.u32 %v3115_v30, %v2215_v31  ;;  %v2247_v24 = vld [vmem:[#allocation2 + $0x188] sm:$0xf0]  ;;  %v3153_v25 = vld [vmem:[#allocation2 + $0x274] sm:$0xf]  ;;  %v2431_v30 = vld [vmem:[#allocation2 + $0x2f8] sm:$0xf0]  ;;  %v2122_v33 = vor.u32 %v3091_v15, %v2119_v16 }
  0x85   :  { %1774 = vmatpush.bf16.msrb.mxu0 %v2822_v41  ;;  %v2143_v41 = vld [vmem:[#allocation2 + $0xb8] sm:$0xf0]  ;;  %v3185_v31 = vld [vmem:[#allocation2 + $0x374] sm:$0xf] }
  0x86   :  { %1787 = vmatpush.bf16.msrb.mxu1 %v2886_v45  ;;  %v2271_v45 = vld [vmem:[#allocation2 + $0x1b8] sm:$0xf0]  ;;  %v2146_v47 = vor.u32 %v3097_v39, %v2143_v41  ;;  %v3151_v41 = vld [vmem:[#allocation2 + $0x264] sm:$0xf]  ;;  %v3161_v15 = vld [vmem:[#allocation2 + $0x2b4] sm:$0xf] }
  0x87   :  { %1800 = vmatpush.bf16.msrb.mxu2 %v2950_v46  ;;  %v2082_v46 = vor.u32 %v3081_v37, %v2079_v38  ;;  %v2370_v38 = vor.u32 %v3153_v25, %v2367_v27  ;;  %v2399_v16 = vld [vmem:[#allocation2 + $0x2b8] sm:$0xf0] }
  0x88   :  { %1813 = vmatpush.bf16.msrb.mxu3 %v3014_v49  ;;  %1775 = vmatmul.bf16.vlgmr.msrb.gmra.mxu0 %v311_v61  ;;  %v3079_v49 = vld [vmem:[#allocation2 + $0x24] sm:$0xf]  ;;  %v2202_v61 = vor.u32 %v3111_v54, %v2199_v55  ;;  %v2351_v54 = vld [vmem:[#allocation2 + $0x258] sm:$0xf0]  ;;  %v3165_v55 = vld [vmem:[#allocation2 + $0x2d4] sm:$0xf] }
  0x89   :  { %1819 = vmatpush.bf16.msra.mxu0 %v2114_v50  ;;  %1788 = vmatmul.bf16.vlgmr.msrb.gmra.mxu1 %v312_v4  ;;  %v2071_v50 = vld [vmem:[#allocation2 + $0x28] sm:$0xf0]  ;;  %v2527_v25 = vld [vmem:[#allocation2 + $0x3b8] sm:$0xf0] }
  0x8a   :  { %1832 = vmatpush.bf16.msra.mxu1 %v2178_v51  ;;  %1801 = vmatmul.bf16.vlgmr.msrb.gmra.mxu2 %v313_v3  ;;  %v3095_v51 = vld [vmem:[#allocation2 + $0xa4] sm:$0xf]  ;;  %v2074_v58 = vor.u32 %v3079_v49, %v2071_v50  ;;  %v3093_v3 = vld [vmem:[#allocation2 + $0x94] sm:$0xf]  ;;  %v2551_v49 = vld [vmem:[#allocation2 + $0x3e8] sm:$0xf0]  ;;  %v2362_v50 = vor.u32 %v3151_v41, %v2359_v42 }
  0x8b   :  { %1845 = vmatpush.bf16.msra.mxu2 %v2242_v52  ;;  %1814 = vmatmul.bf16.vlgmr.msrb.gmra.mxu3 %v314_v5  ;;  %v2274_v52 = vor.u32 %v3129_v44, %v2271_v45  ;;  %v2138_v59 = vor.u32 %v3095_v51, %v2135_v53  ;;  %v2127_v5 = vld [vmem:[#allocation2 + $0x98] sm:$0xf0]  ;;  %v2423_v45 = vld [vmem:[#allocation2 + $0x2e8] sm:$0xf0]  ;;  %v3149_v53 = vld [vmem:[#allocation2 + $0x254] sm:$0xf] }
  0x8c   :  { %1858 = vmatpush.bf16.msra.mxu3 %v2306_v56  ;;  %v3127_v56 = vld [vmem:[#allocation2 + $0x1a4] sm:$0xf]  ;;  %v2130_v13 = vor.u32 %v3093_v3, %v2127_v5  ;;  %v2426_v51 = vor.u32 %v3167_v43, %v2423_v45  ;;  %v2354_v63 = vor.u32 %v3149_v53, %v2351_v54  ;;  %v2319_v45 = vld [vmem:[#allocation2 + $0x218] sm:$0xf0]  ;;  %v3189_v53 = vld [vmem:[#allocation2 + $0x394] sm:$0xf] }
  0x8d   :  { %1820 = vmatpush.bf16.msra.mxu0 %v2106_v6  ;;  %v2266_v4 = vor.u32 %v3127_v56, %v2263_v57  ;;  %v3109_v6 = vld [vmem:[#allocation2 + $0x114] sm:$0xf]  ;;  %v2415_v57 = vld [vmem:[#allocation2 + $0x2d8] sm:$0xf0]  ;;  %v3147_v5 = vld [vmem:[#allocation2 + $0x244] sm:$0xf] }
  0x8e   :  { %1833 = vmatpush.bf16.msra.mxu1 %v2170_v7  ;;  %v2191_v7 = vld [vmem:[#allocation2 + $0x118] sm:$0xf0]  ;;  %v2418_v3 = vor.u32 %v3165_v55, %v2415_v57  ;;  %v3139_v57 = vld [vmem:[#allocation2 + $0x204] sm:$0xf] }
  0x8f   :  { %1846 = vmatpush.bf16.msra.mxu2 %v2234_v8  ;;  %v3125_v8 = vld [vmem:[#allocation2 + $0x194] sm:$0xf]  ;;  %v2194_v14 = vor.u32 %v3109_v6, %v2191_v7  ;;  %v2343_v6 = vld [vmem:[#allocation2 + $0x248] sm:$0xf0]  ;;  %v3163_v7 = vld [vmem:[#allocation2 + $0x2c4] sm:$0xf] }
  0x90   :  { %1859 = vmatpush.bf16.msra.mxu3 %v2298_v12  ;;  %v2055_v12 = vld [vmem:[#allocation2 + $0x8] sm:$0xf0]  ;;  %v2511_v54 = vld [vmem:[#allocation2 + $0x398] sm:$0xf0] }
  0x91   :  { %1821 = vmatpush.bf16.msra.mxu0 %v2098_v18  ;;  %v2258_v18 = vor.u32 %v3125_v8, %v2255_v9  ;;  %v2058_v29 = vor.u32 %v3075_v11, %v2055_v12  ;;  %v3179_v9 = vld [vmem:[#allocation2 + $0x344] sm:$0xf]  ;;  %v3145_v12 = vld [vmem:[#allocation2 + $0x234] sm:$0xf] }
  0x92   :  { %1834 = vmatpush.bf16.msra.mxu1 %v2162_v19  ;;  %v2183_v19 = vld [vmem:[#allocation2 + $0x108] sm:$0xf0]  ;;  %v3195_v11 = vld [vmem:[#allocation2 + $0x3c4] sm:$0xf] }
  0x93   :  { %1847 = vmatpush.bf16.msra.mxu2 %v2226_v23  ;;  %v3123_v23 = vld [vmem:[#allocation2 + $0x184] sm:$0xf] }
  0x94   :  { %1860 = vmatpush.bf16.msra.mxu3 %v2290_v28  ;;  %v3169_v28 = vld [vmem:[#allocation2 + $0x2f4] sm:$0xf]  ;;  %v2250_v37 = vor.u32 %v3123_v23, %v2247_v24  ;;  %v3459_v23 = vld [vmem:[%s3478_s2] sm:$0x3]  ;;  %s3398_s2 = smov [#allocation5]  }
  0x95   :  { %1822 = vmatpush.bf16.msra.mxu0 %v2090_v34  ;;  %v2186_v34 = vor.u32 %v3107_v17, %v2183_v19  ;;  %v2434_v39 = vor.u32 %v3169_v28, %v2431_v30  ;;  %v2463_v19 = vld [vmem:[#allocation2 + $0x338] sm:$0xf0]  ;;  %v3193_v24 = vld [vmem:[#allocation2 + $0x3b4] sm:$0xf]  ;;  %v3143_v28 = vld [vmem:[#allocation2 + $0x224] sm:$0xf] }
  0x96   :  { %1835 = vmatpush.bf16.msra.mxu1 %v2154_v35  ;;  %v3201_v35 = vld [vmem:[#allocation2 + $0x3f4] sm:$0xf]  ;;  %s2039_s23 = sshll.u32 %s3398_s2, 4  ;;  %s2040_s23 = int_to_ptr.vmem [resolvable:$true] %s2039_s23 }
  0x97   :  { %1848 = vmatpush.bf16.msra.mxu2 %v2218_v36  ;;  %v2559_v36 = vld [vmem:[#allocation2 + $0x3f8] sm:$0xf0] }
  0x98   :  { %1861 = vmatpush.bf16.msra.mxu3 %v2282_v40  ;;  %v2498_v40 = vor.u32 %v3185_v31, %v2495_v32  ;;  %v2562_v44 = vor.u32 %v3201_v35, %v2559_v36  ;;  %v2327_v31 = vld [vmem:[#allocation2 + $0x228] sm:$0xf0]  ;;  %v3159_v32 = vld [vmem:[#allocation2 + $0x2a4] sm:$0xf] }
  0x99   :  { %1823 = vmatpush.bf16.msra.mxu0 %v2082_v46  ;;  %v3183_v46 = vld [vmem:[#allocation2 + $0x364] sm:$0xf]  ;;  %v2391_v35 = vld [vmem:[#allocation2 + $0x2a8] sm:$0xf0] }
  0x9a   :  { %1836 = vmatpush.bf16.msra.mxu1 %v2146_v47  ;;  %v2487_v47 = vld [vmem:[#allocation2 + $0x368] sm:$0xf0]  ;;  %v3175_v36 = vld [vmem:[#allocation2 + $0x324] sm:$0xf]  ;;  %v2394_v42 = vor.u32 %v3159_v32, %v2391_v35 }
  0x9b   :  { %1849 = vmatpush.bf16.msra.mxu2 %v2210_v48  ;;  %v3199_v48 = vld [vmem:[#allocation2 + $0x3e4] sm:$0xf] }
  0x9c   :  { %1862 = vmatpush.bf16.msra.mxu3 %v2274_v52  ;;  %v2490_v52 = vor.u32 %v3183_v46, %v2487_v47  ;;  %v2554_v56 = vor.u32 %v3199_v48, %v2551_v49  ;;  %v3157_v46 = vld [vmem:[#allocation2 + $0x294] sm:$0xf]  ;;  %v3231_v32 = vld [vmem:[#allocation2 + $0x4e4] sm:$0xf] }
  0x9d   :  { %1824 = vmatpush.bf16.msra.mxu0 %v2074_v58  ;;  %v3181_v58 = vld [vmem:[#allocation2 + $0x354] sm:$0xf]  ;;  %v3247_v35 = vld [vmem:[#allocation2 + $0x564] sm:$0xf] }
  0x9e   :  { %1837 = vmatpush.bf16.msra.mxu1 %v2138_v59  ;;  %v2479_v59 = vld [vmem:[#allocation2 + $0x358] sm:$0xf0] }
  0x9f   :  { %1850 = vmatpush.bf16.msra.mxu2 %v2202_v61  ;;  %v3197_v61 = vld [vmem:[#allocation2 + $0x3d4] sm:$0xf] }
  0xa0   :  { %1863 = vmatpush.bf16.msra.mxu3 %v2266_v4  ;;  %v2482_v4 = vor.u32 %v3181_v58, %v2479_v59  ;;  %v2546_v8 = vor.u32 %v3197_v61, %v2543_v62  ;;  %v2311_v58 = vld [vmem:[#allocation2 + $0x208] sm:$0xf0]  ;;  %v3155_v62 = vld [vmem:[#allocation2 + $0x284] sm:$0xf] }
  0xa1   :  { %1825 = vmatpush.bf16.msra.mxu0 %v2066_v10  ;;  %v2471_v10 = vld [vmem:[#allocation2 + $0x348] sm:$0xf0] }
  0xa2   :  { %1838 = vmatpush.bf16.msra.mxu1 %v2130_v13  ;;  %v2474_v13 = vor.u32 %v3179_v9, %v2471_v10  ;;  %v3217_v10 = vld [vmem:[#allocation2 + $0x474] sm:$0xf] }
  0xa3   :  { %1851 = vmatpush.bf16.msra.mxu2 %v2194_v14  ;;  %v2335_v14 = vld [vmem:[#allocation2 + $0x238] sm:$0xf0] }
  0xa4   :  { %1864 = vmatpush.bf16.msra.mxu3 %v2258_v18  ;;  %v3177_v18 = vld [vmem:[#allocation2 + $0x334] sm:$0xf]  ;;  %v2338_v27 = vor.u32 %v3145_v12, %v2335_v14  ;;  %v2687_v12 = vld [vmem:[#allocation2 + $0x4f8] sm:$0xf0] }
  0xa5   :  { %1826 = vmatpush.bf16.msra.mxu0 %v2058_v29  ;;  %v2402_v29 = vor.u32 %v3161_v15, %v2399_v16  ;;  %v2466_v30 = vor.u32 %v3177_v18, %v2463_v19  ;;  %v3265_v18 = vld [vmem:[#allocation2 + $0x5f4] sm:$0xf]  ;;  %v2815_v19 = vld [vmem:[#allocation2 + $0x5f8] sm:$0xf0] }
  0xa6   :  { %1839 = vmatpush.bf16.msra.mxu1 %v2122_v33  ;;  %v291_v33 = vperm.slane %v3459_v23, 0 }
  0xa7   :  { %1852 = vmatpush.bf16.msra.mxu2 %v2186_v34  ;;  %v2530_v34 = vor.u32 %v3193_v24, %v2527_v25 }
  0xa8   :  { %1865 = vmatpush.bf16.msra.mxu3 %v2250_v37  ;;  %1827 = vmatmul.bf16.vlgmr.msra.gmra.mxu0 %v3427_v21  ;;  %v2535_v21 = vld [vmem:[#allocation2 + $0x3c8] sm:$0xf0] }
  0xa9   :  { %1871 = vmatpush.bf16.msrb.mxu0 %v2370_v38  ;;  %1840 = vmatmul.bf16.vlgmr.msra.gmra.mxu1 %v3432_v26  ;;  %v2538_v17 = vor.u32 %v3195_v11, %v2535_v21  ;;  %v2455_v37 = vld [vmem:[#allocation2 + $0x328] sm:$0xf0]  ;;  %v3191_v38 = vld [vmem:[#allocation2 + $0x3a4] sm:$0xf]  ;;  %v2623_v11 = vld [vmem:[#allocation2 + $0x478] sm:$0xf0] }
  0xaa   :  { %1884 = vmatpush.bf16.msrb.mxu1 %v2434_v39  ;;  %1853 = vmatmul.bf16.vlgmr.msra.gmra.mxu2 %v3425_v20  ;;  %v2407_v20 = vld [vmem:[#allocation2 + $0x2c8] sm:$0xf0]  ;;  %v2458_v43 = vor.u32 %v3175_v36, %v2455_v37  ;;  %v3233_v21 = vld [vmem:[#allocation2 + $0x4f4] sm:$0xf]  ;;  %v3263_v37 = vld [vmem:[#allocation2 + $0x5e4] sm:$0xf] }
  0xab   :  { %1897 = vmatpush.bf16.msrb.mxu2 %v2498_v40  ;;  %1866 = vmatmul.bf16.vlgmr.msra.gmra.mxu3 %v3429_v22  ;;  %v2346_v22 = vor.u32 %v3147_v5, %v2343_v6  ;;  %v2410_v26 = vor.u32 %v3163_v7, %v2407_v20  ;;  %v2519_v39 = vld [vmem:[#allocation2 + $0x3a8] sm:$0xf0]  ;;  %v2330_v40 = vor.u32 %v3143_v28, %v2327_v31  ;;  %v1620_v41 = vpop.f32.mrf.mxu0  ;;  %v3187_v7 = vld [vmem:[#allocation2 + $0x384] sm:$0xf] }
  0xac   :  { %1910 = vmatpush.bf16.msrb.mxu3 %v2562_v44  ;;  %v3141_v44 = vld [vmem:[#allocation2 + $0x214] sm:$0xf]  ;;  %v1621_v47 = vadd.f32 %v1620_v41, %v291_v33  ;;  %v1633_v48 = vpop.f32.mrf.mxu1  ;;  %v2522_v49 = vor.u32 %v3191_v38, %v2519_v39  ;;  %v2514_v5 = vor.u32 %v3189_v53, %v2511_v54  ;;  %v2439_v6 = vld [vmem:[#allocation2 + $0x308] sm:$0xf0]  ;;  %v2690_v28 = vor.u32 %v3233_v21, %v2687_v12  ;;  %v2719_v21 = vld [vmem:[#allocation2 + $0x538] sm:$0xf0] }
  0xad   :  { %1872 = vmatpush.bf16.msrb.mxu0 %v2362_v50  ;;  %v2383_v50 = vld [vmem:[#allocation2 + $0x298] sm:$0xf0]  ;;  %v2615_v31 = vld [vmem:[#allocation2 + $0x468] sm:$0xf0]  ;;  %v2818_v33 = vor.u32 %v3265_v18, %v2815_v19  ;;  %v3223_v19 = vld [vmem:[#allocation2 + $0x4a4] sm:$0xf] }
  0xae   :  { %1885 = vmatpush.bf16.msrb.mxu1 %v2426_v51  ;;  %v3173_v51 = vld [vmem:[#allocation2 + $0x314] sm:$0xf]  ;;  %v1634_v55 = vadd.f32 %v1633_v48, %v1621_v47  ;;  %v2386_v59 = vor.u32 %v3157_v46, %v2383_v50  ;;  %v2743_v36 = vld [vmem:[#allocation2 + $0x568] sm:$0xf0]  ;;  %v2671_v48 = vld [vmem:[#allocation2 + $0x4d8] sm:$0xf0] }
  0xaf   :  { %1898 = vmatpush.bf16.msrb.mxu2 %v2490_v52  ;;  %v2447_v52 = vld [vmem:[#allocation2 + $0x318] sm:$0xf0]  ;;  %v2807_v38 = vld [vmem:[#allocation2 + $0x5e8] sm:$0xf0]  ;;  %v3229_v46 = vld [vmem:[#allocation2 + $0x4d4] sm:$0xf] }
  0xb0   :  { %1911 = vmatpush.bf16.msrb.mxu3 %v2554_v56  ;;  %v2322_v56 = vor.u32 %v3141_v44, %v2319_v45  ;;  %v2450_v61 = vor.u32 %v3173_v51, %v2447_v52  ;;  %v1659_v9 = vpop.f32.mrf.mxu3  ;;  %v3213_v44 = vld [vmem:[#allocation2 + $0x454] sm:$0xf]  ;;  %v2607_v45 = vld [vmem:[#allocation2 + $0x458] sm:$0xf0]  ;;  %v2810_v47 = vor.u32 %v3263_v37, %v2807_v38  ;;  %v2674_v54 = vor.u32 %v3229_v46, %v2671_v48  ;;  %v2583_v18 = vld [vmem:[#allocation2 + $0x428] sm:$0xf0] }
  0xb1   :  { %1873 = vmatpush.bf16.msrb.mxu0 %v2354_v63  ;;  %v2375_v63 = vld [vmem:[#allocation2 + $0x288] sm:$0xf0]  ;;  %v2735_v50 = vld [vmem:[#allocation2 + $0x558] sm:$0xf0]  ;;  %v3261_v51 = vld [vmem:[#allocation2 + $0x5d4] sm:$0xf]  ;;  %v2610_v53 = vor.u32 %v3213_v44, %v2607_v45 }
  0xb2   :  { %1886 = vmatpush.bf16.msrb.mxu1 %v2418_v3  ;;  %v3171_v3 = vld [vmem:[#allocation2 + $0x304] sm:$0xf]  ;;  %v2378_v16 = vor.u32 %v3155_v62, %v2375_v63  ;;  %v2799_v52 = vld [vmem:[#allocation2 + $0x5d8] sm:$0xf0]  ;;  %v2727_v62 = vld [vmem:[#allocation2 + $0x548] sm:$0xf0] }
  0xb3   :  { %1899 = vmatpush.bf16.msrb.mxu2 %v2482_v4  ;;  %v1646_v4 = vpop.f32.mrf.mxu2  ;;  %v1622_v15 = vpop.f32.mrf.mxu0  ;;  %v3259_v63 = vld [vmem:[#allocation2 + $0x5c4] sm:$0xf]  ;;  %v2783_v12 = vld [vmem:[#allocation2 + $0x5b8] sm:$0xf0]  ;;  %v3205_v38 = vld [vmem:[#allocation2 + $0x414] sm:$0xf] }
  0xb4   :  { %1912 = vmatpush.bf16.msrb.mxu3 %v2546_v8  ;;  %v2503_v8 = vld [vmem:[#allocation2 + $0x388] sm:$0xf0]  ;;  %v1647_v20 = vadd.f32 %v1646_v4, %v1634_v55  ;;  %v1635_v24 = vpop.f32.mrf.mxu1  ;;  %v3237_v44 = vld [vmem:[#allocation2 + $0x514] sm:$0xf]  ;;  %v2703_v45 = vld [vmem:[#allocation2 + $0x518] sm:$0xf0] }
  0xb5   :  { %1874 = vmatpush.bf16.msrb.mxu0 %v2346_v22  ;;  %v2314_v22 = vor.u32 %v3139_v57, %v2311_v58  ;;  %v2506_v25 = vor.u32 %v3187_v7, %v2503_v8  ;;  %v2599_v57 = vld [vmem:[#allocation2 + $0x448] sm:$0xf0]  ;;  %v2802_v58 = vor.u32 %v3261_v51, %v2799_v52  ;;  %v3225_v7 = vld [vmem:[#allocation2 + $0x4b4] sm:$0xf]  ;;  %v2706_v52 = vor.u32 %v3237_v44, %v2703_v45  ;;  %v3291_v45 = vld [vmem:[#allocation2 + $0x6c4] sm:$0xf] }
  0xb6   :  { %1887 = vmatpush.bf16.msrb.mxu1 %v2410_v26  ;;  %v3249_v26 = vld [vmem:[#allocation2 + $0x574] sm:$0xf]  ;;  %v3462_v14 = vadd.f32 %v1659_v9, %v1647_v20  ;;  %v2855_v44 = vld [vmem:[#allocation2 + $0x648] sm:$0xf0] }
  0xb7   :  { %1900 = vmatpush.bf16.msrb.mxu2 %v2474_v13  ;;  %v2751_v13 = vld [vmem:[#allocation2 + $0x578] sm:$0xf0]  ;;  %v3253_v46 = vld [vmem:[#allocation2 + $0x594] sm:$0xf] }
  0xb8   :  { %1913 = vmatpush.bf16.msrb.mxu3 %v2538_v17  ;;  %v2442_v17 = vor.u32 %v3171_v3, %v2439_v6  ;;  %v1661_v41 = vpop.f32.mrf.mxu3  ;;  %v2591_v6 = vld [vmem:[#allocation2 + $0x438] sm:$0xf0] }
  0xb9   :  { %1875 = vmatpush.bf16.msrb.mxu0 %v2338_v27  ;;  %v2626_v27 = vor.u32 %v3217_v10, %v2623_v11  ;;  %v2655_v10 = vld [vmem:[#allocation2 + $0x4b8] sm:$0xf0]  ;;  %v3241_v11 = vld [vmem:[#allocation2 + $0x534] sm:$0xf] }
  0xba   :  { %1888 = vmatpush.bf16.msrb.mxu1 %v2402_v29  ;;  %v2754_v29 = vor.u32 %v3249_v26, %v2751_v13  ;;  %v2658_v15 = vor.u32 %v3225_v7, %v2655_v10  ;;  %v3329_v7 = vld [vmem:[#allocation2 + $0x7f4] sm:$0xf] }
  0xbb   :  { %1901 = vmatpush.bf16.msrb.mxu2 %v2466_v30  ;;  %v3215_v30 = vld [vmem:[#allocation2 + $0x464] sm:$0xf]  ;;  %v1648_v39 = vpop.f32.mrf.mxu2 }
  0xbc   :  { %1914 = vmatpush.bf16.msrb.mxu3 %v2530_v34  ;;  %v2679_v34 = vld [vmem:[#allocation2 + $0x4e8] sm:$0xf0]  ;;  %v2575_v39 = vld [vmem:[#allocation2 + $0x418] sm:$0xf0] }
  0xbd   :  { %1876 = vmatpush.bf16.msrb.mxu0 %v2330_v40  ;;  %v2618_v40 = vor.u32 %v3215_v30, %v2615_v31  ;;  %v3255_v31 = vld [vmem:[#allocation2 + $0x5a4] sm:$0xf]  ;;  %v2578_v48 = vor.u32 %v3205_v38, %v2575_v39  ;;  %v3055_v38 = vld [vmem:[#allocation2 + $0x7d8] sm:$0xf0]  ;;  %v3338_v39 = vld [vmem:[#allocation1 + $0x1b] sm:$0xff] }
  0xbe   :  { %1889 = vmatpush.bf16.msrb.mxu1 %v2394_v42  ;;  %v2682_v42 = vor.u32 %v3231_v32, %v2679_v34  ;;  %v2775_v32 = vld [vmem:[#allocation2 + $0x5a8] sm:$0xf0] }
  0xbf   :  { %1902 = vmatpush.bf16.msrb.mxu2 %v2458_v43  ;;  %v2746_v43 = vor.u32 %v3247_v35, %v2743_v36 }
  0xc0   :  { %1915 = vmatpush.bf16.msrb.mxu3 %v2522_v49  ;;  %v3245_v49 = vld [vmem:[#allocation2 + $0x554] sm:$0xf] }
  0xc1   :  { %1877 = vmatpush.bf16.msrb.mxu0 %v2322_v56  ;;  %v2738_v55 = vor.u32 %v3245_v49, %v2735_v50  ;;  %v3211_v56 = vld [vmem:[#allocation2 + $0x444] sm:$0xf]  ;;  %v2567_v50 = vld [vmem:[#allocation2 + $0x408] sm:$0xf0] }
  0xc2   :  { %1890 = vmatpush.bf16.msrb.mxu1 %v2386_v59  ;;  %v2663_v59 = vld [vmem:[#allocation2 + $0x4c8] sm:$0xf0]  ;;  %v3203_v49 = vld [vmem:[#allocation2 + $0x404] sm:$0xf] }
  0xc3   :  { %1903 = vmatpush.bf16.msrb.mxu2 %v2450_v61  ;;  %v3243_v61 = vld [vmem:[#allocation2 + $0x544] sm:$0xf] }
  0xc4   :  { %1916 = vmatpush.bf16.msrb.mxu3 %v2514_v5  ;;  %v2730_v4 = vor.u32 %v3243_v61, %v2727_v62  ;;  %v3209_v5 = vld [vmem:[#allocation2 + $0x434] sm:$0xf] }
  0xc5   :  { %1878 = vmatpush.bf16.msrb.mxu0 %v2314_v22  ;;  %v1672_v3 = vpop.f32.mrf.mxu0  ;;  %v3257_v22 = vld [vmem:[#allocation2 + $0x5b4] sm:$0xf]  ;;  %v2594_v13 = vor.u32 %v3209_v5, %v2591_v6 }
  0xc6   :  { %1891 = vmatpush.bf16.msrb.mxu1 %v2378_v16  ;;  %v1673_v8 = vadd.f32 %v1672_v3, %v3462_v14  ;;  %v1685_v20 = vpop.f32.mrf.mxu1  ;;  %v2722_v16 = vor.u32 %v3241_v11, %v2719_v21  ;;  %v2786_v14 = vor.u32 %v3257_v22, %v2783_v12  ;;  %v3281_v62 = vld [vmem:[#allocation2 + $0x674] sm:$0xf]  ;;  %v2943_v3 = vld [vmem:[#allocation2 + $0x6f8] sm:$0xf0]  ;;  %v3279_v21 = vld [vmem:[#allocation2 + $0x664] sm:$0xf] }
  0xc7   :  { %1904 = vmatpush.bf16.msrb.mxu2 %v2442_v17  ;;  %v3207_v17 = vld [vmem:[#allocation2 + $0x424] sm:$0xf]  ;;  %v2871_v22 = vld [vmem:[#allocation2 + $0x668] sm:$0xf0] }
  0xc8   :  { %1917 = vmatpush.bf16.msrb.mxu3 %v2506_v25  ;;  %1879 = vmatmul.bf16.vlgmr.msrb.gmra.mxu0 %v3442_v0  ;;  %v2791_v0 = vld [vmem:[#allocation2 + $0x5c8] sm:$0xf0]  ;;  %v1686_v26 = vadd.f32 %v1685_v20, %v1673_v8  ;;  %v3071_v8 = vld [vmem:[#allocation2 + $0x7f8] sm:$0xf0]  ;;  %v3295_v12 = vld [vmem:[#allocation2 + $0x6e4] sm:$0xf] }
  0xc9   :  { %1923 = vmatpush.bf16.msra.mxu0 %v2626_v27  ;;  %1892 = vmatmul.bf16.vlgmr.msrb.gmra.mxu1 %v3446_v2  ;;  %v2794_v9 = vor.u32 %v3259_v63, %v2791_v0  ;;  %v2647_v25 = vld [vmem:[#allocation2 + $0x4a8] sm:$0xf0]  ;;  %v3239_v27 = vld [vmem:[#allocation2 + $0x524] sm:$0xf]  ;;  %v2879_v63 = vld [vmem:[#allocation2 + $0x678] sm:$0xf0] }
  0xca   :  { %1936 = vmatpush.bf16.msra.mxu1 %v2690_v28  ;;  %1905 = vmatmul.bf16.vlgmr.msrb.gmra.mxu2 %v3437_v60  ;;  %v3227_v60 = vld [vmem:[#allocation2 + $0x4c4] sm:$0xf]  ;;  %v2711_v28 = vld [vmem:[#allocation2 + $0x528] sm:$0xf0]  ;;  %v2650_v36 = vor.u32 %v3223_v19, %v2647_v25  ;;  %v3297_v0 = vld [vmem:[#allocation2 + $0x6f4] sm:$0xf]  ;;  %v2874_v19 = vor.u32 %v3279_v21, %v2871_v22 }
  0xcb   :  { %1949 = vmatpush.bf16.msra.mxu2 %v2754_v29  ;;  %1918 = vmatmul.bf16.vlgmr.msrb.gmra.mxu3 %v3444_v1  ;;  %v2602_v1 = vor.u32 %v3211_v56, %v2599_v57  ;;  %v2666_v2 = vor.u32 %v3227_v60, %v2663_v59  ;;  %v2714_v37 = vor.u32 %v3239_v27, %v2711_v28  ;;  %v2695_v60 = vld [vmem:[#allocation2 + $0x508] sm:$0xf0]  ;;  %v3277_v25 = vld [vmem:[#allocation2 + $0x654] sm:$0xf]  ;;  %v2863_v27 = vld [vmem:[#allocation2 + $0x658] sm:$0xf0] }
  0xcc   :  { %1962 = vmatpush.bf16.msra.mxu3 %v2818_v33  ;;  %v2586_v33 = vor.u32 %v3207_v17, %v2583_v18  ;;  %v2759_v59 = vld [vmem:[#allocation2 + $0x588] sm:$0xf0]  ;;  %v2946_v10 = vor.u32 %v3297_v0, %v2943_v3  ;;  %v3327_v17 = vld [vmem:[#allocation2 + $0x7e4] sm:$0xf]  ;;  %v3293_v28 = vld [vmem:[#allocation2 + $0x6d4] sm:$0xf] }
  0xcd   :  { %1924 = vmatpush.bf16.msra.mxu0 %v2618_v40  ;;  %v1698_v24 = vpop.f32.mrf.mxu2  ;;  %v1674_v35 = vpop.f32.mrf.mxu0  ;;  %v3221_v40 = vld [vmem:[#allocation2 + $0x494] sm:$0xf]  ;;  %v3063_v18 = vld [vmem:[#allocation2 + $0x7e8] sm:$0xf0] }
  0xce   :  { %1937 = vmatpush.bf16.msra.mxu1 %v2682_v42  ;;  %v1699_v29 = vadd.f32 %v1698_v24, %v1686_v26  ;;  %v1711_v30 = vpop.f32.mrf.mxu3  ;;  %v1687_v41 = vpop.f32.mrf.mxu1  ;;  %v2778_v42 = vor.u32 %v3255_v31, %v2775_v32  ;;  %v3074_v26 = vor.u32 %v3329_v7, %v3071_v8  ;;  %v2927_v31 = vld [vmem:[#allocation2 + $0x6d8] sm:$0xf0]  ;;  %v3309_v32 = vld [vmem:[#allocation2 + $0x754] sm:$0xf]  ;;  %v3336_v35 = vld [vmem:[#allocation1 + $0x12] sm:$0xff] }
  0xcf   :  { %1950 = vmatpush.bf16.msra.mxu2 %v2746_v43  ;;  %v2639_v43 = vld [vmem:[#allocation2 + $0x498] sm:$0xf0]  ;;  %v2930_v41 = vor.u32 %v3293_v28, %v2927_v31  ;;  %v3305_v0 = vld [vmem:[#allocation2 + $0x734] sm:$0xf]  ;;  %v2839_v7 = vld [vmem:[#allocation2 + $0x628] sm:$0xf0] }
  0xd0   :  { %1963 = vmatpush.bf16.msra.mxu3 %v2810_v47  ;;  %v3469_v34 = vadd.f32 %v1711_v30, %v1699_v29  ;;  %v2767_v47 = vld [vmem:[#allocation2 + $0x598] sm:$0xf0]  ;;  %v2642_v51 = vor.u32 %v3221_v40, %v2639_v43  ;;  %v3066_v30 = vor.u32 %v3327_v17, %v3063_v18  ;;  %v2866_v40 = vor.u32 %v3277_v25, %v2863_v27  ;;  %v3275_v43 = vld [vmem:[#allocation2 + $0x644] sm:$0xf]  ;;  %v3321_v3 = vld [vmem:[#allocation2 + $0x7b4] sm:$0xf] }
  0xd1   :  { %1925 = vmatpush.bf16.msra.mxu0 %v2610_v53  ;;  %v3219_v53 = vld [vmem:[#allocation2 + $0x484] sm:$0xf]  ;;  %v2770_v57 = vor.u32 %v3253_v46, %v2767_v47  ;;  %v3335_v29 = vld [vmem:[#allocation1] sm:$0xff]  ;;  %v2919_v47 = vld [vmem:[#allocation2 + $0x6c8] sm:$0xf0] }
  0xd2   :  { %1938 = vmatpush.bf16.msra.mxu1 %v2674_v54  ;;  %v2631_v54 = vld [vmem:[#allocation2 + $0x488] sm:$0xf0]  ;;  %v3287_v8 = vld [vmem:[#allocation2 + $0x6a4] sm:$0xf]  ;;  %v2831_v25 = vld [vmem:[#allocation2 + $0x618] sm:$0xf0] }
  0xd3   :  { %1951 = vmatpush.bf16.msra.mxu2 %v2738_v55  ;;  %v3235_v55 = vld [vmem:[#allocation2 + $0x504] sm:$0xf]  ;;  %v2634_v5 = vor.u32 %v3219_v53, %v2631_v54  ;;  %v2858_v54 = vor.u32 %v3275_v43, %v2855_v44  ;;  %v2967_v21 = vld [vmem:[#allocation2 + $0x728] sm:$0xf0]  ;;  %v3285_v27 = vld [vmem:[#allocation2 + $0x694] sm:$0xf] }
  0xd4   :  { %1964 = vmatpush.bf16.msra.mxu3 %v2802_v58  ;;  %v3251_v58 = vld [vmem:[#allocation2 + $0x584] sm:$0xf]  ;;  %v2698_v6 = vor.u32 %v3235_v55, %v2695_v60  ;;  %v3273_v60 = vld [vmem:[#allocation2 + $0x634] sm:$0xf]  ;;  %v2959_v31 = vld [vmem:[#allocation2 + $0x718] sm:$0xf0] }
  0xd5   :  { %1926 = vmatpush.bf16.msra.mxu0 %v2602_v1  ;;  %v1700_v56 = vpop.f32.mrf.mxu2  ;;  %v2570_v1 = vor.u32 %v3203_v49, %v2567_v50  ;;  %v2762_v20 = vor.u32 %v3251_v58, %v2759_v59  ;;  %v2983_v49 = vld [vmem:[#allocation2 + $0x748] sm:$0xf0]  ;;  %v2847_v58 = vld [vmem:[#allocation2 + $0x638] sm:$0xf0]  ;;  %v3289_v59 = vld [vmem:[#allocation2 + $0x6b4] sm:$0xf] }
  0xd6   :  { %1939 = vmatpush.bf16.msra.mxu1 %v2666_v2  ;;  %v1713_v61 = vpop.f32.mrf.mxu3  ;;  %v3313_v2 = vld [vmem:[#allocation2 + $0x774] sm:$0xf]  ;;  %v2922_v56 = vor.u32 %v3291_v45, %v2919_v47  ;;  %v3299_v43 = vld [vmem:[#allocation2 + $0x704] sm:$0xf]  ;;  %v2951_v44 = vld [vmem:[#allocation2 + $0x708] sm:$0xf0] }
  0xd7   :  { %1952 = vmatpush.bf16.msra.mxu2 %v2730_v4  ;;  %v3007_v4 = vld [vmem:[#allocation2 + $0x778] sm:$0xf0]  ;;  %v3015_v47 = vld [vmem:[#allocation2 + $0x788] sm:$0xf0] }
  0xd8   :  { %1965 = vmatpush.bf16.msra.mxu3 %v2794_v9  ;;  %v2882_v9 = vor.u32 %v3281_v62, %v2879_v63  ;;  %v3010_v11 = vor.u32 %v3313_v2, %v3007_v4  ;;  %v2911_v63 = vld [vmem:[#allocation2 + $0x6b8] sm:$0xf0]  ;;  %v2850_v4 = vor.u32 %v3273_v60, %v2847_v58 }
  0xd9   :  { %1927 = vmatpush.bf16.msra.mxu0 %v2594_v13  ;;  %v2935_v13 = vld [vmem:[#allocation2 + $0x6e8] sm:$0xf0]  ;;  %v3039_v2 = vld [vmem:[#allocation2 + $0x7b8] sm:$0xf0] }
  0xda   :  { %1940 = vmatpush.bf16.msra.mxu1 %v2658_v15  ;;  %v3311_v15 = vld [vmem:[#allocation2 + $0x764] sm:$0xf]  ;;  %v2938_v24 = vor.u32 %v3295_v12, %v2935_v13  ;;  %v3031_v13 = vld [vmem:[#allocation2 + $0x7a8] sm:$0xf0] }
  0xdb   :  { %1953 = vmatpush.bf16.msra.mxu2 %v2722_v16  ;;  %v2999_v16 = vld [vmem:[#allocation2 + $0x768] sm:$0xf0] }
  0xdc   :  { %1966 = vmatpush.bf16.msra.mxu3 %v2786_v14  ;;  %v3002_v14 = vor.u32 %v3311_v15, %v2999_v16 }
  0xdd   :  { %1928 = vmatpush.bf16.msra.mxu0 %v2586_v33  ;;  %v2991_v33 = vld [vmem:[#allocation2 + $0x758] sm:$0xf0] }
  0xde   :  { %1941 = vmatpush.bf16.msra.mxu1 %v2650_v36  ;;  %v3337_v36 = vld [vmem:[#allocation1 + $0x9] sm:$0xff] }
  0xdf   :  { %1954 = vmatpush.bf16.msra.mxu2 %v2714_v37  ;;  %v3325_v37 = vld [vmem:[#allocation2 + $0x7d4] sm:$0xf] }
  0xe0   :  { %1967 = vmatpush.bf16.msra.mxu3 %v2778_v42  ;;  %v2994_v42 = vor.u32 %v3309_v32, %v2991_v33  ;;  %v3058_v46 = vor.u32 %v3325_v37, %v3055_v38  ;;  %v3317_v32 = vld [vmem:[#allocation2 + $0x794] sm:$0xf]  ;;  %v3023_v33 = vld [vmem:[#allocation2 + $0x798] sm:$0xf0]  ;;  %v3267_v38 = vld [vmem:[#allocation2 + $0x604] sm:$0xf] }
  0xe1   :  { %1929 = vmatpush.bf16.msra.mxu0 %v2578_v48  ;;  %v3307_v48 = vld [vmem:[#allocation2 + $0x744] sm:$0xf] }
  0xe2   :  { %1942 = vmatpush.bf16.msra.mxu1 %v2642_v51  ;;  %v3323_v51 = vld [vmem:[#allocation2 + $0x7c4] sm:$0xf] }
  0xe3   :  { %1955 = vmatpush.bf16.msra.mxu2 %v2706_v52  ;;  %v3047_v52 = vld [vmem:[#allocation2 + $0x7c8] sm:$0xf0] }
  0xe4   :  { %1968 = vmatpush.bf16.msra.mxu3 %v2770_v57  ;;  %v2986_v57 = vor.u32 %v3307_v48, %v2983_v49  ;;  %v3050_v61 = vor.u32 %v3323_v51, %v3047_v52  ;;  %v2954_v51 = vor.u32 %v3299_v43, %v2951_v44 }
  0xe5   :  { %1930 = vmatpush.bf16.msra.mxu0 %v2570_v1  ;;  %v1724_v50 = vpop.f32.mrf.mxu0  ;;  %v2975_v1 = vld [vmem:[#allocation2 + $0x738] sm:$0xf0] }
  0xe6   :  { %1943 = vmatpush.bf16.msra.mxu1 %v2634_v5  ;;  %v1725_v53 = vadd.f32 %v1724_v50, %v3469_v34  ;;  %v1737_v55 = vpop.f32.mrf.mxu1  ;;  %v2914_v34 = vor.u32 %v3289_v59, %v2911_v63  ;;  %v2978_v5 = vor.u32 %v3305_v0, %v2975_v1 }
  0xe7   :  { %1956 = vmatpush.bf16.msra.mxu2 %v2698_v6  ;;  %v3271_v6 = vld [vmem:[#allocation2 + $0x624] sm:$0xf] }
  0xe8   :  { %1969 = vmatpush.bf16.msra.mxu3 %v2762_v20  ;;  %1931 = vmatmul.bf16.vlgmr.msra.gmra.mxu0 %v3335_v29  ;;  %v1738_v62 = vadd.f32 %v1737_v55, %v1725_v53  ;;  %v3042_v20 = vor.u32 %v3321_v3, %v3039_v2  ;;  %v2842_v16 = vor.u32 %v3271_v6, %v2839_v7  ;;  %v2895_v29 = vld [vmem:[#allocation2 + $0x698] sm:$0xf0]  ;;  %v3341_v55 = vld [vmem:[#allocation1 + $0x36] sm:$0xff] }
  0xe9   :  { %1975 = vmatpush.bf16.msrb.mxu0 %v2882_v9  ;;  %1944 = vmatmul.bf16.vlgmr.msra.gmra.mxu1 %v3337_v36  ;;  %v2898_v36 = vor.u32 %v3285_v27, %v2895_v29  ;;  %v3339_v53 = vld [vmem:[#allocation1 + $0x24] sm:$0xff] }
  0xea   :  { %1988 = vmatpush.bf16.msrb.mxu1 %v2946_v10  ;;  %1957 = vmatmul.bf16.vlgmr.msra.gmra.mxu2 %v3336_v35  ;;  %v2903_v10 = vld [vmem:[#allocation2 + $0x6a8] sm:$0xf0] }
  0xeb   :  { %2001 = vmatpush.bf16.msrb.mxu2 %v3010_v11  ;;  %1970 = vmatmul.bf16.vlgmr.msra.gmra.mxu3 %v3338_v39  ;;  %v3303_v11 = vld [vmem:[#allocation2 + $0x724] sm:$0xf]  ;;  %v2823_v39 = vld [vmem:[#allocation2 + $0x608] sm:$0xf0] }
  0xec   :  { %2014 = vmatpush.bf16.msrb.mxu3 %v3074_v26  ;;  %v3319_v26 = vld [vmem:[#allocation2 + $0x7a4] sm:$0xf]  ;;  %v2826_v49 = vor.u32 %v3267_v38, %v2823_v39 }
  0xed   :  { %1976 = vmatpush.bf16.msrb.mxu0 %v2874_v19  ;;  %v1750_v9 = vpop.f32.mrf.mxu2  ;;  %v1726_v15 = vpop.f32.mrf.mxu0  ;;  %v2906_v19 = vor.u32 %v3287_v8, %v2903_v10  ;;  %v3034_v28 = vor.u32 %v3319_v26, %v3031_v13 }
  0xee   :  { %1989 = vmatpush.bf16.msrb.mxu1 %v2938_v24  ;;  %v1751_v22 = vadd.f32 %v1750_v9, %v1738_v62  ;;  %v1763_v12 = vpop.f32.mrf.mxu3  ;;  %v1739_v17 = vpop.f32.mrf.mxu1  ;;  %v2970_v24 = vor.u32 %v3303_v11, %v2967_v21 }
  0xef   :  { %2002 = vmatpush.bf16.msrb.mxu2 %v3002_v14  ;;  %v3269_v14 = vld [vmem:[#allocation2 + $0x614] sm:$0xf] }
  0xf0   :  { %2015 = vmatpush.bf16.msrb.mxu3 %v3066_v30  ;;  %v1764_v18 = vadd.f32 %v1763_v12, %v1751_v22  ;;  %v3301_v30 = vld [vmem:[#allocation2 + $0x714] sm:$0xf]  ;;  %v2834_v35 = vor.u32 %v3269_v14, %v2831_v25 }
  0xf1   :  { %1977 = vmatpush.bf16.msrb.mxu0 %v2866_v40  ;;  %v2962_v37 = vor.u32 %v3301_v30, %v2959_v31  ;;  %v3283_v40 = vld [vmem:[#allocation2 + $0x684] sm:$0xf] }
  0xf2   :  { %1990 = vmatpush.bf16.msrb.mxu1 %v2930_v41  ;;  %v3026_v41 = vor.u32 %v3317_v32, %v3023_v33 }
  0xf3   :  { %2003 = vmatpush.bf16.msrb.mxu2 %v2994_v42  ;;  %v2887_v42 = vld [vmem:[#allocation2 + $0x688] sm:$0xf0] }
  0xf4   :  { %2016 = vmatpush.bf16.msrb.mxu3 %v3058_v46  ;;  %v3315_v46 = vld [vmem:[#allocation2 + $0x784] sm:$0xf]  ;;  %v2890_v50 = vor.u32 %v3283_v40, %v2887_v42 }
  0xf5   :  { %1978 = vmatpush.bf16.msrb.mxu0 %v2858_v54  ;;  %v1752_v45 = vpop.f32.mrf.mxu2  ;;  %v3018_v52 = vor.u32 %v3315_v46, %v3015_v47  ;;  %v3340_v54 = vld [vmem:[#allocation1 + $0x2d] sm:$0xff] }
  0xf6   :  { %1991 = vmatpush.bf16.msrb.mxu1 %v2922_v56  ;;  %v1765_v48 = vpop.f32.mrf.mxu3  ;;  %v3342_v56 = vld [vmem:[#allocation1 + $0x3f] sm:$0xff] }
  0xf7   :  { %2004 = vmatpush.bf16.msrb.mxu2 %v2986_v57 }
  0xf8   :  { %2017 = vmatpush.bf16.msrb.mxu3 %v3050_v61 }
  0xf9   :  { %1979 = vmatpush.bf16.msrb.mxu0 %v2850_v4 }
  0xfa   :  { %1992 = vmatpush.bf16.msrb.mxu1 %v2914_v34  ;;  %v292_v34 = vperm.slane %v3459_v23, 1 }
  0xfb   :  { %2005 = vmatpush.bf16.msrb.mxu2 %v2978_v5 }
  0xfc   :  { %2018 = vmatpush.bf16.msrb.mxu3 %v3042_v20 }
  0xfd   :  { %1980 = vmatpush.bf16.msrb.mxu0 %v2842_v16 }
  0xfe   :  { %1993 = vmatpush.bf16.msrb.mxu1 %v2906_v19 }
  0xff   :  { %2006 = vmatpush.bf16.msrb.mxu2 %v2970_v24 }
 0x100   :  { %2019 = vmatpush.bf16.msrb.mxu3 %v3034_v28 }
 0x101   :  { %1981 = vmatpush.bf16.msrb.mxu0 %v2834_v35 }
 0x102   :  { %1994 = vmatpush.bf16.msrb.mxu1 %v2898_v36 }
 0x103   :  { %2007 = vmatpush.bf16.msrb.mxu2 %v2962_v37 }
 0x104   :  { %2020 = vmatpush.bf16.msrb.mxu3 %v3026_v41 }
 0x105   :  { %1982 = vmatpush.bf16.msrb.mxu0 %v2826_v49  ;;  %v1776_v57 = vpop.f32.mrf.mxu0 }
 0x106   :  { %1995 = vmatpush.bf16.msrb.mxu1 %v2890_v50  ;;  %v1777_v60 = vadd.f32 %v1776_v57, %v1764_v18  ;;  %v1789_v58 = vpop.f32.mrf.mxu1 }
 0x107   :  { %2008 = vmatpush.bf16.msrb.mxu2 %v2954_v51 }
 0x108   :  { %2021 = vmatpush.bf16.msrb.mxu3 %v3018_v52  ;;  %1983 = vmatmul.bf16.vlgmr.msrb.gmra.mxu0 %v3339_v53  ;;  %v1790_v59 = vadd.f32 %v1789_v58, %v1777_v60 }
 0x109   :  { %1996 = vmatmul.bf16.vlgmr.msrb.gmra.mxu1 %v3340_v54 }
 0x10a   :  { %2009 = vmatmul.bf16.vlgmr.msrb.gmra.mxu2 %v3341_v55 }
 0x10b   :  { %2022 = vmatmul.bf16.vlgmr.msrb.gmra.mxu3 %v3342_v56 }
 0x10d   :  { %v1802_v61 = vpop.f32.mrf.mxu2  ;;  %v1778_v0 = vpop.f32.mrf.mxu0 }
 0x10e   :  { %v1803_v62 = vadd.f32 %v1802_v61, %v1790_v59  ;;  %v1815_v63 = vpop.f32.mrf.mxu3  ;;  %v1791_v1 = vpop.f32.mrf.mxu1 }
 0x110   :  { %v1816_v3 = vadd.f32 %v1815_v63, %v1803_v62 }
 0x115   :  { %v1804_v2 = vpop.f32.mrf.mxu2 }
 0x116   :  { %v1817_v4 = vpop.f32.mrf.mxu3 }
 0x125   :  { %v1828_v5 = vpop.f32.mrf.mxu0 }
 0x126   :  { %v1829_v6 = vadd.f32 %v1828_v5, %v292_v34  ;;  %v1841_v7 = vpop.f32.mrf.mxu1 }
 0x128   :  { %v1842_v8 = vadd.f32 %v1841_v7, %v1829_v6 }
 0x12d   :  { %v1854_v20 = vpop.f32.mrf.mxu2  ;;  %v1830_v21 = vpop.f32.mrf.mxu0 }
 0x12e   :  { %v1855_v9 = vadd.f32 %v1854_v20, %v1842_v8  ;;  %v1867_v10 = vpop.f32.mrf.mxu3  ;;  %v1843_v22 = vpop.f32.mrf.mxu1 }
 0x130   :  { %v1868_v11 = vadd.f32 %v1867_v10, %v1855_v9 }
 0x135   :  { %v1856_v12 = vpop.f32.mrf.mxu2 }
 0x136   :  { %v1869_v26 = vpop.f32.mrf.mxu3 }
 0x145   :  { %v1880_v13 = vpop.f32.mrf.mxu0 }
 0x146   :  { %v1893_v15 = vpop.f32.mrf.mxu1  ;;  %v1881_v27 = vadd.f32 %v1880_v13, %v1868_v11 }
 0x148   :  { %v1894_v31 = vadd.f32 %v1893_v15, %v1881_v27 }
 0x14d   :  { %v1906_v16 = vpop.f32.mrf.mxu2  ;;  %v1882_v18 = vpop.f32.mrf.mxu0 }
 0x14e   :  { %v1919_v17 = vpop.f32.mrf.mxu3  ;;  %v1895_v19 = vpop.f32.mrf.mxu1  ;;  %v1907_v33 = vadd.f32 %v1906_v16, %v1894_v31 }
 0x150   :  { %v1920_v37 = vadd.f32 %v1919_v17, %v1907_v33 }
 0x155   :  { %v1908_v24 = vpop.f32.mrf.mxu2 }
 0x156   :  { %v1921_v23 = vpop.f32.mrf.mxu3 }
 0x165   :  { %v1932_v14 = vpop.f32.mrf.mxu0 }
 0x166   :  { %v1945_v25 = vpop.f32.mrf.mxu1  ;;  %v1933_v38 = vadd.f32 %v1932_v14, %v1920_v37 }
 0x168   :  { %v1946_v39 = vadd.f32 %v1945_v25, %v1933_v38 }
 0x16d   :  { %v1958_v28 = vpop.f32.mrf.mxu2  ;;  %v1934_v30 = vpop.f32.mrf.mxu0 }
 0x16e   :  { %v1971_v29 = vpop.f32.mrf.mxu3  ;;  %v1947_v32 = vpop.f32.mrf.mxu1  ;;  %v1959_v40 = vadd.f32 %v1958_v28, %v1946_v39 }
 0x170   :  { %v1972_v41 = vadd.f32 %v1971_v29, %v1959_v40 }
 0x175   :  { %v1960_v35 = vpop.f32.mrf.mxu2 }
 0x176   :  { %v1973_v36 = vpop.f32.mrf.mxu3 }
 0x185   :  { %v1984_v42 = vpop.f32.mrf.mxu0 }
 0x186   :  { %v1997_v43 = vpop.f32.mrf.mxu1  ;;  %v1985_v44 = vadd.f32 %v1984_v42, %v1972_v41 }
 0x188   :  { %v1998_v45 = vadd.f32 %v1997_v43, %v1985_v44 }
 0x18d   :  { %v2010_v46 = vpop.f32.mrf.mxu2  ;;  %v1986_v49 = vpop.f32.mrf.mxu0 }
 0x18e   :  { %v2011_v47 = vadd.f32 %v2010_v46, %v1998_v45  ;;  %v2023_v48 = vpop.f32.mrf.mxu3  ;;  %v1999_v50 = vpop.f32.mrf.mxu1 }
 0x190   :  { %v2024_v51 = vadd.f32 %v2023_v48, %v2011_v47 }
 0x192   :  { %v2029_v52 = vrot.slane %v2024_v51, 6 }
 0x194   :  { %v2031_v53 = vsel %vm2030_vm0, %v1816_v3, %v2029_v52 }
 0x195   :  { %v2012_v54 = vpop.f32.mrf.mxu2  ;;  %2033 = vst [vmem:[#allocation5] sm:$0xf] %v2031_v53 }
 0x196   :  { %v2025_v55 = vpop.f32.mrf.mxu3  ;;  %2044 = dma.vmem_to_hbm [thread:$0]  %s2040_s23, 64, %s2042_s26, [#allocation4]  }
 0x197   :  { %3393 = dma.done.wait [#allocation4], 64  }
 0x198   :  { %3394 = vsyncadd [#allocation4], 4294967232 }
 0x199   :  { %2049 = vsyncpa [#allocation3], 1 }
 0x19a   :  { %2050 = vsyncpa [#allocation4], 1 }

// kernel: _lambda_.26
= control target key start
LH: loop header
LB: loop body
LE: loop exit
PB: predicated region body
PF: predicated region fallthrough
CT: control target
= control target key end

     0   :  { %s5936_s0 = inlined_call_operand.vmem [shape: bf16[2,32,64], index: 0, kind: input, shape index: {}]   ;;  %s5937_s1 = inlined_call_operand.vmem [shape: bf16[2,32,64], index: 1, kind: input, shape index: {}]   ;;  %s5938_s2 = inlined_call_operand.vmem [shape: bf16[2,32,128], index: 2, kind: input, shape index: {}]   ;;  %s5939_s3 = inlined_call_operand.vmem [shape: bf16[2,32,256], index: 3, kind: input, shape index: {}]   ;;  %s5940_s4 = inlined_call_operand.hbm [shape: bf16[64,1024], index: 4, kind: input, shape index: {}]   ;;  %s5941_s5 = inlined_call_operand.hbm [shape: bf16[64,1024], index: 5, kind: input, shape index: {}]   ;;  %s5942_s6 = inlined_call_operand.hbm [shape: bf16[128,1024], index: 6, kind: input, shape index: {}]   ;;  %s5943_s7 = inlined_call_operand.hbm [shape: bf16[256,1024], index: 7, kind: input, shape index: {}]   ;;  %s5944_s8 = inlined_call_operand.vmem [shape: f32[1,1024], index: 8, kind: input, shape index: {}]   ;;  %s5945_s9 = inlined_call_operand.vmem [shape: f32[2,1,1024], index: 9, kind: output, shape index: {0}]   ;;  %s5946_s10 = inlined_call_operand.vmem [shape: f32[2,1,1024], index: 10, kind: output, shape index: {1}]  }
   0x1   :  { %5947 = sst [smem:[#allocation13_spill]] %s5941_s5 }
   0x2   :  { %16 = vsyncpa [#allocation3], 0 }
   0x3   :  { %17 = vsyncpa [#allocation5], 0 }
   0x4   :  { %18 = vsyncpa [#allocation8], 0  ;;  %s5301_s13 = smov 0   ;;  %s5303_s14 = smov 0  }
   0x5   :  { %s5305_s15 = smov 0  }
   0x6 LB: > { %s3626_s16 = sadd.s32 4294967295, %s5238_s15   ;;  %p3628_p0 = scmp.ge.s32.totalorder %s5238_s15, 1  ;;  %s5238_s15 = sphi %s5305_s15, %s24_s15   ;;  %s5234_s14 = sphi %s5303_s14, %s5955_s14   ;;  %s5230_s13 = sphi %s5301_s13, %s5954_s13  }
   0x7   : > { %p310_p1 = scmp.lt.s32.totalorder %s5238_s15, 3  ;;  %p5319_p2 = scmp.eq.s32.totalorder %s3626_s16, 0 }
   0x8   : > { %s5949_s5 = sld [smem:[#allocation13_spill]]  ;;  %s5240_s22 = smov [#allocation4]  }
   0x9   : > { %p5326_p3 = pnand %p3628_p0, %p310_p1  ;;  %s337_s23 = sshll.u32 %s5240_s22, 4  ;;  %s338_s23 = int_to_ptr.vmem [resolvable:$true] %s337_s23 }
   0xa   : > { %s36_s25 = sadd.s32 1, %s5234_s14  ;;  %s5241_s26 = smov 512  }
   0xb   : > { %p5033_p4 = pneg %p5326_p3  ;;  %p38_p6 = scmp.ge.s32.totalorder %s36_s25, 2 }
   0xc   : > { %s5242_s27 = smov 32   ;;  %s321_s30 = sshll.u32 %s5940_s4, 4  ;;  %s322_s30 = int_to_ptr.hbm [resolvable:$true] %s321_s30 }
   0xd   : > { %p5334_p5 = pnand %p5319_p2, %p5033_p4  ;;  %s5957_s25 = smov (%p38_p6, %s36_s25), 0 }
   0xe   : > { %s335_s20 = sshll.u32 %s5949_s5, 4  ;;  %5952 = sst [smem:[#allocation12_spill]] %s5957_s25  ;;  %s336_s20 = int_to_ptr.hbm [resolvable:$true] %s335_s20 }
   0xf   : > { %5039 = dma.hbm_to_vmem [thread:$0]  (!%p5334_p5), %s336_s20, 4096, %s338_s23, [#allocation5], %s5241_s26, %s5241_s26, %s5242_s27  }
  0x10   : > { %s5243_s11 = smov [#allocation2]   ;;  %s349_s19 = sshll.u32 %s5942_s6, 4  ;;  %s350_s19 = int_to_ptr.hbm [resolvable:$true] %s349_s19 }
  0x11   : > { %s323_s12 = sshll.u32 %s5243_s11, 4  ;;  %s5244_s22 = smov [#allocation6]   ;;  %s324_s12 = int_to_ptr.vmem [resolvable:$true] %s323_s12 }
  0x12   : > { %5036 = dma.hbm_to_vmem [thread:$0]  (!%p5334_p5), %s322_s30, 4096, %s324_s12, [#allocation3], %s5241_s26, %s5241_s26, %s5242_s27  }
  0x13   : > { %s351_s20 = sshll.u32 %s5244_s22, 4  ;;  %s363_s25 = sshll.u32 %s5943_s7, 4  ;;  %s352_s20 = int_to_ptr.vmem [resolvable:$true] %s351_s20  ;;  %s364_s25 = int_to_ptr.hbm [resolvable:$true] %s363_s25 }
  0x14   : > { %5042 = dma.hbm_to_vmem [thread:$0]  (!%p5334_p5), %s350_s19, 8192, %s352_s20, [#allocation5], %s5241_s26, %s5241_s26, %s5242_s27  }
  0x15   : > { %s5245_s28 = smov [#allocation7]   ;;  %437 = sbr.rel (%p5326_p3) target bundleno = 527 (0x20f), region = 56 }
  0x16   : > { %s365_s29 = sshll.u32 %s5245_s28, 4  ;;  %s366_s29 = int_to_ptr.vmem [resolvable:$true] %s365_s29 }
  0x17   : > { %5045 = dma.hbm_to_vmem [thread:$0]  (!%p5334_p5), %s364_s25, 16384, %s366_s29, [#allocation8], %s5241_s26, %s5241_s26, %s5242_s27  }
  0x1a   : > { %5217 = dma.done.wait (%p5319_p2), [#allocation3], 4096  }
  0x1b   : > { %5219 = vsyncadd (%p5319_p2), [#allocation3], 4294963200 }
  0x1c   : > { %5221 = dma.done.wait (%p5319_p2), [#allocation5], 12288  }
  0x1d   : > { %5223 = vsyncadd (%p5319_p2), [#allocation5], 4294955008 }
  0x1e   : > { %5225 = dma.done.wait (%p5319_p2), [#allocation8], 16384  }
  0x1f   : > { %5227 = vsyncadd (%p5319_p2), [#allocation8], 4294950912  ;;  %p527_p7 = scmp.lt.s32.totalorder %s5230_s13, 1  ;;  %v3755_v0 = vld [vmem:[#allocation4 + $0xc0] sm:$0xf]  ;;  %vm818_vm0 = vcmask 523264  }
  0x20   : > { %v4815_v1 = vld [vmem:[#allocation4 + $0xdc] sm:$0xf0]  ;;  %v4811_v2 = vld [vmem:[#allocation4 + $0xc4] sm:$0xf]  ;;  %v3763_v5 = vld [vmem:[#allocation4 + $0xc8] sm:$0xf] }
  0x21   : > { %s5959_s13 = smov (!%p527_p7, %s5230_s13), 1  ;;  %v3756_v3 = vor.u32 %v4815_v1, %v3755_v0  ;;  %v3757_v4 = vld [vmem:[#allocation4 + $0xe0] sm:$0xf0]  ;;  %v4816_v6 = vld [vmem:[#allocation4 + $0xe4] sm:$0xf0]  ;;  %vm3326_vm11 = vcmask 1040384  }
  0x22   : > { %s5377_s5 = sshll.u32 %s5959_s13, 4  ;;  %v3760_v7 = vor.u32 %v4811_v2, %v3757_v4  ;;  %v3764_v8 = vor.u32 %v4816_v6, %v3763_v5  ;;  %v4812_v9 = vld [vmem:[#allocation4 + $0xcc] sm:$0xf]  ;;  %v3723_v11 = vld [vmem:[#allocation4 + $0x80] sm:$0xf]  ;;  %s4750_s16 = sshll.u32 %s5959_s13, 5 }
  0x23   : > { %v3765_v10 = vld [vmem:[#allocation4 + $0xe8] sm:$0xf0]  ;;  %829 = vmatpush.bf16.msra.mxu0 %v3756_v3  ;;  %v4807_v13 = vld [vmem:[#allocation4 + $0x9c] sm:$0xf0]  ;;  %v4803_v14 = vld [vmem:[#allocation4 + $0x84] sm:$0xf]  ;;  %s5383_s24 = scalar_lea.vmem %s5937_s1, %s5377_s5  ;;  %s5427_s27 = scalar_lea.vmem %s5936_s0, %s5377_s5 }
  0x24   : > { %v3768_v12 = vor.u32 %v4812_v9, %v3765_v10  ;;  %v3725_v15 = vld [vmem:[#allocation4 + $0xa0] sm:$0xf0]  ;;  %848 = vmatpush.bf16.msra.mxu1 %v3760_v7  ;;  %867 = vmatpush.bf16.msra.mxu2 %v3764_v8  ;;  %v3724_v16 = vor.u32 %v4807_v13, %v3723_v11  ;;  %v3731_v18 = vld [vmem:[#allocation4 + $0x88] sm:$0xf]  ;;  %v4804_v20 = vld [vmem:[#allocation4 + $0x8c] sm:$0xf]  ;;  %s5471_s12 = scalar_lea.vmem %s5938_s2, %s5377_s5  ;;  %s5551_s22 = scalar_lea.vmem %s5939_s3, %s4750_s16 }
  0x25   : > { %v3728_v17 = vor.u32 %v4803_v14, %v3725_v15  ;;  %v4808_v19 = vld [vmem:[#allocation4 + $0xa4] sm:$0xf0]  ;;  %v3733_v22 = vld [vmem:[#allocation4 + $0xa8] sm:$0xf0]  ;;  %v3691_v23 = vld [vmem:[#allocation4 + $0x40] sm:$0xf] }
  0x26   : > { %886 = vmatpush.bf16.msra.mxu3 %v3768_v12  ;;  %v3732_v21 = vor.u32 %v4808_v19, %v3731_v18  ;;  %v4799_v24 = vld [vmem:[#allocation4 + $0x5c] sm:$0xf0]  ;;  %v3736_v25 = vor.u32 %v4804_v20, %v3733_v22  ;;  %v4795_v26 = vld [vmem:[#allocation4 + $0x44] sm:$0xf]  ;;  %v3699_v28 = vld [vmem:[#allocation4 + $0x48] sm:$0xf] }
  0x27   : > { %v3693_v27 = vld [vmem:[#allocation4 + $0x60] sm:$0xf0]  ;;  %830 = vmatpush.bf16.msra.mxu0 %v3724_v16  ;;  %v3692_v29 = vor.u32 %v4799_v24, %v3691_v23  ;;  %v4800_v30 = vld [vmem:[#allocation4 + $0x64] sm:$0xf0]  ;;  %v4796_v31 = vld [vmem:[#allocation4 + $0x4c] sm:$0xf] }
  0x28   : > { %v3701_v32 = vld [vmem:[#allocation4 + $0x68] sm:$0xf0]  ;;  %849 = vmatpush.bf16.msra.mxu1 %v3728_v17  ;;  %868 = vmatpush.bf16.msra.mxu2 %v3732_v21  ;;  %v3696_v33 = vor.u32 %v4795_v26, %v3693_v27  ;;  %v3700_v34 = vor.u32 %v4800_v30, %v3699_v28  ;;  %v3659_v35 = vld [vmem:[#allocation4] sm:$0xf]  ;;  %v4787_v37 = vld [vmem:[#allocation4 + $0x4] sm:$0xf] }
  0x29   : > { %v4791_v36 = vld [vmem:[#allocation4 + $0x1c] sm:$0xf0]  ;;  %v3704_v38 = vor.u32 %v4796_v31, %v3701_v32  ;;  %v3661_v39 = vld [vmem:[#allocation4 + $0x20] sm:$0xf0]  ;;  %v3667_v40 = vld [vmem:[#allocation4 + $0x8] sm:$0xf] }
  0x2a   : > { %887 = vmatpush.bf16.msra.mxu3 %v3736_v25  ;;  %v4792_v41 = vld [vmem:[#allocation4 + $0x24] sm:$0xf0]  ;;  %v4788_v42 = vld [vmem:[#allocation4 + $0xc] sm:$0xf]  ;;  %v3660_v44 = vor.u32 %v4791_v36, %v3659_v35  ;;  %v3779_v45 = vld [vmem:[#allocation4 + $0xd8] sm:$0xf]  ;;  %v3664_v48 = vor.u32 %v4787_v37, %v3661_v39 }
  0x2b   : > { %v3669_v43 = vld [vmem:[#allocation4 + $0x28] sm:$0xf0]  ;;  %831 = vmatpush.bf16.msra.mxu0 %v3692_v29  ;;  %v4818_v46 = vld [vmem:[#allocation4 + $0xf4] sm:$0xf0]  ;;  %v4814_v47 = vld [vmem:[#allocation4 + $0xdc] sm:$0xf]  ;;  %v3668_v49 = vor.u32 %v4792_v41, %v3667_v40 }
  0x2c   : > { %850 = vmatpush.bf16.msra.mxu1 %v3696_v33  ;;  %869 = vmatpush.bf16.msra.mxu2 %v3700_v34  ;;  %v5386_v50 = vld [vmem:[%s5383_s24] sm:$0xff]  ;;  %v3781_v51 = vld [vmem:[#allocation4 + $0xf8] sm:$0xf0]  ;;  %v3672_v52 = vor.u32 %v4788_v42, %v3669_v43  ;;  %v3780_v53 = vor.u32 %v4818_v46, %v3779_v45  ;;  %v3771_v54 = vld [vmem:[#allocation4 + $0xd0] sm:$0xf]  ;;  %s3647_s28 = sshll.u32 %s5959_s13, 3 }
  0x2d   : > { %v4817_v55 = vld [vmem:[#allocation4 + $0xec] sm:$0xf0]  ;;  %v4813_v56 = vld [vmem:[#allocation4 + $0xd4] sm:$0xf]  ;;  %v3784_v57 = vor.u32 %v4814_v47, %v3781_v51  ;;  %v3747_v59 = vld [vmem:[#allocation4 + $0x98] sm:$0xf]  ;;  %s570_s17 = scalar_lea.vmem %s5945_s9, %s3647_s28  ;;  %s574_s25 = scalar_lea.vmem %s5946_s10, %s3647_s28 }
  0x2e   : > { %888 = vmatpush.bf16.msra.mxu3 %v3704_v38  ;;  %v3773_v58 = vld [vmem:[#allocation4 + $0xf0] sm:$0xf0]  ;;  %v4810_v60 = vld [vmem:[#allocation4 + $0xb4] sm:$0xf0]  ;;  %v4806_v61 = vld [vmem:[#allocation4 + $0x9c] sm:$0xf]  ;;  %v3772_v63 = vor.u32 %v4817_v55, %v3771_v54 }
  0x2f   : > { %832 = vmatpush.bf16.msra.mxu0 %v3660_v44  ;;  %v3749_v62 = vld [vmem:[#allocation4 + $0xb8] sm:$0xf0]  ;;  %v3776_v0 = vor.u32 %v4813_v56, %v3773_v58  ;;  %v3748_v1 = vor.u32 %v4810_v60, %v3747_v59  ;;  %v3739_v2 = vld [vmem:[#allocation4 + $0x90] sm:$0xf]  ;;  %v4805_v4 = vld [vmem:[#allocation4 + $0x94] sm:$0xf] }
  0x30   : > { %851 = vmatpush.bf16.msra.mxu1 %v3664_v48  ;;  %870 = vmatpush.bf16.msra.mxu2 %v3668_v49  ;;  %v4809_v3 = vld [vmem:[#allocation4 + $0xac] sm:$0xf0]  ;;  %v3752_v5 = vor.u32 %v4806_v61, %v3749_v62  ;;  %v3741_v6 = vld [vmem:[#allocation4 + $0xb0] sm:$0xf0]  ;;  %v3715_v7 = vld [vmem:[#allocation4 + $0x58] sm:$0xf] }
  0x31   : > { %v4802_v8 = vld [vmem:[#allocation4 + $0x74] sm:$0xf0]  ;;  %v4798_v9 = vld [vmem:[#allocation4 + $0x5c] sm:$0xf]  ;;  %v3740_v11 = vor.u32 %v4809_v3, %v3739_v2  ;;  %v3707_v12 = vld [vmem:[#allocation4 + $0x50] sm:$0xf]  ;;  %v3744_v13 = vor.u32 %v4805_v4, %v3741_v6 }
  0x32   : > { %889 = vmatpush.bf16.msra.mxu3 %v3672_v52  ;;  %3785 = vmatmul.msk.bf16.vlgmr.msra.gmra.mxu0 %vm818_vm0, %v5386_v50  ;;  %v3717_v10 = vld [vmem:[#allocation4 + $0x78] sm:$0xf0]  ;;  %v3716_v14 = vor.u32 %v4802_v8, %v3715_v7  ;;  %v4801_v15 = vld [vmem:[#allocation4 + $0x6c] sm:$0xf0]  ;;  %v4797_v16 = vld [vmem:[#allocation4 + $0x54] sm:$0xf] }
  0x33   : > { %3787 = vmatmul.msk.bf16.vlgmr.msra.gmra.mxu1 %vm818_vm0, %v5386_v50  ;;  %3789 = vmatmul.msk.bf16.vlgmr.msra.gmra.mxu2 %vm818_vm0, %v5386_v50  ;;  %v3709_v17 = vld [vmem:[#allocation4 + $0x70] sm:$0xf0]  ;;  %v3720_v18 = vor.u32 %v4798_v9, %v3717_v10  ;;  %v3683_v19 = vld [vmem:[#allocation4 + $0x18] sm:$0xf]  ;;  %v4790_v21 = vld [vmem:[#allocation4 + $0x1c] sm:$0xf]  ;;  %v3708_v25 = vor.u32 %v4801_v15, %v3707_v12 }
  0x34   : > { %943 = vmatpush.bf16.msrb.mxu2 %v3780_v53  ;;  %905 = vmatpush.bf16.msrb.mxu0 %v3772_v63  ;;  %v4794_v20 = vld [vmem:[#allocation4 + $0x34] sm:$0xf0]  ;;  %v3685_v22 = vld [vmem:[#allocation4 + $0x38] sm:$0xf0]  ;;  %v3915_v23 = vld [vmem:[#allocation2 + $0xc8] sm:$0xf]  ;;  %v3712_v28 = vor.u32 %v4797_v16, %v3709_v17 }
  0x35   : > { %3791 = vmatmul.msk.bf16.vlgmr.msra.gmra.mxu3 %vm818_vm0, %v5386_v50  ;;  %924 = vmatpush.bf16.msrb.mxu1 %v3776_v0  ;;  %v4782_v24 = vld [vmem:[#allocation2 + $0xe4] sm:$0xf0]  ;;  %v4778_v26 = vld [vmem:[#allocation2 + $0xcc] sm:$0xf]  ;;  %v3684_v29 = vor.u32 %v4794_v20, %v3683_v19  ;;  %v3675_v30 = vld [vmem:[#allocation4 + $0x10] sm:$0xf]  ;;  %v3688_v33 = vor.u32 %v4790_v21, %v3685_v22 }
  0x36   : > { %962 = vmatpush.bf16.msrb.mxu3 %v3784_v57  ;;  %v3917_v27 = vld [vmem:[#allocation2 + $0xe8] sm:$0xf0]  ;;  %v4793_v31 = vld [vmem:[#allocation4 + $0x2c] sm:$0xf0]  ;;  %v4789_v32 = vld [vmem:[#allocation4 + $0x14] sm:$0xf]  ;;  %v3916_v35 = vor.u32 %v4782_v24, %v3915_v23 }
  0x37   : > { %v3677_v34 = vld [vmem:[#allocation4 + $0x30] sm:$0xf0]  ;;  %v3907_v36 = vld [vmem:[#allocation2 + $0xc0] sm:$0xf]  ;;  %v3920_v38 = vor.u32 %v4778_v26, %v3917_v27  ;;  %v4777_v39 = vld [vmem:[#allocation2 + $0xc4] sm:$0xf]  ;;  %v3676_v42 = vor.u32 %v4793_v31, %v3675_v30 }
  0x38   : > { %944 = vmatpush.bf16.msrb.mxu2 %v3748_v1  ;;  %906 = vmatpush.bf16.msrb.mxu0 %v3740_v11  ;;  %v4781_v37 = vld [vmem:[#allocation2 + $0xdc] sm:$0xf0]  ;;  %v3909_v40 = vld [vmem:[#allocation2 + $0xe0] sm:$0xf0]  ;;  %v5397_v41 = vld [vmem:[%s5383_s24 + $0x8] sm:$0xff]  ;;  %v3680_v43 = vor.u32 %v4789_v32, %v3677_v34 }
  0x39   : > { %925 = vmatpush.bf16.msrb.mxu1 %v3744_v13  ;;  %v3908_v44 = vor.u32 %v4781_v37, %v3907_v36  ;;  %v3883_v45 = vld [vmem:[#allocation2 + $0x88] sm:$0xf]  ;;  %v4770_v47 = vld [vmem:[#allocation2 + $0x8c] sm:$0xf]  ;;  %v3912_v48 = vor.u32 %v4777_v39, %v3909_v40  ;;  %v3875_v51 = vld [vmem:[#allocation2 + $0x80] sm:$0xf] }
  0x3a   : > { %963 = vmatpush.bf16.msrb.mxu3 %v3752_v5  ;;  %v4774_v46 = vld [vmem:[#allocation2 + $0xa4] sm:$0xf0]  ;;  %v3885_v49 = vld [vmem:[#allocation2 + $0xa8] sm:$0xf0]  ;;  %v4773_v52 = vld [vmem:[#allocation2 + $0x9c] sm:$0xf0] }
  0x3b   : > { %v4769_v53 = vld [vmem:[#allocation2 + $0x84] sm:$0xf]  ;;  %v3884_v55 = vor.u32 %v4774_v46, %v3883_v45  ;;  %v3888_v56 = vor.u32 %v4770_v47, %v3885_v49  ;;  %v3876_v57 = vor.u32 %v4773_v52, %v3875_v51  ;;  %v3851_v59 = vld [vmem:[#allocation2 + $0x48] sm:$0xf]  ;;  %v4762_v61 = vld [vmem:[#allocation2 + $0x4c] sm:$0xf] }
  0x3c   : > { %945 = vmatpush.bf16.msrb.mxu2 %v3716_v14  ;;  %907 = vmatpush.bf16.msrb.mxu0 %v3708_v25  ;;  %v3877_v54 = vld [vmem:[#allocation2 + $0xa0] sm:$0xf0]  ;;  %v4766_v60 = vld [vmem:[#allocation2 + $0x64] sm:$0xf0]  ;;  %v3853_v63 = vld [vmem:[#allocation2 + $0x68] sm:$0xf0] }
  0x3d   : > { %926 = vmatpush.bf16.msrb.mxu1 %v3712_v28  ;;  %v3880_v58 = vor.u32 %v4769_v53, %v3877_v54  ;;  %v3852_v62 = vor.u32 %v4766_v60, %v3851_v59  ;;  %v3843_v0 = vld [vmem:[#allocation2 + $0x40] sm:$0xf]  ;;  %v3856_v2 = vor.u32 %v4762_v61, %v3853_v63  ;;  %v4761_v4 = vld [vmem:[#allocation2 + $0x44] sm:$0xf]  ;;  %v3819_v6 = vld [vmem:[#allocation2 + $0x8] sm:$0xf] }
  0x3e   : > { %964 = vmatpush.bf16.msrb.mxu3 %v3720_v18  ;;  %v4765_v1 = vld [vmem:[#allocation2 + $0x5c] sm:$0xf0]  ;;  %v3845_v5 = vld [vmem:[#allocation2 + $0x60] sm:$0xf0]  ;;  %v4758_v8 = vld [vmem:[#allocation2 + $0x24] sm:$0xf0] }
  0x3f   : > { %v3844_v3 = vor.u32 %v4765_v1, %v3843_v0  ;;  %v3848_v7 = vor.u32 %v4761_v4, %v3845_v5  ;;  %v4754_v9 = vld [vmem:[#allocation2 + $0xc] sm:$0xf]  ;;  %v3820_v11 = vor.u32 %v4758_v8, %v3819_v6  ;;  %v3811_v12 = vld [vmem:[#allocation2] sm:$0xf]  ;;  %v4753_v14 = vld [vmem:[#allocation2 + $0x4] sm:$0xf] }
  0x40   : > { %946 = vmatpush.bf16.msrb.mxu2 %v3684_v29  ;;  %908 = vmatpush.bf16.msrb.mxu0 %v3676_v42  ;;  %v3821_v10 = vld [vmem:[#allocation2 + $0x28] sm:$0xf0]  ;;  %v4757_v13 = vld [vmem:[#allocation2 + $0x1c] sm:$0xf0]  ;;  %v3813_v17 = vld [vmem:[#allocation2 + $0x20] sm:$0xf0] }
  0x41   : > { %927 = vmatpush.bf16.msrb.mxu1 %v3680_v43  ;;  %v3824_v15 = vor.u32 %v4754_v9, %v3821_v10  ;;  %v3812_v16 = vor.u32 %v4757_v13, %v3811_v12  ;;  %v3816_v18 = vor.u32 %v4753_v14, %v3813_v17  ;;  %v3931_v19 = vld [vmem:[#allocation2 + $0xd8] sm:$0xf]  ;;  %v4780_v21 = vld [vmem:[#allocation2 + $0xdc] sm:$0xf]  ;;  %v3923_v24 = vld [vmem:[#allocation2 + $0xd0] sm:$0xf] }
  0x42   : > { %965 = vmatpush.bf16.msrb.mxu3 %v3688_v33  ;;  %3786 = vmatmul.msk.bf16.gmra.mxu0 %vm818_vm0, %v5397_v41  ;;  %v4784_v20 = vld [vmem:[#allocation2 + $0xf4] sm:$0xf0]  ;;  %v3933_v23 = vld [vmem:[#allocation2 + $0xf8] sm:$0xf0]  ;;  %v4783_v25 = vld [vmem:[#allocation2 + $0xec] sm:$0xf0] }
  0x43   : > { %3788 = vmatmul.msk.bf16.gmra.mxu1 %vm818_vm0, %v5397_v41  ;;  %3790 = vmatmul.msk.bf16.gmra.mxu2 %vm818_vm0, %v5397_v41  ;;  %v3932_v22 = vor.u32 %v4784_v20, %v3931_v19  ;;  %v3936_v26 = vor.u32 %v4780_v21, %v3933_v23  ;;  %v3924_v27 = vor.u32 %v4783_v25, %v3923_v24  ;;  %v4779_v28 = vld [vmem:[#allocation2 + $0xd4] sm:$0xf]  ;;  %v3899_v30 = vld [vmem:[#allocation2 + $0x98] sm:$0xf]  ;;  %v4772_v33 = vld [vmem:[#allocation2 + $0x9c] sm:$0xf] }
  0x44   : > { %1195 = vmatpush.bf16.msra.mxu2 %v3916_v35  ;;  %1157 = vmatpush.bf16.msra.mxu0 %v3908_v44  ;;  %v3925_v29 = vld [vmem:[#allocation2 + $0xf0] sm:$0xf0]  ;;  %v4776_v32 = vld [vmem:[#allocation2 + $0xb4] sm:$0xf0]  ;;  %v3901_v34 = vld [vmem:[#allocation2 + $0xb8] sm:$0xf0] }
  0x45   : > { %1176 = vmatpush.bf16.msra.mxu1 %v3912_v48  ;;  %3792 = vmatmul.msk.bf16.gmra.mxu3 %vm818_vm0, %v5397_v41  ;;  %v3928_v31 = vor.u32 %v4779_v28, %v3925_v29  ;;  %v3904_v35 = vor.u32 %v4772_v33, %v3901_v34  ;;  %v3891_v36 = vld [vmem:[#allocation2 + $0x90] sm:$0xf]  ;;  %v3893_v40 = vld [vmem:[#allocation2 + $0xb0] sm:$0xf0]  ;;  %v3867_v43 = vld [vmem:[#allocation2 + $0x58] sm:$0xf] }
  0x46   : > { %1214 = vmatpush.bf16.msra.mxu3 %v3920_v38  ;;  %v4775_v37 = vld [vmem:[#allocation2 + $0xac] sm:$0xf0]  ;;  %v4771_v38 = vld [vmem:[#allocation2 + $0x94] sm:$0xf]  ;;  %v4768_v44 = vld [vmem:[#allocation2 + $0x74] sm:$0xf0] }
  0x47   : > { %v3892_v39 = vor.u32 %v4775_v37, %v3891_v36  ;;  %v3896_v42 = vor.u32 %v4771_v38, %v3893_v40  ;;  %v4764_v45 = vld [vmem:[#allocation2 + $0x5c] sm:$0xf]  ;;  %v3868_v46 = vor.u32 %v4768_v44, %v3867_v43  ;;  %v3859_v48 = vld [vmem:[#allocation2 + $0x50] sm:$0xf]  ;;  %v4763_v53 = vld [vmem:[#allocation2 + $0x54] sm:$0xf] }
  0x48   : > { %1196 = vmatpush.bf16.msra.mxu2 %v3884_v55  ;;  %1158 = vmatpush.bf16.msra.mxu0 %v3876_v57  ;;  %v3869_v47 = vld [vmem:[#allocation2 + $0x78] sm:$0xf0]  ;;  %v4767_v49 = vld [vmem:[#allocation2 + $0x6c] sm:$0xf0]  ;;  %v3861_v54 = vld [vmem:[#allocation2 + $0x70] sm:$0xf0] }
  0x49   : > { %1177 = vmatpush.bf16.msra.mxu1 %v3880_v58  ;;  %v3872_v51 = vor.u32 %v4764_v45, %v3869_v47  ;;  %v3860_v52 = vor.u32 %v4767_v49, %v3859_v48  ;;  %v3835_v55 = vld [vmem:[#allocation2 + $0x18] sm:$0xf]  ;;  %v4756_v58 = vld [vmem:[#allocation2 + $0x1c] sm:$0xf]  ;;  %v3827_v61 = vld [vmem:[#allocation2 + $0x10] sm:$0xf] }
  0x4a   : > { %1215 = vmatpush.bf16.msra.mxu3 %v3888_v56  ;;  %v3864_v56 = vor.u32 %v4763_v53, %v3861_v54  ;;  %v4760_v57 = vld [vmem:[#allocation2 + $0x34] sm:$0xf0]  ;;  %v3837_v59 = vld [vmem:[#allocation2 + $0x38] sm:$0xf0]  ;;  %v4755_v63 = vld [vmem:[#allocation2 + $0x14] sm:$0xf] }
  0x4b   : > { %v3840_v60 = vor.u32 %v4756_v58, %v3837_v59  ;;  %v3829_v1 = vld [vmem:[#allocation2 + $0x30] sm:$0xf0]  ;;  %v4195_v4 = vld [vmem:[#allocation6 + $0x1c8] sm:$0xf]  ;;  %v4878_v6 = vld [vmem:[#allocation6 + $0x1cc] sm:$0xf] }
  0x4c   : > { %1197 = vmatpush.bf16.msra.mxu2 %v3852_v62  ;;  %1159 = vmatpush.bf16.msra.mxu0 %v3844_v3  ;;  %v4759_v62 = vld [vmem:[#allocation2 + $0x2c] sm:$0xf0]  ;;  %v5430_v3 = vld [vmem:[%s5427_s27] sm:$0xff]  ;;  %v4882_v5 = vld [vmem:[#allocation6 + $0x1e4] sm:$0xf0] }
  0x4d   : > { %1178 = vmatpush.bf16.msra.mxu1 %v3848_v7  ;;  %v3828_v0 = vor.u32 %v4759_v62, %v3827_v61  ;;  %v4196_v7 = vor.u32 %v4882_v5, %v4195_v4  ;;  %v4197_v8 = vld [vmem:[#allocation6 + $0x1e8] sm:$0xf0]  ;;  %v4187_v9 = vld [vmem:[#allocation6 + $0x1c0] sm:$0xf]  ;;  %v4877_v13 = vld [vmem:[#allocation6 + $0x1c4] sm:$0xf] }
  0x4e   : > { %1216 = vmatpush.bf16.msra.mxu3 %v3856_v2  ;;  %v3832_v2 = vor.u32 %v4755_v63, %v3829_v1  ;;  %v4881_v10 = vld [vmem:[#allocation6 + $0x1dc] sm:$0xf0]  ;;  %v4189_v14 = vld [vmem:[#allocation6 + $0x1e0] sm:$0xf0]  ;;  %v4874_v17 = vld [vmem:[#allocation6 + $0x1a4] sm:$0xf0] }
  0x4f   : > { %v4188_v12 = vor.u32 %v4881_v10, %v4187_v9  ;;  %v4165_v19 = vld [vmem:[#allocation6 + $0x1a8] sm:$0xf0]  ;;  %v4873_v23 = vld [vmem:[#allocation6 + $0x19c] sm:$0xf0]  ;;  %v4869_v24 = vld [vmem:[#allocation6 + $0x184] sm:$0xf] }
  0x50   : > { %1198 = vmatpush.bf16.msra.mxu2 %v3820_v11  ;;  %1160 = vmatpush.bf16.msra.mxu0 %v3812_v16  ;;  %v4200_v11 = vor.u32 %v4878_v6, %v4197_v8  ;;  %v4192_v16 = vor.u32 %v4877_v13, %v4189_v14  ;;  %v4866_v28 = vld [vmem:[#allocation6 + $0x164] sm:$0xf0]  ;;  %v4865_v34 = vld [vmem:[#allocation6 + $0x15c] sm:$0xf0]  ;;  %v4101_v43 = vld [vmem:[#allocation6 + $0x128] sm:$0xf0] }
  0x51   : > { %1179 = vmatpush.bf16.msra.mxu1 %v3816_v18  ;;  %v4870_v18 = vld [vmem:[#allocation6 + $0x18c] sm:$0xf]  ;;  %v4099_v38 = vld [vmem:[#allocation6 + $0x108] sm:$0xf]  ;;  %v4091_v45 = vld [vmem:[#allocation6 + $0x100] sm:$0xf] }
  0x52   : > { %1217 = vmatpush.bf16.msra.mxu3 %v3824_v15  ;;  %3793 = vmatmul.msk.bf16.vlgmr.msrb.gmra.mxu0 %vm818_vm0, %v5386_v50  ;;  %v4163_v15 = vld [vmem:[#allocation6 + $0x188] sm:$0xf]  ;;  %v4168_v21 = vor.u32 %v4870_v18, %v4165_v19  ;;  %v4853_v49 = vld [vmem:[#allocation6 + $0x104] sm:$0xf]  ;;  %v4069_v58 = vld [vmem:[#allocation6 + $0xe8] sm:$0xf0] }
  0x53   : > { %3795 = vmatmul.msk.bf16.vlgmr.msrb.gmra.mxu1 %vm818_vm0, %v5386_v50  ;;  %3797 = vmatmul.msk.bf16.vlgmr.msrb.gmra.mxu2 %vm818_vm0, %v5386_v50  ;;  %v4164_v20 = vor.u32 %v4874_v17, %v4163_v15  ;;  %v5441_v47 = vld [vmem:[%s5427_s27 + $0x8] sm:$0xff]  ;;  %v4059_v59 = vld [vmem:[#allocation6 + $0xc0] sm:$0xf]  ;;  %v4845_v62 = vld [vmem:[#allocation6 + $0xc4] sm:$0xf] }
  0x54   : > { %1271 = vmatpush.bf16.msrb.mxu2 %v3932_v22  ;;  %1233 = vmatpush.bf16.msrb.mxu0 %v3924_v27  ;;  %v4155_v22 = vld [vmem:[#allocation6 + $0x180] sm:$0xf]  ;;  %v4131_v27 = vld [vmem:[#allocation6 + $0x148] sm:$0xf]  ;;  %v4061_v63 = vld [vmem:[#allocation6 + $0xe0] sm:$0xf0] }
  0x55   : > { %3799 = vmatmul.msk.bf16.vlgmr.msrb.gmra.mxu3 %vm818_vm0, %v5386_v50  ;;  %v3900_v50 = vor.u32 %v4776_v32, %v3899_v30  ;;  %1252 = vmatpush.bf16.msrb.mxu1 %v3928_v31  ;;  %v4156_v25 = vor.u32 %v4873_v23, %v4155_v22  ;;  %v4862_v30 = vld [vmem:[#allocation6 + $0x14c] sm:$0xf]  ;;  %v4123_v32 = vld [vmem:[#allocation6 + $0x140] sm:$0xf]  ;;  %v4132_v33 = vor.u32 %v4866_v28, %v4131_v27  ;;  %v4067_v54 = vld [vmem:[#allocation6 + $0xc8] sm:$0xf] }
  0x56   : > { %1290 = vmatpush.bf16.msrb.mxu3 %v3936_v26  ;;  %v4157_v26 = vld [vmem:[#allocation6 + $0x1a0] sm:$0xf0]  ;;  %v4133_v31 = vld [vmem:[#allocation6 + $0x168] sm:$0xf0]  ;;  %v4124_v37 = vor.u32 %v4865_v34, %v4123_v32  ;;  %v4064_v1 = vor.u32 %v4845_v62, %v4061_v63  ;;  %v4027_v8 = vld [vmem:[#allocation6 + $0x80] sm:$0xf] }
  0x57   : > { %v4160_v29 = vor.u32 %v4869_v24, %v4157_v26  ;;  %v4136_v36 = vor.u32 %v4862_v30, %v4133_v31  ;;  %v4838_v4 = vld [vmem:[#allocation6 + $0x8c] sm:$0xf]  ;;  %v4841_v9 = vld [vmem:[#allocation6 + $0x9c] sm:$0xf0]  ;;  %v4837_v10 = vld [vmem:[#allocation6 + $0x84] sm:$0xf] }
  0x58   : > { %1272 = vmatpush.bf16.msrb.mxu2 %v3900_v50  ;;  %1234 = vmatpush.bf16.msrb.mxu0 %v3892_v39  ;;  %v4861_v50 = vld [vmem:[#allocation6 + $0x144] sm:$0xf]  ;;  %v4858_v39 = vld [vmem:[#allocation6 + $0x124] sm:$0xf0]  ;;  %v4037_v5 = vld [vmem:[#allocation6 + $0xa8] sm:$0xf0]  ;;  %v4028_v14 = vor.u32 %v4841_v9, %v4027_v8 }
  0x59   : > { %1253 = vmatpush.bf16.msrb.mxu1 %v3896_v42  ;;  %v4854_v42 = vld [vmem:[#allocation6 + $0x10c] sm:$0xf]  ;;  %v4100_v44 = vor.u32 %v4858_v39, %v4099_v38  ;;  %v4834_v13 = vld [vmem:[#allocation6 + $0x64] sm:$0xf0]  ;;  %v3995_v19 = vld [vmem:[#allocation6 + $0x40] sm:$0xf] }
  0x5a   : > { %1291 = vmatpush.bf16.msrb.mxu3 %v3904_v35  ;;  %v4125_v35 = vld [vmem:[#allocation6 + $0x160] sm:$0xf0]  ;;  %v4104_v48 = vor.u32 %v4854_v42, %v4101_v43  ;;  %v4830_v15 = vld [vmem:[#allocation6 + $0x4c] sm:$0xf]  ;;  %v3971_v24 = vld [vmem:[#allocation6 + $0x8] sm:$0xf] }
  0x5b   : > { %v4128_v40 = vor.u32 %v4861_v50, %v4125_v35  ;;  %v3997_v23 = vld [vmem:[#allocation6 + $0x60] sm:$0xf0]  ;;  %v4822_v26 = vld [vmem:[#allocation6 + $0xc] sm:$0xf]  ;;  %v3963_v32 = vld [vmem:[#allocation6] sm:$0xf] }
  0x5c   : > { %1273 = vmatpush.bf16.msrb.mxu2 %v3868_v46  ;;  %1235 = vmatpush.bf16.msrb.mxu0 %v3860_v52  ;;  %v4857_v46 = vld [vmem:[#allocation6 + $0x11c] sm:$0xf0]  ;;  %v3973_v27 = vld [vmem:[#allocation6 + $0x28] sm:$0xf0]  ;;  %v4821_v34 = vld [vmem:[#allocation6 + $0x4] sm:$0xf] }
  0x5d   : > { %1254 = vmatpush.bf16.msrb.mxu1 %v3864_v56  ;;  %v4092_v52 = vor.u32 %v4857_v46, %v4091_v45  ;;  %v4846_v56 = vld [vmem:[#allocation6 + $0xcc] sm:$0xf]  ;;  %v3976_v31 = vor.u32 %v4822_v26, %v3973_v27  ;;  %v3965_v50 = vld [vmem:[#allocation6 + $0x20] sm:$0xf0]  ;;  %v4884_v38 = vld [vmem:[#allocation6 + $0x1f4] sm:$0xf0] }
  0x5e   : > { %1292 = vmatpush.bf16.msrb.mxu3 %v3872_v51  ;;  %v4093_v51 = vld [vmem:[#allocation6 + $0x120] sm:$0xf0]  ;;  %v4880_v39 = vld [vmem:[#allocation6 + $0x1dc] sm:$0xf]  ;;  %v4203_v43 = vld [vmem:[#allocation6 + $0x1d0] sm:$0xf] }
  0x5f   : > { %v4096_v53 = vor.u32 %v4853_v49, %v4093_v51  ;;  %v4213_v42 = vld [vmem:[#allocation6 + $0x1f8] sm:$0xf0]  ;;  %v4205_v49 = vld [vmem:[#allocation6 + $0x1f0] sm:$0xf0]  ;;  %v4868_v63 = vld [vmem:[#allocation6 + $0x174] sm:$0xf0] }
  0x60   : > { %1236 = vmatpush.bf16.msrb.mxu0 %v3828_v0  ;;  %v4035_v0 = vld [vmem:[#allocation6 + $0x88] sm:$0xf]  ;;  %v4216_v45 = vor.u32 %v4880_v39, %v4213_v42  ;;  %v4141_v9 = vld [vmem:[#allocation6 + $0x170] sm:$0xf0]  ;;  %v4085_v27 = vld [vmem:[#allocation6 + $0xf8] sm:$0xf0] }
  0x61   : > { %1255 = vmatpush.bf16.msrb.mxu1 %v3832_v2  ;;  %v4842_v2 = vld [vmem:[#allocation6 + $0xa4] sm:$0xf0]  ;;  %v4043_v39 = vld [vmem:[#allocation6 + $0x90] sm:$0xf] }
  0x62   : > { %3794 = vmatmul.msk.bf16.gmra.mxu0 %vm818_vm0, %v5397_v41  ;;  %1293 = vmatpush.bf16.msrb.mxu3 %v3840_v60  ;;  %v4072_v60 = vor.u32 %v4846_v56, %v4069_v58  ;;  %v4036_v6 = vor.u32 %v4842_v2, %v4035_v0  ;;  %v4181_v56 = vld [vmem:[#allocation6 + $0x1b8] sm:$0xf0]  ;;  %v4875_v58 = vld [vmem:[#allocation6 + $0x1ac] sm:$0xf0] }
  0x63   : > { %3796 = vmatmul.msk.bf16.gmra.mxu1 %vm818_vm0, %v5397_v41  ;;  %3798 = vmatmul.msk.bf16.gmra.mxu2 %vm818_vm0, %v5397_v41  ;;  %v4864_v0 = vld [vmem:[#allocation6 + $0x15c] sm:$0xf] }
  0x65   : > { %3800 = vmatmul.msk.bf16.gmra.mxu3 %vm818_vm0, %v5397_v41  ;;  %v3836_v41 = vor.u32 %v4760_v57, %v3835_v55  ;;  %v4850_v55 = vld [vmem:[#allocation6 + $0xe4] sm:$0xf0] }
  0x66   : > { %v4068_v57 = vor.u32 %v4850_v55, %v4067_v54  ;;  %v4872_v54 = vld [vmem:[#allocation6 + $0x19c] sm:$0xf] }
  0x67   : > { %1274 = vmatpush.bf16.msrb.mxu2 %v3836_v41  ;;  %v4849_v41 = vld [vmem:[#allocation6 + $0xdc] sm:$0xf0] }
  0x68   : > { %v4060_v61 = vor.u32 %v4849_v41, %v4059_v59  ;;  %v4184_v59 = vor.u32 %v4872_v54, %v4181_v56  ;;  %v4871_v41 = vld [vmem:[#allocation6 + $0x194] sm:$0xf]  ;;  %v4011_v54 = vld [vmem:[#allocation6 + $0x50] sm:$0xf] }
  0x69   : > { %v4831_v56 = vld [vmem:[#allocation6 + $0x54] sm:$0xf] }
  0x72   : > { %3937 = vmatmul.msk.bf16.vlgmr.msra.gmra.mxu0 %vm818_vm0, %v5430_v3 }
  0x73   : > { %3939 = vmatmul.msk.bf16.vlgmr.msra.gmra.mxu1 %vm818_vm0, %v5430_v3  ;;  %3941 = vmatmul.msk.bf16.vlgmr.msra.gmra.mxu2 %vm818_vm0, %v5430_v3 }
  0x74   : > { %1743 = vmatpush.bf16.msra.mxu2 %v4196_v7  ;;  %1705 = vmatpush.bf16.msra.mxu0 %v4188_v12  ;;  %v4040_v7 = vor.u32 %v4838_v4, %v4037_v5  ;;  %v4003_v12 = vld [vmem:[#allocation6 + $0x48] sm:$0xf]  ;;  %v4139_v5 = vld [vmem:[#allocation6 + $0x150] sm:$0xf] }
  0x75   : > { %3943 = vmatmul.msk.bf16.vlgmr.msra.gmra.mxu3 %vm818_vm0, %v5430_v3  ;;  %1724 = vmatpush.bf16.msra.mxu1 %v4192_v16  ;;  %v4005_v16 = vld [vmem:[#allocation6 + $0x68] sm:$0xf0]  ;;  %v4004_v18 = vor.u32 %v4834_v13, %v4003_v12  ;;  %v4860_v12 = vld [vmem:[#allocation6 + $0x134] sm:$0xf0]  ;;  %v4856_v13 = vld [vmem:[#allocation6 + $0x11c] sm:$0xf] }
  0x76   : > { %1762 = vmatpush.bf16.msra.mxu3 %v4200_v11  ;;  %v4029_v11 = vld [vmem:[#allocation6 + $0xa0] sm:$0xf0]  ;;  %v4008_v22 = vor.u32 %v4830_v15, %v4005_v16  ;;  %v4117_v15 = vld [vmem:[#allocation6 + $0x138] sm:$0xf0]  ;;  %v4107_v16 = vld [vmem:[#allocation6 + $0x110] sm:$0xf] }
  0x77   : > { %v4032_v17 = vor.u32 %v4837_v10, %v4029_v11  ;;  %v4115_v11 = vld [vmem:[#allocation6 + $0x118] sm:$0xf] }
  0x78   : > { %1744 = vmatpush.bf16.msra.mxu2 %v4164_v20  ;;  %1706 = vmatpush.bf16.msra.mxu0 %v4156_v25  ;;  %v4833_v20 = vld [vmem:[#allocation6 + $0x5c] sm:$0xf0]  ;;  %v4826_v25 = vld [vmem:[#allocation6 + $0x24] sm:$0xf0] }
  0x79   : > { %1725 = vmatpush.bf16.msra.mxu1 %v4160_v29  ;;  %v3996_v28 = vor.u32 %v4833_v20, %v3995_v19  ;;  %v3972_v30 = vor.u32 %v4826_v25, %v3971_v24  ;;  %v4855_v20 = vld [vmem:[#allocation6 + $0x114] sm:$0xf]  ;;  %v4852_v24 = vld [vmem:[#allocation6 + $0xf4] sm:$0xf0]  ;;  %v4848_v25 = vld [vmem:[#allocation6 + $0xdc] sm:$0xf] }
  0x7a   : > { %1763 = vmatpush.bf16.msra.mxu3 %v4168_v21  ;;  %v4829_v21 = vld [vmem:[#allocation6 + $0x44] sm:$0xf] }
  0x7b   : > { %v4000_v29 = vor.u32 %v4829_v21, %v3997_v23  ;;  %v4109_v21 = vld [vmem:[#allocation6 + $0x130] sm:$0xf0]  ;;  %v4083_v23 = vld [vmem:[#allocation6 + $0xd8] sm:$0xf] }
  0x7c   : > { %1745 = vmatpush.bf16.msra.mxu2 %v4132_v33  ;;  %1707 = vmatpush.bf16.msra.mxu0 %v4124_v37  ;;  %v4825_v33 = vld [vmem:[#allocation6 + $0x1c] sm:$0xf0]  ;;  %v4211_v37 = vld [vmem:[#allocation6 + $0x1d8] sm:$0xf]  ;;  %v4084_v26 = vor.u32 %v4852_v24, %v4083_v23  ;;  %v4937_v23 = vld [vmem:[#allocation7 + $0x184] sm:$0xf] }
  0x7d   : > { %1726 = vmatpush.bf16.msra.mxu1 %v4128_v40  ;;  %v3964_v35 = vor.u32 %v4825_v33, %v3963_v32  ;;  %v4212_v40 = vor.u32 %v4884_v38, %v4211_v37  ;;  %v4847_v32 = vld [vmem:[#allocation6 + $0xd4] sm:$0xf]  ;;  %v4053_v38 = vld [vmem:[#allocation6 + $0xb8] sm:$0xf0]  ;;  %v4429_v24 = vld [vmem:[#allocation7 + $0x1a0] sm:$0xf0] }
  0x7e   : > { %1764 = vmatpush.bf16.msra.mxu3 %v4136_v36  ;;  %v3968_v36 = vor.u32 %v4821_v34, %v3965_v50  ;;  %v4077_v33 = vld [vmem:[#allocation6 + $0xf0] sm:$0xf0]  ;;  %v4051_v50 = vld [vmem:[#allocation6 + $0x98] sm:$0xf] }
  0x7f   : > { %v4080_v34 = vor.u32 %v4847_v32, %v4077_v33 }
  0x80   : > { %1746 = vmatpush.bf16.msra.mxu2 %v4100_v44  ;;  %1708 = vmatpush.bf16.msra.mxu0 %v4092_v52  ;;  %v4883_v44 = vld [vmem:[#allocation6 + $0x1ec] sm:$0xf0]  ;;  %v4179_v52 = vld [vmem:[#allocation6 + $0x198] sm:$0xf] }
  0x81   : > { %1727 = vmatpush.bf16.msra.mxu1 %v4096_v53  ;;  %v4204_v46 = vor.u32 %v4883_v44, %v4203_v43  ;;  %v4876_v53 = vld [vmem:[#allocation6 + $0x1b4] sm:$0xf0]  ;;  %v4839_v43 = vld [vmem:[#allocation6 + $0x94] sm:$0xf] }
  0x82   : > { %3938 = vmatmul.msk.bf16.gmra.mxu0 %vm818_vm0, %v5441_v47  ;;  %1765 = vmatpush.bf16.msra.mxu3 %v4104_v48  ;;  %v4879_v48 = vld [vmem:[#allocation6 + $0x1d4] sm:$0xf]  ;;  %v4180_v55 = vor.u32 %v4876_v53, %v4179_v52 }
  0x83   : > { %3940 = vmatmul.msk.bf16.gmra.mxu1 %vm818_vm0, %v5441_v47  ;;  %3942 = vmatmul.msk.bf16.gmra.mxu2 %vm818_vm0, %v5441_v47  ;;  %v4208_v51 = vor.u32 %v4879_v48, %v4205_v49  ;;  %v4045_v44 = vld [vmem:[#allocation6 + $0xb0] sm:$0xf0]  ;;  %v4836_v48 = vld [vmem:[#allocation6 + $0x74] sm:$0xf0]  ;;  %v4832_v49 = vld [vmem:[#allocation6 + $0x5c] sm:$0xf] }
  0x84   : > { %1747 = vmatpush.bf16.msra.mxu2 %v4068_v57  ;;  %1709 = vmatpush.bf16.msra.mxu0 %v4060_v61  ;;  %v4171_v57 = vld [vmem:[#allocation6 + $0x190] sm:$0xf]  ;;  %v4147_v61 = vld [vmem:[#allocation6 + $0x158] sm:$0xf] }
  0x85   : > { %3944 = vmatmul.msk.bf16.gmra.mxu3 %vm818_vm0, %v5441_v47  ;;  %1728 = vmatpush.bf16.msra.mxu1 %v4064_v1  ;;  %v4149_v1 = vld [vmem:[#allocation6 + $0x178] sm:$0xf0]  ;;  %v4148_v2 = vor.u32 %v4868_v63, %v4147_v61 }
  0x86   : > { %1766 = vmatpush.bf16.msra.mxu3 %v4072_v60  ;;  %v4173_v60 = vld [vmem:[#allocation6 + $0x1b0] sm:$0xf0]  ;;  %v4152_v4 = vor.u32 %v4864_v0, %v4149_v1  ;;  %v4824_v61 = vld [vmem:[#allocation6 + $0x1c] sm:$0xf]  ;;  %v3979_v1 = vld [vmem:[#allocation6 + $0x10] sm:$0xf] }
  0x87   : > { %v4176_v62 = vor.u32 %v4871_v41, %v4173_v60  ;;  %v3987_v41 = vld [vmem:[#allocation6 + $0x18] sm:$0xf]  ;;  %v3989_v0 = vld [vmem:[#allocation6 + $0x38] sm:$0xf0] }
  0x88   : > { %1748 = vmatpush.bf16.msra.mxu2 %v4036_v6  ;;  %1710 = vmatpush.bf16.msra.mxu0 %v4028_v14  ;;  %v4867_v6 = vld [vmem:[#allocation6 + $0x16c] sm:$0xf0]  ;;  %v4116_v14 = vor.u32 %v4860_v12, %v4115_v11  ;;  %v4828_v60 = vld [vmem:[#allocation6 + $0x34] sm:$0xf0]  ;;  %v4461_v11 = vld [vmem:[#allocation7 + $0x1e0] sm:$0xf0] }
  0x89   : > { %1729 = vmatpush.bf16.msra.mxu1 %v4032_v17  ;;  %v4140_v8 = vor.u32 %v4867_v6, %v4139_v5  ;;  %v4859_v17 = vld [vmem:[#allocation6 + $0x12c] sm:$0xf0]  ;;  %v3988_v63 = vor.u32 %v4828_v60, %v3987_v41  ;;  %v3992_v5 = vor.u32 %v4824_v61, %v3989_v0  ;;  %v5009_v12 = vld [vmem:[#allocation7 + $0x3c4] sm:$0xf]  ;;  %v4363_v41 = vld [vmem:[#allocation7 + $0x100] sm:$0xf] }
  0x8a   : > { %1767 = vmatpush.bf16.msra.mxu3 %v4040_v7  ;;  %v4863_v7 = vld [vmem:[#allocation6 + $0x154] sm:$0xf]  ;;  %v4108_v19 = vor.u32 %v4859_v17, %v4107_v16  ;;  %v4949_v16 = vld [vmem:[#allocation7 + $0x1dc] sm:$0xf0] }
  0x8b   : > { %v4144_v10 = vor.u32 %v4863_v7, %v4141_v9  ;;  %v4823_v7 = vld [vmem:[#allocation6 + $0x14] sm:$0xf]  ;;  %v4925_v60 = vld [vmem:[#allocation7 + $0x11c] sm:$0xf0] }
  0x8c   : > { %1749 = vmatpush.bf16.msra.mxu2 %v4004_v18  ;;  %1711 = vmatpush.bf16.msra.mxu0 %v3996_v28  ;;  %v4120_v18 = vor.u32 %v4856_v13, %v4117_v15  ;;  %v4075_v28 = vld [vmem:[#allocation6 + $0xd0] sm:$0xf]  ;;  %v4459_v15 = vld [vmem:[#allocation7 + $0x1c0] sm:$0xf]  ;;  %v4364_v0 = vor.u32 %v4925_v60, %v4363_v41 }
  0x8d   : > { %1730 = vmatpush.bf16.msra.mxu1 %v4000_v29  ;;  %v4851_v29 = vld [vmem:[#allocation6 + $0xec] sm:$0xf0] }
  0x8e   : > { %1768 = vmatpush.bf16.msra.mxu3 %v4008_v22  ;;  %v4112_v22 = vor.u32 %v4855_v20, %v4109_v21  ;;  %v5013_v20 = vld [vmem:[#allocation7 + $0x3dc] sm:$0xf0] }
  0x90   : > { %1750 = vmatpush.bf16.msra.mxu2 %v3972_v30  ;;  %1712 = vmatpush.bf16.msra.mxu0 %v3964_v35  ;;  %v4088_v30 = vor.u32 %v4848_v25, %v4085_v27  ;;  %v4844_v35 = vld [vmem:[#allocation6 + $0xb4] sm:$0xf0]  ;;  %v5001_v25 = vld [vmem:[#allocation7 + $0x384] sm:$0xf] }
  0x91   : > { %1731 = vmatpush.bf16.msra.mxu1 %v3968_v36  ;;  %v4840_v36 = vld [vmem:[#allocation6 + $0x9c] sm:$0xf]  ;;  %v4052_v37 = vor.u32 %v4844_v35, %v4051_v50  ;;  %v4683_v50 = vld [vmem:[#allocation7 + $0x380] sm:$0xf] }
  0x92   : > { %3945 = vmatmul.msk.bf16.vlgmr.msrb.gmra.mxu0 %vm818_vm0, %v5430_v3  ;;  %1769 = vmatpush.bf16.msra.mxu3 %v3976_v31  ;;  %v4076_v31 = vor.u32 %v4851_v29, %v4075_v28  ;;  %v4056_v42 = vor.u32 %v4840_v36, %v4053_v38  ;;  %v4432_v28 = vor.u32 %v4937_v23, %v4429_v24  ;;  %v4685_v29 = vld [vmem:[#allocation7 + $0x3a0] sm:$0xf0]  ;;  %v5005_v35 = vld [vmem:[#allocation7 + $0x39c] sm:$0xf0] }
  0x93   : > { %3947 = vmatmul.msk.bf16.vlgmr.msrb.gmra.mxu1 %vm818_vm0, %v5430_v3  ;;  %3949 = vmatmul.msk.bf16.vlgmr.msrb.gmra.mxu2 %vm818_vm0, %v5430_v3  ;;  %v4688_v33 = vor.u32 %v5001_v25, %v4685_v29  ;;  %v4929_v36 = vld [vmem:[#allocation7 + $0x144] sm:$0xf]  ;;  %v4299_v29 = vld [vmem:[#allocation7 + $0x80] sm:$0xf] }
  0x94   : > { %1819 = vmatpush.bf16.msrb.mxu2 %v4212_v40  ;;  %1781 = vmatpush.bf16.msrb.mxu0 %v4204_v46  ;;  %v4843_v40 = vld [vmem:[#allocation6 + $0xac] sm:$0xf0]  ;;  %v4048_v46 = vor.u32 %v4839_v43, %v4045_v44  ;;  %v4397_v38 = vld [vmem:[#allocation7 + $0x160] sm:$0xf0]  ;;  %v4395_v43 = vld [vmem:[#allocation7 + $0x140] sm:$0xf] }
  0x95   : > { %3951 = vmatmul.msk.bf16.vlgmr.msrb.gmra.mxu3 %vm818_vm0, %v5430_v3  ;;  %1800 = vmatpush.bf16.msrb.mxu1 %v4208_v51  ;;  %v4172_v3 = vor.u32 %v4875_v58, %v4171_v57  ;;  %v4021_v51 = vld [vmem:[#allocation6 + $0x78] sm:$0xf0]  ;;  %v4013_v57 = vld [vmem:[#allocation6 + $0x70] sm:$0xf0]  ;;  %v4933_v44 = vld [vmem:[#allocation7 + $0x15c] sm:$0xf0] }
  0x96   : > { %1838 = vmatpush.bf16.msrb.mxu3 %v4216_v45  ;;  %v4019_v45 = vld [vmem:[#allocation6 + $0x58] sm:$0xf]  ;;  %v4024_v53 = vor.u32 %v4832_v49, %v4021_v51  ;;  %v5493_v51 = vld [vmem:[%s5471_s12 + $0x8] sm:$0xff] }
  0x97   : > { %v4020_v52 = vor.u32 %v4836_v48, %v4019_v45  ;;  %v4651_v45 = vld [vmem:[#allocation7 + $0x340] sm:$0xf] }
  0x98   : > { %1820 = vmatpush.bf16.msrb.mxu2 %v4180_v55  ;;  %1782 = vmatpush.bf16.msrb.mxu0 %v4172_v3  ;;  %v4835_v55 = vld [vmem:[#allocation6 + $0x6c] sm:$0xf0]  ;;  %v4016_v3 = vor.u32 %v4831_v56, %v4013_v57  ;;  %v4997_v48 = vld [vmem:[#allocation7 + $0x35c] sm:$0xf0] }
  0x99   : > { %1801 = vmatpush.bf16.msrb.mxu1 %v4176_v62  ;;  %v4012_v58 = vor.u32 %v4835_v55, %v4011_v54  ;;  %v4652_v49 = vor.u32 %v4997_v48, %v4651_v45  ;;  %v4365_v54 = vld [vmem:[#allocation7 + $0x120] sm:$0xf0]  ;;  %v4523_v45 = vld [vmem:[#allocation7 + $0x240] sm:$0xf] }
  0x9a   : > { %1839 = vmatpush.bf16.msrb.mxu3 %v4184_v59  ;;  %v5474_v59 = vld [vmem:[%s5471_s12] sm:$0xff] }
  0x9b   : > { %v4985_v55 = vld [vmem:[#allocation7 + $0x304] sm:$0xf] }
  0x9c   : > { %1821 = vmatpush.bf16.msrb.mxu2 %v4148_v2  ;;  %1783 = vmatpush.bf16.msrb.mxu0 %v4140_v8  ;;  %v4827_v2 = vld [vmem:[#allocation6 + $0x2c] sm:$0xf0]  ;;  %v3981_v8 = vld [vmem:[#allocation6 + $0x30] sm:$0xf0] }
  0x9d   : > { %1802 = vmatpush.bf16.msrb.mxu1 %v4144_v10  ;;  %v3980_v6 = vor.u32 %v4827_v2, %v3979_v1  ;;  %v3984_v9 = vor.u32 %v4823_v7, %v3981_v8  ;;  %v4945_v10 = vld [vmem:[#allocation7 + $0x1c4] sm:$0xf]  ;;  %v4619_v1 = vld [vmem:[#allocation7 + $0x300] sm:$0xf] }
  0x9e   : > { %1840 = vmatpush.bf16.msrb.mxu3 %v4152_v4  ;;  %v4464_v13 = vor.u32 %v4945_v10, %v4461_v11  ;;  %v4989_v2 = vld [vmem:[#allocation7 + $0x31c] sm:$0xf0]  ;;  %v4333_v7 = vld [vmem:[#allocation7 + $0xe0] sm:$0xf0] }
  0x9f   : > { %v4977_v8 = vld [vmem:[#allocation7 + $0x2c4] sm:$0xf]  ;;  %v4331_v11 = vld [vmem:[#allocation7 + $0xc0] sm:$0xf] }
  0xa0   : > { %1822 = vmatpush.bf16.msrb.mxu2 %v4116_v14  ;;  %1784 = vmatpush.bf16.msrb.mxu0 %v4108_v19  ;;  %v4717_v14 = vld [vmem:[#allocation7 + $0x3e0] sm:$0xf0]  ;;  %v4715_v19 = vld [vmem:[#allocation7 + $0x3c0] sm:$0xf] }
  0xa1   : > { %1803 = vmatpush.bf16.msrb.mxu1 %v4112_v22  ;;  %v4720_v17 = vor.u32 %v5009_v12, %v4717_v14  ;;  %v4716_v21 = vor.u32 %v5013_v20, %v4715_v19  ;;  %v4589_v10 = vld [vmem:[#allocation7 + $0x2e0] sm:$0xf0]  ;;  %v4917_v12 = vld [vmem:[#allocation7 + $0xdc] sm:$0xf0] }
  0xa2   : > { %3946 = vmatmul.msk.bf16.gmra.mxu0 %vm818_vm0, %v5441_v47  ;;  %1841 = vmatpush.bf16.msrb.mxu3 %v4120_v18  ;;  %v4460_v18 = vor.u32 %v4949_v16, %v4459_v15  ;;  %v4332_v14 = vor.u32 %v4917_v12, %v4331_v11  ;;  %v4587_v15 = vld [vmem:[#allocation7 + $0x2c0] sm:$0xf]  ;;  %v4905_v19 = vld [vmem:[#allocation7 + $0x84] sm:$0xf]  ;;  %v4469_v11 = vld [vmem:[#allocation7 + $0x1e8] sm:$0xf0] }
  0xa3   : > { %3948 = vmatmul.msk.bf16.gmra.mxu1 %vm818_vm0, %v5441_v47  ;;  %3950 = vmatmul.msk.bf16.gmra.mxu2 %vm818_vm0, %v5441_v47  ;;  %v4981_v16 = vld [vmem:[#allocation7 + $0x2dc] sm:$0xf0]  ;;  %v4301_v20 = vld [vmem:[#allocation7 + $0xa0] sm:$0xf0] }
  0xa4   : > { %1823 = vmatpush.bf16.msrb.mxu2 %v4084_v26  ;;  %1785 = vmatpush.bf16.msrb.mxu0 %v4076_v31  ;;  %v4941_v31 = vld [vmem:[#allocation7 + $0x19c] sm:$0xf0]  ;;  %v4304_v25 = vor.u32 %v4905_v19, %v4301_v20  ;;  %v4723_v19 = vld [vmem:[#allocation7 + $0x3c8] sm:$0xf] }
  0xa5   : > { %3952 = vmatmul.msk.bf16.gmra.mxu3 %vm818_vm0, %v5441_v47  ;;  %v4044_v47 = vor.u32 %v4843_v40, %v4043_v39  ;;  %1804 = vmatpush.bf16.msrb.mxu1 %v4080_v34  ;;  %v4993_v39 = vld [vmem:[#allocation7 + $0x344] sm:$0xf]  ;;  %v5014_v20 = vld [vmem:[#allocation7 + $0x3e4] sm:$0xf0] }
  0xa6   : > { %1842 = vmatpush.bf16.msrb.mxu3 %v4088_v30  ;;  %v4427_v30 = vld [vmem:[#allocation7 + $0x180] sm:$0xf]  ;;  %v4653_v40 = vld [vmem:[#allocation7 + $0x360] sm:$0xf0] }
  0xa7   : > { %v4428_v34 = vor.u32 %v4941_v31, %v4427_v30  ;;  %v4909_v30 = vld [vmem:[#allocation7 + $0x9c] sm:$0xf0] }
  0xa8   : > { %1824 = vmatpush.bf16.msrb.mxu2 %v4052_v37  ;;  %1786 = vmatpush.bf16.msrb.mxu0 %v4044_v47  ;;  %v4684_v37 = vor.u32 %v5005_v35, %v4683_v50  ;;  %v4656_v47 = vor.u32 %v4993_v39, %v4653_v40  ;;  %v4555_v50 = vld [vmem:[#allocation7 + $0x280] sm:$0xf]  ;;  %v4961_v39 = vld [vmem:[#allocation7 + $0x244] sm:$0xf] }
  0xa9   : > { %1805 = vmatpush.bf16.msrb.mxu1 %v4048_v46  ;;  %v4396_v46 = vor.u32 %v4933_v44, %v4395_v43  ;;  %v4973_v35 = vld [vmem:[#allocation7 + $0x29c] sm:$0xf0]  ;;  %v4525_v40 = vld [vmem:[#allocation7 + $0x260] sm:$0xf0] }
  0xaa   : > { %1843 = vmatpush.bf16.msrb.mxu3 %v4056_v42  ;;  %v4400_v42 = vor.u32 %v4929_v36, %v4397_v38  ;;  %v4897_v36 = vld [vmem:[#allocation7 + $0x44] sm:$0xf]  ;;  %v4267_v43 = vld [vmem:[#allocation7 + $0x40] sm:$0xf] }
  0xab   : > { %v4269_v38 = vld [vmem:[#allocation7 + $0x60] sm:$0xf0]  ;;  %v4901_v44 = vld [vmem:[#allocation7 + $0x5c] sm:$0xf0] }
  0xac   : > { %1825 = vmatpush.bf16.msrb.mxu2 %v4020_v52  ;;  %1787 = vmatpush.bf16.msrb.mxu0 %v4012_v58  ;;  %v4268_v48 = vor.u32 %v4901_v44, %v4267_v43  ;;  %v4930_v44 = vld [vmem:[#allocation7 + $0x14c] sm:$0xf] }
  0xad   : > { %1806 = vmatpush.bf16.msrb.mxu1 %v4016_v3  ;;  %v4621_v3 = vld [vmem:[#allocation7 + $0x320] sm:$0xf0] }
  0xae   : > { %1844 = vmatpush.bf16.msrb.mxu3 %v4024_v53  ;;  %v4921_v53 = vld [vmem:[#allocation7 + $0x104] sm:$0xf] }
  0xaf   : > { %v5476_v62 = vpop.f32.mrf.mxu0  ;;  %v4368_v58 = vor.u32 %v4921_v53, %v4365_v54  ;;  %v4889_v54 = vld [vmem:[#allocation7 + $0x4] sm:$0xf] }
  0xb0   : > { %v5478_v4 = vpop.f32.mrf.mxu1  ;;  %1826 = vmatpush.bf16.msrb.mxu2 %v3988_v63  ;;  %1788 = vmatpush.bf16.msrb.mxu0 %v3980_v6  ;;  %v4624_v63 = vor.u32 %v4985_v55, %v4621_v3  ;;  %v4913_v6 = vld [vmem:[#allocation7 + $0xc4] sm:$0xf] }
  0xb1   : > { %1807 = vmatpush.bf16.msrb.mxu1 %v3984_v9  ;;  %v4336_v9 = vor.u32 %v4913_v6, %v4333_v7  ;;  %v4237_v55 = vld [vmem:[#allocation7 + $0x20] sm:$0xf0]  ;;  %v4491_v7 = vld [vmem:[#allocation7 + $0x200] sm:$0xf] }
  0xb2   : > { %1713 = vmatmul.bf16.vlgmr.msra.gmra.mxu0 %v5474_v59  ;;  %1845 = vmatpush.bf16.msrb.mxu3 %v3992_v5  ;;  %v4620_v5 = vor.u32 %v4989_v2, %v4619_v1  ;;  %v4240_v60 = vor.u32 %v4889_v54, %v4237_v55  ;;  %v4893_v1 = vld [vmem:[#allocation7 + $0x1c] sm:$0xf0]  ;;  %v4403_v54 = vld [vmem:[#allocation7 + $0x148] sm:$0xf] }
  0xb3   : > { %1732 = vmatmul.bf16.vlgmr.msra.gmra.mxu1 %v5474_v59  ;;  %1751 = vmatmul.bf16.vlgmr.msra.gmra.mxu2 %v5474_v59  ;;  %v4934_v55 = vld [vmem:[#allocation7 + $0x164] sm:$0xf0] }
  0xb4   : > { %2719 = vmatpush.bf16.msra.mxu2 %v4464_v13  ;;  %2681 = vmatpush.bf16.msra.mxu0 %v4460_v18  ;;  %v4592_v13 = vor.u32 %v4977_v8, %v4589_v10  ;;  %v4957_v8 = vld [vmem:[#allocation7 + $0x21c] sm:$0xf0]  ;;  %v4946_v10 = vld [vmem:[#allocation7 + $0x1cc] sm:$0xf] }
  0xb5   : > { %1770 = vmatmul.bf16.vlgmr.msra.gmra.mxu3 %v5474_v59  ;;  %2700 = vmatpush.bf16.msra.mxu1 %v4716_v21  ;;  %v4969_v21 = vld [vmem:[#allocation7 + $0x284] sm:$0xf]  ;;  %v4472_v12 = vor.u32 %v4946_v10, %v4469_v11 }
  0xb6   : > { %v5484_v22 = vpop.f32.mrf.mxu2  ;;  %2738 = vmatpush.bf16.msra.mxu3 %v4720_v17  ;;  %v4588_v17 = vor.u32 %v4981_v16, %v4587_v15  ;;  %v4467_v15 = vld [vmem:[#allocation7 + $0x1c8] sm:$0xf] }
  0xb7   : > { %v5488_v27 = vpop.f32.mrf.mxu0 }
  0xb8   : > { %v5486_v26 = vpop.f32.mrf.mxu3  ;;  %v5490_v32 = vpop.f32.mrf.mxu1  ;;  %2720 = vmatpush.bf16.msra.mxu2 %v4432_v28  ;;  %2682 = vmatpush.bf16.msra.mxu0 %v4428_v34  ;;  %v4557_v28 = vld [vmem:[#allocation7 + $0x2a0] sm:$0xf0]  ;;  %v4300_v34 = vor.u32 %v4909_v30, %v4299_v29  ;;  %v4938_v29 = vld [vmem:[#allocation7 + $0x18c] sm:$0xf] }
  0xb9   : > { %2701 = vmatpush.bf16.msra.mxu1 %v4684_v37  ;;  %v4556_v37 = vor.u32 %v4973_v35, %v4555_v50  ;;  %v4437_v30 = vld [vmem:[#allocation7 + $0x1a8] sm:$0xf0] }
  0xba   : > { %2739 = vmatpush.bf16.msra.mxu3 %v4688_v33  ;;  %v4560_v33 = vor.u32 %v4969_v21, %v4557_v28  ;;  %v4693_v35 = vld [vmem:[#allocation7 + $0x3a8] sm:$0xf0] }
  0xbc   : > { %2721 = vmatpush.bf16.msra.mxu2 %v4400_v42  ;;  %2683 = vmatpush.bf16.msra.mxu0 %v4396_v46  ;;  %v4272_v42 = vor.u32 %v4897_v36, %v4269_v38  ;;  %v4965_v46 = vld [vmem:[#allocation7 + $0x25c] sm:$0xf0]  ;;  %v4435_v36 = vld [vmem:[#allocation7 + $0x188] sm:$0xf] }
  0xbd   : > { %2702 = vmatpush.bf16.msra.mxu1 %v4652_v49  ;;  %v4524_v49 = vor.u32 %v4965_v46, %v4523_v45  ;;  %v4405_v45 = vld [vmem:[#allocation7 + $0x168] sm:$0xf0] }
  0xbe   : > { %v5495_v52 = vpop.f32.mrf.mxu2  ;;  %2740 = vmatpush.bf16.msra.mxu3 %v4656_v47  ;;  %v4528_v47 = vor.u32 %v4961_v39, %v4525_v40  ;;  %v4994_v46 = vld [vmem:[#allocation7 + $0x34c] sm:$0xf] }
  0xbf   : > { %v5499_v57 = vpop.f32.mrf.mxu0 }
  0xc0   : > { %v5497_v56 = vpop.f32.mrf.mxu3  ;;  %v5501_v61 = vpop.f32.mrf.mxu1  ;;  %2722 = vmatpush.bf16.msra.mxu2 %v4368_v58  ;;  %2684 = vmatpush.bf16.msra.mxu0 %v4364_v0  ;;  %v4953_v58 = vld [vmem:[#allocation7 + $0x204] sm:$0xf]  ;;  %v4235_v0 = vld [vmem:[#allocation7] sm:$0xf] }
  0xc1   : > { %2703 = vmatpush.bf16.msra.mxu1 %v4620_v5  ;;  %v4236_v6 = vor.u32 %v4893_v1, %v4235_v0  ;;  %v4998_v0 = vld [vmem:[#allocation7 + $0x364] sm:$0xf0] }
  0xc2   : > { %1718 = vmatmul.bf16.gmra.mxu0 %v5493_v51  ;;  %2741 = vmatpush.bf16.msra.mxu3 %v4624_v63  ;;  %v4493_v63 = vld [vmem:[#allocation7 + $0x220] sm:$0xf0] }
  0xc3   : > { %1737 = vmatmul.bf16.gmra.mxu1 %v5493_v51  ;;  %1756 = vmatmul.bf16.gmra.mxu2 %v5493_v51  ;;  %v4496_v5 = vor.u32 %v4953_v58, %v4493_v63  ;;  %v4659_v63 = vld [vmem:[#allocation7 + $0x348] sm:$0xf] }
  0xc4   : > { %2723 = vmatpush.bf16.msra.mxu2 %v4336_v9  ;;  %2685 = vmatpush.bf16.msra.mxu0 %v4332_v14  ;;  %v4492_v9 = vor.u32 %v4957_v8, %v4491_v7  ;;  %v4725_v14 = vld [vmem:[#allocation7 + $0x3e8] sm:$0xf0]  ;;  %v4660_v1 = vor.u32 %v4998_v0, %v4659_v63 }
  0xc5   : > { %1775 = vmatmul.bf16.gmra.mxu3 %v5493_v51  ;;  %2704 = vmatpush.bf16.msra.mxu1 %v4588_v17  ;;  %v4950_v17 = vld [vmem:[#allocation7 + $0x1e4] sm:$0xf0]  ;;  %v4373_v7 = vld [vmem:[#allocation7 + $0x128] sm:$0xf0] }
  0xc6   : > { %v5507_v18 = vpop.f32.mrf.mxu2  ;;  %2742 = vmatpush.bf16.msra.mxu3 %v4592_v13  ;;  %v5010_v13 = vld [vmem:[#allocation7 + $0x3cc] sm:$0xf]  ;;  %v4468_v21 = vor.u32 %v4950_v17, %v4467_v15 }
  0xc7   : > { %v5511_v24 = vpop.f32.mrf.mxu0  ;;  %v4728_v16 = vor.u32 %v5010_v13, %v4725_v14  ;;  %v4986_v8 = vld [vmem:[#allocation7 + $0x30c] sm:$0xf]  ;;  %v4371_v13 = vld [vmem:[#allocation7 + $0x108] sm:$0xf] }
  0xc8   : > { %v5509_v23 = vpop.f32.mrf.mxu3  ;;  %v5513_v31 = vpop.f32.mrf.mxu1  ;;  %2724 = vmatpush.bf16.msra.mxu2 %v4304_v25  ;;  %2686 = vmatpush.bf16.msra.mxu0 %v4300_v34  ;;  %v4724_v25 = vor.u32 %v5014_v20, %v4723_v19  ;;  %v4926_v14 = vld [vmem:[#allocation7 + $0x124] sm:$0xf0] }
  0xc9   : > { %2705 = vmatpush.bf16.msra.mxu1 %v4556_v37  ;;  %v4942_v37 = vld [vmem:[#allocation7 + $0x1a4] sm:$0xf0]  ;;  %v4372_v17 = vor.u32 %v4926_v14, %v4371_v13  ;;  %v4962_v13 = vld [vmem:[#allocation7 + $0x24c] sm:$0xf] }
  0xca   : > { %2743 = vmatpush.bf16.msra.mxu3 %v4560_v33  ;;  %v5002_v33 = vld [vmem:[#allocation7 + $0x38c] sm:$0xf]  ;;  %v4436_v40 = vor.u32 %v4942_v37, %v4435_v36  ;;  %v4627_v19 = vld [vmem:[#allocation7 + $0x308] sm:$0xf] }
  0xcb   : > { %v4696_v39 = vor.u32 %v5002_v33, %v4693_v35  ;;  %v4990_v20 = vld [vmem:[#allocation7 + $0x324] sm:$0xf0]  ;;  %v4978_v33 = vld [vmem:[#allocation7 + $0x2cc] sm:$0xf] }
  0xcc   : > { %2725 = vmatpush.bf16.msra.mxu2 %v4272_v42  ;;  %2687 = vmatpush.bf16.msra.mxu0 %v4268_v48  ;;  %v4691_v42 = vld [vmem:[#allocation7 + $0x388] sm:$0xf]  ;;  %v4408_v48 = vor.u32 %v4930_v44, %v4405_v45  ;;  %v4906_v44 = vld [vmem:[#allocation7 + $0x8c] sm:$0xf] }
  0xcd   : > { %2706 = vmatpush.bf16.msra.mxu1 %v4524_v49  ;;  %v4661_v49 = vld [vmem:[#allocation7 + $0x368] sm:$0xf0]  ;;  %v4339_v35 = vld [vmem:[#allocation7 + $0xc8] sm:$0xf] }
  0xce   : > { %v5515_v53 = vpop.f32.mrf.mxu2  ;;  %2744 = vmatpush.bf16.msra.mxu3 %v4528_v47  ;;  %v5006_v47 = vld [vmem:[#allocation7 + $0x3a4] sm:$0xf0]  ;;  %v4664_v58 = vor.u32 %v4994_v46, %v4661_v49  ;;  %v4970_v45 = vld [vmem:[#allocation7 + $0x28c] sm:$0xf] }
  0xcf   : > { %v5519_v41 = vpop.f32.mrf.mxu0  ;;  %v4692_v43 = vor.u32 %v5006_v47, %v4691_v42  ;;  %v4918_v37 = vld [vmem:[#allocation7 + $0xe4] sm:$0xf0] }
  0xd0   : > { %v5517_v3 = vpop.f32.mrf.mxu3  ;;  %v5521_v2 = vpop.f32.mrf.mxu1  ;;  %2726 = vmatpush.bf16.msra.mxu2 %v4240_v60  ;;  %2688 = vmatpush.bf16.msra.mxu0 %v4236_v6  ;;  %v4404_v60 = vor.u32 %v4934_v55, %v4403_v54  ;;  %v4922_v6 = vld [vmem:[#allocation7 + $0x10c] sm:$0xf]  ;;  %v4340_v42 = vor.u32 %v4918_v37, %v4339_v35  ;;  %v4307_v55 = vld [vmem:[#allocation7 + $0x88] sm:$0xf] }
  0xd1   : > { %2707 = vmatpush.bf16.msra.mxu1 %v4492_v9  ;;  %v4376_v11 = vor.u32 %v4922_v6, %v4373_v7  ;;  %v4565_v54 = vld [vmem:[#allocation7 + $0x2a8] sm:$0xf0]  ;;  %v4974_v6 = vld [vmem:[#allocation7 + $0x2a4] sm:$0xf0]  ;;  %v4219_v7 = vld [vmem:[%s5551_s22] sm:$0xf] }
  0xd2   : > { %1789 = vmatmul.bf16.vlgmr.msrb.gmra.mxu0 %v5474_v59  ;;  %2745 = vmatpush.bf16.msra.mxu3 %v4496_v5  ;;  %v4568_v63 = vor.u32 %v4970_v45, %v4565_v54  ;;  %v4243_v54 = vld [vmem:[#allocation7 + $0x8] sm:$0xf] }
  0xd3   : > { %1808 = vmatmul.bf16.vlgmr.msrb.gmra.mxu1 %v5474_v59  ;;  %1827 = vmatmul.bf16.vlgmr.msrb.gmra.mxu2 %v5474_v59 }
  0xd4   : > { %2795 = vmatpush.bf16.msrb.mxu2 %v4472_v12  ;;  %2757 = vmatpush.bf16.msrb.mxu0 %v4468_v21  ;;  %v4629_v12 = vld [vmem:[#allocation7 + $0x328] sm:$0xf0]  ;;  %v4628_v21 = vor.u32 %v4990_v20, %v4627_v19  ;;  %v4902_v19 = vld [vmem:[#allocation7 + $0x64] sm:$0xf0] }
  0xd5   : > { %1846 = vmatmul.bf16.vlgmr.msrb.gmra.mxu3 %v5474_v59  ;;  %2776 = vmatpush.bf16.msrb.mxu1 %v4724_v25  ;;  %v4440_v59 = vor.u32 %v4938_v29, %v4437_v30  ;;  %v4914_v25 = vld [vmem:[#allocation7 + $0xcc] sm:$0xf]  ;;  %v4886_v20 = vld [vmem:[%s5551_s22 + $0x4] sm:$0xf0] }
  0xd6   : > { %v5527_v28 = vpop.f32.mrf.mxu2  ;;  %2814 = vmatpush.bf16.msrb.mxu3 %v4728_v16  ;;  %v4632_v16 = vor.u32 %v4986_v8, %v4629_v12  ;;  %v4341_v29 = vld [vmem:[#allocation7 + $0xe8] sm:$0xf0]  ;;  %v5567_v37 = vor.u32 %v4886_v20, %v4219_v7  ;;  %v4958_v7 = vld [vmem:[#allocation7 + $0x224] sm:$0xf0] }
  0xd7   : > { %v5531_v50 = vpop.f32.mrf.mxu0  ;;  %v4344_v30 = vor.u32 %v4914_v25, %v4341_v29  ;;  %v4277_v12 = vld [vmem:[#allocation7 + $0x68] sm:$0xf0]  ;;  %v4531_v25 = vld [vmem:[#allocation7 + $0x248] sm:$0xf] }
  0xd8   : > { %v5529_v34 = vpop.f32.mrf.mxu3  ;;  %v5533_v38 = vpop.f32.mrf.mxu1  ;;  %2796 = vmatpush.bf16.msrb.mxu2 %v4440_v59  ;;  %2758 = vmatpush.bf16.msrb.mxu0 %v4436_v40  ;;  %v4597_v59 = vld [vmem:[#allocation7 + $0x2e8] sm:$0xf0]  ;;  %v4982_v40 = vld [vmem:[#allocation7 + $0x2e4] sm:$0xf0] }
  0xd9   : > { %2777 = vmatpush.bf16.msrb.mxu1 %v4692_v43  ;;  %v4600_v36 = vor.u32 %v4978_v33, %v4597_v59  ;;  %v4966_v29 = vld [vmem:[#allocation7 + $0x264] sm:$0xf0]  ;;  %v4221_v33 = vld [vmem:[%s5551_s22 + $0x8] sm:$0xf0] }
  0xda   : > { %2815 = vmatpush.bf16.msrb.mxu3 %v4696_v39  ;;  %v4595_v39 = vld [vmem:[#allocation7 + $0x2c8] sm:$0xf]  ;;  %v4532_v35 = vor.u32 %v4966_v29, %v4531_v25  ;;  %v5015_v25 = vld [vmem:[#allocation7 + $0x3ec] sm:$0xf0] }
  0xdb   : > { %v4596_v47 = vor.u32 %v4982_v40, %v4595_v39  ;;  %v4890_v39 = vld [vmem:[#allocation7 + $0xc] sm:$0xf] }
  0xdc   : > { %2797 = vmatpush.bf16.msrb.mxu2 %v4408_v48  ;;  %2759 = vmatpush.bf16.msrb.mxu0 %v4404_v60  ;;  %v4245_v40 = vld [vmem:[#allocation7 + $0x28] sm:$0xf0] }
  0xdd   : > { %2778 = vmatpush.bf16.msrb.mxu1 %v4660_v1  ;;  %v4563_v1 = vld [vmem:[#allocation7 + $0x288] sm:$0xf]  ;;  %v4248_v45 = vor.u32 %v4890_v39, %v4245_v40 }
  0xde   : > { %v5535_v5 = vpop.f32.mrf.mxu2  ;;  %2816 = vmatpush.bf16.msrb.mxu3 %v4664_v58  ;;  %v4910_v58 = vld [vmem:[#allocation7 + $0xa4] sm:$0xf0]  ;;  %v4564_v8 = vor.u32 %v4974_v6, %v4563_v1 }
  0xdf   : > { %v5539_v10 = vpop.f32.mrf.mxu0  ;;  %v4308_v0 = vor.u32 %v4910_v58, %v4307_v55  ;;  %v4894_v55 = vld [vmem:[#allocation7 + $0x24] sm:$0xf0] }
  0xe0   : > { %v5537_v9 = vpop.f32.mrf.mxu3  ;;  %v5541_v15 = vpop.f32.mrf.mxu1  ;;  %2798 = vmatpush.bf16.msrb.mxu2 %v4376_v11  ;;  %2760 = vmatpush.bf16.msrb.mxu0 %v4372_v17  ;;  %v4898_v11 = vld [vmem:[#allocation7 + $0x4c] sm:$0xf]  ;;  %v4275_v17 = vld [vmem:[#allocation7 + $0x48] sm:$0xf]  ;;  %v4244_v1 = vor.u32 %v4894_v55, %v4243_v54  ;;  %v4943_v54 = vld [vmem:[#allocation7 + $0x1ac] sm:$0xf0] }
  0xe1   : > { %2779 = vmatpush.bf16.msrb.mxu1 %v4628_v21  ;;  %v4280_v14 = vor.u32 %v4898_v11, %v4277_v12  ;;  %v4276_v59 = vor.u32 %v4902_v19, %v4275_v17  ;;  %v4499_v6 = vld [vmem:[#allocation7 + $0x208] sm:$0xf]  ;;  %v4947_v12 = vld [vmem:[#allocation7 + $0x1d4] sm:$0xf]  ;;  %v4475_v17 = vld [vmem:[#allocation7 + $0x1d0] sm:$0xf] }
  0xe2   : > { %1794 = vmatmul.bf16.gmra.mxu0 %v5493_v51  ;;  %2817 = vmatpush.bf16.msrb.mxu3 %v4632_v16  ;;  %v4533_v16 = vld [vmem:[#allocation7 + $0x268] sm:$0xf0]  ;;  %v4500_v11 = vor.u32 %v4958_v7, %v4499_v6  ;;  %v4951_v19 = vld [vmem:[#allocation7 + $0x1ec] sm:$0xf0] }
  0xe3   : > { %1813 = vmatmul.bf16.gmra.mxu1 %v5493_v51  ;;  %1832 = vmatmul.bf16.gmra.mxu2 %v5493_v51  ;;  %v4536_v21 = vor.u32 %v4962_v13, %v4533_v16  ;;  %v4477_v13 = vld [vmem:[#allocation7 + $0x1f0] sm:$0xf0]  ;;  %v4476_v20 = vor.u32 %v4951_v19, %v4475_v17  ;;  %v5007_v7 = vld [vmem:[#allocation7 + $0x3ac] sm:$0xf0] }
  0xe4   : > { %2799 = vmatpush.bf16.msrb.mxu2 %v4344_v30  ;;  %2761 = vmatpush.bf16.msrb.mxu0 %v4340_v42  ;;  %v4885_v30 = vld [vmem:[%s5551_s22 + $0x4] sm:$0xf]  ;;  %v4954_v42 = vld [vmem:[#allocation7 + $0x20c] sm:$0xf]  ;;  %v4733_v16 = vld [vmem:[#allocation7 + $0x3f0] sm:$0xf0] }
  0xe5   : > { %1851 = vmatmul.bf16.gmra.mxu3 %v5493_v51  ;;  %v4309_v51 = vld [vmem:[#allocation7 + $0xa8] sm:$0xf0]  ;;  %2780 = vmatpush.bf16.msrb.mxu1 %v4596_v47  ;;  %v4411_v17 = vld [vmem:[#allocation7 + $0x150] sm:$0xf] }
  0xe6   : > { %v5553_v43 = vpop.f32.mrf.mxu2  ;;  %2818 = vmatpush.bf16.msrb.mxu3 %v4600_v36  ;;  %v4312_v49 = vor.u32 %v4906_v44, %v4309_v51  ;;  %v5571_v51 = vor.u32 %v4885_v30, %v4221_v33  ;;  %v4939_v33 = vld [vmem:[#allocation7 + $0x194] sm:$0xf]  ;;  %v4935_v19 = vld [vmem:[#allocation7 + $0x16c] sm:$0xf0] }
  0xe7   : > { %v5557_v48 = vpop.f32.mrf.mxu0 }
  0xe8   : > { %v5555_v46 = vpop.f32.mrf.mxu3  ;;  %v5559_v60 = vpop.f32.mrf.mxu1  ;;  %2800 = vmatpush.bf16.msrb.mxu2 %v4312_v49  ;;  %2762 = vmatpush.bf16.msrb.mxu0 %v4308_v0  ;;  %v4501_v49 = vld [vmem:[#allocation7 + $0x228] sm:$0xf0] }
  0xe9   : > { %2781 = vmatpush.bf16.msrb.mxu1 %v4564_v8  ;;  %v4504_v0 = vor.u32 %v4954_v42, %v4501_v49  ;;  %v4443_v49 = vld [vmem:[#allocation7 + $0x190] sm:$0xf] }
  0xea   : > { %2819 = vmatpush.bf16.msrb.mxu3 %v4568_v63  ;;  %v4444_v6 = vor.u32 %v4943_v54, %v4443_v49 }
  0xec   : > { %2801 = vmatpush.bf16.msrb.mxu2 %v4280_v14  ;;  %2763 = vmatpush.bf16.msrb.mxu0 %v4276_v59  ;;  %v5011_v14 = vld [vmem:[#allocation7 + $0x3d4] sm:$0xf] }
  0xed   : > { %2782 = vmatpush.bf16.msrb.mxu1 %v4532_v35  ;;  %v4445_v59 = vld [vmem:[#allocation7 + $0x1b0] sm:$0xf0] }
  0xee   : > { %v5565_v36 = vpop.f32.mrf.mxu2  ;;  %2820 = vmatpush.bf16.msrb.mxu3 %v4536_v21  ;;  %v4731_v21 = vld [vmem:[#allocation7 + $0x3d0] sm:$0xf]  ;;  %v5003_v35 = vld [vmem:[#allocation7 + $0x394] sm:$0xf] }
  0xef   : > { %v1162_v44 = vpop.f32.mrf.mxu0  ;;  %v4732_v29 = vor.u32 %v5015_v25, %v4731_v21  ;;  %v4412_v21 = vor.u32 %v4935_v19, %v4411_v17  ;;  %v4999_v25 = vld [vmem:[#allocation7 + $0x36c] sm:$0xf0]  ;;  %v4915_v19 = vld [vmem:[#allocation7 + $0xd4] sm:$0xf] }
  0xf0   : > { %v5569_v47 = vpop.f32.mrf.mxu3  ;;  %v5574_v58 = vadd.f32 %v1162_v44, %v5476_v62  ;;  %v1181_v63 = vpop.f32.mrf.mxu1  ;;  %2802 = vmatpush.bf16.msrb.mxu2 %v4248_v45  ;;  %v4480_v62 = vor.u32 %v4947_v12, %v4477_v13  ;;  %2764 = vmatpush.bf16.msrb.mxu0 %v4244_v1  ;;  %v4448_v44 = vor.u32 %v4939_v33, %v4445_v59  ;;  %v4701_v45 = vld [vmem:[#allocation7 + $0x3b0] sm:$0xf0]  ;;  %v4227_v12 = vld [vmem:[%s5551_s22 + $0x10] sm:$0xf] }
  0xf1   : > { %v5577_v8 = vadd.f32 %v1181_v63, %v5478_v4  ;;  %v4736_v4 = vor.u32 %v5011_v14, %v4733_v16  ;;  %2783 = vmatpush.bf16.msrb.mxu1 %v4500_v11  ;;  %v4704_v1 = vor.u32 %v5003_v35, %v4701_v45  ;;  %v4931_v14 = vld [vmem:[#allocation7 + $0x154] sm:$0xf] }
  0xf2   : > { %2689 = vmatmul.bf16.vlgmr.msra.gmra.mxu0 %v5567_v37  ;;  %2821 = vmatpush.bf16.msrb.mxu3 %v4504_v0  ;;  %v4669_v16 = vld [vmem:[#allocation7 + $0x370] sm:$0xf0] }
  0xf3   : > { %2708 = vmatmul.bf16.vlgmr.msra.gmra.mxu1 %v5571_v51  ;;  %2727 = vmatmul.bf16.vlgmr.msra.gmra.mxu2 %v5567_v37 }
  0xf4   : > { %2871 = vmatpush.bf16.msra.mxu2 %v4480_v62  ;;  %2833 = vmatpush.bf16.msra.mxu0 %v4476_v20  ;;  %v4995_v62 = vld [vmem:[#allocation7 + $0x354] sm:$0xf] }
  0xf5   : > { %2746 = vmatmul.bf16.vlgmr.msra.gmra.mxu3 %v5571_v51  ;;  %2852 = vmatpush.bf16.msra.mxu1 %v4732_v29  ;;  %v4672_v20 = vor.u32 %v4995_v62, %v4669_v16  ;;  %v4887_v29 = vld [vmem:[%s5551_s22 + $0x14] sm:$0xf] }
  0xf6   : > { %v1200_v30 = vpop.f32.mrf.mxu2  ;;  %2890 = vmatpush.bf16.msra.mxu3 %v4736_v4  ;;  %v4888_v4 = vld [vmem:[%s5551_s22 + $0x14] sm:$0xf0] }
  0xf7   : > { %v5584_v39 = vadd.f32 %v1200_v30, %v5484_v22  ;;  %v1164_v42 = vpop.f32.mrf.mxu0  ;;  %v4699_v22 = vld [vmem:[#allocation7 + $0x390] sm:$0xf]  ;;  %v4229_v30 = vld [vmem:[%s5551_s22 + $0x18] sm:$0xf0]  ;;  %v5599_v35 = vor.u32 %v4888_v4, %v4227_v12  ;;  %v4349_v4 = vld [vmem:[#allocation7 + $0xf0] sm:$0xf0] }
  0xf8   : > { %v1219_v40 = vpop.f32.mrf.mxu3  ;;  %v5590_v63 = vadd.f32 %v1164_v42, %v5488_v27  ;;  %v1183_v0 = vpop.f32.mrf.mxu1  ;;  %2872 = vmatpush.bf16.msra.mxu2 %v4448_v44  ;;  %v4700_v13 = vor.u32 %v5007_v7, %v4699_v22  ;;  %2834 = vmatpush.bf16.msra.mxu0 %v4444_v6  ;;  %v4381_v42 = vld [vmem:[#allocation7 + $0x130] sm:$0xf0]  ;;  %v4379_v22 = vld [vmem:[#allocation7 + $0x110] sm:$0xf] }
  0xf9   : > { %v5587_v55 = vadd.f32 %v1219_v40, %v5486_v26  ;;  %v5593_v11 = vadd.f32 %v1183_v0, %v5490_v32  ;;  %v4413_v26 = vld [vmem:[#allocation7 + $0x170] sm:$0xf0]  ;;  %v4667_v32 = vld [vmem:[#allocation7 + $0x350] sm:$0xf]  ;;  %v5604_v0 = vor.u32 %v4887_v29, %v4229_v30 }
  0xfa   : > { %2891 = vmatpush.bf16.msra.mxu3 %v4704_v1  ;;  %v4416_v27 = vor.u32 %v4931_v14, %v4413_v26  ;;  %2853 = vmatpush.bf16.msra.mxu1 %v4700_v13  ;;  %v4668_v33 = vor.u32 %v4999_v25, %v4667_v32  ;;  %v4923_v40 = vld [vmem:[#allocation7 + $0x114] sm:$0xf]  ;;  %v4927_v7 = vld [vmem:[#allocation7 + $0x12c] sm:$0xf0] }
  0xfb   : > { %v4987_v44 = vld [vmem:[#allocation7 + $0x314] sm:$0xf]  ;;  %v4384_v1 = vor.u32 %v4923_v40, %v4381_v42  ;;  %v4380_v62 = vor.u32 %v4927_v7, %v4379_v22  ;;  %v4919_v32 = vld [vmem:[#allocation7 + $0xec] sm:$0xf0] }
  0xfc   : > { %2873 = vmatpush.bf16.msra.mxu2 %v4416_v27  ;;  %2835 = vmatpush.bf16.msra.mxu0 %v4412_v21  ;;  %v4637_v6 = vld [vmem:[#allocation7 + $0x330] sm:$0xf0]  ;;  %v4991_v27 = vld [vmem:[#allocation7 + $0x32c] sm:$0xf0] }
  0xfd   : > { %v4640_v26 = vor.u32 %v4987_v44, %v4637_v6  ;;  %v4347_v21 = vld [vmem:[#allocation7 + $0xd0] sm:$0xf]  ;;  %v4907_v40 = vld [vmem:[#allocation7 + $0x94] sm:$0xf] }
  0xfe   : > { %v1202_v59 = vpop.f32.mrf.mxu2  ;;  %2892 = vmatpush.bf16.msra.mxu3 %v4672_v20  ;;  %2854 = vmatpush.bf16.msra.mxu1 %v4668_v33  ;;  %v4605_v20 = vld [vmem:[#allocation7 + $0x2f0] sm:$0xf0]  ;;  %v4348_v25 = vor.u32 %v4919_v32, %v4347_v21  ;;  %v4603_v29 = vld [vmem:[#allocation7 + $0x2d0] sm:$0xf] }
  0xff   : > { %v5602_v45 = vadd.f32 %v1202_v59, %v5495_v52  ;;  %v1167_v54 = vpop.f32.mrf.mxu0  ;;  %v4635_v52 = vld [vmem:[#allocation7 + $0x310] sm:$0xf]  ;;  %v4317_v42 = vld [vmem:[#allocation7 + $0xb0] sm:$0xf0] }
 0x100   : > { %v1221_v49 = vpop.f32.mrf.mxu3  ;;  %v5610_v13 = vadd.f32 %v1167_v54, %v5499_v57  ;;  %v1186_v14 = vpop.f32.mrf.mxu1  ;;  %2874 = vmatpush.bf16.msra.mxu2 %v4384_v1  ;;  %v4636_v17 = vor.u32 %v4991_v27, %v4635_v52  ;;  %v4352_v57 = vor.u32 %v4915_v19, %v4349_v4  ;;  %2836 = vmatpush.bf16.msra.mxu0 %v4380_v62  ;;  %v4983_v30 = vld [vmem:[#allocation7 + $0x2ec] sm:$0xf0]  ;;  %v4971_v44 = vld [vmem:[#allocation7 + $0x294] sm:$0xf] }
 0x101   : > { %v5607_v12 = vadd.f32 %v1221_v49, %v5497_v56  ;;  %v5613_v16 = vadd.f32 %v1186_v14, %v5501_v61  ;;  %v4979_v56 = vld [vmem:[#allocation7 + $0x2d4] sm:$0xf]  ;;  %v4604_v33 = vor.u32 %v4983_v30, %v4603_v29  ;;  %v4320_v6 = vor.u32 %v4907_v40, %v4317_v42  ;;  %v4315_v7 = vld [vmem:[#allocation7 + $0x90] sm:$0xf] }
 0x102   : > { %2694 = vmatmul.bf16.gmra.mxu0 %v5599_v35  ;;  %2893 = vmatpush.bf16.msra.mxu3 %v4640_v26  ;;  %v4608_v61 = vor.u32 %v4979_v56, %v4605_v20  ;;  %v4573_v22 = vld [vmem:[#allocation7 + $0x2b0] sm:$0xf0]  ;;  %v4911_v14 = vld [vmem:[#allocation7 + $0xac] sm:$0xf0] }
 0x103   : > { %2713 = vmatmul.bf16.gmra.mxu1 %v5604_v0  ;;  %2732 = vmatmul.bf16.gmra.mxu2 %v5599_v35  ;;  %v4576_v27 = vor.u32 %v4971_v44, %v4573_v22  ;;  %v4571_v19 = vld [vmem:[#allocation7 + $0x290] sm:$0xf]  ;;  %v4285_v20 = vld [vmem:[#allocation7 + $0x70] sm:$0xf0] }
 0x104   : > { %2855 = vmatpush.bf16.msra.mxu1 %v4636_v17  ;;  %2875 = vmatpush.bf16.msra.mxu2 %v4352_v57  ;;  %v4316_v17 = vor.u32 %v4911_v14, %v4315_v7  ;;  %v4975_v4 = vld [vmem:[#allocation7 + $0x2ac] sm:$0xf0]  ;;  %v4899_v57 = vld [vmem:[#allocation7 + $0x54] sm:$0xf] }
 0x105   : > { %2751 = vmatmul.bf16.gmra.mxu3 %v5604_v0  ;;  %2837 = vmatpush.bf16.msra.mxu0 %v4348_v25  ;;  %v4572_v56 = vor.u32 %v4975_v4, %v4571_v19  ;;  %v4963_v21 = vld [vmem:[#allocation7 + $0x254] sm:$0xf]  ;;  %v4539_v25 = vld [vmem:[#allocation7 + $0x250] sm:$0xf] }
 0x106   : > { %v1205_v59 = vpop.f32.mrf.mxu2  ;;  %2894 = vmatpush.bf16.msra.mxu3 %v4608_v61  ;;  %v4541_v32 = vld [vmem:[#allocation7 + $0x270] sm:$0xf0]  ;;  %v4903_v61 = vld [vmem:[#allocation7 + $0x6c] sm:$0xf0] }
 0x107   : > { %v5620_v49 = vadd.f32 %v1205_v59, %v5507_v18  ;;  %v1169_v1 = vpop.f32.mrf.mxu0  ;;  %v4544_v29 = vor.u32 %v4963_v21, %v4541_v32  ;;  %v4967_v30 = vld [vmem:[#allocation7 + $0x26c] sm:$0xf0]  ;;  %v4253_v42 = vld [vmem:[#allocation7 + $0x30] sm:$0xf0]  ;;  %v5012_v32 = vld [vmem:[#allocation7 + $0x3dc] sm:$0xf] }
 0x108   : > { %v1224_v54 = vpop.f32.mrf.mxu3  ;;  %v5626_v62 = vadd.f32 %v1169_v1, %v5511_v24  ;;  %v1188_v52 = vpop.f32.mrf.mxu1  ;;  %2856 = vmatpush.bf16.msra.mxu1 %v4604_v33  ;;  %2876 = vmatpush.bf16.msra.mxu2 %v4320_v6  ;;  %v4283_v24 = vld [vmem:[#allocation7 + $0x50] sm:$0xf]  ;;  %v4891_v33 = vld [vmem:[#allocation7 + $0x14] sm:$0xf] }
 0x109   : > { %v5623_v26 = vadd.f32 %v1224_v54, %v5509_v23  ;;  %v5629_v18 = vadd.f32 %v1188_v52, %v5513_v31  ;;  %v4288_v23 = vor.u32 %v4899_v57, %v4285_v20  ;;  %2838 = vmatpush.bf16.msra.mxu0 %v4316_v17  ;;  %v4284_v59 = vor.u32 %v4903_v61, %v4283_v24  ;;  %v4955_v44 = vld [vmem:[#allocation7 + $0x214] sm:$0xf]  ;;  %v4251_v14 = vld [vmem:[#allocation7 + $0x10] sm:$0xf]  ;;  %v4741_v24 = vld [vmem:[#allocation7 + $0x3f8] sm:$0xf0] }
 0x10a   : > { %2895 = vmatpush.bf16.msra.mxu3 %v4576_v27  ;;  %v4540_v31 = vor.u32 %v4967_v30, %v4539_v25  ;;  %v4256_v22 = vor.u32 %v4891_v33, %v4253_v42  ;;  %v4509_v7 = vld [vmem:[#allocation7 + $0x230] sm:$0xf0]  ;;  %v4895_v52 = vld [vmem:[#allocation7 + $0x2c] sm:$0xf0]  ;;  %v4483_v61 = vld [vmem:[#allocation7 + $0x1d8] sm:$0xf] }
 0x10b   : > { %v4512_v4 = vor.u32 %v4955_v44, %v4509_v7  ;;  %v4507_v57 = vld [vmem:[#allocation7 + $0x210] sm:$0xf]  ;;  %v4739_v30 = vld [vmem:[#allocation7 + $0x3d8] sm:$0xf]  ;;  %v4940_v33 = vld [vmem:[#allocation7 + $0x19c] sm:$0xf] }
 0x10c   : > { %2857 = vmatpush.bf16.msra.mxu1 %v4572_v56  ;;  %2877 = vmatpush.bf16.msra.mxu2 %v4288_v23  ;;  %v4252_v56 = vor.u32 %v4895_v52, %v4251_v14  ;;  %v4959_v20 = vld [vmem:[#allocation7 + $0x22c] sm:$0xf0]  ;;  %v4485_v23 = vld [vmem:[#allocation7 + $0x1f8] sm:$0xf0]  ;;  %v4451_v52 = vld [vmem:[#allocation7 + $0x198] sm:$0xf] }
 0x10d   : > { %2839 = vmatpush.bf16.msra.mxu0 %v4284_v59  ;;  %v4508_v21 = vor.u32 %v4959_v20, %v4507_v57  ;;  %v5016_v59 = vld [vmem:[#allocation7 + $0x3f4] sm:$0xf0]  ;;  %v4453_v42 = vld [vmem:[#allocation7 + $0x1b8] sm:$0xf0] }
 0x10e   : > { %v1207_v40 = vpop.f32.mrf.mxu2  ;;  %2896 = vmatpush.bf16.msra.mxu3 %v4544_v29  ;;  %v4952_v29 = vld [vmem:[#allocation7 + $0x1f4] sm:$0xf0]  ;;  %v5004_v44 = vld [vmem:[#allocation7 + $0x39c] sm:$0xf]  ;;  %v4456_v7 = vor.u32 %v4940_v33, %v4453_v42 }
 0x10f   : > { %v5632_v54 = vadd.f32 %v1207_v40, %v5515_v53  ;;  %v1238_v6 = vpop.f32.mrf.mxu0  ;;  %v4484_v25 = vor.u32 %v4952_v29, %v4483_v61  ;;  %v4709_v14 = vld [vmem:[#allocation7 + $0x3b8] sm:$0xf0] }
 0x110   : > { %v1226_v1 = vpop.f32.mrf.mxu3  ;;  %v5638_v17 = vadd.f32 %v1238_v6, %v5519_v41  ;;  %v1257_v19 = vpop.f32.mrf.mxu1  ;;  %2858 = vmatpush.bf16.msra.mxu1 %v4540_v31  ;;  %2878 = vmatpush.bf16.msra.mxu2 %v4256_v22  ;;  %v4740_v31 = vor.u32 %v5016_v59, %v4739_v30  ;;  %v4712_v20 = vor.u32 %v5004_v44, %v4709_v14  ;;  %v4996_v61 = vld [vmem:[#allocation7 + $0x35c] sm:$0xf]  ;;  %v4675_v59 = vld [vmem:[#allocation7 + $0x358] sm:$0xf] }
 0x111   : > { %v5635_v27 = vadd.f32 %v1226_v1, %v5517_v3  ;;  %v5641_v53 = vadd.f32 %v1257_v19, %v5521_v2  ;;  %v4948_v3 = vld [vmem:[#allocation7 + $0x1dc] sm:$0xf]  ;;  %2840 = vmatpush.bf16.msra.mxu0 %v4252_v56  ;;  %v4744_v2 = vor.u32 %v5012_v32, %v4741_v24  ;;  %v4944_v19 = vld [vmem:[#allocation7 + $0x1b4] sm:$0xf0] }
 0x112   : > { %2765 = vmatmul.bf16.vlgmr.msrb.gmra.mxu0 %v5567_v37  ;;  %2897 = vmatpush.bf16.msra.mxu3 %v4512_v4  ;;  %v4488_v41 = vor.u32 %v4948_v3, %v4485_v23  ;;  %v4707_v3 = vld [vmem:[#allocation7 + $0x398] sm:$0xf]  ;;  %v4421_v24 = vld [vmem:[#allocation7 + $0x178] sm:$0xf0] }
 0x113   : > { %2784 = vmatmul.bf16.vlgmr.msrb.gmra.mxu1 %v5571_v51  ;;  %2803 = vmatmul.bf16.vlgmr.msrb.gmra.mxu2 %v5567_v37  ;;  %v5008_v23 = vld [vmem:[#allocation7 + $0x3b4] sm:$0xf0]  ;;  %v4677_v29 = vld [vmem:[#allocation7 + $0x378] sm:$0xf0] }
 0x114   : > { %2859 = vmatpush.bf16.msra.mxu1 %v4508_v21  ;;  %2947 = vmatpush.bf16.msrb.mxu2 %v4488_v41  ;;  %v4452_v21 = vor.u32 %v4944_v19, %v4451_v52  ;;  %v4708_v32 = vor.u32 %v5008_v23, %v4707_v3  ;;  %v4932_v41 = vld [vmem:[#allocation7 + $0x15c] sm:$0xf]  ;;  %v4387_v19 = vld [vmem:[#allocation7 + $0x118] sm:$0xf] }
 0x115   : > { %2822 = vmatmul.bf16.vlgmr.msrb.gmra.mxu3 %v5571_v51  ;;  %2909 = vmatpush.bf16.msrb.mxu0 %v4484_v25  ;;  %v4680_v25 = vor.u32 %v4996_v61, %v4677_v29  ;;  %v4924_v33 = vld [vmem:[#allocation7 + $0x11c] sm:$0xf] }
 0x116   : > { %v1276_v40 = vpop.f32.mrf.mxu2  ;;  %2966 = vmatpush.bf16.msrb.mxu3 %v4744_v2  ;;  %v4419_v2 = vld [vmem:[#allocation7 + $0x158] sm:$0xf]  ;;  %v4389_v42 = vld [vmem:[#allocation7 + $0x138] sm:$0xf0] }
 0x117   : > { %v5648_v1 = vadd.f32 %v1276_v40, %v5527_v28  ;;  %v1240_v22 = vpop.f32.mrf.mxu0  ;;  %v4988_v44 = vld [vmem:[#allocation7 + $0x31c] sm:$0xf]  ;;  %v4392_v14 = vor.u32 %v4924_v33, %v4389_v42 }
 0x118   : > { %v1295_v6 = vpop.f32.mrf.mxu3  ;;  %2928 = vmatpush.bf16.msrb.mxu1 %v4740_v31  ;;  %v5654_v56 = vadd.f32 %v1240_v22, %v5531_v50  ;;  %v1259_v57 = vpop.f32.mrf.mxu1  ;;  %2948 = vmatpush.bf16.msrb.mxu2 %v4456_v7  ;;  %v4936_v50 = vld [vmem:[#allocation7 + $0x174] sm:$0xf0]  ;;  %v4645_v52 = vld [vmem:[#allocation7 + $0x338] sm:$0xf0] }
 0x119   : > { %v5651_v4 = vadd.f32 %v1295_v6, %v5529_v34  ;;  %v5657_v28 = vadd.f32 %v1259_v57, %v5533_v38  ;;  %2910 = vmatpush.bf16.msrb.mxu0 %v4452_v21  ;;  %v4424_v34 = vor.u32 %v4932_v41, %v4421_v24  ;;  %v4420_v30 = vor.u32 %v4936_v50, %v4419_v2  ;;  %v5000_v31 = vld [vmem:[#allocation7 + $0x374] sm:$0xf0]  ;;  %v4357_v29 = vld [vmem:[#allocation7 + $0xf8] sm:$0xf0] }
 0x11a   : > { %2967 = vmatpush.bf16.msrb.mxu3 %v4712_v20  ;;  %v4676_v40 = vor.u32 %v5000_v31, %v4675_v59  ;;  %v4928_v57 = vld [vmem:[#allocation7 + $0x134] sm:$0xf0]  ;;  %v4648_v23 = vor.u32 %v4988_v44, %v4645_v52  ;;  %v4613_v2 = vld [vmem:[#allocation7 + $0x2f8] sm:$0xf0] }
 0x11b   : > { %v4643_v41 = vld [vmem:[#allocation7 + $0x318] sm:$0xf]  ;;  %v4908_v33 = vld [vmem:[#allocation7 + $0x9c] sm:$0xf] }
 0x11c   : > { %2929 = vmatpush.bf16.msrb.mxu1 %v4708_v32  ;;  %2949 = vmatpush.bf16.msrb.mxu2 %v4424_v34  ;;  %v4388_v32 = vor.u32 %v4928_v57, %v4387_v19  ;;  %v4992_v24 = vld [vmem:[#allocation7 + $0x334] sm:$0xf0]  ;;  %v4916_v34 = vld [vmem:[#allocation7 + $0xdc] sm:$0xf] }
 0x11d   : > { %2911 = vmatpush.bf16.msrb.mxu0 %v4420_v30  ;;  %v4644_v61 = vor.u32 %v4992_v24, %v4643_v41  ;;  %v4355_v50 = vld [vmem:[#allocation7 + $0xd8] sm:$0xf]  ;;  %v4325_v42 = vld [vmem:[#allocation7 + $0xb8] sm:$0xf0] }
 0x11e   : > { %v1278_v38 = vpop.f32.mrf.mxu2  ;;  %2968 = vmatpush.bf16.msrb.mxu3 %v4680_v25  ;;  %v4920_v25 = vld [vmem:[#allocation7 + $0xf4] sm:$0xf0]  ;;  %v4972_v44 = vld [vmem:[#allocation7 + $0x29c] sm:$0xf]  ;;  %v4328_v52 = vor.u32 %v4908_v33, %v4325_v42 }
 0x11f   : > { %v5660_v6 = vadd.f32 %v1278_v38, %v5535_v5  ;;  %v1243_v7 = vpop.f32.mrf.mxu0  ;;  %v4356_v30 = vor.u32 %v4920_v25, %v4355_v50  ;;  %v4611_v59 = vld [vmem:[#allocation7 + $0x2d8] sm:$0xf]  ;;  %v4581_v19 = vld [vmem:[#allocation7 + $0x2b8] sm:$0xf0] }
 0x120   : > { %v1297_v22 = vpop.f32.mrf.mxu3  ;;  %2930 = vmatpush.bf16.msrb.mxu1 %v4676_v40  ;;  %v5666_v21 = vadd.f32 %v1243_v7, %v5539_v10  ;;  %v1262_v3 = vpop.f32.mrf.mxu1  ;;  %2950 = vmatpush.bf16.msrb.mxu2 %v4392_v14  ;;  %v4360_v10 = vor.u32 %v4916_v34, %v4357_v29  ;;  %v4984_v31 = vld [vmem:[#allocation7 + $0x2f4] sm:$0xf0]  ;;  %v4584_v24 = vor.u32 %v4972_v44, %v4581_v19  ;;  %v4964_v50 = vld [vmem:[#allocation7 + $0x25c] sm:$0xf] }
 0x121   : > { %v5663_v20 = vadd.f32 %v1297_v22, %v5537_v9  ;;  %v5669_v5 = vadd.f32 %v1262_v3, %v5541_v15  ;;  %v4980_v9 = vld [vmem:[#allocation7 + $0x2dc] sm:$0xf]  ;;  %2912 = vmatpush.bf16.msrb.mxu0 %v4388_v32  ;;  %v4612_v40 = vor.u32 %v4984_v31, %v4611_v59  ;;  %v4323_v57 = vld [vmem:[#allocation7 + $0x98] sm:$0xf] }
 0x122   : > { %2770 = vmatmul.bf16.gmra.mxu0 %v5599_v35  ;;  %2969 = vmatpush.bf16.msrb.mxu3 %v4648_v23  ;;  %v4616_v15 = vor.u32 %v4980_v9, %v4613_v2  ;;  %v4912_v3 = vld [vmem:[#allocation7 + $0xb4] sm:$0xf0]  ;;  %v4293_v2 = vld [vmem:[#allocation7 + $0x78] sm:$0xf0] }
 0x123   : > { %2789 = vmatmul.bf16.gmra.mxu1 %v5604_v0  ;;  %2808 = vmatmul.bf16.gmra.mxu2 %v5599_v35  ;;  %v4579_v34 = vld [vmem:[#allocation7 + $0x298] sm:$0xf]  ;;  %v4549_v25 = vld [vmem:[#allocation7 + $0x278] sm:$0xf0] }
 0x124   : > { %2931 = vmatpush.bf16.msrb.mxu1 %v4644_v61  ;;  %2951 = vmatpush.bf16.msrb.mxu2 %v4360_v10  ;;  %v4324_v61 = vor.u32 %v4912_v3, %v4323_v57  ;;  %v4976_v29 = vld [vmem:[#allocation7 + $0x2b4] sm:$0xf0]  ;;  %v4900_v10 = vld [vmem:[#allocation7 + $0x5c] sm:$0xf]  ;;  %v4552_v59 = vor.u32 %v4964_v50, %v4549_v25 }
 0x125   : > { %2827 = vmatmul.bf16.gmra.mxu3 %v5604_v0  ;;  %2913 = vmatpush.bf16.msrb.mxu0 %v4356_v30  ;;  %v4580_v9 = vor.u32 %v4976_v29, %v4579_v34  ;;  %v4547_v30 = vld [vmem:[#allocation7 + $0x258] sm:$0xf]  ;;  %v4261_v42 = vld [vmem:[#allocation7 + $0x38] sm:$0xf0] }
 0x126   : > { %v1281_v38 = vpop.f32.mrf.mxu2  ;;  %2970 = vmatpush.bf16.msrb.mxu3 %v4616_v15  ;;  %v4904_v15 = vld [vmem:[#allocation7 + $0x74] sm:$0xf0]  ;;  %v4956_v44 = vld [vmem:[#allocation7 + $0x21c] sm:$0xf] }
 0x127   : > { %v5676_v22 = vadd.f32 %v1281_v38, %v5553_v43  ;;  %v1245_v14 = vpop.f32.mrf.mxu0  ;;  %v4968_v31 = vld [vmem:[#allocation7 + $0x274] sm:$0xf0]  ;;  %v4517_v57 = vld [vmem:[#allocation7 + $0x238] sm:$0xf0] }
 0x128   : > { %v1300_v7 = vpop.f32.mrf.mxu3  ;;  %v5682_v32 = vadd.f32 %v1245_v14, %v5557_v48  ;;  %v1264_v41 = vpop.f32.mrf.mxu1  ;;  %2932 = vmatpush.bf16.msrb.mxu1 %v4612_v40  ;;  %2952 = vmatpush.bf16.msrb.mxu2 %v4328_v52  ;;  %v4291_v48 = vld [vmem:[#allocation7 + $0x58] sm:$0xf]  ;;  %v4892_v40 = vld [vmem:[#allocation7 + $0x1c] sm:$0xf]  ;;  %v4520_v29 = vor.u32 %v4956_v44, %v4517_v57 }
 0x129   : > { %v5679_v23 = vadd.f32 %v1300_v7, %v5555_v46  ;;  %v5685_v43 = vadd.f32 %v1264_v41, %v5559_v60  ;;  %v4296_v46 = vor.u32 %v4900_v10, %v4293_v2  ;;  %2914 = vmatpush.bf16.msrb.mxu0 %v4324_v61  ;;  %v4292_v38 = vor.u32 %v4904_v15, %v4291_v48  ;;  %v4259_v3 = vld [vmem:[#allocation7 + $0x18] sm:$0xf] }
 0x12a   : > { %2971 = vmatpush.bf16.msrb.mxu3 %v4584_v24  ;;  %v4548_v60 = vor.u32 %v4968_v31, %v4547_v30  ;;  %v4264_v19 = vor.u32 %v4892_v40, %v4261_v42  ;;  %v4896_v41 = vld [vmem:[#allocation7 + $0x34] sm:$0xf0] }
 0x12b   : > { %v4515_v10 = vld [vmem:[#allocation7 + $0x218] sm:$0xf] }
 0x12c   : > { %2933 = vmatpush.bf16.msrb.mxu1 %v4580_v9  ;;  %2953 = vmatpush.bf16.msrb.mxu2 %v4296_v46  ;;  %v4260_v9 = vor.u32 %v4896_v41, %v4259_v3  ;;  %v4960_v2 = vld [vmem:[#allocation7 + $0x234] sm:$0xf0] }
 0x12d   : > { %2915 = vmatpush.bf16.msrb.mxu0 %v4292_v38  ;;  %v4516_v50 = vor.u32 %v4960_v2, %v4515_v10 }
 0x12e   : > { %v1283_v33 = vpop.f32.mrf.mxu2  ;;  %2972 = vmatpush.bf16.msrb.mxu3 %v4552_v59 }
 0x12f   : > { %v5688_v7 = vadd.f32 %v1283_v33, %v5565_v36  ;;  %v1714_v52 = vpop.f32.mrf.mxu0 }
 0x130   : > { %v1302_v14 = vpop.f32.mrf.mxu3  ;;  %v5694_v61 = vadd.f32 %v1714_v52, %v5574_v58  ;;  %v1733_v34 = vpop.f32.mrf.mxu1  ;;  %2934 = vmatpush.bf16.msrb.mxu1 %v4548_v60  ;;  %2954 = vmatpush.bf16.msrb.mxu2 %v4264_v19 }
 0x131   : > { %v5691_v24 = vadd.f32 %v1302_v14, %v5569_v47  ;;  %v5697_v36 = vadd.f32 %v1733_v34, %v5577_v8  ;;  %2916 = vmatpush.bf16.msrb.mxu0 %v4260_v9 }
 0x132   : > { %2841 = vmatmul.bf16.vlgmr.msra.gmra.mxu0 %v5567_v37  ;;  %2973 = vmatpush.bf16.msrb.mxu3 %v4520_v29 }
 0x133   : > { %2860 = vmatmul.bf16.vlgmr.msra.gmra.mxu1 %v5571_v51  ;;  %2879 = vmatmul.bf16.vlgmr.msra.gmra.mxu2 %v5567_v37 }
 0x134   : > { %2935 = vmatpush.bf16.msrb.mxu1 %v4516_v50 }
 0x135   : > { %2898 = vmatmul.bf16.vlgmr.msra.gmra.mxu3 %v5571_v51 }
 0x136   : > { %v1752_v47 = vpop.f32.mrf.mxu2 }
 0x137   : > { %v5704_v58 = vadd.f32 %v1752_v47, %v5584_v39  ;;  %v1716_v46 = vpop.f32.mrf.mxu0 }
 0x138   : > { %v1771_v8 = vpop.f32.mrf.mxu3  ;;  %v5710_v48 = vadd.f32 %v1716_v46, %v5590_v63  ;;  %v1735_v15 = vpop.f32.mrf.mxu1 }
 0x139   : > { %v5707_v25 = vadd.f32 %v1771_v8, %v5587_v55  ;;  %v5713_v59 = vadd.f32 %v1735_v15, %v5593_v11 }
 0x13e   : > { %v1754_v30 = vpop.f32.mrf.mxu2 }
 0x13f   : > { %v5716_v31 = vadd.f32 %v1754_v30, %v5602_v45  ;;  %v1719_v60 = vpop.f32.mrf.mxu0 }
 0x140   : > { %v1773_v38 = vpop.f32.mrf.mxu3  ;;  %v5722_v33 = vadd.f32 %v1719_v60, %v5610_v13  ;;  %v1738_v55 = vpop.f32.mrf.mxu1 }
 0x141   : > { %v5719_v39 = vadd.f32 %v1773_v38, %v5607_v12  ;;  %v5725_v63 = vadd.f32 %v1738_v55, %v5613_v16 }
 0x142   : > { %2846 = vmatmul.bf16.gmra.mxu0 %v5599_v35 }
 0x143   : > { %2865 = vmatmul.bf16.gmra.mxu1 %v5604_v0  ;;  %2884 = vmatmul.bf16.gmra.mxu2 %v5599_v35 }
 0x145   : > { %2903 = vmatmul.bf16.gmra.mxu3 %v5604_v0 }
 0x146   : > { %v1757_v11 = vpop.f32.mrf.mxu2 }
 0x147   : > { %v5732_v45 = vadd.f32 %v1757_v11, %v5620_v49  ;;  %v1721_v40 = vpop.f32.mrf.mxu0 }
 0x148   : > { %v1776_v12 = vpop.f32.mrf.mxu3  ;;  %v5738_v16 = vadd.f32 %v1721_v40, %v5626_v62  ;;  %v1740_v42 = vpop.f32.mrf.mxu1 }
 0x149   : > { %v5735_v13 = vadd.f32 %v1776_v12, %v5623_v26  ;;  %v5741_v44 = vadd.f32 %v1740_v42, %v5629_v18 }
 0x14e   : > { %v1759_v14 = vpop.f32.mrf.mxu2 }
 0x14f   : > { %v5744_v52 = vadd.f32 %v1759_v14, %v5632_v54  ;;  %v1790_v57 = vpop.f32.mrf.mxu0 }
 0x150   : > { %v1778_v19 = vpop.f32.mrf.mxu3  ;;  %v5750_v3 = vadd.f32 %v1790_v57, %v5638_v17  ;;  %v1809_v26 = vpop.f32.mrf.mxu1 }
 0x151   : > { %v5747_v49 = vadd.f32 %v1778_v19, %v5635_v27  ;;  %v5753_v62 = vadd.f32 %v1809_v26, %v5641_v53 }
 0x152   : > { %2917 = vmatmul.bf16.vlgmr.msrb.gmra.mxu0 %v5567_v37 }
 0x153   : > { %2936 = vmatmul.bf16.vlgmr.msrb.gmra.mxu1 %v5571_v51  ;;  %2955 = vmatmul.bf16.vlgmr.msrb.gmra.mxu2 %v5567_v37 }
 0x155   : > { %2974 = vmatmul.bf16.vlgmr.msrb.gmra.mxu3 %v5571_v51 }
 0x156   : > { %v1828_v18 = vpop.f32.mrf.mxu2 }
 0x157   : > { %v5760_v54 = vadd.f32 %v1828_v18, %v5648_v1  ;;  %v1792_v41 = vpop.f32.mrf.mxu0 }
 0x158   : > { %v1847_v27 = vpop.f32.mrf.mxu3  ;;  %v5766_v53 = vadd.f32 %v1792_v41, %v5654_v56  ;;  %v1811_v34 = vpop.f32.mrf.mxu1 }
 0x159   : > { %v5763_v17 = vadd.f32 %v1847_v27, %v5651_v4  ;;  %v5769_v29 = vadd.f32 %v1811_v34, %v5657_v28 }
 0x15e   : > { %v1830_v9 = vpop.f32.mrf.mxu2 }
 0x15f   : > { %v5772_v37 = vadd.f32 %v1830_v9, %v5660_v6  ;;  %v1795_v10 = vpop.f32.mrf.mxu0 }
 0x160   : > { %v1849_v51 = vpop.f32.mrf.mxu3  ;;  %v5778_v2 = vadd.f32 %v1795_v10, %v5666_v21  ;;  %v1814_v4 = vpop.f32.mrf.mxu1 }
 0x161   : > { %v5775_v1 = vadd.f32 %v1849_v51, %v5663_v20  ;;  %v5781_v56 = vadd.f32 %v1814_v4, %v5669_v5 }
 0x162   : > { %2922 = vmatmul.bf16.gmra.mxu0 %v5599_v35 }
 0x163   : > { %2941 = vmatmul.bf16.gmra.mxu1 %v5604_v0  ;;  %2960 = vmatmul.bf16.gmra.mxu2 %v5599_v35 }
 0x165   : > { %2979 = vmatmul.bf16.gmra.mxu3 %v5604_v0 }
 0x166   : > { %v1833_v28 = vpop.f32.mrf.mxu2 }
 0x167   : > { %v5788_v6 = vadd.f32 %v1833_v28, %v5676_v22  ;;  %v1797_v50 = vpop.f32.mrf.mxu0 }
 0x168   : > { %v1852_v20 = vpop.f32.mrf.mxu3  ;;  %v5794_v5 = vadd.f32 %v1797_v50, %v5682_v32  ;;  %v1816_v47 = vpop.f32.mrf.mxu1 }
 0x169   : > { %v5791_v21 = vadd.f32 %v1852_v20, %v5679_v23  ;;  %v5797_v8 = vadd.f32 %v1816_v47, %v5685_v43  ;;  %v5808_v23 = vld [vmem:[%s5944_s8] sm:$0xff] }
 0x16a   : > { %v3019_v43 = vperm.slane %v5808_v23, 0  ;;  %v5815_v19 = vperm.slane %v5808_v23, 1 }
 0x16e   : > { %v1835_v46 = vpop.f32.mrf.mxu2 }
 0x16f   : > { %v5800_v35 = vadd.f32 %v1835_v46, %v5688_v7  ;;  %v2690_v15 = vpop.f32.mrf.mxu0 }
 0x170   : > { %v1854_v0 = vpop.f32.mrf.mxu3  ;;  %v2709_v30 = vpop.f32.mrf.mxu1 }
 0x171   : > { %v5803_v22 = vadd.f32 %v1854_v0, %v5691_v24  ;;  %v2710_v38 = vadd.f32 %v2709_v30, %v2690_v15 }
 0x173   : > { %v2985_v32 = vadd.f32 %v2710_v38, %v5694_v61 }
 0x175   : > { %v3035_v40 = vadd.f32 %v3019_v43, %v2985_v32 }
 0x176   : > { %v2728_v60 = vpop.f32.mrf.mxu2 }
 0x177   : > { %v2692_v7 = vpop.f32.mrf.mxu0  ;;  %v3099_v57 = vmul.f32 0.2, %v3035_v40  ;;  %vm3067_vm1 = vcmp.gt.f32.partialorder %v3035_v40, 0.0 }
 0x178   : > { %v2747_v55 = vpop.f32.mrf.mxu3  ;;  %v2711_v12 = vpop.f32.mrf.mxu1 }
 0x179   : > { %v2748_v11 = vadd.f32 %v2747_v55, %v2728_v60  ;;  %v2712_v42 = vadd.f32 %v2711_v12, %v2692_v7  ;;  %v3131_v10 = vsel %vm3067_vm1, %v3035_v40, %v3099_v57 }
 0x17b   : > { %v2986_v24 = vadd.f32 %v2748_v11, %v5697_v36  ;;  %v2993_v14 = vadd.f32 %v2712_v42, %v5710_v48 }
 0x17d   : > { %v3043_v26 = vadd.f32 %v3019_v43, %v2993_v14  ;;  %v3036_v34 = vadd.f32 %v5815_v19, %v2986_v24 }
 0x17e   : > { %v2730_v61 = vpop.f32.mrf.mxu2 }
 0x17f   : > { %vm3075_vm2 = vcmp.gt.f32.partialorder %v3043_v26, 0.0  ;;  %v3107_v18 = vmul.f32 0.2, %v3043_v26  ;;  %v2695_v41 = vpop.f32.mrf.mxu0  ;;  %v3100_v47 = vmul.f32 0.2, %v3036_v34  ;;  %vm3068_vm3 = vcmp.gt.f32.partialorder %v3036_v34, 0.0 }
 0x180   : > { %v2749_v27 = vpop.f32.mrf.mxu3  ;;  %v2714_v51 = vpop.f32.mrf.mxu1 }
 0x181   : > { %v2750_v9 = vadd.f32 %v2749_v27, %v2730_v61  ;;  %v3139_v4 = vsel %vm3075_vm2, %v3043_v26, %v3107_v18  ;;  %v2715_v36 = vadd.f32 %v2714_v51, %v2695_v41  ;;  %v3132_v55 = vsel %vm3068_vm3, %v3036_v34, %v3100_v47 }
 0x182   : > { %v3163_v28 = vmax.f32 %v3131_v10, %v3139_v4  ;;  %v3235_v48 = vadd.f32 %v3139_v4, %v3131_v10 }
 0x183   : > { %v2994_v20 = vadd.f32 %v2750_v9, %v5713_v59  ;;  %v3001_v50 = vadd.f32 %v2715_v36, %v5722_v33 }
 0x185   : > { %v3044_v46 = vadd.f32 %v5815_v19, %v2994_v20  ;;  %v3051_v0 = vadd.f32 %v3019_v43, %v3001_v50 }
 0x186   : > { %v2733_v30 = vpop.f32.mrf.mxu2 }
 0x187   : > { %vm3076_vm4 = vcmp.gt.f32.partialorder %v3044_v46, 0.0  ;;  %v3108_v15 = vmul.f32 0.2, %v3044_v46  ;;  %vm3083_vm5 = vcmp.gt.f32.partialorder %v3051_v0, 0.0  ;;  %v3115_v38 = vmul.f32 0.2, %v3051_v0  ;;  %v2697_v60 = vpop.f32.mrf.mxu0 }
 0x188   : > { %v2752_v32 = vpop.f32.mrf.mxu3  ;;  %v2716_v12 = vpop.f32.mrf.mxu1 }
 0x189   : > { %v3140_v7 = vsel %vm3076_vm4, %v3044_v46, %v3108_v15  ;;  %v2753_v11 = vadd.f32 %v2752_v32, %v2733_v30  ;;  %v3147_v42 = vsel %vm3083_vm5, %v3051_v0, %v3115_v38  ;;  %v2717_v33 = vadd.f32 %v2716_v12, %v2697_v60 }
 0x18a   : > { %v3172_v40 = vmax.f32 %v3132_v55, %v3140_v7  ;;  %v3244_v59 = vadd.f32 %v3140_v7, %v3132_v55  ;;  %v3164_v24 = vmax.f32 %v3163_v28, %v3147_v42  ;;  %v3236_v14 = vadd.f32 %v3235_v48, %v3147_v42 }
 0x18b   : > { %v3002_v57 = vadd.f32 %v2753_v11, %v5725_v63  ;;  %v3009_v26 = vadd.f32 %v2717_v33, %v5738_v16  ;;  %v5828_v30 = vperm.slane %v5808_v23, 2  ;;  %vm3328_vm5 = vcmask 1042434  }
 0x18d   : > { %v3052_v61 = vadd.f32 %v5815_v19, %v3002_v57  ;;  %v3059_v18 = vadd.f32 %v3019_v43, %v3009_v26 }
 0x18e   : > { %v2735_v41 = vpop.f32.mrf.mxu2 }
 0x18f   : > { %vm3084_vm6 = vcmp.gt.f32.partialorder %v3052_v61, 0.0  ;;  %v3116_v27 = vmul.f32 0.2, %v3052_v61  ;;  %vm3091_vm7 = vcmp.gt.f32.partialorder %v3059_v18, 0.0  ;;  %v3123_v34 = vmul.f32 0.2, %v3059_v18  ;;  %v2766_v51 = vpop.f32.mrf.mxu0 }
 0x190   : > { %v2754_v9 = vpop.f32.mrf.mxu3  ;;  %v2785_v36 = vpop.f32.mrf.mxu1 }
 0x191   : > { %v3148_v10 = vsel %vm3084_vm6, %v3052_v61, %v3116_v27  ;;  %v2755_v4 = vadd.f32 %v2754_v9, %v2735_v41  ;;  %v3155_v48 = vsel %vm3091_vm7, %v3059_v18, %v3123_v34  ;;  %v2786_v50 = vadd.f32 %v2785_v36, %v2766_v51 }
 0x192   : > { %v3173_v20 = vmax.f32 %v3172_v40, %v3148_v10  ;;  %v3245_v28 = vadd.f32 %v3244_v59, %v3148_v10  ;;  %v3165_v63 = vmax.f32 %v3164_v24, %v3155_v48  ;;  %v3237_v47 = vadd.f32 %v3236_v14, %v3155_v48 }
 0x193   : > { %v3010_v16 = vadd.f32 %v2755_v4, %v5741_v44  ;;  %v2987_v43 = vadd.f32 %v2786_v50, %v5704_v58  ;;  %v5834_v41 = vperm.slane %v5808_v23, 3  ;;  %vm3330_vm6 = vcmask 1041408  }
 0x194   : > { %v3166_v46 = vrot.slane %v3165_v63, 4  ;;  %v3238_v0 = vrot.slane %v3237_v47, 4 }
 0x195   : > { %v3060_v15 = vadd.f32 %v5815_v19, %v3010_v16  ;;  %v3037_v44 = vadd.f32 %v5828_v30, %v2987_v43 }
 0x196   : > { %v3167_v38 = vmax.f32 %v3165_v63, %v3166_v46  ;;  %v3239_v32 = vadd.f32 %v3238_v0, %v3237_v47  ;;  %v2804_v55 = vpop.f32.mrf.mxu2 }
 0x197   : > { %vm3092_vm8 = vcmp.gt.f32.partialorder %v3060_v15, 0.0  ;;  %v3124_v60 = vmul.f32 0.2, %v3060_v15  ;;  %v2768_v11 = vpop.f32.mrf.mxu0  ;;  %v3101_v27 = vmul.f32 0.2, %v3037_v44  ;;  %vm3069_vm9 = vcmp.gt.f32.partialorder %v3037_v44, 0.0 }
 0x198   : > { %v2823_v7 = vpop.f32.mrf.mxu3  ;;  %v3168_v12 = vrot.slane %v3167_v38, 2  ;;  %v2787_v58 = vpop.f32.mrf.mxu1  ;;  %v3240_v19 = vrot.slane %v3239_v32, 2 }
 0x199   : > { %v3156_v40 = vsel %vm3092_vm8, %v3060_v15, %v3124_v60  ;;  %v2824_v59 = vadd.f32 %v2823_v7, %v2804_v55  ;;  %v2788_v24 = vadd.f32 %v2787_v58, %v2768_v11 }
 0x19a   : > { %v3174_v42 = vmax.f32 %v3173_v20, %v3156_v40  ;;  %v3246_v33 = vadd.f32 %v3245_v28, %v3156_v40  ;;  %v3169_v18 = vmax.f32 %v3167_v38, %v3168_v12  ;;  %v3241_v10 = vadd.f32 %v3240_v19, %v3239_v32 }
 0x19b   : > { %v2988_v14 = vadd.f32 %v2824_v59, %v5707_v25  ;;  %v2995_v61 = vadd.f32 %v2788_v24, %v5716_v31  ;;  %v3133_v31 = vsel %vm3069_vm9, %v3037_v44, %v3101_v27 }
 0x19c   : > { %v3175_v57 = vrot.slane %v3174_v42, 4  ;;  %v3247_v26 = vrot.slane %v3246_v33, 4  ;;  %v3170_v50 = vrot.slane %v3169_v18, 1  ;;  %v3242_v38 = vrot.slane %v3241_v10, 1 }
 0x19d   : > { %v3045_v51 = vadd.f32 %v5828_v30, %v2995_v61  ;;  %v3038_v63 = vadd.f32 %v5834_v41, %v2988_v14 }
 0x19e   : > { %v3176_v34 = vmax.f32 %v3174_v42, %v3175_v57  ;;  %v3248_v9 = vadd.f32 %v3247_v26, %v3246_v33  ;;  %v2806_v4 = vpop.f32.mrf.mxu2  ;;  %v3171_v33 = vmax.f32 %v3169_v18, %v3170_v50  ;;  %v3243_v24 = vadd.f32 %v3242_v38, %v3241_v10 }
 0x19f   : > { %vm3077_vm10 = vcmp.gt.f32.partialorder %v3045_v51, 0.0  ;;  %v3109_v25 = vmul.f32 0.2, %v3045_v51  ;;  %v2771_v48 = vpop.f32.mrf.mxu0  ;;  %v3102_v40 = vmul.f32 0.2, %v3038_v63  ;;  %vm3070_vm12 = vcmp.gt.f32.partialorder %v3038_v63, 0.0 }
 0x1a0   : > { %v3177_v36 = vrot.slane %v3176_v34, 2  ;;  %v3249_v20 = vrot.slane %v3248_v9, 2  ;;  %v2825_v28 = vpop.f32.mrf.mxu3  ;;  %v2790_v16 = vpop.f32.mrf.mxu1 }
 0x1a1   : > { %v2826_v47 = vadd.f32 %v2825_v28, %v2806_v4  ;;  %v3141_v0 = vsel %vm3077_vm10, %v3045_v51, %v3109_v25  ;;  %v2791_v15 = vadd.f32 %v2790_v16, %v2771_v48  ;;  %v3134_v27 = vsel %vm3070_vm12, %v3038_v63, %v3102_v40 }
 0x1a2   : > { %v3178_v43 = vmax.f32 %v3176_v34, %v3177_v36  ;;  %v3250_v46 = vadd.f32 %v3249_v20, %v3248_v9  ;;  %v3181_v60 = vmax.f32 %v3133_v31, %v3141_v0  ;;  %v3253_v32 = vadd.f32 %v3141_v0, %v3133_v31 }
 0x1a3   : > { %v2996_v55 = vadd.f32 %v2826_v47, %v5719_v39  ;;  %v3003_v12 = vadd.f32 %v2791_v15, %v5732_v45 }
 0x1a4   : > { %v3179_v7 = vrot.slane %v3178_v43, 1  ;;  %v3251_v11 = vrot.slane %v3250_v46, 1 }
 0x1a5   : > { %v3046_v44 = vadd.f32 %v5834_v41, %v2996_v55  ;;  %v3053_v42 = vadd.f32 %v5828_v30, %v3003_v12 }
 0x1a6   : > { %v3180_v59 = vmax.f32 %v3178_v43, %v3179_v7  ;;  %v3252_v58 = vadd.f32 %v3251_v11, %v3250_v46  ;;  %v2809_v14 = vpop.f32.mrf.mxu2 }
 0x1a7   : > { %vm3078_vm13 = vcmp.gt.f32.partialorder %v3046_v44, 0.0  ;;  %v3110_v19 = vmul.f32 0.2, %v3046_v44  ;;  %vm3085_vm14 = vcmp.gt.f32.partialorder %v3053_v42, 0.0  ;;  %v3117_v26 = vmul.f32 0.2, %v3053_v42  ;;  %v2773_v45 = vpop.f32.mrf.mxu0 }
 0x1a8   : > { %v3319_v57 = vrot.slane %v3180_v59, 7  ;;  %v3350_v39 = vrot.slane %v3252_v58, 7  ;;  %v2828_v61 = vpop.f32.mrf.mxu3  ;;  %v2792_v51 = vpop.f32.mrf.mxu1 }
 0x1a9   : > { %v3142_v34 = vsel %vm3078_vm13, %v3046_v44, %v3110_v19  ;;  %v2829_v9 = vadd.f32 %v2828_v61, %v2809_v14  ;;  %v3149_v20 = vsel %vm3085_vm14, %v3053_v42, %v3117_v26  ;;  %v2793_v28 = vadd.f32 %v2792_v51, %v2773_v45 }
 0x1aa   : > { %v5843_v4 = vsel %vm3326_vm11, %v3171_v33, %v3319_v57  ;;  %v5846_v36 = vsel %vm3326_vm11, %v3243_v24, %v3350_v39  ;;  %v3190_v18 = vmax.f32 %v3134_v27, %v3142_v34  ;;  %v3262_v10 = vadd.f32 %v3142_v34, %v3134_v27 }
 0x1ab   : > { %v3004_v25 = vadd.f32 %v2829_v9, %v5735_v13  ;;  %v3182_v48 = vmax.f32 %v3181_v60, %v3149_v20  ;;  %v3254_v50 = vadd.f32 %v3253_v32, %v3149_v20  ;;  %v3011_v63 = vadd.f32 %v2793_v28, %v5744_v52 }
 0x1ac   : > { %v5854_v52 = vperm.slane %v5808_v23, 4  ;;  %v5860_v45 = vperm.slane %v5808_v23, 5 }
 0x1ad   : > { %v3054_v31 = vadd.f32 %v5834_v41, %v3004_v25  ;;  %v3061_v16 = vadd.f32 %v5828_v30, %v3011_v63 }
 0x1ae   : > { %v2811_v43 = vpop.f32.mrf.mxu2 }
 0x1af   : > { %vm3086_vm15 = vcmp.gt.f32.partialorder %v3054_v31, 0.0  ;;  %v3118_v47 = vmul.f32 0.2, %v3054_v31  ;;  %v2842_v0 = vpop.f32.mrf.mxu0  ;;  %vm3093_vm0 = vcmp.gt.f32.partialorder %v3061_v16, 0.0  ;;  %v3125_v38 = vmul.f32 0.2, %v3061_v16 }
 0x1b0   : > { %v2830_v46 = vpop.f32.mrf.mxu3  ;;  %v2861_v7 = vpop.f32.mrf.mxu1 }
 0x1b1   : > { %v3150_v15 = vsel %vm3086_vm15, %v3054_v31, %v3118_v47  ;;  %v2831_v55 = vadd.f32 %v2830_v46, %v2811_v43  ;;  %v2862_v60 = vadd.f32 %v2861_v7, %v2842_v0  ;;  %v3157_v32 = vsel %vm3093_vm0, %v3061_v16, %v3125_v38 }
 0x1b2   : > { %v3191_v13 = vmax.f32 %v3190_v18, %v3150_v15  ;;  %v3263_v11 = vadd.f32 %v3262_v10, %v3150_v15  ;;  %v3183_v40 = vmax.f32 %v3182_v48, %v3157_v32  ;;  %v3255_v44 = vadd.f32 %v3254_v50, %v3157_v32 }
 0x1b3   : > { %v3012_v12 = vadd.f32 %v2831_v55, %v5747_v49  ;;  %v2989_v30 = vadd.f32 %v2862_v60, %v5750_v3  ;;  %vm3332_vm15 = vcmask 1044484  }
 0x1b4   : > { %v3184_v58 = vrot.slane %v3183_v40, 4  ;;  %v3256_v42 = vrot.slane %v3255_v44, 4 }
 0x1b5   : > { %v3062_v59 = vadd.f32 %v5834_v41, %v3012_v12  ;;  %v3039_v24 = vadd.f32 %v5854_v52, %v2989_v30 }
 0x1b6   : > { %v2880_v19 = vpop.f32.mrf.mxu2  ;;  %v3185_v14 = vmax.f32 %v3183_v40, %v3184_v58  ;;  %v3257_v57 = vadd.f32 %v3256_v42, %v3255_v44 }
 0x1b7   : > { %vm3094_vm1 = vcmp.gt.f32.partialorder %v3062_v59, 0.0  ;;  %v3126_v33 = vmul.f32 0.2, %v3062_v59  ;;  %v2844_v49 = vpop.f32.mrf.mxu0  ;;  %v3103_v51 = vmul.f32 0.2, %v3039_v24  ;;  %vm3071_vm2 = vcmp.gt.f32.partialorder %v3039_v24, 0.0 }
 0x1b8   : > { %v2899_v39 = vpop.f32.mrf.mxu3  ;;  %v2863_v27 = vpop.f32.mrf.mxu1  ;;  %v3186_v3 = vrot.slane %v3185_v14, 2  ;;  %v3258_v34 = vrot.slane %v3257_v57, 2 }
 0x1b9   : > { %v3158_v26 = vsel %vm3094_vm1, %v3062_v59, %v3126_v33  ;;  %v2900_v61 = vadd.f32 %v2899_v39, %v2880_v19  ;;  %v2864_v10 = vadd.f32 %v2863_v27, %v2844_v49 }
 0x1ba   : > { %v3192_v41 = vmax.f32 %v3191_v13, %v3158_v26  ;;  %v3264_v9 = vadd.f32 %v3263_v11, %v3158_v26  ;;  %v3187_v20 = vmax.f32 %v3185_v14, %v3186_v3  ;;  %v3259_v25 = vadd.f32 %v3258_v34, %v3257_v57 }
 0x1bb   : > { %v2990_v18 = vadd.f32 %v2900_v61, %v5753_v62  ;;  %v2997_v31 = vadd.f32 %v2864_v10, %v5766_v53  ;;  %v3135_v62 = vsel %vm3071_vm2, %v3039_v24, %v3103_v51 }
 0x1bc   : > { %v3193_v28 = vrot.slane %v3192_v41, 4  ;;  %v3265_v48 = vrot.slane %v3264_v9, 4  ;;  %v3188_v63 = vrot.slane %v3187_v20, 1  ;;  %v3260_v43 = vrot.slane %v3259_v25, 1 }
 0x1bd   : > { %v3040_v50 = vadd.f32 %v5860_v45, %v2990_v18  ;;  %v3047_v46 = vadd.f32 %v5854_v52, %v2997_v31 }
 0x1be   : > { %v3194_v47 = vmax.f32 %v3192_v41, %v3193_v28  ;;  %v3266_v16 = vadd.f32 %v3265_v48, %v3264_v9  ;;  %v2882_v0 = vpop.f32.mrf.mxu2  ;;  %v3189_v32 = vmax.f32 %v3187_v20, %v3188_v63  ;;  %v3261_v44 = vadd.f32 %v3260_v43, %v3259_v25 }
 0x1bf   : > { %v2847_v7 = vpop.f32.mrf.mxu0  ;;  %vm3072_vm3 = vcmp.gt.f32.partialorder %v3040_v50, 0.0  ;;  %vm3079_vm4 = vcmp.gt.f32.partialorder %v3047_v46, 0.0  ;;  %v3111_v13 = vmul.f32 0.2, %v3047_v46  ;;  %v3104_v40 = vmul.f32 0.2, %v3040_v50 }
 0x1c0   : > { %v3195_v15 = vrot.slane %v3194_v47, 2  ;;  %v3267_v38 = vrot.slane %v3266_v16, 2  ;;  %v2901_v55 = vpop.f32.mrf.mxu3  ;;  %v2866_v60 = vpop.f32.mrf.mxu1  ;;  %v3320_v3 = vrot.slane %v3189_v32, 6  ;;  %v3351_v34 = vrot.slane %v3261_v44, 6 }
 0x1c1   : > { %v2902_v11 = vadd.f32 %v2901_v55, %v2882_v0  ;;  %v3143_v30 = vsel %vm3079_vm4, %v3047_v46, %v3111_v13  ;;  %v2867_v58 = vadd.f32 %v2866_v60, %v2847_v7  ;;  %v3136_v26 = vsel %vm3072_vm3, %v3040_v50, %v3104_v40 }
 0x1c2   : > { %v3196_v12 = vmax.f32 %v3194_v47, %v3195_v15  ;;  %v3268_v53 = vadd.f32 %v3267_v38, %v3266_v16  ;;  %v3199_v19 = vmax.f32 %v3135_v62, %v3143_v30  ;;  %v3271_v24 = vadd.f32 %v3143_v30, %v3135_v62 }
 0x1c3   : > { %v2998_v59 = vadd.f32 %v2902_v11, %v5769_v29  ;;  %v3005_v57 = vadd.f32 %v2867_v58, %v5778_v2 }
 0x1c4   : > { %v3197_v42 = vrot.slane %v3196_v12, 1  ;;  %v3269_v33 = vrot.slane %v3268_v53, 1 }
 0x1c5   : > { %v3048_v14 = vadd.f32 %v5860_v45, %v2998_v59  ;;  %v3055_v27 = vadd.f32 %v5854_v52, %v3005_v57 }
 0x1c6   : > { %v3198_v39 = vmax.f32 %v3196_v12, %v3197_v42  ;;  %v3270_v49 = vadd.f32 %v3269_v33, %v3268_v53  ;;  %v2885_v29 = vpop.f32.mrf.mxu2 }
 0x1c7   : > { %vm3080_vm7 = vcmp.gt.f32.partialorder %v3048_v14, 0.0  ;;  %v3112_v61 = vmul.f32 0.2, %v3048_v14  ;;  %v2849_v18 = vpop.f32.mrf.mxu0  ;;  %vm3087_vm8 = vcmp.gt.f32.partialorder %v3055_v27, 0.0  ;;  %v3119_v2 = vmul.f32 0.2, %v3055_v27 }
 0x1c8   : > { %v3321_v41 = vrot.slane %v3198_v39, 5  ;;  %v3352_v9 = vrot.slane %v3270_v49, 5  ;;  %v2904_v51 = vpop.f32.mrf.mxu3  ;;  %v2868_v25 = vpop.f32.mrf.mxu1 }
 0x1c9   : > { %v3144_v10 = vsel %vm3080_vm7, %v3048_v14, %v3112_v61  ;;  %v2905_v20 = vadd.f32 %v2904_v51, %v2885_v29  ;;  %v3151_v16 = vsel %vm3087_vm8, %v3055_v27, %v3119_v2  ;;  %v2869_v15 = vadd.f32 %v2868_v25, %v2849_v18 }
 0x1ca   : > { %v3329_v28 = vsel %vm3328_vm5, %v3320_v3, %v3321_v41  ;;  %v3358_v48 = vsel %vm3328_vm5, %v3351_v34, %v3352_v9  ;;  %v3208_v50 = vmax.f32 %v3136_v26, %v3144_v10  ;;  %v3280_v31 = vadd.f32 %v3144_v10, %v3136_v26 }
 0x1cb   : > { %v5875_v63 = vsel %vm3330_vm6, %v5843_v4, %v3329_v28  ;;  %v5879_v47 = vsel %vm3330_vm6, %v5846_v36, %v3358_v48  ;;  %v3006_v43 = vadd.f32 %v2905_v20, %v5781_v56  ;;  %v3200_v46 = vmax.f32 %v3199_v19, %v3151_v16 }
 0x1cc   : > { %v3272_v0 = vadd.f32 %v3271_v24, %v3151_v16  ;;  %v3013_v62 = vadd.f32 %v2869_v15, %v5794_v5  ;;  %v5887_v5 = vperm.slane %v5808_v23, 6  ;;  %vm3334_vm5 = vcmask 1046534  }
 0x1cd   : > { %v3056_v38 = vadd.f32 %v5860_v45, %v3006_v43  ;;  %vm3336_vm6 = vcmask 1045508   ;;  %vm3338_vm7 = vcmask 1043456  }
 0x1ce   : > { %v2887_v7 = vpop.f32.mrf.mxu2  ;;  %v3063_v4 = vadd.f32 %v5854_v52, %v3013_v62 }
 0x1cf   : > { %vm3088_vm9 = vcmp.gt.f32.partialorder %v3056_v38, 0.0  ;;  %v3120_v55 = vmul.f32 0.2, %v3056_v38  ;;  %v2918_v11 = vpop.f32.mrf.mxu0 }
 0x1d0   : > { %v2906_v13 = vpop.f32.mrf.mxu3  ;;  %v2937_v32 = vpop.f32.mrf.mxu1  ;;  %vm3095_vm10 = vcmp.gt.f32.partialorder %v3063_v4, 0.0  ;;  %v3127_v56 = vmul.f32 0.2, %v3063_v4 }
 0x1d1   : > { %v3152_v60 = vsel %vm3088_vm9, %v3056_v38, %v3120_v55  ;;  %v2907_v36 = vadd.f32 %v2906_v13, %v2887_v7  ;;  %v2938_v44 = vadd.f32 %v2937_v32, %v2918_v11 }
 0x1d2   : > { %v3209_v12 = vmax.f32 %v3208_v50, %v3152_v60  ;;  %v3281_v53 = vadd.f32 %v3280_v31, %v3152_v60  ;;  %v3159_v30 = vsel %vm3095_vm10, %v3063_v4, %v3127_v56 }
 0x1d3   : > { %v3014_v40 = vadd.f32 %v2907_v36, %v5797_v8  ;;  %v3201_v59 = vmax.f32 %v3200_v46, %v3159_v30  ;;  %v3273_v58 = vadd.f32 %v3272_v0, %v3159_v30  ;;  %v2991_v42 = vadd.f32 %v2938_v44, %v5760_v54 }
 0x1d4   : > { %v5893_v8 = vperm.slane %v5808_v23, 7 }
 0x1d5   : > { %v3064_v52 = vadd.f32 %v5860_v45, %v3014_v40  ;;  %v3202_v33 = vrot.slane %v3201_v59, 4  ;;  %v3274_v19 = vrot.slane %v3273_v58, 4  ;;  %v3041_v57 = vadd.f32 %v5887_v5, %v2991_v42 }
 0x1d6   : > { %v2956_v14 = vpop.f32.mrf.mxu2 }
 0x1d7   : > { %vm3096_vm11 = vcmp.gt.f32.partialorder %v3064_v52, 0.0  ;;  %v3128_v24 = vmul.f32 0.2, %v3064_v52  ;;  %v2920_v49 = vpop.f32.mrf.mxu0  ;;  %v3203_v26 = vmax.f32 %v3201_v59, %v3202_v33  ;;  %v3275_v61 = vadd.f32 %v3274_v19, %v3273_v58 }
 0x1d8   : > { %v2975_v39 = vpop.f32.mrf.mxu3  ;;  %v2939_v3 = vpop.f32.mrf.mxu1  ;;  %v3105_v2 = vmul.f32 0.2, %v3041_v57  ;;  %vm3073_vm12 = vcmp.gt.f32.partialorder %v3041_v57, 0.0 }
 0x1d9   : > { %v3160_v27 = vsel %vm3096_vm11, %v3064_v52, %v3128_v24  ;;  %v2976_v29 = vadd.f32 %v2975_v39, %v2956_v14  ;;  %v3204_v54 = vrot.slane %v3203_v26, 2  ;;  %v3276_v41 = vrot.slane %v3275_v61, 2 }
 0x1da   : > { %v3210_v45 = vmax.f32 %v3209_v12, %v3160_v27  ;;  %v3282_v34 = vadd.f32 %v3281_v53, %v3160_v27  ;;  %v2940_v51 = vadd.f32 %v2939_v3, %v2920_v49  ;;  %v3137_v62 = vsel %vm3073_vm12, %v3041_v57, %v3105_v2 }
 0x1db   : > { %v2992_v9 = vadd.f32 %v2976_v29, %v5763_v17  ;;  %v3205_v20 = vmax.f32 %v3203_v26, %v3204_v54  ;;  %v3277_v25 = vadd.f32 %v3276_v41, %v3275_v61 }
 0x1dc   : > { %v3211_v18 = vrot.slane %v3210_v45, 4  ;;  %v3283_v10 = vrot.slane %v3282_v34, 4  ;;  %v2999_v28 = vadd.f32 %v2940_v51, %v5772_v37 }
 0x1dd   : > { %v3042_v23 = vadd.f32 %v5893_v8, %v2992_v9  ;;  %v3206_v31 = vrot.slane %v3205_v20, 1  ;;  %v3278_v43 = vrot.slane %v3277_v25, 1 }
 0x1de   : > { %v3212_v48 = vmax.f32 %v3210_v45, %v3211_v18  ;;  %v3284_v50 = vadd.f32 %v3283_v10, %v3282_v34  ;;  %v2958_v16 = vpop.f32.mrf.mxu2  ;;  %v3049_v17 = vadd.f32 %v5887_v5, %v2999_v28 }
 0x1df   : > { %v2923_v38 = vpop.f32.mrf.mxu0  ;;  %vm3074_vm13 = vcmp.gt.f32.partialorder %v3042_v23, 0.0  ;;  %v3207_v11 = vmax.f32 %v3205_v20, %v3206_v31  ;;  %v3106_v60 = vmul.f32 0.2, %v3042_v23  ;;  %v3279_v12 = vadd.f32 %v3278_v43, %v3277_v25 }
 0x1e0   : > { %v3213_v46 = vrot.slane %v3212_v48, 2  ;;  %v3285_v0 = vrot.slane %v3284_v50, 2  ;;  %v2977_v15 = vpop.f32.mrf.mxu3  ;;  %v2942_v7 = vpop.f32.mrf.mxu1  ;;  %vm3081_vm14 = vcmp.gt.f32.partialorder %v3049_v17, 0.0  ;;  %v3113_v37 = vmul.f32 0.2, %v3049_v17 }
 0x1e1   : > { %v2978_v55 = vadd.f32 %v2977_v15, %v2958_v16  ;;  %v2943_v32 = vadd.f32 %v2942_v7, %v2923_v38  ;;  %v3138_v33 = vsel %vm3074_vm13, %v3042_v23, %v3106_v60  ;;  %v3322_v14 = vrot.slane %v3207_v11, 4 }
 0x1e2   : > { %v3214_v4 = vmax.f32 %v3212_v48, %v3213_v46  ;;  %v3286_v13 = vadd.f32 %v3285_v0, %v3284_v50  ;;  %v3145_v40 = vsel %vm3081_vm14, %v3049_v17, %v3113_v37  ;;  %v3353_v57 = vrot.slane %v3279_v12, 4 }
 0x1e3   : > { %v3000_v36 = vadd.f32 %v2978_v55, %v5775_v1  ;;  %v3217_v44 = vmax.f32 %v3137_v62, %v3145_v40  ;;  %v3289_v30 = vadd.f32 %v3145_v40, %v3137_v62  ;;  %v3007_v58 = vadd.f32 %v2943_v32, %v5788_v6 }
 0x1e4   : > { %v3215_v53 = vrot.slane %v3214_v4, 1  ;;  %v3287_v56 = vrot.slane %v3286_v13, 1 }
 0x1e5   : > { %v3050_v59 = vadd.f32 %v5893_v8, %v3000_v36  ;;  %v3057_v1 = vadd.f32 %v5887_v5, %v3007_v58 }
 0x1e6   : > { %v3216_v52 = vmax.f32 %v3214_v4, %v3215_v53  ;;  %v3288_v42 = vadd.f32 %v3287_v56, %v3286_v13  ;;  %v2961_v24 = vpop.f32.mrf.mxu2 }
 0x1e7   : > { %vm3082_vm0 = vcmp.gt.f32.partialorder %v3050_v59, 0.0  ;;  %v3114_v19 = vmul.f32 0.2, %v3050_v59  ;;  %v2925_v61 = vpop.f32.mrf.mxu0  ;;  %vm3089_vm1 = vcmp.gt.f32.partialorder %v3057_v1, 0.0  ;;  %v3121_v29 = vmul.f32 0.2, %v3057_v1 }
 0x1e8   : > { %v3323_v39 = vrot.slane %v3216_v52, 3  ;;  %v3354_v49 = vrot.slane %v3288_v42, 3  ;;  %v2980_v26 = vpop.f32.mrf.mxu3  ;;  %v2944_v3 = vpop.f32.mrf.mxu1 }
 0x1e9   : > { %v3146_v27 = vsel %vm3082_vm0, %v3050_v59, %v3114_v19  ;;  %v2981_v6 = vadd.f32 %v2980_v26, %v2961_v24  ;;  %v3153_v9 = vsel %vm3089_vm1, %v3057_v1, %v3121_v29  ;;  %v2945_v18 = vadd.f32 %v2944_v3, %v2925_v61 }
 0x1ea   : > { %v5905_v45 = vsel %vm3332_vm15, %v3322_v14, %v3323_v39  ;;  %v5908_v34 = vsel %vm3332_vm15, %v3353_v57, %v3354_v49  ;;  %v3226_v54 = vmax.f32 %v3138_v33, %v3146_v27  ;;  %v3298_v41 = vadd.f32 %v3146_v27, %v3138_v33 }
 0x1eb   : > { %v3008_v51 = vadd.f32 %v2981_v6, %v5791_v21  ;;  %v3218_v10 = vmax.f32 %v3217_v44, %v3153_v9  ;;  %v3290_v2 = vadd.f32 %v3289_v30, %v3153_v9  ;;  %v3015_v25 = vadd.f32 %v2945_v18, %v5800_v35 }
 0x1ed   : > { %v3058_v20 = vadd.f32 %v5893_v8, %v3008_v51  ;;  %v3065_v28 = vadd.f32 %v5887_v5, %v3015_v25 }
 0x1ee   : > { %v2963_v48 = vpop.f32.mrf.mxu2 }
 0x1ef   : > { %vm3090_vm2 = vcmp.gt.f32.partialorder %v3058_v20, 0.0  ;;  %v3122_v23 = vmul.f32 0.2, %v3058_v20  ;;  %vm3097_vm3 = vcmp.gt.f32.partialorder %v3065_v28, 0.0  ;;  %v3129_v16 = vmul.f32 0.2, %v3065_v28 }
 0x1f0   : > { %v2982_v50 = vpop.f32.mrf.mxu3 }
 0x1f1   : > { %v3154_v31 = vsel %vm3090_vm2, %v3058_v20, %v3122_v23  ;;  %v2983_v43 = vadd.f32 %v2982_v50, %v2963_v48  ;;  %v3161_v21 = vsel %vm3097_vm3, %v3065_v28, %v3129_v16 }
 0x1f2   : > { %v3227_v46 = vmax.f32 %v3226_v54, %v3154_v31  ;;  %v3299_v0 = vadd.f32 %v3298_v41, %v3154_v31  ;;  %v3219_v15 = vmax.f32 %v3218_v10, %v3161_v21  ;;  %v3291_v38 = vadd.f32 %v3290_v2, %v3161_v21 }
 0x1f3   : > { %v3016_v17 = vadd.f32 %v2983_v43, %v5803_v22 }
 0x1f4   : > { %v3220_v35 = vrot.slane %v3219_v15, 4  ;;  %v3292_v55 = vrot.slane %v3291_v38, 4 }
 0x1f5   : > { %v3066_v62 = vadd.f32 %v5893_v8, %v3016_v17 }
 0x1f6   : > { %v3221_v5 = vmax.f32 %v3219_v15, %v3220_v35  ;;  %v3293_v4 = vadd.f32 %v3292_v55, %v3291_v38 }
 0x1f7   : > { %vm3098_vm4 = vcmp.gt.f32.partialorder %v3066_v62, 0.0  ;;  %v3130_v7 = vmul.f32 0.2, %v3066_v62 }
 0x1f8   : > { %v3222_v37 = vrot.slane %v3221_v5, 2  ;;  %v3294_v11 = vrot.slane %v3293_v4, 2 }
 0x1f9   : > { %v3162_v13 = vsel %vm3098_vm4, %v3066_v62, %v3130_v7 }
 0x1fa   : > { %v3228_v60 = vmax.f32 %v3227_v46, %v3162_v13  ;;  %v3300_v36 = vadd.f32 %v3299_v0, %v3162_v13  ;;  %v3223_v32 = vmax.f32 %v3221_v5, %v3222_v37  ;;  %v3295_v12 = vadd.f32 %v3294_v11, %v3293_v4 }
 0x1fc   : > { %v3229_v53 = vrot.slane %v3228_v60, 4  ;;  %v3301_v22 = vrot.slane %v3300_v36, 4  ;;  %v3224_v44 = vrot.slane %v3223_v32, 1  ;;  %v3296_v8 = vrot.slane %v3295_v12, 1 }
 0x1fe   : > { %v3230_v56 = vmax.f32 %v3228_v60, %v3229_v53  ;;  %v3302_v40 = vadd.f32 %v3301_v22, %v3300_v36  ;;  %v3225_v42 = vmax.f32 %v3223_v32, %v3224_v44  ;;  %v3297_v33 = vadd.f32 %v3296_v8, %v3295_v12 }
 0x200   : > { %v3231_v30 = vrot.slane %v3230_v56, 2  ;;  %v3303_v59 = vrot.slane %v3302_v40, 2  ;;  %v3324_v57 = vrot.slane %v3225_v42, 2  ;;  %v3355_v39 = vrot.slane %v3297_v33, 2 }
 0x202   : > { %v3232_v58 = vmax.f32 %v3230_v56, %v3231_v30  ;;  %v3304_v52 = vadd.f32 %v3303_v59, %v3302_v40 }
 0x204   : > { %v3233_v19 = vrot.slane %v3232_v58, 1  ;;  %v3305_v1 = vrot.slane %v3304_v52, 1 }
 0x206   : > { %v3234_v24 = vmax.f32 %v3232_v58, %v3233_v19  ;;  %v3306_v14 = vadd.f32 %v3305_v1, %v3304_v52 }
 0x208   : > { %v3325_v49 = vrot.slane %v3234_v24, 1  ;;  %v3356_v26 = vrot.slane %v3306_v14, 1 }
 0x20a   : > { %v3335_v61 = vsel %vm3334_vm5, %v3324_v57, %v3325_v49  ;;  %v3361_v27 = vsel %vm3334_vm5, %v3355_v39, %v3356_v26 }
 0x20b   : > { %v3337_v29 = vsel %vm3336_vm6, %v5905_v45, %v3335_v61  ;;  %v3362_v6 = vsel %vm3336_vm6, %v5908_v34, %v3361_v27 }
 0x20c   : > { %v3339_v3 = vsel %vm3338_vm7, %v5875_v63, %v3337_v29  ;;  %v3363_v54 = vsel %vm3338_vm7, %v5879_v47, %v3362_v6 }
 0x20d   : > { %3341 = vst [vmem:[%s570_s17] sm:$0xff] %v3339_v3 }
 0x20e   : > { %3365 = vst [vmem:[%s574_s25] sm:$0xff] %v3363_v54 }
 0x20f PF: > { %s24_s15 = sadd.s32 1, %s5238_s15   ;;  %s5953_s26 = sld [smem:[#allocation12_spill]] }
 0x210   : > { %p21_p8 = scmp.ge.s32.totalorder %s24_s15, 4   ;;  %s5954_s13 = smov %s5234_s14 }
 0x212   :  { %23 = sbr.rel (!%p21_p8) target bundleno = 6 (0x6), region = 132 }
 0x215   : > { %s5955_s14 = smov %s5953_s26 }
 0x217   :  { %3462 = vsyncpa [#allocation3], 1 }
 0x218   :  { %3464 = vsyncpa [#allocation3 + $0x1], 1 }
 0x219   :  { %3465 = vsyncpa [#allocation5], 1 }
 0x21a   :  { %3466 = vsyncpa [#allocation8], 1 }

</bundles_post_ra>
